<compile_context>
chip_gen: v7x
topology: tpu7x:2x2x1
jax: 0.10.0
libtpu: 0.0.40
codegen_flags: <defaults>
</compile_context>

<pallas_src>
import functools

import jax
import jax.numpy as jnp
import numpy as np
from jax.experimental import pallas as pl
from jax.experimental.pallas import tpu as pltpu


def _yolo_kernel(rays_ref, zr_ref, w1_ref, b1_ref, w2_ref, b2p_ref, b2v_ref,
                 expand_ref, out_ref, *, tb, K, H, A, c_pad):
    C = 7 * A

    rays6 = rays_ref[0:6, :]                   # (6, tb)   [origin; dir]
    near = rays_ref[6:7, :]                    # (1, tb)
    far = rays_ref[7:8, :]                     # (1, tb)

    # --- fused layer-1: one MXU push ------------------------------------------
    # w1_ref = [[w1p,0],[w1d,w1p]]^T : rows 0:H = o@w1p + d@w1d, rows H:2H = d@w1p
    l1 = jnp.dot(w1_ref[...], rays6, preferred_element_type=jnp.float32)   # (2H, tb)
    base = l1[0:H, :] + b1_ref[...]            # (H, tb)   point-independent part
    scale = l1[H:2 * H, :]                     # (H, tb)   multiplies z

    w2 = w2_ref[...]                           # (C, H)  rows 0:A prob, A:C values
    b2p = b2p_ref[...]                         # (A, 1)  prob-logit bias
    expand = expand_ref[...]                   # (6A, A) 0/1 anchor->value-row map
    step = 1.0 / K

    # --- stream over the K coarse samples; accumulators stay (A..6A, tb) ------
    maxp = None
    sump = None
    wsum = None
    for k in range(K):                         # K static -> unrolled
        zs = (float(k) + zr_ref[k:k + 1, :]) * step          # (1, tb) in [0,1)
        zk = near * (1.0 - zs) + far * zs                    # (1, tb)
        hk = jnp.maximum(base + zk * scale, 0.0)             # (H, tb)
        o2 = jnp.dot(w2, hk, preferred_element_type=jnp.float32)   # (C, tb)
        prob = jax.nn.sigmoid(o2[0:A, :] + b2p)              # (A, tb)
        # broadcast prob of anchor a onto that anchor's 6 value rows (MXU).
        probe = jnp.dot(expand, prob, preferred_element_type=jnp.float32)  # (6A, tb)
        wv = o2[A:C, :] * probe                # (6A, tb)  value bias deferred
        if k == 0:
            maxp, sump, wsum = prob, prob, wv
        else:
            maxp = jnp.maximum(maxp, prob)
            sump = sump + prob
            wsum = wsum + wv

    # --- finalize --------------------------------------------------------------
    denom = sump + 1e-5                        # (A, tb)
    inv = pl.reciprocal(denom, approx=True)    # EUP; one Newton step -> ~f32
    inv = inv * (2.0 - denom * inv)
    sump_e = jnp.dot(expand, sump, preferred_element_type=jnp.float32)     # (6A, tb)
    inv_e = jnp.dot(expand, inv, preferred_element_type=jnp.float32)       # (6A, tb)
    # deferred bias:  sum_k p_k (v_k + b)  =  wsum + b * sum_k p_k
    final = (wsum + b2v_ref[...] * sump_e) * inv_e                         # (6A, tb)

    parts = [maxp, final]
    if c_pad > C:
        parts.append(jnp.zeros((c_pad - C, tb), jnp.float32))
    out_ref[...] = jnp.concatenate(parts, axis=0)                          # (c_pad, tb)


def yolo_render(rays, z_rand, params, *, n_coarse, num_anchors, hidden, tb=512):
    """rays: (B, 8) f32, z_rand: (B, n_coarse) uniform[0,1) f32.

    Returns (B, num_anchors, 7), matching YoloRenderer.forward.
    tb: rays per grid step (lane tile); 512 amortizes per-step overhead and
    keeps per-k MXU pushes >= 256 lanes wide.
    """
    w1, b1, w2, b2 = params
    B = rays.shape[0]
    K, A, H = n_coarse, num_anchors, hidden
    C = 7 * A
    c_pad = ((C + 7) // 8) * 8                 # sublane-aligned output rows

    # ---- host-side weight packing (layout plumbing, done once) --------------
    w1p, w1d = w1[0:3, :], w1[3:6, :]
    zeros = jnp.zeros_like(w1p)
    w1pack = jnp.concatenate(
        [jnp.concatenate([w1p, zeros], axis=1),
         jnp.concatenate([w1d, w1p], axis=1)], axis=0)          # (6, 2H)
    w1_t = w1pack.T                                             # (2H, 6)
    b1_t = b1.reshape(H, 1)                                     # (H, 1)
    w2r = w2.reshape(H, A, 7)
    w2f = jnp.concatenate([w2r[:, :, 0],
                           w2r[:, :, 1:].reshape(H, 6 * A)], axis=1)   # (H, 7A)
    w2_t = w2f.T                                                # (C, H)
    b2r = b2.reshape(A, 7)
    b2p = b2r[:, 0].reshape(A, 1)                               # prob-logit bias
    b2v = b2r[:, 1:].reshape(6 * A, 1)                          # value bias (a-major)
    expand = jnp.asarray(
        np.arange(6 * A)[:, None] // 6 == np.arange(A)[None, :],
        dtype=jnp.float32)                                      # (6A, A)

    # ---- put rays on the lane axis; pad B up to a multiple of tb ------------
    Bp = ((B + tb - 1) // tb) * tb
    rays_t = rays.T                                             # (8, B)
    zr_t = z_rand.T                                             # (K, B)
    if Bp != B:
        rays_t = jnp.pad(rays_t, ((0, 0), (0, Bp - B)))
        zr_t = jnp.pad(zr_t, ((0, 0), (0, Bp - B)))

    kernel = functools.partial(_yolo_kernel, tb=tb, K=K, H=H, A=A, c_pad=c_pad)
    out_t = pl.pallas_call(
        kernel,
        out_shape=jax.ShapeDtypeStruct((c_pad, Bp), jnp.float32),
        grid_spec=pltpu.PrefetchScalarGridSpec(
            num_scalar_prefetch=0,
            grid=(Bp // tb,),
            in_specs=[
                pl.BlockSpec((8, tb), lambda i: (0, i)),        # rays (transposed)
                pl.BlockSpec((K, tb), lambda i: (0, i)),        # z noise (transposed)
                # Constant blocks: index (0,0) never changes, so Pallas skips
                # re-DMA of the weights across grid steps.
                pl.BlockSpec((2 * H, 6), lambda i: (0, 0)),     # fused layer-1 W
                pl.BlockSpec((H, 1), lambda i: (0, 0)),         # layer-1 bias
                pl.BlockSpec((C, H), lambda i: (0, 0)),         # fused layer-2 W
                pl.BlockSpec((A, 1), lambda i: (0, 0)),         # prob bias
                pl.BlockSpec((6 * A, 1), lambda i: (0, 0)),     # value bias
                pl.BlockSpec((6 * A, A), lambda i: (0, 0)),     # expand matrix
            ],
            out_specs=pl.BlockSpec((c_pad, tb), lambda i: (0, i)),
        ),
        compiler_params=pltpu.CompilerParams(
            dimension_semantics=("parallel",)),                 # shards across TCs
    )(rays_t, zr_t, w1_t, b1_t, w2_t, b2p, b2v, expand)

    # ---- cheap XLA-side unpacking back to the PyTorch (B, A, 7) layout ------
    out_t = out_t[:C, :B]
    maxp = out_t[0:A, :].T                                      # (B, A)
    final = out_t[A:C, :].reshape(A, 6, B).transpose(2, 0, 1)   # (B, A, 6)
    return jnp.concatenate([maxp[..., None], final], axis=-1)   # (B, A, 7)


def yolo_reference(rays, z_rand, params, *, n_coarse, num_anchors):
    """Pure-JAX reference mirroring the PyTorch forward (same synthetic net)."""
    w1, b1, w2, b2 = params
    B = rays.shape[0]
    K, A = n_coarse, num_anchors
    step = 1.0 / K
    z_steps = jnp.arange(K, dtype=jnp.float32) * step
    zs = z_steps[None, :] + z_rand * step
    near, far = rays[:, 6:7], rays[:, 7:8]
    z = near * (1.0 - zs) + far * zs
    pts = rays[:, None, :3] + z[:, :, None] * rays[:, None, 3:6]
    dirs = jnp.broadcast_to(rays[:, None, 3:6], (B, K, 3))
    feats = jnp.concatenate([pts, dirs], -1).reshape(B * K, 6)
    h = jnp.maximum(feats @ w1 + b1, 0.0)
    out = (h @ w2 + b2).reshape(B, K, A, 7)
    prob = jax.nn.sigmoid(out[..., 0])
    summed = prob.sum(1)
    maxp = prob.max(1)
    final = (out[..., 1:] * prob[..., None]).sum(1) / (summed[..., None] + 1e-5)
    return jnp.concatenate([maxp[..., None], final], -1)


if __name__ == "__main__":
    # Renderer hyper-parameters (small, consistent with the module).
    n_coarse = 16           # K
    num_anchors = 3         # num_anchors_per_scale
    hidden = 32             # synthetic net hidden width
    # eval_batch_size / num_scales: no effect on the math (chunking / unused).

    key = jax.random.PRNGKey(0)
    k_rays, k_dirs, k_near, k_z, k_w1, k_b1, k_w2, k_b2 = jax.random.split(key, 8)

    # rays come in as (2, N, 8) and are flattened to (-1, 8) like the module.
    # B = 4096 with tb = 512 gives a grid of 8 steps -> 4 per TensorCore on
    # v7x, so the auto-pipeline has work to overlap.
    B = 4096
    origins = jax.random.normal(k_rays, (B, 3), jnp.float32)
    d = jax.random.normal(k_dirs, (B, 3), jnp.float32)
    d = d / jnp.linalg.norm(d, axis=-1, keepdims=True)
    near = 0.5 + 0.1 * jax.random.uniform(k_near, (B, 1), jnp.float32)
    far = near + 2.0
    rays_in = jnp.concatenate([origins, d, near, far], -1).reshape(2, B // 2, 8)
    rays = rays_in.reshape(-1, 8)

    # Stratified-sampling noise (torch.rand_like equivalent), passed in so the
    # result is deterministic and checkable against the reference.
    z_rand = jax.random.uniform(k_z, (B, n_coarse), jnp.float32)

    # Deterministic synthetic net parameters (stand-in for the bound net).
    w1 = 0.5 * jax.random.normal(k_w1, (6, hidden), jnp.float32)
    b1 = 0.1 * jax.random.normal(k_b1, (1, hidden), jnp.float32)
    w2 = 0.5 * jax.random.normal(k_w2, (hidden, num_anchors * 7), jnp.float32)
    b2 = 0.1 * jax.random.normal(k_b2, (1, num_anchors * 7), jnp.float32)
    params = (w1, b1, w2, b2)

    out = yolo_render(rays, z_rand, params, n_coarse=n_coarse,
                      num_anchors=num_anchors, hidden=hidden, tb=512)
    out = jax.block_until_ready(out)

    ref = yolo_reference(rays, z_rand, params, n_coarse=n_coarse,
                         num_anchors=num_anchors)
    np.testing.assert_allclose(np.asarray(out), np.asarray(ref),
                               rtol=1e-4, atol=1e-4)

    # TODO(synk): the nan/inf debug prints from the PyTorch forward are
    # diagnostics only and are omitted.
    print("KERNEL_OK")
</pallas_src>

<mosaic_0001>
module attributes {stable_mosaic.version = 11 : i64} {
  func.func @_yolo_kernel(%arg0: i32, %arg1: memref<8x512xf32, #tpu.memory_space<vmem>>, %arg2: memref<16x512xf32, #tpu.memory_space<vmem>>, %arg3: memref<64x6xf32, #tpu.memory_space<vmem>>, %arg4: memref<32x1xf32, #tpu.memory_space<vmem>>, %arg5: memref<21x32xf32, #tpu.memory_space<vmem>>, %arg6: memref<3x1xf32, #tpu.memory_space<vmem>>, %arg7: memref<18x1xf32, #tpu.memory_space<vmem>>, %arg8: memref<18x3xf32, #tpu.memory_space<vmem>>, %arg9: memref<24x512xf32, #tpu.memory_space<vmem>>) attributes {dimension_semantics = [#tpu.dimension_semantics<parallel>], iteration_bounds = array<i64: 8>, scalar_prefetch = 0 : i64, scratch_operands = 0 : i64, tpu.core_type = #tpu.core_type<tc>, window_params = [{transform_indices = @transform_0, window_bounds = array<i64: 8, 512>}, {transform_indices = @transform_1, window_bounds = array<i64: 16, 512>}, {pipeline_mode = #tpu.pipeline_mode<synchronous>, transform_indices = @transform_2, window_bounds = array<i64: 64, 6>}, {pipeline_mode = #tpu.pipeline_mode<synchronous>, transform_indices = @transform_3, window_bounds = array<i64: 32, 1>}, {pipeline_mode = #tpu.pipeline_mode<synchronous>, transform_indices = @transform_4, window_bounds = array<i64: 21, 32>}, {pipeline_mode = #tpu.pipeline_mode<synchronous>, transform_indices = @transform_5, window_bounds = array<i64: 3, 1>}, {pipeline_mode = #tpu.pipeline_mode<synchronous>, transform_indices = @transform_6, window_bounds = array<i64: 18, 1>}, {pipeline_mode = #tpu.pipeline_mode<synchronous>, transform_indices = @transform_7, window_bounds = array<i64: 18, 3>}, {transform_indices = @transform_8, window_bounds = array<i64: 24, 512>}]} {
    %c0 = arith.constant 0 : index
    %c0_0 = arith.constant 0 : index
    %0 = vector.load %arg1[%c0, %c0_0] : memref<8x512xf32, #tpu.memory_space<vmem>>, vector<6x512xf32>
    %c6 = arith.constant 6 : index
    %c0_1 = arith.constant 0 : index
    %1 = vector.load %arg1[%c6, %c0_1] : memref<8x512xf32, #tpu.memory_space<vmem>>, vector<1x512xf32>
    %c7 = arith.constant 7 : index
    %c0_2 = arith.constant 0 : index
    %2 = vector.load %arg1[%c7, %c0_2] : memref<8x512xf32, #tpu.memory_space<vmem>>, vector<1x512xf32>
    %c0_3 = arith.constant 0 : index
    %c0_4 = arith.constant 0 : index
    %3 = vector.load %arg3[%c0_3, %c0_4] : memref<64x6xf32, #tpu.memory_space<vmem>>, vector<64x6xf32>
    %cst = arith.constant dense<0.000000e+00> : vector<64x512xf32>
    %4 = tpu.matmul %3, %0, %cst {dimension_numbers = #tpu.dot_dimension_numbers<[1], [0], [0], [1], [0, 0, 1, 1], [], []>} : vector<64x6xf32>, vector<6x512xf32>, vector<64x512xf32> -> vector<64x512xf32>
    %5 = vector.extract_strided_slice %4 {offsets = [0, 0], sizes = [32, 512], strides = [1, 1]} : vector<64x512xf32> to vector<32x512xf32>
    %c0_5 = arith.constant 0 : index
    %c0_6 = arith.constant 0 : index
    %6 = vector.load %arg4[%c0_5, %c0_6] : memref<32x1xf32, #tpu.memory_space<vmem>>, vector<32x1xf32>
    %7 = vector.broadcast %6 : vector<32x1xf32> to vector<32x512xf32>
    %8 = arith.addf %5, %7 : vector<32x512xf32>
    %9 = vector.extract_strided_slice %4 {offsets = [32, 0], sizes = [32, 512], strides = [1, 1]} : vector<64x512xf32> to vector<32x512xf32>
    %c0_7 = arith.constant 0 : index
    %c0_8 = arith.constant 0 : index
    %10 = vector.load %arg5[%c0_7, %c0_8] : memref<21x32xf32, #tpu.memory_space<vmem>>, vector<21x32xf32>
    %c0_9 = arith.constant 0 : index
    %c0_10 = arith.constant 0 : index
    %11 = vector.load %arg6[%c0_9, %c0_10] : memref<3x1xf32, #tpu.memory_space<vmem>>, vector<3x1xf32>
    %c0_11 = arith.constant 0 : index
    %c0_12 = arith.constant 0 : index
    %12 = vector.load %arg8[%c0_11, %c0_12] : memref<18x3xf32, #tpu.memory_space<vmem>>, vector<18x3xf32>
    %c0_13 = arith.constant 0 : index
    %c0_14 = arith.constant 0 : index
    %13 = vector.load %arg2[%c0_13, %c0_14] : memref<16x512xf32, #tpu.memory_space<vmem>>, vector<1x512xf32>
    %cst_15 = arith.constant 0.000000e+00 : f32
    %14 = vector.broadcast %cst_15 : f32 to vector<1x512xf32>
    %15 = arith.addf %14, %13 : vector<1x512xf32>
    %cst_16 = arith.constant 6.250000e-02 : f32
    %16 = vector.broadcast %cst_16 : f32 to vector<1x512xf32>
    %17 = arith.mulf %15, %16 : vector<1x512xf32>
    %cst_17 = arith.constant 1.000000e+00 : f32
    %18 = vector.broadcast %cst_17 : f32 to vector<1x512xf32>
    %19 = arith.subf %18, %17 : vector<1x512xf32>
    %20 = arith.mulf %1, %19 : vector<1x512xf32>
    %21 = arith.mulf %2, %17 : vector<1x512xf32>
    %22 = arith.addf %20, %21 : vector<1x512xf32>
    %23 = vector.broadcast %22 : vector<1x512xf32> to vector<32x512xf32>
    %24 = arith.mulf %23, %9 : vector<32x512xf32>
    %25 = arith.addf %8, %24 : vector<32x512xf32>
    %cst_18 = arith.constant 0.000000e+00 : f32
    %26 = vector.broadcast %cst_18 : f32 to vector<32x512xf32>
    %27 = arith.maximumf %25, %26 : vector<32x512xf32>
    %cst_19 = arith.constant dense<0.000000e+00> : vector<21x512xf32>
    %28 = tpu.matmul %10, %27, %cst_19 {dimension_numbers = #tpu.dot_dimension_numbers<[1], [0], [0], [1], [0, 0, 1, 1], [], []>} : vector<21x32xf32>, vector<32x512xf32>, vector<21x512xf32> -> vector<21x512xf32>
    %29 = vector.extract_strided_slice %28 {offsets = [0, 0], sizes = [3, 512], strides = [1, 1]} : vector<21x512xf32> to vector<3x512xf32>
    %30 = vector.broadcast %11 : vector<3x1xf32> to vector<3x512xf32>
    %31 = arith.addf %29, %30 : vector<3x512xf32>
    %32 = arith.negf %31 : vector<3x512xf32>
    %33 = math.exp %32 : vector<3x512xf32>
    %cst_20 = arith.constant 1.000000e+00 : f32
    %34 = vector.broadcast %cst_20 : f32 to vector<3x512xf32>
    %35 = arith.addf %34, %33 : vector<3x512xf32>
    %36 = arith.divf %34, %35 : vector<3x512xf32>
    %cst_21 = arith.constant dense<0.000000e+00> : vector<18x512xf32>
    %37 = tpu.matmul %12, %36, %cst_21 {dimension_numbers = #tpu.dot_dimension_numbers<[1], [0], [0], [1], [0, 0, 1, 1], [], []>} : vector<18x3xf32>, vector<3x512xf32>, vector<18x512xf32> -> vector<18x512xf32>
    %38 = vector.extract_strided_slice %28 {offsets = [3, 0], sizes = [18, 512], strides = [1, 1]} : vector<21x512xf32> to vector<18x512xf32>
    %39 = arith.mulf %38, %37 : vector<18x512xf32>
    %c1 = arith.constant 1 : index
    %c0_22 = arith.constant 0 : index
    %40 = vector.load %arg2[%c1, %c0_22] : memref<16x512xf32, #tpu.memory_space<vmem>>, vector<1x512xf32>
    %cst_23 = arith.constant 1.000000e+00 : f32
    %41 = vector.broadcast %cst_23 : f32 to vector<1x512xf32>
    %42 = arith.addf %41, %40 : vector<1x512xf32>
    %cst_24 = arith.constant 6.250000e-02 : f32
    %43 = vector.broadcast %cst_24 : f32 to vector<1x512xf32>
    %44 = arith.mulf %42, %43 : vector<1x512xf32>
    %cst_25 = arith.constant 1.000000e+00 : f32
    %45 = vector.broadcast %cst_25 : f32 to vector<1x512xf32>
    %46 = arith.subf %45, %44 : vector<1x512xf32>
    %47 = arith.mulf %1, %46 : vector<1x512xf32>
    %48 = arith.mulf %2, %44 : vector<1x512xf32>
    %49 = arith.addf %47, %48 : vector<1x512xf32>
    %50 = vector.broadcast %49 : vector<1x512xf32> to vector<32x512xf32>
    %51 = arith.mulf %50, %9 : vector<32x512xf32>
    %52 = arith.addf %8, %51 : vector<32x512xf32>
    %cst_26 = arith.constant 0.000000e+00 : f32
    %53 = vector.broadcast %cst_26 : f32 to vector<32x512xf32>
    %54 = arith.maximumf %52, %53 : vector<32x512xf32>
    %cst_27 = arith.constant dense<0.000000e+00> : vector<21x512xf32>
    %55 = tpu.matmul %10, %54, %cst_27 {dimension_numbers = #tpu.dot_dimension_numbers<[1], [0], [0], [1], [0, 0, 1, 1], [], []>} : vector<21x32xf32>, vector<32x512xf32>, vector<21x512xf32> -> vector<21x512xf32>
    %56 = vector.extract_strided_slice %55 {offsets = [0, 0], sizes = [3, 512], strides = [1, 1]} : vector<21x512xf32> to vector<3x512xf32>
    %57 = vector.broadcast %11 : vector<3x1xf32> to vector<3x512xf32>
    %58 = arith.addf %56, %57 : vector<3x512xf32>
    %59 = arith.negf %58 : vector<3x512xf32>
    %60 = math.exp %59 : vector<3x512xf32>
    %cst_28 = arith.constant 1.000000e+00 : f32
    %61 = vector.broadcast %cst_28 : f32 to vector<3x512xf32>
    %62 = arith.addf %61, %60 : vector<3x512xf32>
    %63 = arith.divf %61, %62 : vector<3x512xf32>
    %cst_29 = arith.constant dense<0.000000e+00> : vector<18x512xf32>
    %64 = tpu.matmul %12, %63, %cst_29 {dimension_numbers = #tpu.dot_dimension_numbers<[1], [0], [0], [1], [0, 0, 1, 1], [], []>} : vector<18x3xf32>, vector<3x512xf32>, vector<18x512xf32> -> vector<18x512xf32>
    %65 = vector.extract_strided_slice %55 {offsets = [3, 0], sizes = [18, 512], strides = [1, 1]} : vector<21x512xf32> to vector<18x512xf32>
    %66 = arith.mulf %65, %64 : vector<18x512xf32>
    %67 = arith.maximumf %36, %63 : vector<3x512xf32>
    %68 = arith.addf %36, %63 : vector<3x512xf32>
    %69 = arith.addf %39, %66 : vector<18x512xf32>
    %c2 = arith.constant 2 : index
    %c0_30 = arith.constant 0 : index
    %70 = vector.load %arg2[%c2, %c0_30] : memref<16x512xf32, #tpu.memory_space<vmem>>, vector<1x512xf32>
    %cst_31 = arith.constant 2.000000e+00 : f32
    %71 = vector.broadcast %cst_31 : f32 to vector<1x512xf32>
    %72 = arith.addf %71, %70 : vector<1x512xf32>
    %cst_32 = arith.constant 6.250000e-02 : f32
    %73 = vector.broadcast %cst_32 : f32 to vector<1x512xf32>
    %74 = arith.mulf %72, %73 : vector<1x512xf32>
    %cst_33 = arith.constant 1.000000e+00 : f32
    %75 = vector.broadcast %cst_33 : f32 to vector<1x512xf32>
    %76 = arith.subf %75, %74 : vector<1x512xf32>
    %77 = arith.mulf %1, %76 : vector<1x512xf32>
    %78 = arith.mulf %2, %74 : vector<1x512xf32>
    %79 = arith.addf %77, %78 : vector<1x512xf32>
    %80 = vector.broadcast %79 : vector<1x512xf32> to vector<32x512xf32>
    %81 = arith.mulf %80, %9 : vector<32x512xf32>
    %82 = arith.addf %8, %81 : vector<32x512xf32>
    %cst_34 = arith.constant 0.000000e+00 : f32
    %83 = vector.broadcast %cst_34 : f32 to vector<32x512xf32>
    %84 = arith.maximumf %82, %83 : vector<32x512xf32>
    %cst_35 = arith.constant dense<0.000000e+00> : vector<21x512xf32>
    %85 = tpu.matmul %10, %84, %cst_35 {dimension_numbers = #tpu.dot_dimension_numbers<[1], [0], [0], [1], [0, 0, 1, 1], [], []>} : vector<21x32xf32>, vector<32x512xf32>, vector<21x512xf32> -> vector<21x512xf32>
    %86 = vector.extract_strided_slice %85 {offsets = [0, 0], sizes = [3, 512], strides = [1, 1]} : vector<21x512xf32> to vector<3x512xf32>
    %87 = vector.broadcast %11 : vector<3x1xf32> to vector<3x512xf32>
    %88 = arith.addf %86, %87 : vector<3x512xf32>
    %89 = arith.negf %88 : vector<3x512xf32>
    %90 = math.exp %89 : vector<3x512xf32>
    %cst_36 = arith.constant 1.000000e+00 : f32
    %91 = vector.broadcast %cst_36 : f32 to vector<3x512xf32>
    %92 = arith.addf %91, %90 : vector<3x512xf32>
    %93 = arith.divf %91, %92 : vector<3x512xf32>
    %cst_37 = arith.constant dense<0.000000e+00> : vector<18x512xf32>
    %94 = tpu.matmul %12, %93, %cst_37 {dimension_numbers = #tpu.dot_dimension_numbers<[1], [0], [0], [1], [0, 0, 1, 1], [], []>} : vector<18x3xf32>, vector<3x512xf32>, vector<18x512xf32> -> vector<18x512xf32>
    %95 = vector.extract_strided_slice %85 {offsets = [3, 0], sizes = [18, 512], strides = [1, 1]} : vector<21x512xf32> to vector<18x512xf32>
    %96 = arith.mulf %95, %94 : vector<18x512xf32>
    %97 = arith.maximumf %67, %93 : vector<3x512xf32>
    %98 = arith.addf %68, %93 : vector<3x512xf32>
    %99 = arith.addf %69, %96 : vector<18x512xf32>
    %c3 = arith.constant 3 : index
    %c0_38 = arith.constant 0 : index
    %100 = vector.load %arg2[%c3, %c0_38] : memref<16x512xf32, #tpu.memory_space<vmem>>, vector<1x512xf32>
    %cst_39 = arith.constant 3.000000e+00 : f32
    %101 = vector.broadcast %cst_39 : f32 to vector<1x512xf32>
    %102 = arith.addf %101, %100 : vector<1x512xf32>
    %cst_40 = arith.constant 6.250000e-02 : f32
    %103 = vector.broadcast %cst_40 : f32 to vector<1x512xf32>
    %104 = arith.mulf %102, %103 : vector<1x512xf32>
    %cst_41 = arith.constant 1.000000e+00 : f32
    %105 = vector.broadcast %cst_41 : f32 to vector<1x512xf32>
    %106 = arith.subf %105, %104 : vector<1x512xf32>
    %107 = arith.mulf %1, %106 : vector<1x512xf32>
    %108 = arith.mulf %2, %104 : vector<1x512xf32>
    %109 = arith.addf %107, %108 : vector<1x512xf32>
    %110 = vector.broadcast %109 : vector<1x512xf32> to vector<32x512xf32>
    %111 = arith.mulf %110, %9 : vector<32x512xf32>
    %112 = arith.addf %8, %111 : vector<32x512xf32>
    %cst_42 = arith.constant 0.000000e+00 : f32
    %113 = vector.broadcast %cst_42 : f32 to vector<32x512xf32>
    %114 = arith.maximumf %112, %113 : vector<32x512xf32>
    %cst_43 = arith.constant dense<0.000000e+00> : vector<21x512xf32>
    %115 = tpu.matmul %10, %114, %cst_43 {dimension_numbers = #tpu.dot_dimension_numbers<[1], [0], [0], [1], [0, 0, 1, 1], [], []>} : vector<21x32xf32>, vector<32x512xf32>, vector<21x512xf32> -> vector<21x512xf32>
    %116 = vector.extract_strided_slice %115 {offsets = [0, 0], sizes = [3, 512], strides = [1, 1]} : vector<21x512xf32> to vector<3x512xf32>
    %117 = vector.broadcast %11 : vector<3x1xf32> to vector<3x512xf32>
    %118 = arith.addf %116, %117 : vector<3x512xf32>
    %119 = arith.negf %118 : vector<3x512xf32>
    %120 = math.exp %119 : vector<3x512xf32>
    %cst_44 = arith.constant 1.000000e+00 : f32
    %121 = vector.broadcast %cst_44 : f32 to vector<3x512xf32>
    %122 = arith.addf %121, %120 : vector<3x512xf32>
    %123 = arith.divf %121, %122 : vector<3x512xf32>
    %cst_45 = arith.constant dense<0.000000e+00> : vector<18x512xf32>
    %124 = tpu.matmul %12, %123, %cst_45 {dimension_numbers = #tpu.dot_dimension_numbers<[1], [0], [0], [1], [0, 0, 1, 1], [], []>} : vector<18x3xf32>, vector<3x512xf32>, vector<18x512xf32> -> vector<18x512xf32>
    %125 = vector.extract_strided_slice %115 {offsets = [3, 0], sizes = [18, 512], strides = [1, 1]} : vector<21x512xf32> to vector<18x512xf32>
    %126 = arith.mulf %125, %124 : vector<18x512xf32>
    %127 = arith.maximumf %97, %123 : vector<3x512xf32>
    %128 = arith.addf %98, %123 : vector<3x512xf32>
    %129 = arith.addf %99, %126 : vector<18x512xf32>
    %c4 = arith.constant 4 : index
    %c0_46 = arith.constant 0 : index
    %130 = vector.load %arg2[%c4, %c0_46] : memref<16x512xf32, #tpu.memory_space<vmem>>, vector<1x512xf32>
    %cst_47 = arith.constant 4.000000e+00 : f32
    %131 = vector.broadcast %cst_47 : f32 to vector<1x512xf32>
    %132 = arith.addf %131, %130 : vector<1x512xf32>
    %cst_48 = arith.constant 6.250000e-02 : f32
    %133 = vector.broadcast %cst_48 : f32 to vector<1x512xf32>
    %134 = arith.mulf %132, %133 : vector<1x512xf32>
    %cst_49 = arith.constant 1.000000e+00 : f32
    %135 = vector.broadcast %cst_49 : f32 to vector<1x512xf32>
    %136 = arith.subf %135, %134 : vector<1x512xf32>
    %137 = arith.mulf %1, %136 : vector<1x512xf32>
    %138 = arith.mulf %2, %134 : vector<1x512xf32>
    %139 = arith.addf %137, %138 : vector<1x512xf32>
    %140 = vector.broadcast %139 : vector<1x512xf32> to vector<32x512xf32>
    %141 = arith.mulf %140, %9 : vector<32x512xf32>
    %142 = arith.addf %8, %141 : vector<32x512xf32>
    %cst_50 = arith.constant 0.000000e+00 : f32
    %143 = vector.broadcast %cst_50 : f32 to vector<32x512xf32>
    %144 = arith.maximumf %142, %143 : vector<32x512xf32>
    %cst_51 = arith.constant dense<0.000000e+00> : vector<21x512xf32>
    %145 = tpu.matmul %10, %144, %cst_51 {dimension_numbers = #tpu.dot_dimension_numbers<[1], [0], [0], [1], [0, 0, 1, 1], [], []>} : vector<21x32xf32>, vector<32x512xf32>, vector<21x512xf32> -> vector<21x512xf32>
    %146 = vector.extract_strided_slice %145 {offsets = [0, 0], sizes = [3, 512], strides = [1, 1]} : vector<21x512xf32> to vector<3x512xf32>
    %147 = vector.broadcast %11 : vector<3x1xf32> to vector<3x512xf32>
    %148 = arith.addf %146, %147 : vector<3x512xf32>
    %149 = arith.negf %148 : vector<3x512xf32>
    %150 = math.exp %149 : vector<3x512xf32>
    %cst_52 = arith.constant 1.000000e+00 : f32
    %151 = vector.broadcast %cst_52 : f32 to vector<3x512xf32>
    %152 = arith.addf %151, %150 : vector<3x512xf32>
    %153 = arith.divf %151, %152 : vector<3x512xf32>
    %cst_53 = arith.constant dense<0.000000e+00> : vector<18x512xf32>
    %154 = tpu.matmul %12, %153, %cst_53 {dimension_numbers = #tpu.dot_dimension_numbers<[1], [0], [0], [1], [0, 0, 1, 1], [], []>} : vector<18x3xf32>, vector<3x512xf32>, vector<18x512xf32> -> vector<18x512xf32>
    %155 = vector.extract_strided_slice %145 {offsets = [3, 0], sizes = [18, 512], strides = [1, 1]} : vector<21x512xf32> to vector<18x512xf32>
    %156 = arith.mulf %155, %154 : vector<18x512xf32>
    %157 = arith.maximumf %127, %153 : vector<3x512xf32>
    %158 = arith.addf %128, %153 : vector<3x512xf32>
    %159 = arith.addf %129, %156 : vector<18x512xf32>
    %c5 = arith.constant 5 : index
    %c0_54 = arith.constant 0 : index
    %160 = vector.load %arg2[%c5, %c0_54] : memref<16x512xf32, #tpu.memory_space<vmem>>, vector<1x512xf32>
    %cst_55 = arith.constant 5.000000e+00 : f32
    %161 = vector.broadcast %cst_55 : f32 to vector<1x512xf32>
    %162 = arith.addf %161, %160 : vector<1x512xf32>
    %cst_56 = arith.constant 6.250000e-02 : f32
    %163 = vector.broadcast %cst_56 : f32 to vector<1x512xf32>
    %164 = arith.mulf %162, %163 : vector<1x512xf32>
    %cst_57 = arith.constant 1.000000e+00 : f32
    %165 = vector.broadcast %cst_57 : f32 to vector<1x512xf32>
    %166 = arith.subf %165, %164 : vector<1x512xf32>
    %167 = arith.mulf %1, %166 : vector<1x512xf32>
    %168 = arith.mulf %2, %164 : vector<1x512xf32>
    %169 = arith.addf %167, %168 : vector<1x512xf32>
    %170 = vector.broadcast %169 : vector<1x512xf32> to vector<32x512xf32>
    %171 = arith.mulf %170, %9 : vector<32x512xf32>
    %172 = arith.addf %8, %171 : vector<32x512xf32>
    %cst_58 = arith.constant 0.000000e+00 : f32
    %173 = vector.broadcast %cst_58 : f32 to vector<32x512xf32>
    %174 = arith.maximumf %172, %173 : vector<32x512xf32>
    %cst_59 = arith.constant dense<0.000000e+00> : vector<21x512xf32>
    %175 = tpu.matmul %10, %174, %cst_59 {dimension_numbers = #tpu.dot_dimension_numbers<[1], [0], [0], [1], [0, 0, 1, 1], [], []>} : vector<21x32xf32>, vector<32x512xf32>, vector<21x512xf32> -> vector<21x512xf32>
    %176 = vector.extract_strided_slice %175 {offsets = [0, 0], sizes = [3, 512], strides = [1, 1]} : vector<21x512xf32> to vector<3x512xf32>
    %177 = vector.broadcast %11 : vector<3x1xf32> to vector<3x512xf32>
    %178 = arith.addf %176, %177 : vector<3x512xf32>
    %179 = arith.negf %178 : vector<3x512xf32>
    %180 = math.exp %179 : vector<3x512xf32>
    %cst_60 = arith.constant 1.000000e+00 : f32
    %181 = vector.broadcast %cst_60 : f32 to vector<3x512xf32>
    %182 = arith.addf %181, %180 : vector<3x512xf32>
    %183 = arith.divf %181, %182 : vector<3x512xf32>
    %cst_61 = arith.constant dense<0.000000e+00> : vector<18x512xf32>
    %184 = tpu.matmul %12, %183, %cst_61 {dimension_numbers = #tpu.dot_dimension_numbers<[1], [0], [0], [1], [0, 0, 1, 1], [], []>} : vector<18x3xf32>, vector<3x512xf32>, vector<18x512xf32> -> vector<18x512xf32>
    %185 = vector.extract_strided_slice %175 {offsets = [3, 0], sizes = [18, 512], strides = [1, 1]} : vector<21x512xf32> to vector<18x512xf32>
    %186 = arith.mulf %185, %184 : vector<18x512xf32>
    %187 = arith.maximumf %157, %183 : vector<3x512xf32>
    %188 = arith.addf %158, %183 : vector<3x512xf32>
    %189 = arith.addf %159, %186 : vector<18x512xf32>
    %c6_62 = arith.constant 6 : index
    %c0_63 = arith.constant 0 : index
    %190 = vector.load %arg2[%c6_62, %c0_63] : memref<16x512xf32, #tpu.memory_space<vmem>>, vector<1x512xf32>
    %cst_64 = arith.constant 6.000000e+00 : f32
    %191 = vector.broadcast %cst_64 : f32 to vector<1x512xf32>
    %192 = arith.addf %191, %190 : vector<1x512xf32>
    %cst_65 = arith.constant 6.250000e-02 : f32
    %193 = vector.broadcast %cst_65 : f32 to vector<1x512xf32>
    %194 = arith.mulf %192, %193 : vector<1x512xf32>
    %cst_66 = arith.constant 1.000000e+00 : f32
    %195 = vector.broadcast %cst_66 : f32 to vector<1x512xf32>
    %196 = arith.subf %195, %194 : vector<1x512xf32>
    %197 = arith.mulf %1, %196 : vector<1x512xf32>
    %198 = arith.mulf %2, %194 : vector<1x512xf32>
    %199 = arith.addf %197, %198 : vector<1x512xf32>
    %200 = vector.broadcast %199 : vector<1x512xf32> to vector<32x512xf32>
    %201 = arith.mulf %200, %9 : vector<32x512xf32>
    %202 = arith.addf %8, %201 : vector<32x512xf32>
    %cst_67 = arith.constant 0.000000e+00 : f32
    %203 = vector.broadcast %cst_67 : f32 to vector<32x512xf32>
    %204 = arith.maximumf %202, %203 : vector<32x512xf32>
    %cst_68 = arith.constant dense<0.000000e+00> : vector<21x512xf32>
    %205 = tpu.matmul %10, %204, %cst_68 {dimension_numbers = #tpu.dot_dimension_numbers<[1], [0], [0], [1], [0, 0, 1, 1], [], []>} : vector<21x32xf32>, vector<32x512xf32>, vector<21x512xf32> -> vector<21x512xf32>
    %206 = vector.extract_strided_slice %205 {offsets = [0, 0], sizes = [3, 512], strides = [1, 1]} : vector<21x512xf32> to vector<3x512xf32>
    %207 = vector.broadcast %11 : vector<3x1xf32> to vector<3x512xf32>
    %208 = arith.addf %206, %207 : vector<3x512xf32>
    %209 = arith.negf %208 : vector<3x512xf32>
    %210 = math.exp %209 : vector<3x512xf32>
    %cst_69 = arith.constant 1.000000e+00 : f32
    %211 = vector.broadcast %cst_69 : f32 to vector<3x512xf32>
    %212 = arith.addf %211, %210 : vector<3x512xf32>
    %213 = arith.divf %211, %212 : vector<3x512xf32>
    %cst_70 = arith.constant dense<0.000000e+00> : vector<18x512xf32>
    %214 = tpu.matmul %12, %213, %cst_70 {dimension_numbers = #tpu.dot_dimension_numbers<[1], [0], [0], [1], [0, 0, 1, 1], [], []>} : vector<18x3xf32>, vector<3x512xf32>, vector<18x512xf32> -> vector<18x512xf32>
    %215 = vector.extract_strided_slice %205 {offsets = [3, 0], sizes = [18, 512], strides = [1, 1]} : vector<21x512xf32> to vector<18x512xf32>
    %216 = arith.mulf %215, %214 : vector<18x512xf32>
    %217 = arith.maximumf %187, %213 : vector<3x512xf32>
    %218 = arith.addf %188, %213 : vector<3x512xf32>
    %219 = arith.addf %189, %216 : vector<18x512xf32>
    %c7_71 = arith.constant 7 : index
    %c0_72 = arith.constant 0 : index
    %220 = vector.load %arg2[%c7_71, %c0_72] : memref<16x512xf32, #tpu.memory_space<vmem>>, vector<1x512xf32>
    %cst_73 = arith.constant 7.000000e+00 : f32
    %221 = vector.broadcast %cst_73 : f32 to vector<1x512xf32>
    %222 = arith.addf %221, %220 : vector<1x512xf32>
    %cst_74 = arith.constant 6.250000e-02 : f32
    %223 = vector.broadcast %cst_74 : f32 to vector<1x512xf32>
    %224 = arith.mulf %222, %223 : vector<1x512xf32>
    %cst_75 = arith.constant 1.000000e+00 : f32
    %225 = vector.broadcast %cst_75 : f32 to vector<1x512xf32>
    %226 = arith.subf %225, %224 : vector<1x512xf32>
    %227 = arith.mulf %1, %226 : vector<1x512xf32>
    %228 = arith.mulf %2, %224 : vector<1x512xf32>
    %229 = arith.addf %227, %228 : vector<1x512xf32>
    %230 = vector.broadcast %229 : vector<1x512xf32> to vector<32x512xf32>
    %231 = arith.mulf %230, %9 : vector<32x512xf32>
    %232 = arith.addf %8, %231 : vector<32x512xf32>
    %cst_76 = arith.constant 0.000000e+00 : f32
    %233 = vector.broadcast %cst_76 : f32 to vector<32x512xf32>
    %234 = arith.maximumf %232, %233 : vector<32x512xf32>
    %cst_77 = arith.constant dense<0.000000e+00> : vector<21x512xf32>
    %235 = tpu.matmul %10, %234, %cst_77 {dimension_numbers = #tpu.dot_dimension_numbers<[1], [0], [0], [1], [0, 0, 1, 1], [], []>} : vector<21x32xf32>, vector<32x512xf32>, vector<21x512xf32> -> vector<21x512xf32>
    %236 = vector.extract_strided_slice %235 {offsets = [0, 0], sizes = [3, 512], strides = [1, 1]} : vector<21x512xf32> to vector<3x512xf32>
    %237 = vector.broadcast %11 : vector<3x1xf32> to vector<3x512xf32>
    %238 = arith.addf %236, %237 : vector<3x512xf32>
    %239 = arith.negf %238 : vector<3x512xf32>
    %240 = math.exp %239 : vector<3x512xf32>
    %cst_78 = arith.constant 1.000000e+00 : f32
    %241 = vector.broadcast %cst_78 : f32 to vector<3x512xf32>
    %242 = arith.addf %241, %240 : vector<3x512xf32>
    %243 = arith.divf %241, %242 : vector<3x512xf32>
    %cst_79 = arith.constant dense<0.000000e+00> : vector<18x512xf32>
    %244 = tpu.matmul %12, %243, %cst_79 {dimension_numbers = #tpu.dot_dimension_numbers<[1], [0], [0], [1], [0, 0, 1, 1], [], []>} : vector<18x3xf32>, vector<3x512xf32>, vector<18x512xf32> -> vector<18x512xf32>
    %245 = vector.extract_strided_slice %235 {offsets = [3, 0], sizes = [18, 512], strides = [1, 1]} : vector<21x512xf32> to vector<18x512xf32>
    %246 = arith.mulf %245, %244 : vector<18x512xf32>
    %247 = arith.maximumf %217, %243 : vector<3x512xf32>
    %248 = arith.addf %218, %243 : vector<3x512xf32>
    %249 = arith.addf %219, %246 : vector<18x512xf32>
    %c8 = arith.constant 8 : index
    %c0_80 = arith.constant 0 : index
    %250 = vector.load %arg2[%c8, %c0_80] : memref<16x512xf32, #tpu.memory_space<vmem>>, vector<1x512xf32>
    %cst_81 = arith.constant 8.000000e+00 : f32
    %251 = vector.broadcast %cst_81 : f32 to vector<1x512xf32>
    %252 = arith.addf %251, %250 : vector<1x512xf32>
    %cst_82 = arith.constant 6.250000e-02 : f32
    %253 = vector.broadcast %cst_82 : f32 to vector<1x512xf32>
    %254 = arith.mulf %252, %253 : vector<1x512xf32>
    %cst_83 = arith.constant 1.000000e+00 : f32
    %255 = vector.broadcast %cst_83 : f32 to vector<1x512xf32>
    %256 = arith.subf %255, %254 : vector<1x512xf32>
    %257 = arith.mulf %1, %256 : vector<1x512xf32>
    %258 = arith.mulf %2, %254 : vector<1x512xf32>
    %259 = arith.addf %257, %258 : vector<1x512xf32>
    %260 = vector.broadcast %259 : vector<1x512xf32> to vector<32x512xf32>
    %261 = arith.mulf %260, %9 : vector<32x512xf32>
    %262 = arith.addf %8, %261 : vector<32x512xf32>
    %cst_84 = arith.constant 0.000000e+00 : f32
    %263 = vector.broadcast %cst_84 : f32 to vector<32x512xf32>
    %264 = arith.maximumf %262, %263 : vector<32x512xf32>
    %cst_85 = arith.constant dense<0.000000e+00> : vector<21x512xf32>
    %265 = tpu.matmul %10, %264, %cst_85 {dimension_numbers = #tpu.dot_dimension_numbers<[1], [0], [0], [1], [0, 0, 1, 1], [], []>} : vector<21x32xf32>, vector<32x512xf32>, vector<21x512xf32> -> vector<21x512xf32>
    %266 = vector.extract_strided_slice %265 {offsets = [0, 0], sizes = [3, 512], strides = [1, 1]} : vector<21x512xf32> to vector<3x512xf32>
    %267 = vector.broadcast %11 : vector<3x1xf32> to vector<3x512xf32>
    %268 = arith.addf %266, %267 : vector<3x512xf32>
    %269 = arith.negf %268 : vector<3x512xf32>
    %270 = math.exp %269 : vector<3x512xf32>
    %cst_86 = arith.constant 1.000000e+00 : f32
    %271 = vector.broadcast %cst_86 : f32 to vector<3x512xf32>
    %272 = arith.addf %271, %270 : vector<3x512xf32>
    %273 = arith.divf %271, %272 : vector<3x512xf32>
    %cst_87 = arith.constant dense<0.000000e+00> : vector<18x512xf32>
    %274 = tpu.matmul %12, %273, %cst_87 {dimension_numbers = #tpu.dot_dimension_numbers<[1], [0], [0], [1], [0, 0, 1, 1], [], []>} : vector<18x3xf32>, vector<3x512xf32>, vector<18x512xf32> -> vector<18x512xf32>
    %275 = vector.extract_strided_slice %265 {offsets = [3, 0], sizes = [18, 512], strides = [1, 1]} : vector<21x512xf32> to vector<18x512xf32>
    %276 = arith.mulf %275, %274 : vector<18x512xf32>
    %277 = arith.maximumf %247, %273 : vector<3x512xf32>
    %278 = arith.addf %248, %273 : vector<3x512xf32>
    %279 = arith.addf %249, %276 : vector<18x512xf32>
    %c9 = arith.constant 9 : index
    %c0_88 = arith.constant 0 : index
    %280 = vector.load %arg2[%c9, %c0_88] : memref<16x512xf32, #tpu.memory_space<vmem>>, vector<1x512xf32>
    %cst_89 = arith.constant 9.000000e+00 : f32
    %281 = vector.broadcast %cst_89 : f32 to vector<1x512xf32>
    %282 = arith.addf %281, %280 : vector<1x512xf32>
    %cst_90 = arith.constant 6.250000e-02 : f32
    %283 = vector.broadcast %cst_90 : f32 to vector<1x512xf32>
    %284 = arith.mulf %282, %283 : vector<1x512xf32>
    %cst_91 = arith.constant 1.000000e+00 : f32
    %285 = vector.broadcast %cst_91 : f32 to vector<1x512xf32>
    %286 = arith.subf %285, %284 : vector<1x512xf32>
    %287 = arith.mulf %1, %286 : vector<1x512xf32>
    %288 = arith.mulf %2, %284 : vector<1x512xf32>
    %289 = arith.addf %287, %288 : vector<1x512xf32>
    %290 = vector.broadcast %289 : vector<1x512xf32> to vector<32x512xf32>
    %291 = arith.mulf %290, %9 : vector<32x512xf32>
    %292 = arith.addf %8, %291 : vector<32x512xf32>
    %cst_92 = arith.constant 0.000000e+00 : f32
    %293 = vector.broadcast %cst_92 : f32 to vector<32x512xf32>
    %294 = arith.maximumf %292, %293 : vector<32x512xf32>
    %cst_93 = arith.constant dense<0.000000e+00> : vector<21x512xf32>
    %295 = tpu.matmul %10, %294, %cst_93 {dimension_numbers = #tpu.dot_dimension_numbers<[1], [0], [0], [1], [0, 0, 1, 1], [], []>} : vector<21x32xf32>, vector<32x512xf32>, vector<21x512xf32> -> vector<21x512xf32>
    %296 = vector.extract_strided_slice %295 {offsets = [0, 0], sizes = [3, 512], strides = [1, 1]} : vector<21x512xf32> to vector<3x512xf32>
    %297 = vector.broadcast %11 : vector<3x1xf32> to vector<3x512xf32>
    %298 = arith.addf %296, %297 : vector<3x512xf32>
    %299 = arith.negf %298 : vector<3x512xf32>
    %300 = math.exp %299 : vector<3x512xf32>
    %cst_94 = arith.constant 1.000000e+00 : f32
    %301 = vector.broadcast %cst_94 : f32 to vector<3x512xf32>
    %302 = arith.addf %301, %300 : vector<3x512xf32>
    %303 = arith.divf %301, %302 : vector<3x512xf32>
    %cst_95 = arith.constant dense<0.000000e+00> : vector<18x512xf32>
    %304 = tpu.matmul %12, %303, %cst_95 {dimension_numbers = #tpu.dot_dimension_numbers<[1], [0], [0], [1], [0, 0, 1, 1], [], []>} : vector<18x3xf32>, vector<3x512xf32>, vector<18x512xf32> -> vector<18x512xf32>
    %305 = vector.extract_strided_slice %295 {offsets = [3, 0], sizes = [18, 512], strides = [1, 1]} : vector<21x512xf32> to vector<18x512xf32>
    %306 = arith.mulf %305, %304 : vector<18x512xf32>
    %307 = arith.maximumf %277, %303 : vector<3x512xf32>
    %308 = arith.addf %278, %303 : vector<3x512xf32>
    %309 = arith.addf %279, %306 : vector<18x512xf32>
    %c10 = arith.constant 10 : index
    %c0_96 = arith.constant 0 : index
    %310 = vector.load %arg2[%c10, %c0_96] : memref<16x512xf32, #tpu.memory_space<vmem>>, vector<1x512xf32>
    %cst_97 = arith.constant 1.000000e+01 : f32
    %311 = vector.broadcast %cst_97 : f32 to vector<1x512xf32>
    %312 = arith.addf %311, %310 : vector<1x512xf32>
    %cst_98 = arith.constant 6.250000e-02 : f32
    %313 = vector.broadcast %cst_98 : f32 to vector<1x512xf32>
    %314 = arith.mulf %312, %313 : vector<1x512xf32>
    %cst_99 = arith.constant 1.000000e+00 : f32
    %315 = vector.broadcast %cst_99 : f32 to vector<1x512xf32>
    %316 = arith.subf %315, %314 : vector<1x512xf32>
    %317 = arith.mulf %1, %316 : vector<1x512xf32>
    %318 = arith.mulf %2, %314 : vector<1x512xf32>
    %319 = arith.addf %317, %318 : vector<1x512xf32>
    %320 = vector.broadcast %319 : vector<1x512xf32> to vector<32x512xf32>
    %321 = arith.mulf %320, %9 : vector<32x512xf32>
    %322 = arith.addf %8, %321 : vector<32x512xf32>
    %cst_100 = arith.constant 0.000000e+00 : f32
    %323 = vector.broadcast %cst_100 : f32 to vector<32x512xf32>
    %324 = arith.maximumf %322, %323 : vector<32x512xf32>
    %cst_101 = arith.constant dense<0.000000e+00> : vector<21x512xf32>
    %325 = tpu.matmul %10, %324, %cst_101 {dimension_numbers = #tpu.dot_dimension_numbers<[1], [0], [0], [1], [0, 0, 1, 1], [], []>} : vector<21x32xf32>, vector<32x512xf32>, vector<21x512xf32> -> vector<21x512xf32>
    %326 = vector.extract_strided_slice %325 {offsets = [0, 0], sizes = [3, 512], strides = [1, 1]} : vector<21x512xf32> to vector<3x512xf32>
    %327 = vector.broadcast %11 : vector<3x1xf32> to vector<3x512xf32>
    %328 = arith.addf %326, %327 : vector<3x512xf32>
    %329 = arith.negf %328 : vector<3x512xf32>
    %330 = math.exp %329 : vector<3x512xf32>
    %cst_102 = arith.constant 1.000000e+00 : f32
    %331 = vector.broadcast %cst_102 : f32 to vector<3x512xf32>
    %332 = arith.addf %331, %330 : vector<3x512xf32>
    %333 = arith.divf %331, %332 : vector<3x512xf32>
    %cst_103 = arith.constant dense<0.000000e+00> : vector<18x512xf32>
    %334 = tpu.matmul %12, %333, %cst_103 {dimension_numbers = #tpu.dot_dimension_numbers<[1], [0], [0], [1], [0, 0, 1, 1], [], []>} : vector<18x3xf32>, vector<3x512xf32>, vector<18x512xf32> -> vector<18x512xf32>
    %335 = vector.extract_strided_slice %325 {offsets = [3, 0], sizes = [18, 512], strides = [1, 1]} : vector<21x512xf32> to vector<18x512xf32>
    %336 = arith.mulf %335, %334 : vector<18x512xf32>
    %337 = arith.maximumf %307, %333 : vector<3x512xf32>
    %338 = arith.addf %308, %333 : vector<3x512xf32>
    %339 = arith.addf %309, %336 : vector<18x512xf32>
    %c11 = arith.constant 11 : index
    %c0_104 = arith.constant 0 : index
    %340 = vector.load %arg2[%c11, %c0_104] : memref<16x512xf32, #tpu.memory_space<vmem>>, vector<1x512xf32>
    %cst_105 = arith.constant 1.100000e+01 : f32
    %341 = vector.broadcast %cst_105 : f32 to vector<1x512xf32>
    %342 = arith.addf %341, %340 : vector<1x512xf32>
    %cst_106 = arith.constant 6.250000e-02 : f32
    %343 = vector.broadcast %cst_106 : f32 to vector<1x512xf32>
    %344 = arith.mulf %342, %343 : vector<1x512xf32>
    %cst_107 = arith.constant 1.000000e+00 : f32
    %345 = vector.broadcast %cst_107 : f32 to vector<1x512xf32>
    %346 = arith.subf %345, %344 : vector<1x512xf32>
    %347 = arith.mulf %1, %346 : vector<1x512xf32>
    %348 = arith.mulf %2, %344 : vector<1x512xf32>
    %349 = arith.addf %347, %348 : vector<1x512xf32>
    %350 = vector.broadcast %349 : vector<1x512xf32> to vector<32x512xf32>
    %351 = arith.mulf %350, %9 : vector<32x512xf32>
    %352 = arith.addf %8, %351 : vector<32x512xf32>
    %cst_108 = arith.constant 0.000000e+00 : f32
    %353 = vector.broadcast %cst_108 : f32 to vector<32x512xf32>
    %354 = arith.maximumf %352, %353 : vector<32x512xf32>
    %cst_109 = arith.constant dense<0.000000e+00> : vector<21x512xf32>
    %355 = tpu.matmul %10, %354, %cst_109 {dimension_numbers = #tpu.dot_dimension_numbers<[1], [0], [0], [1], [0, 0, 1, 1], [], []>} : vector<21x32xf32>, vector<32x512xf32>, vector<21x512xf32> -> vector<21x512xf32>
    %356 = vector.extract_strided_slice %355 {offsets = [0, 0], sizes = [3, 512], strides = [1, 1]} : vector<21x512xf32> to vector<3x512xf32>
    %357 = vector.broadcast %11 : vector<3x1xf32> to vector<3x512xf32>
    %358 = arith.addf %356, %357 : vector<3x512xf32>
    %359 = arith.negf %358 : vector<3x512xf32>
    %360 = math.exp %359 : vector<3x512xf32>
    %cst_110 = arith.constant 1.000000e+00 : f32
    %361 = vector.broadcast %cst_110 : f32 to vector<3x512xf32>
    %362 = arith.addf %361, %360 : vector<3x512xf32>
    %363 = arith.divf %361, %362 : vector<3x512xf32>
    %cst_111 = arith.constant dense<0.000000e+00> : vector<18x512xf32>
    %364 = tpu.matmul %12, %363, %cst_111 {dimension_numbers = #tpu.dot_dimension_numbers<[1], [0], [0], [1], [0, 0, 1, 1], [], []>} : vector<18x3xf32>, vector<3x512xf32>, vector<18x512xf32> -> vector<18x512xf32>
    %365 = vector.extract_strided_slice %355 {offsets = [3, 0], sizes = [18, 512], strides = [1, 1]} : vector<21x512xf32> to vector<18x512xf32>
    %366 = arith.mulf %365, %364 : vector<18x512xf32>
    %367 = arith.maximumf %337, %363 : vector<3x512xf32>
    %368 = arith.addf %338, %363 : vector<3x512xf32>
    %369 = arith.addf %339, %366 : vector<18x512xf32>
    %c12 = arith.constant 12 : index
    %c0_112 = arith.constant 0 : index
    %370 = vector.load %arg2[%c12, %c0_112] : memref<16x512xf32, #tpu.memory_space<vmem>>, vector<1x512xf32>
    %cst_113 = arith.constant 1.200000e+01 : f32
    %371 = vector.broadcast %cst_113 : f32 to vector<1x512xf32>
    %372 = arith.addf %371, %370 : vector<1x512xf32>
    %cst_114 = arith.constant 6.250000e-02 : f32
    %373 = vector.broadcast %cst_114 : f32 to vector<1x512xf32>
    %374 = arith.mulf %372, %373 : vector<1x512xf32>
    %cst_115 = arith.constant 1.000000e+00 : f32
    %375 = vector.broadcast %cst_115 : f32 to vector<1x512xf32>
    %376 = arith.subf %375, %374 : vector<1x512xf32>
    %377 = arith.mulf %1, %376 : vector<1x512xf32>
    %378 = arith.mulf %2, %374 : vector<1x512xf32>
    %379 = arith.addf %377, %378 : vector<1x512xf32>
    %380 = vector.broadcast %379 : vector<1x512xf32> to vector<32x512xf32>
    %381 = arith.mulf %380, %9 : vector<32x512xf32>
    %382 = arith.addf %8, %381 : vector<32x512xf32>
    %cst_116 = arith.constant 0.000000e+00 : f32
    %383 = vector.broadcast %cst_116 : f32 to vector<32x512xf32>
    %384 = arith.maximumf %382, %383 : vector<32x512xf32>
    %cst_117 = arith.constant dense<0.000000e+00> : vector<21x512xf32>
    %385 = tpu.matmul %10, %384, %cst_117 {dimension_numbers = #tpu.dot_dimension_numbers<[1], [0], [0], [1], [0, 0, 1, 1], [], []>} : vector<21x32xf32>, vector<32x512xf32>, vector<21x512xf32> -> vector<21x512xf32>
    %386 = vector.extract_strided_slice %385 {offsets = [0, 0], sizes = [3, 512], strides = [1, 1]} : vector<21x512xf32> to vector<3x512xf32>
    %387 = vector.broadcast %11 : vector<3x1xf32> to vector<3x512xf32>
    %388 = arith.addf %386, %387 : vector<3x512xf32>
    %389 = arith.negf %388 : vector<3x512xf32>
    %390 = math.exp %389 : vector<3x512xf32>
    %cst_118 = arith.constant 1.000000e+00 : f32
    %391 = vector.broadcast %cst_118 : f32 to vector<3x512xf32>
    %392 = arith.addf %391, %390 : vector<3x512xf32>
    %393 = arith.divf %391, %392 : vector<3x512xf32>
    %cst_119 = arith.constant dense<0.000000e+00> : vector<18x512xf32>
    %394 = tpu.matmul %12, %393, %cst_119 {dimension_numbers = #tpu.dot_dimension_numbers<[1], [0], [0], [1], [0, 0, 1, 1], [], []>} : vector<18x3xf32>, vector<3x512xf32>, vector<18x512xf32> -> vector<18x512xf32>
    %395 = vector.extract_strided_slice %385 {offsets = [3, 0], sizes = [18, 512], strides = [1, 1]} : vector<21x512xf32> to vector<18x512xf32>
    %396 = arith.mulf %395, %394 : vector<18x512xf32>
    %397 = arith.maximumf %367, %393 : vector<3x512xf32>
    %398 = arith.addf %368, %393 : vector<3x512xf32>
    %399 = arith.addf %369, %396 : vector<18x512xf32>
    %c13 = arith.constant 13 : index
    %c0_120 = arith.constant 0 : index
    %400 = vector.load %arg2[%c13, %c0_120] : memref<16x512xf32, #tpu.memory_space<vmem>>, vector<1x512xf32>
    %cst_121 = arith.constant 1.300000e+01 : f32
    %401 = vector.broadcast %cst_121 : f32 to vector<1x512xf32>
    %402 = arith.addf %401, %400 : vector<1x512xf32>
    %cst_122 = arith.constant 6.250000e-02 : f32
    %403 = vector.broadcast %cst_122 : f32 to vector<1x512xf32>
    %404 = arith.mulf %402, %403 : vector<1x512xf32>
    %cst_123 = arith.constant 1.000000e+00 : f32
    %405 = vector.broadcast %cst_123 : f32 to vector<1x512xf32>
    %406 = arith.subf %405, %404 : vector<1x512xf32>
    %407 = arith.mulf %1, %406 : vector<1x512xf32>
    %408 = arith.mulf %2, %404 : vector<1x512xf32>
    %409 = arith.addf %407, %408 : vector<1x512xf32>
    %410 = vector.broadcast %409 : vector<1x512xf32> to vector<32x512xf32>
    %411 = arith.mulf %410, %9 : vector<32x512xf32>
    %412 = arith.addf %8, %411 : vector<32x512xf32>
    %cst_124 = arith.constant 0.000000e+00 : f32
    %413 = vector.broadcast %cst_124 : f32 to vector<32x512xf32>
    %414 = arith.maximumf %412, %413 : vector<32x512xf32>
    %cst_125 = arith.constant dense<0.000000e+00> : vector<21x512xf32>
    %415 = tpu.matmul %10, %414, %cst_125 {dimension_numbers = #tpu.dot_dimension_numbers<[1], [0], [0], [1], [0, 0, 1, 1], [], []>} : vector<21x32xf32>, vector<32x512xf32>, vector<21x512xf32> -> vector<21x512xf32>
    %416 = vector.extract_strided_slice %415 {offsets = [0, 0], sizes = [3, 512], strides = [1, 1]} : vector<21x512xf32> to vector<3x512xf32>
    %417 = vector.broadcast %11 : vector<3x1xf32> to vector<3x512xf32>
    %418 = arith.addf %416, %417 : vector<3x512xf32>
    %419 = arith.negf %418 : vector<3x512xf32>
    %420 = math.exp %419 : vector<3x512xf32>
    %cst_126 = arith.constant 1.000000e+00 : f32
    %421 = vector.broadcast %cst_126 : f32 to vector<3x512xf32>
    %422 = arith.addf %421, %420 : vector<3x512xf32>
    %423 = arith.divf %421, %422 : vector<3x512xf32>
    %cst_127 = arith.constant dense<0.000000e+00> : vector<18x512xf32>
    %424 = tpu.matmul %12, %423, %cst_127 {dimension_numbers = #tpu.dot_dimension_numbers<[1], [0], [0], [1], [0, 0, 1, 1], [], []>} : vector<18x3xf32>, vector<3x512xf32>, vector<18x512xf32> -> vector<18x512xf32>
    %425 = vector.extract_strided_slice %415 {offsets = [3, 0], sizes = [18, 512], strides = [1, 1]} : vector<21x512xf32> to vector<18x512xf32>
    %426 = arith.mulf %425, %424 : vector<18x512xf32>
    %427 = arith.maximumf %397, %423 : vector<3x512xf32>
    %428 = arith.addf %398, %423 : vector<3x512xf32>
    %429 = arith.addf %399, %426 : vector<18x512xf32>
    %c14 = arith.constant 14 : index
    %c0_128 = arith.constant 0 : index
    %430 = vector.load %arg2[%c14, %c0_128] : memref<16x512xf32, #tpu.memory_space<vmem>>, vector<1x512xf32>
    %cst_129 = arith.constant 1.400000e+01 : f32
    %431 = vector.broadcast %cst_129 : f32 to vector<1x512xf32>
    %432 = arith.addf %431, %430 : vector<1x512xf32>
    %cst_130 = arith.constant 6.250000e-02 : f32
    %433 = vector.broadcast %cst_130 : f32 to vector<1x512xf32>
    %434 = arith.mulf %432, %433 : vector<1x512xf32>
    %cst_131 = arith.constant 1.000000e+00 : f32
    %435 = vector.broadcast %cst_131 : f32 to vector<1x512xf32>
    %436 = arith.subf %435, %434 : vector<1x512xf32>
    %437 = arith.mulf %1, %436 : vector<1x512xf32>
    %438 = arith.mulf %2, %434 : vector<1x512xf32>
    %439 = arith.addf %437, %438 : vector<1x512xf32>
    %440 = vector.broadcast %439 : vector<1x512xf32> to vector<32x512xf32>
    %441 = arith.mulf %440, %9 : vector<32x512xf32>
    %442 = arith.addf %8, %441 : vector<32x512xf32>
    %cst_132 = arith.constant 0.000000e+00 : f32
    %443 = vector.broadcast %cst_132 : f32 to vector<32x512xf32>
    %444 = arith.maximumf %442, %443 : vector<32x512xf32>
    %cst_133 = arith.constant dense<0.000000e+00> : vector<21x512xf32>
    %445 = tpu.matmul %10, %444, %cst_133 {dimension_numbers = #tpu.dot_dimension_numbers<[1], [0], [0], [1], [0, 0, 1, 1], [], []>} : vector<21x32xf32>, vector<32x512xf32>, vector<21x512xf32> -> vector<21x512xf32>
    %446 = vector.extract_strided_slice %445 {offsets = [0, 0], sizes = [3, 512], strides = [1, 1]} : vector<21x512xf32> to vector<3x512xf32>
    %447 = vector.broadcast %11 : vector<3x1xf32> to vector<3x512xf32>
    %448 = arith.addf %446, %447 : vector<3x512xf32>
    %449 = arith.negf %448 : vector<3x512xf32>
    %450 = math.exp %449 : vector<3x512xf32>
    %cst_134 = arith.constant 1.000000e+00 : f32
    %451 = vector.broadcast %cst_134 : f32 to vector<3x512xf32>
    %452 = arith.addf %451, %450 : vector<3x512xf32>
    %453 = arith.divf %451, %452 : vector<3x512xf32>
    %cst_135 = arith.constant dense<0.000000e+00> : vector<18x512xf32>
    %454 = tpu.matmul %12, %453, %cst_135 {dimension_numbers = #tpu.dot_dimension_numbers<[1], [0], [0], [1], [0, 0, 1, 1], [], []>} : vector<18x3xf32>, vector<3x512xf32>, vector<18x512xf32> -> vector<18x512xf32>
    %455 = vector.extract_strided_slice %445 {offsets = [3, 0], sizes = [18, 512], strides = [1, 1]} : vector<21x512xf32> to vector<18x512xf32>
    %456 = arith.mulf %455, %454 : vector<18x512xf32>
    %457 = arith.maximumf %427, %453 : vector<3x512xf32>
    %458 = arith.addf %428, %453 : vector<3x512xf32>
    %459 = arith.addf %429, %456 : vector<18x512xf32>
    %c15 = arith.constant 15 : index
    %c0_136 = arith.constant 0 : index
    %460 = vector.load %arg2[%c15, %c0_136] : memref<16x512xf32, #tpu.memory_space<vmem>>, vector<1x512xf32>
    %cst_137 = arith.constant 1.500000e+01 : f32
    %461 = vector.broadcast %cst_137 : f32 to vector<1x512xf32>
    %462 = arith.addf %461, %460 : vector<1x512xf32>
    %cst_138 = arith.constant 6.250000e-02 : f32
    %463 = vector.broadcast %cst_138 : f32 to vector<1x512xf32>
    %464 = arith.mulf %462, %463 : vector<1x512xf32>
    %cst_139 = arith.constant 1.000000e+00 : f32
    %465 = vector.broadcast %cst_139 : f32 to vector<1x512xf32>
    %466 = arith.subf %465, %464 : vector<1x512xf32>
    %467 = arith.mulf %1, %466 : vector<1x512xf32>
    %468 = arith.mulf %2, %464 : vector<1x512xf32>
    %469 = arith.addf %467, %468 : vector<1x512xf32>
    %470 = vector.broadcast %469 : vector<1x512xf32> to vector<32x512xf32>
    %471 = arith.mulf %470, %9 : vector<32x512xf32>
    %472 = arith.addf %8, %471 : vector<32x512xf32>
    %cst_140 = arith.constant 0.000000e+00 : f32
    %473 = vector.broadcast %cst_140 : f32 to vector<32x512xf32>
    %474 = arith.maximumf %472, %473 : vector<32x512xf32>
    %cst_141 = arith.constant dense<0.000000e+00> : vector<21x512xf32>
    %475 = tpu.matmul %10, %474, %cst_141 {dimension_numbers = #tpu.dot_dimension_numbers<[1], [0], [0], [1], [0, 0, 1, 1], [], []>} : vector<21x32xf32>, vector<32x512xf32>, vector<21x512xf32> -> vector<21x512xf32>
    %476 = vector.extract_strided_slice %475 {offsets = [0, 0], sizes = [3, 512], strides = [1, 1]} : vector<21x512xf32> to vector<3x512xf32>
    %477 = vector.broadcast %11 : vector<3x1xf32> to vector<3x512xf32>
    %478 = arith.addf %476, %477 : vector<3x512xf32>
    %479 = arith.negf %478 : vector<3x512xf32>
    %480 = math.exp %479 : vector<3x512xf32>
    %cst_142 = arith.constant 1.000000e+00 : f32
    %481 = vector.broadcast %cst_142 : f32 to vector<3x512xf32>
    %482 = arith.addf %481, %480 : vector<3x512xf32>
    %483 = arith.divf %481, %482 : vector<3x512xf32>
    %cst_143 = arith.constant dense<0.000000e+00> : vector<18x512xf32>
    %484 = tpu.matmul %12, %483, %cst_143 {dimension_numbers = #tpu.dot_dimension_numbers<[1], [0], [0], [1], [0, 0, 1, 1], [], []>} : vector<18x3xf32>, vector<3x512xf32>, vector<18x512xf32> -> vector<18x512xf32>
    %485 = vector.extract_strided_slice %475 {offsets = [3, 0], sizes = [18, 512], strides = [1, 1]} : vector<21x512xf32> to vector<18x512xf32>
    %486 = arith.mulf %485, %484 : vector<18x512xf32>
    %487 = arith.maximumf %457, %483 : vector<3x512xf32>
    %488 = arith.addf %458, %483 : vector<3x512xf32>
    %489 = arith.addf %459, %486 : vector<18x512xf32>
    %cst_144 = arith.constant 9.99999974E-6 : f32
    %490 = vector.broadcast %cst_144 : f32 to vector<3x512xf32>
    %491 = arith.addf %488, %490 : vector<3x512xf32>
    %492 = tpu.reciprocal %491 {approx = true} : vector<3x512xf32> -> vector<3x512xf32>
    %493 = arith.mulf %491, %492 : vector<3x512xf32>
    %cst_145 = arith.constant 2.000000e+00 : f32
    %494 = vector.broadcast %cst_145 : f32 to vector<3x512xf32>
    %495 = arith.subf %494, %493 : vector<3x512xf32>
    %496 = arith.mulf %492, %495 : vector<3x512xf32>
    %cst_146 = arith.constant dense<0.000000e+00> : vector<18x512xf32>
    %497 = tpu.matmul %12, %488, %cst_146 {dimension_numbers = #tpu.dot_dimension_numbers<[1], [0], [0], [1], [0, 0, 1, 1], [], []>} : vector<18x3xf32>, vector<3x512xf32>, vector<18x512xf32> -> vector<18x512xf32>
    %cst_147 = arith.constant dense<0.000000e+00> : vector<18x512xf32>
    %498 = tpu.matmul %12, %496, %cst_147 {dimension_numbers = #tpu.dot_dimension_numbers<[1], [0], [0], [1], [0, 0, 1, 1], [], []>} : vector<18x3xf32>, vector<3x512xf32>, vector<18x512xf32> -> vector<18x512xf32>
    %c0_148 = arith.constant 0 : index
    %c0_149 = arith.constant 0 : index
    %499 = vector.load %arg7[%c0_148, %c0_149] : memref<18x1xf32, #tpu.memory_space<vmem>>, vector<18x1xf32>
    %500 = vector.broadcast %499 : vector<18x1xf32> to vector<18x512xf32>
    %501 = arith.mulf %500, %497 : vector<18x512xf32>
    %502 = arith.addf %489, %501 : vector<18x512xf32>
    %503 = arith.mulf %502, %498 : vector<18x512xf32>
    %cst_150 = arith.constant 0.000000e+00 : f32
    %504 = vector.broadcast %cst_150 : f32 to vector<3x512xf32>
    %505 = tpu.concatenate %487, %503, %504 in 0 : vector<3x512xf32>, vector<18x512xf32>, vector<3x512xf32> -> vector<24x512xf32>
    %c0_151 = arith.constant 0 : index
    %c0_152 = arith.constant 0 : index
    %506 = vector.load %arg9[%c0_151, %c0_152] : memref<24x512xf32, #tpu.memory_space<vmem>>, vector<24x512xf32>
    tpu.vector_store %arg9[%c0_151, %c0_152], %505 {strides = array<i32>} : memref<24x512xf32, #tpu.memory_space<vmem>>, vector<24x512xf32>,
    return
  }
  func.func @transform_0(%arg0: i32) -> (i32, i32) {
    %c0_i32 = arith.constant 0 : i32
    %c0_i32_0 = arith.constant 0 : i32
    return %c0_i32, %arg0 : i32, i32
  }
  func.func @transform_1(%arg0: i32) -> (i32, i32) {
    %c0_i32 = arith.constant 0 : i32
    %c0_i32_0 = arith.constant 0 : i32
    return %c0_i32, %arg0 : i32, i32
  }
  func.func @transform_2(%arg0: i32) -> (i32, i32) {
    %c0_i32 = arith.constant 0 : i32
    %c0_i32_0 = arith.constant 0 : i32
    %c0_i32_1 = arith.constant 0 : i32
    return %c0_i32, %c0_i32_0 : i32, i32
  }
  func.func @transform_3(%arg0: i32) -> (i32, i32) {
    %c0_i32 = arith.constant 0 : i32
    %c0_i32_0 = arith.constant 0 : i32
    %c0_i32_1 = arith.constant 0 : i32
    return %c0_i32, %c0_i32_0 : i32, i32
  }
  func.func @transform_4(%arg0: i32) -> (i32, i32) {
    %c0_i32 = arith.constant 0 : i32
    %c0_i32_0 = arith.constant 0 : i32
    %c0_i32_1 = arith.constant 0 : i32
    return %c0_i32, %c0_i32_0 : i32, i32
  }
  func.func @transform_5(%arg0: i32) -> (i32, i32) {
    %c0_i32 = arith.constant 0 : i32
    %c0_i32_0 = arith.constant 0 : i32
    %c0_i32_1 = arith.constant 0 : i32
    return %c0_i32, %c0_i32_0 : i32, i32
  }
  func.func @transform_6(%arg0: i32) -> (i32, i32) {
    %c0_i32 = arith.constant 0 : i32
    %c0_i32_0 = arith.constant 0 : i32
    %c0_i32_1 = arith.constant 0 : i32
    return %c0_i32, %c0_i32_0 : i32, i32
  }
  func.func @transform_7(%arg0: i32) -> (i32, i32) {
    %c0_i32 = arith.constant 0 : i32
    %c0_i32_0 = arith.constant 0 : i32
    %c0_i32_1 = arith.constant 0 : i32
    return %c0_i32, %c0_i32_0 : i32, i32
  }
  func.func @transform_8(%arg0: i32) -> (i32, i32) {
    %c0_i32 = arith.constant 0 : i32
    %c0_i32_0 = arith.constant 0 : i32
    return %c0_i32, %arg0 : i32, i32
  }
}

</mosaic_0001>

<bundles_post_ra>
// kernel: tpu_custom_call.1
= control target key start
LH: loop header
LB: loop body
LE: loop exit
PB: predicated region body
PF: predicated region fallthrough
CT: control target
= control target key end

     0   :  { %s15193_s0 = inlined_call_operand.hbm [shape: f32[8,4096], index: 0, kind: input, shape index: {}]   ;;  %s15194_s1 = inlined_call_operand.hbm [shape: f32[16,4096], index: 1, kind: input, shape index: {}]   ;;  %s15195_s2 = inlined_call_operand.vmem [shape: f32[64,6], index: 2, kind: input, shape index: {}]   ;;  %s15196_s3 = inlined_call_operand.vmem [shape: f32[32,1], index: 3, kind: input, shape index: {}]   ;;  %s15197_s4 = inlined_call_operand.vmem [shape: f32[21,32], index: 4, kind: input, shape index: {}]   ;;  %s15198_s5 = inlined_call_operand.vmem [shape: f32[3,1], index: 5, kind: input, shape index: {}]   ;;  %s15199_s6 = inlined_call_operand.vmem [shape: f32[18,1], index: 6, kind: input, shape index: {}]   ;;  %s15200_s7 = inlined_call_operand.vmem [shape: f32[18,3], index: 7, kind: input, shape index: {}]   ;;  %s15201_s8 = inlined_call_operand.hbm [shape: f32[24,4096], index: 8, kind: output, shape index: {}]  }
   0x1   :  { %15329 = sst [smem:[#allocation125_spill]] %s15193_s0 }
   0x2   :  { %13 = vsyncpa [#allocation3], 0 }
   0x3   :  { %15 = vsyncpa [#allocation3 + $0x1], 0 }
   0x4   :  { %16 = vsyncpa [#allocation6], 0 }
   0x5   :  { %18 = vsyncpa [#allocation6 + $0x1], 0 }
   0x6   :  { %19 = vsyncpa [#allocation4], 0 }
   0x7   :  { %21 = vsyncpa [#allocation4 + $0x1], 0  ;;  %s10938_s27 = smov 0   ;;  %s10940_s28 = smov 0  }
   0x8   :  { %s10942_s29 = smov 0   ;;  %s10944_s30 = smov 0  }
   0x9 LB: > { %s10959_s9 = sadd.s32 4294967295, %s10880_s30   ;;  %s9746_s10 = sadd.s32 4294967294, %s10880_s30   ;;  %s10880_s30 = sphi %s10944_s30, %s15753_s30   ;;  %s10876_s29 = sphi %s10942_s29, %s15752_s29   ;;  %s10872_s28 = sphi %s10940_s28, %s15751_s28   ;;  %s10868_s27 = sphi %s10938_s27, %s15750_s27  }
   0xa   : > { %s10963_s11 = sadd.s32 1, %s10880_s30   ;;  %s34_s12 = sadd.s32 1, %s10876_s29 }
   0xb   : > { %s31_s13 = ssub.s32 %s10880_s30, %s10963_s11  ;;  %p41_p0 = scmp.ne.s32.totalorder %s10876_s29, %s10872_s28 }
   0xc   : > { %p32_p1 = scmp.eq.s32.totalorder %s31_s13, 0  ;;  %p42_p2 = scmp.eq.s32.totalorder %s10880_s30, 0 }
   0xd   : > { %p47_p3 = scmp.ne.s32.totalorder %s10872_s28, %s10868_s27  ;;  %p48_p4 = scmp.eq.s32.totalorder %s10959_s9, 0 }
   0xe   : > { %s10975_s14 = scalar_select %p32_p1, %s10876_s29, %s34_s12  }
   0xf   : > { %p10977_p5 = por %p42_p2, %p41_p0  ;;  %p10981_p6 = por %p48_p4, %p47_p3 }
  0x10   : > { %p223_p7 = scmp.eq.s32.totalorder %s10959_s9, 7  ;;  %p229_p8 = scmp.eq.s32.totalorder %s9746_s10, 7 }
  0x11   : > { %s15331_s16 = scalar_select %p10981_p6, 1, 0 }
  0x12   : > { %p10416_p9 = scmp.lt.s32.totalorder %s10880_s30, 8  ;;  %p10987_p10 = por %p223_p7, %p41_p0 }
  0x13   : > { %p10991_p11 = por %p229_p8, %p47_p3  ;;  %s10996_s19 = sand.u32 1, %s10876_s29  }
  0x14   : > { %s15332_s17 = scalar_select %p10987_p10, 1, 0 }
  0x15   : > { %s15333_s18 = scalar_select %p10991_p11, 1, 0 }
  0x16   : > { %s15202_s20 = sshll.u32 %s10880_s30, 9  ;;  %s9749_s21 = sshll.u32 %s10996_s19, 5 }
  0x17   : > { %s15334_s0 = sld [smem:[#allocation125_spill]]  ;;  %s271_s25 = scalar_lea.vmem [#allocation2], %s9749_s21 }
  0x18   : > { %s279_s26 = sshll.u32 %s271_s25, 4  ;;  %p11009_p12 = pnand %p10416_p9, %p10977_p5  ;;  %s11013_s26 = int_to_ptr.vmem [resolvable:$true] %s279_s26 }
  0x19   : > { %s268_s13 = scalar_lea.sflag [#allocation3], %s10996_s19 }
  0x1a   : > { %p10752_p0 = pneg %p11009_p12 }
  0x1d   : > { %s11005_s24 = scalar_lea.hbm %s15334_s0, %s15202_s20  ;;  %s10755_s23 = scalar_lea.hbm %s15334_s0, 4096 }
  0x1e   : > { %s10750_s22 = scalar_lea.hbm %s11005_s24, 512  ;;  %p10756_p3 = scmp.lt.u32.totalorder %s11005_s24, %s15334_s0 }
  0x1f   : > { %p10751_p13 = scmp.ne.s32.totalorder %s11005_s24, %s10750_s22  ;;  %p10757_p4 = scmp.lt.u32.totalorder %s10755_s23, %s10750_s22 }
  0x20   : > { %p10759_p7 = scmp.lt.u32.totalorder %s10750_s22, %s11005_s24 }
  0x21   : > { %p10753_p1 = pnand %p10752_p0, %p10751_p13  ;;  %p10758_p5 = por %p10757_p4, %p10756_p3 }
  0x23   : > { %p10754_p2 = pneg %p10753_p1  ;;  %p10760_p8 = por %p10759_p7, %p10758_p5 }
  0x25   : > { %p10761_p9 = pnand %p10760_p8, %p10754_p2 }
  0x27   : > { %10764 = shalt.err (!%p10761_p9)
}
  0x28   : > { %s10765_s12 = scalar_lea.vmem %s11013_s26, 512  ;;  %s10882_s21 = smov [#allocation2]  }
  0x29   : > { %p10766_p13 = scmp.ne.s32.totalorder %s11013_s26, %s10765_s12  ;;  %s10770_s15 = sshll.u32 %s10882_s21, 4  ;;  %s10771_s15 = int_to_ptr.vmem [resolvable:$false] %s10770_s15 }
  0x2a   : > { %s10772_s20 = scalar_lea.vmem %s10771_s15, 1024  ;;  %p10773_p10 = scmp.lt.s32.totalorder %s11013_s26, %s10771_s15 }
  0x2b   : > { %p10768_p1 = pnand %p10766_p13, %p10752_p0  ;;  %p10774_p3 = scmp.lt.s32.totalorder %s10772_s20, %s10765_s12 }
  0x2d   : > { %p10769_p11 = pneg %p10768_p1  ;;  %p10775_p4 = por %p10774_p3, %p10773_p10 }
  0x2f   : > { %p10776_p5 = pnand %p10775_p4, %p10769_p11 }
  0x31   : > { %10779 = shalt.err (!%p10776_p5)
}
  0x32   : > { %10408 = dma.hbm_to_vmem [thread:$0]  (!%p11009_p12), %s11005_s24, 512, %s11013_s26, %s268_s13  }
  0x33   : > { %s15336_s22 = sshll.u32 %s10880_s30, 9  ;;  %p9755_p10 = scmp.ge.s32.totalorder %s10880_s30, 1 }
  0x34   : > { %s11047_s21 = scalar_lea.hbm %s15194_s1, %s15336_s22  ;;  %p305_p11 = scmp.lt.s32.totalorder %s10880_s30, 9 }
  0x35   : > { %s15337_s12 = sshll.u32 %s10996_s19, 6  ;;  %s287_s24 = scalar_lea.sflag [#allocation6], %s10996_s19 }
  0x36   : > { %s290_s15 = scalar_lea.vmem [#allocation5], %s15337_s12  ;;  %p11053_p2 = pnand %p9755_p10, %p305_p11 }
  0x37   : > { %s297_s20 = sshll.u32 %s290_s15, 4  ;;  %s10780_s26 = scalar_lea.hbm %s11047_s21, 1024  ;;  %s11057_s20 = int_to_ptr.vmem [resolvable:$true] %s297_s20 }
  0x38   : > { %p10781_p7 = scmp.ne.s32.totalorder %s11047_s21, %s10780_s26  ;;  %s10785_s23 = scalar_lea.hbm %s15194_s1, 8192 }
  0x39   : > { %p10786_p13 = scmp.lt.u32.totalorder %s11047_s21, %s15194_s1  ;;  %p10787_p1 = scmp.lt.u32.totalorder %s10785_s23, %s10780_s26 }
  0x3a   : > { %p10783_p8 = pnand %p10781_p7, %p10752_p0  ;;  %p10789_p4 = scmp.lt.u32.totalorder %s10780_s26, %s11047_s21 }
  0x3b   : > { %p10788_p3 = por %p10787_p1, %p10786_p13 }
  0x3c   : > { %p10784_p9 = pneg %p10783_p8 }
  0x3d   : > { %p10790_p5 = por %p10789_p4, %p10788_p3 }
  0x3f   : > { %p10791_p10 = pnand %p10790_p5, %p10784_p9 }
  0x41   : > { %10794 = shalt.err (!%p10791_p10)
}
  0x42   : > { %s10795_s15 = scalar_lea.vmem %s11057_s20, 1024  ;;  %s10883_s13 = smov [#allocation5]  }
  0x43   : > { %p10796_p11 = scmp.ne.s32.totalorder %s11057_s20, %s10795_s15  ;;  %s10800_s22 = sshll.u32 %s10883_s13, 4  ;;  %s10801_s22 = int_to_ptr.vmem [resolvable:$false] %s10800_s22 }
  0x44   : > { %s10802_s25 = scalar_lea.vmem %s10801_s22, 2048  ;;  %p10803_p6 = scmp.lt.s32.totalorder %s11057_s20, %s10801_s22 }
  0x45   : > { %p10798_p7 = pnand %p10796_p11, %p10752_p0  ;;  %p10804_p13 = scmp.lt.s32.totalorder %s10802_s25, %s10795_s15 }
  0x47   : > { %p10799_p8 = pneg %p10798_p7  ;;  %p10805_p1 = por %p10804_p13, %p10803_p6 }
  0x49   : > { %p10806_p3 = pnand %p10805_p1, %p10799_p8 }
  0x4b   : > { %10809 = shalt.err (!%p10806_p3)
}
  0x4c   : > { %s10884_s26 = smov 4096   ;;  %s10885_s23 = smov 512  }
  0x4d   : > { %s10886_s12 = smov 32   ;;  %309 = sbr.rel (%p11053_p2) target bundleno = 4717 (0x126d), region = 52 }
  0x4e   : > { %10411 = dma.hbm_to_vmem [thread:$0]  (!%p11009_p12), %s11047_s21, 1024, %s11057_s20, %s287_s24, %s10884_s26, %s10885_s23, %s10886_s12  }
  0x54   : > { %s11088_s13 = sand.u32 1, %s10872_s28   ;;  %p15339_p6 = scmp.ne.s32.totalorder %s15331_s16, 0 }
  0x55   : > { %s9756_s15 = sshll.u32 %s11088_s13, 5  ;;  %s312_s22 = scalar_lea.sflag [#allocation3], %s11088_s13 }
  0x56   : > { %s11092_s25 = scalar_lea.vmem [#allocation2], %s9756_s15 }
  0x57   : > { %10855 = dma.done.wait (%p15339_p6), %s312_s22, 512  }
  0x58   : > { %10857 = vsyncadd (%p15339_p6), %s312_s22, 4294966784  ;;  %s9757_s0 = sshll.u32 %s11088_s13, 6  ;;  %s321_s19 = scalar_lea.sflag [#allocation6], %s11088_s13 }
  0x59   : > { %s11100_s10 = scalar_lea.vmem [#allocation5], %s9757_s0 }
  0x5a   : > { %10859 = dma.done.wait (%p15339_p6), %s321_s19, 1024  }
  0x5b   : > { %10861 = vsyncadd (%p15339_p6), %s321_s19, 4294966272  ;;  %v15205_v0 = vmov 0.0   ;;  %v10888_v1 = vmov 0   ;;  %vm406_vm0 = vcmask 1045504   ;;  %vm381_vm1 = vcmask 48128   ;;  %v373_v6 = vld [vmem:[%s15195_s2] sm:$0xff] }
  0x5c   : > { %483 = vmatprep.mubr.f32.mxu0 %v15205_v0  ;;  %596 = vmatprep.mubr.f32.mxu1 %v15205_v0  ;;  %v366_v2 = vld [vmem:[%s11092_s25 + $0x8] sm:$0x3f]  ;;  %v368_v3 = vld [vmem:[%s11092_s25 + $0x18] sm:$0x3f]  ;;  %v365_v4 = vld [vmem:[%s11092_s25] sm:$0x3f]  ;;  %v700_v33 = vlaneseq }
  0x5d   : > { %10458 = vset.pattern.permute.xlu0 %v10888_v1  ;;  %10459 = vset.pattern.permute.xlu1 %v10888_v1  ;;  %v367_v5 = vld [vmem:[%s11092_s25 + $0x10] sm:$0x3f]  ;;  %v374_v7 = vld [vmem:[%s15195_s2 + $0x8] sm:$0xff]  ;;  %v645_v8 = vld [vmem:[%s15196_s3] sm:$0xff]  ;;  %vm768_vm2 = vcmask 261120   ;;  %vm987_vm3 = vcmask 1042432  }
  0x5e   : > { %9760 = vmatprep.subr.msk.mxu0 %vm406_vm0, %v366_v2  ;;  %9770 = vmatprep.subr.msk.mxu1 %vm406_vm0, %v368_v3  ;;  %v647_v9 = vld [vmem:[%s15196_s3 + $0x10] sm:$0xff]  ;;  %v646_v10 = vld [vmem:[%s15196_s3 + $0x8] sm:$0xff]  ;;  %v648_v11 = vld [vmem:[%s15196_s3 + $0x18] sm:$0xff]  ;;  %v701_v44 = vshrl.u32 %v700_v33, 7  ;;  %vm977_vm4 = vcmask 23552   ;;  %s10398_s23 = smul.u32 96, %s11088_s13 }
  0x5f   : > { %9761 = vmatpush1.msk.msra.mxu0 %vm406_vm0, %v365_v4  ;;  %9771 = vmatpush1.msk.msra.mxu1 %vm406_vm0, %v367_v5  ;;  %v375_v12 = vld [vmem:[%s15195_s2 + $0x10] sm:$0xff]  ;;  %v688_v13 = vld [vmem:[%s15198_s5] sm:$0x7]  ;;  %v9474_v14 = vld [vmem:[%s15199_s6 + $0x8] sm:$0xff]  ;;  %s10141_s15 = sshll.u32 %s10959_s9, 9  ;;  %vm9619_vm5 = vcmask 1044480  }
  0x60   : > { %9762 = vmatmul.mubr.msk.f32.vlgmr.msra.gmra.mrb[0].mxu0 %vm381_vm1, %v373_v6  ;;  %9772 = vmatmul.mubr.msk.f32.vlgmr.msra.gmra.mrb[0].mxu1 %vm381_vm1, %v373_v6  ;;  %v376_v15 = vld [vmem:[%s15195_s2 + $0x18] sm:$0xff]  ;;  %v9475_v16 = vld [vmem:[%s15199_s6 + $0x10] sm:$0x3]  ;;  %v9473_v17 = vld [vmem:[%s15199_s6] sm:$0xff]  ;;  %v11211_v55 = vsub.s32 0, %v701_v44  ;;  %v11213_v58 = vsub.s32 2, %v701_v44  ;;  %s15144_s19 = scalar_lea.hbm %s15201_s8, %s10141_s15 }
  0x61   : > { %489 = vmatprep.mubr.f32.mxu0 %v15205_v0  ;;  %602 = vmatprep.mubr.f32.mxu1 %v15205_v0  ;;  %v377_v18 = vld [vmem:[%s15195_s2 + $0x20] sm:$0xff]  ;;  %v378_v19 = vld [vmem:[%s15195_s2 + $0x28] sm:$0xff]  ;;  %v379_v20 = vld [vmem:[%s15195_s2 + $0x30] sm:$0xff]  ;;  %v11216_v62 = vsub.s32 1, %v701_v44  ;;  %v11218_v63 = vsub.s32 3, %v701_v44  ;;  %s15109_s12 = scalar_lea.vmem [#allocation7], %s10398_s23 }
  0x62   : > { %651 = vperm.xlu0 %10458, %v645_v8   ;;  %661 = vperm.xlu1 %10459, %v647_v9   ;;  %v380_v21 = vld [vmem:[%s15195_s2 + $0x38] sm:$0xff]  ;;  %15340 = vst [vmem:[#allocation11_spill] sm:$0xff] %v11211_v55  ;;  %15341 = vst [vmem:[#allocation12_spill] sm:$0xff] %v11213_v58  ;;  %s9650_s22 = sshll.u32 %s15109_s12, 4  ;;  %s9637_s16 = scalar_lea.sflag [#allocation4], %s11088_s13  ;;  %s15146_s22 = int_to_ptr.vmem [resolvable:$true] %s9650_s22 }
  0x63   : > { %v692_v22 = vld [vmem:[%s11100_s10] ss:$8 sm:$0xf]  ;;  %v9800_v23 = vld [vmem:[%s11100_s10 + $0x1] ss:$8 sm:$0xf] }
  0x64   : > { %9763 = vmatmul.mubr.msk.f32.gmra.mrb[2].mxu0 %vm381_vm1, %v374_v7  ;;  %9773 = vmatmul.mubr.msk.f32.gmra.mrb[2].mxu1 %vm381_vm1, %v374_v7  ;;  %v694_v24 = vmul.f32 0.0625, %v692_v22  ;;  %v1224_v25 = vadd.f32 1.0, %v9800_v23  ;;  %v9821_v26 = vld [vmem:[%s11100_s10 + $0x2] ss:$8 sm:$0xf]  ;;  %15342 = vst [vmem:[#allocation13_spill] sm:$0xff] %v11216_v62 }
  0x65   : > { %495 = vmatprep.mubr.f32.mxu0 %v15205_v0  ;;  %608 = vmatprep.mubr.f32.mxu1 %v15205_v0  ;;  %v9842_v27 = vld [vmem:[%s11100_s10 + $0x3] ss:$8 sm:$0xf]  ;;  %v11197_v28 = vld [vmem:[%s11092_s25 + $0x6] ss:$8 sm:$0xf] }
  0x66   : > { %656 = vperm.xlu0 %10458, %v646_v10   ;;  %666 = vperm.xlu1 %10459, %v648_v11   ;;  %v695_v29 = vsub.f32 1.0, %v694_v24  ;;  %v1225_v30 = vmul.f32 0.0625, %v1224_v25  ;;  %v1749_v31 = vadd.f32 2.0, %v9821_v26  ;;  %v11200_v32 = vld [vmem:[%s11092_s25 + $0x7] ss:$8 sm:$0xf] }
  0x67   : > { %v9863_v34 = vld [vmem:[%s11100_s10 + $0x4] ss:$8 sm:$0xf]  ;;  %v2274_v35 = vadd.f32 3.0, %v9842_v27  ;;  %v697_v43 = vmul.f32 %v11200_v32, %v694_v24  ;;  %15343 = vst [vmem:[#allocation14_spill] sm:$0xff] %v11218_v63  ;;  %s10810_s21 = scalar_lea.vmem %s15146_s22, 1536 }
  0x68   : > { %9764 = vmatmul.mubr.msk.f32.gmra.mrb[4].mxu0 %vm381_vm1, %v375_v12  ;;  %9774 = vmatmul.mubr.msk.f32.gmra.mrb[4].mxu1 %vm381_vm1, %v375_v12  ;;  %v9884_v36 = vld [vmem:[%s11100_s10 + $0x5] ss:$8 sm:$0xf]  ;;  %v9905_v37 = vld [vmem:[%s11100_s10 + $0x6] ss:$8 sm:$0xf]  ;;  %v696_v42 = vmul.f32 %v11197_v28, %v695_v29  ;;  %v1228_v51 = vmul.f32 %v11200_v32, %v1225_v30  ;;  %p10811_p12 = scmp.ne.s32.totalorder %s15146_s22, %s10810_s21 }
  0x69   : > { %501 = vmatprep.mubr.f32.mxu0 %v15205_v0  ;;  %614 = vmatprep.mubr.f32.mxu1 %v15205_v0  ;;  %v1226_v38 = vsub.f32 1.0, %v1225_v30  ;;  %v1750_v39 = vmul.f32 0.0625, %v1749_v31  ;;  %v2799_v40 = vadd.f32 4.0, %v9863_v34  ;;  %v9926_v41 = vld [vmem:[%s11100_s10 + $0x7] ss:$8 sm:$0xf] }
  0x6a   : > { %946 = vperm.xlu0 %10458, %v688_v13   ;;  %9483 = vperm.xlu1 %10459, %v9474_v14   ;;  %v3324_v45 = vadd.f32 5.0, %v9884_v36  ;;  %v2275_v46 = vmul.f32 0.0625, %v2274_v35  ;;  %v3849_v47 = vadd.f32 6.0, %v9905_v37  ;;  %v9947_v48 = vld [vmem:[%s11100_s10 + $0x20] ss:$8 sm:$0xf]  ;;  %v698_v54 = vadd.f32 %v697_v43, %v696_v42 }
  0x6b   : > { %v4374_v49 = vadd.f32 7.0, %v9926_v41  ;;  %v1227_v50 = vmul.f32 %v11197_v28, %v1226_v38  ;;  %v1751_v52 = vsub.f32 1.0, %v1750_v39  ;;  %v2800_v53 = vmul.f32 0.0625, %v2799_v40  ;;  %v9968_v61 = vld [vmem:[%s11100_s10 + $0x21] ss:$8 sm:$0xf] }
  0x6c   : > { %9765 = vmatmul.mubr.msk.f32.gmra.mrb[6].mxu0 %vm381_vm1, %v376_v15  ;;  %9775 = vmatmul.mubr.msk.f32.gmra.mrb[6].mxu1 %vm381_vm1, %v376_v15  ;;  %v3325_v56 = vmul.f32 0.0625, %v3324_v45  ;;  %v4899_v57 = vadd.f32 8.0, %v9947_v48  ;;  %v2276_v59 = vsub.f32 1.0, %v2275_v46  ;;  %v3850_v60 = vmul.f32 0.0625, %v3849_v47  ;;  %p15748_p0 = scmp.ne.s32.totalorder %s15332_s17, 0  ;;  %s10889_s20 = smov [#allocation7]  }
  0x6d   : > { %507 = vmatprep.mubr.f32.mxu0 %v15205_v0  ;;  %620 = vmatprep.mubr.f32.mxu1 %v15205_v0  ;;  %v4375_v1 = vmul.f32 0.0625, %v4374_v49  ;;  %v5424_v2 = vadd.f32 9.0, %v9968_v61  ;;  %v1229_v3 = vadd.f32 %v1228_v51, %v1227_v50  ;;  %v1752_v4 = vmul.f32 %v11197_v28, %v1751_v52  ;;  %s10814_s24 = sshll.u32 %s10889_s20, 4  ;;  %s10815_s24 = int_to_ptr.vmem [resolvable:$false] %s10814_s24 }
  0x6e   : > { %9488 = vperm.xlu0 %10458, %v9475_v16   ;;  %9478 = vperm.xlu1 %10459, %v9473_v17   ;;  %v1753_v5 = vmul.f32 %v11200_v32, %v1750_v39  ;;  %v2801_v6 = vsub.f32 1.0, %v2800_v53  ;;  %v11223_v7 = vrot.slane %v698_v54, %v11211_v55  ;;  %v3326_v8 = vsub.f32 1.0, %v3325_v56  ;;  %p10812_p2 = pnand %p10811_p12, %p15748_p0  ;;  %s10816_s26 = scalar_lea.vmem %s10815_s24, 3072 }
  0x6f   : > { %v4900_v9 = vmul.f32 0.0625, %v4899_v57  ;;  %v11226_v10 = vrot.slane %v698_v54, %v11213_v58  ;;  %v2277_v11 = vmul.f32 %v11197_v28, %v2276_v59  ;;  %v2278_v12 = vmul.f32 %v11200_v32, %v2275_v46  ;;  %p10817_p4 = scmp.lt.s32.totalorder %s15146_s22, %s10815_s24  ;;  %p10818_p5 = scmp.lt.s32.totalorder %s10816_s26, %s10810_s21 }
  0x70   : > { %9766 = vmatmul.mubr.msk.f32.gmra.mrb[8].mxu0 %vm381_vm1, %v377_v18  ;;  %9776 = vmatmul.mubr.msk.f32.gmra.mrb[8].mxu1 %vm381_vm1, %v377_v18  ;;  %v3851_v13 = vsub.f32 1.0, %v3850_v60  ;;  %v11231_v14 = vrot.slane %v698_v54, %v11216_v62  ;;  %v11234_v15 = vrot.slane %v698_v54, %v11218_v63  ;;  %v4376_v16 = vsub.f32 1.0, %v4375_v1  ;;  %p10813_p9 = pneg %p10812_p2 }
  0x71   : > { %513 = vmatprep.mubr.f32.mxu0 %v15205_v0  ;;  %626 = vmatprep.mubr.f32.mxu1 %v15205_v0  ;;  %v5425_v17 = vmul.f32 0.0625, %v5424_v2  ;;  %v11237_v18 = vrot.slane %v1229_v3, %v11216_v62  ;;  %v11242_v22 = vrot.slane %v1229_v3, %v11218_v63  ;;  %v3327_v23 = vmul.f32 %v11197_v28, %v3326_v8  ;;  %p10819_p10 = por %p10818_p5, %p10817_p4 }
  0x72   : > { %v3328_v24 = vmul.f32 %v11200_v32, %v3325_v56  ;;  %v4901_v25 = vsub.f32 1.0, %v4900_v9  ;;  %v11249_v27 = vrot.slane %v1229_v3, %v11211_v55  ;;  %v2279_v29 = vadd.f32 %v2278_v12, %v2277_v11 }
  0x73   : > { %v3852_v30 = vmul.f32 %v11197_v28, %v3851_v13  ;;  %v3853_v31 = vmul.f32 %v11200_v32, %v3850_v60  ;;  %v11254_v35 = vrot.slane %v1229_v3, %v11213_v58  ;;  %v4377_v36 = vmul.f32 %v11197_v28, %v4376_v16  ;;  %v9989_v13 = vld [vmem:[%s11100_s10 + $0x22] ss:$8 sm:$0xf]  ;;  %p10820_p11 = pnand %p10819_p10, %p10813_p9 }
  0x74   : > { %9767 = vmatmul.mubr.msk.f32.gmra.mrb[10].mxu0 %vm381_vm1, %v378_v19  ;;  %9777 = vmatmul.mubr.msk.f32.gmra.mrb[10].mxu1 %vm381_vm1, %v378_v19  ;;  %v1754_v19 = vadd.f32 %v1753_v5, %v1752_v4  ;;  %v4378_v37 = vmul.f32 %v11200_v32, %v4375_v1  ;;  %v5426_v38 = vsub.f32 1.0, %v5425_v17  ;;  %v3329_v46 = vadd.f32 %v3328_v24, %v3327_v23 }
  0x75   : > { %519 = vmatprep.mubr.f32.mxu0 %v15205_v0  ;;  %632 = vmatprep.mubr.f32.mxu1 %v15205_v0  ;;  %v4902_v47 = vmul.f32 %v11197_v28, %v4901_v25  ;;  %v4903_v48 = vmul.f32 %v11200_v32, %v4900_v9  ;;  %v11275_v50 = vrot.slane %v2279_v29, %v11216_v62 }
  0x76   : > { %v11259_v41 = vrot.slane %v1754_v19, %v11216_v62  ;;  %v11262_v42 = vrot.slane %v1754_v19, %v11218_v63  ;;  %v11265_v43 = vrot.slane %v1754_v19, %v11211_v55  ;;  %v11268_v45 = vrot.slane %v1754_v19, %v11213_v58 }
  0x77   : > { %15346 = vst [vmem:[#allocation17_spill] sm:$0xff] %v11275_v50  ;;  %v11278_v51 = vrot.slane %v2279_v29, %v11218_v63  ;;  %v11281_v52 = vrot.slane %v2279_v29, %v11211_v55  ;;  %v11284_v57 = vrot.slane %v2279_v29, %v11213_v58  ;;  %v4379_v59 = vadd.f32 %v4378_v37, %v4377_v36 }
  0x78   : > { %9768 = vmatmul.mubr.msk.f32.gmra.mrb[12].mxu0 %vm381_vm1, %v379_v20  ;;  %9778 = vmatmul.mubr.msk.f32.gmra.mrb[12].mxu1 %vm381_vm1, %v379_v20  ;;  %v2802_v20 = vmul.f32 %v11197_v28, %v2801_v6  ;;  %15344 = vst [vmem:[#allocation15_spill] sm:$0xff] %v11265_v43  ;;  %15345 = vst [vmem:[#allocation16_spill] sm:$0xff] %v11268_v45  ;;  %v5427_v60 = vmul.f32 %v11197_v28, %v5426_v38 }
  0x79   : > { %525 = vmatprep.mubr.f32.mxu0 %v15205_v0  ;;  %638 = vmatprep.mubr.f32.mxu1 %v15205_v0  ;;  %15347 = vst [vmem:[#allocation18_spill] sm:$0xff] %v11278_v51  ;;  %15348 = vst [vmem:[#allocation19_spill] sm:$0xff] %v11281_v52  ;;  %v5428_v61 = vmul.f32 %v11200_v32, %v5425_v17  ;;  %v11301_v8 = vrot.slane %v3329_v46, %v11216_v62 }
  0x7a   : > { %15349 = vst [vmem:[#allocation20_spill] sm:$0xff] %v11284_v57  ;;  %v11304_v9 = vrot.slane %v3329_v46, %v11218_v63  ;;  %v11307_v11 = vrot.slane %v3329_v46, %v11211_v55  ;;  %v4904_v12 = vadd.f32 %v4903_v48, %v4902_v47  ;;  %v11311_v17 = vrot.slane %v3329_v46, %v11213_v58 }
  0x7b   : > { %15354 = vst [vmem:[#allocation25_spill] sm:$0xff] %v11301_v8  ;;  %v11329_v38 = vrot.slane %v4379_v59, %v11218_v63  ;;  %v11335_v46 = vrot.slane %v4379_v59, %v11213_v58 }
  0x7c   : > { %9769 = vmatmul.mubr.msk.f32.gmra.mrb[14].mxu0 %vm381_vm1, %v380_v21  ;;  %9779 = vmatmul.mubr.msk.f32.gmra.mrb[14].mxu1 %vm381_vm1, %v380_v21  ;;  %v2803_v21 = vmul.f32 %v11200_v32, %v2800_v53  ;;  %v3854_v53 = vadd.f32 %v3853_v31, %v3852_v30  ;;  %15355 = vst [vmem:[#allocation26_spill] sm:$0xff] %v11304_v9  ;;  %15356 = vst [vmem:[#allocation27_spill] sm:$0xff] %v11307_v11 }
  0x7d   : > { %842 = vmatprep.mubr.f32.mxu0 %v15205_v0  ;;  %925 = vmatprep.mubr.f32.mxu1 %v15205_v0  ;;  %15357 = vst [vmem:[#allocation28_spill] sm:$0xff] %v11311_v17  ;;  %v11326_v30 = vrot.slane %v4379_v59, %v11216_v62  ;;  %v5429_v31 = vadd.f32 %v5428_v61, %v5427_v60  ;;  %15363 = vst [vmem:[#allocation34_spill] sm:$0xff] %v11329_v38 }
  0x7e   : > { %v2804_v44 = vadd.f32 %v2803_v21, %v2802_v20  ;;  %v11314_v19 = vrot.slane %v3854_v53, %v11216_v62  ;;  %v11317_v20 = vrot.slane %v3854_v53, %v11218_v63  ;;  %v5949_v21 = vadd.f32 10.0, %v9989_v13  ;;  %15365 = vst [vmem:[#allocation36_spill] sm:$0xff] %v11335_v46 }
  0x7f   : > { %v11320_v25 = vrot.slane %v3854_v53, %v11211_v55  ;;  %v11323_v29 = vrot.slane %v3854_v53, %v11213_v58  ;;  %15362 = vst [vmem:[#allocation33_spill] sm:$0xff] %v11326_v30  ;;  %v11341_v53 = vrot.slane %v4904_v12, %v11216_v62  ;;  %v11344_v60 = vrot.slane %v4904_v12, %v11218_v63 }
  0x80   : > { %v11289_v3 = vrot.slane %v2804_v44, %v11216_v62  ;;  %v11292_v4 = vrot.slane %v2804_v44, %v11218_v63  ;;  %v11295_v5 = vrot.slane %v2804_v44, %v11211_v55  ;;  %v11298_v6 = vrot.slane %v2804_v44, %v11213_v58  ;;  %15358 = vst [vmem:[#allocation29_spill] sm:$0xff] %v11314_v19 }
  0x81   : > { %15359 = vst [vmem:[#allocation30_spill] sm:$0xff] %v11317_v20  ;;  %15360 = vst [vmem:[#allocation31_spill] sm:$0xff] %v11320_v25  ;;  %v11332_v44 = vrot.slane %v4379_v59, %v11211_v55  ;;  %v5950_v47 = vmul.f32 0.0625, %v5949_v21  ;;  %v11347_v61 = vrot.slane %v4904_v12, %v11211_v55  ;;  %v11356_v21 = vrot.slane %v4904_v12, %v11213_v58 }
  0x82   : > { %15350 = vst [vmem:[#allocation21_spill] sm:$0xff] %v11289_v3  ;;  %15351 = vst [vmem:[#allocation22_spill] sm:$0xff] %v11292_v4 }
  0x83   : > { %15352 = vst [vmem:[#allocation23_spill] sm:$0xff] %v11295_v5  ;;  %15353 = vst [vmem:[#allocation24_spill] sm:$0xff] %v11298_v6 }
  0x84   : > { %15361 = vst [vmem:[#allocation32_spill] sm:$0xff] %v11323_v29  ;;  %15364 = vst [vmem:[#allocation35_spill] sm:$0xff] %v11332_v44 }
  0x85   : > { %15367 = vst [vmem:[#allocation38_spill] sm:$0xff] %v11341_v53  ;;  %15368 = vst [vmem:[#allocation39_spill] sm:$0xff] %v11344_v60 }
  0x86   : > { %15369 = vst [vmem:[#allocation40_spill] sm:$0xff] %v11347_v61  ;;  %15372 = vst [vmem:[#allocation43_spill] sm:$0xff] %v11356_v21 }
  0xe1   : > { %v11246_v26 = vpop.permute.xlu0 %651  ;;  %v11272_v49 = vpop.permute.xlu1 %661 }
  0xe5   : > { %v657_v16 = vpop.permute.xlu0 %656  ;;  %v667_v59 = vpop.permute.xlu1 %666 }
 0x133   : > { %v485_v33 = vpop.f32.mrb[0].mxu0  ;;  %v598_v34 = vpop.f32.mrb[0].mxu1 }
 0x134   : > { %v487_v39 = vpop.f32.mrb[1].mxu0  ;;  %v600_v40 = vpop.f32.mrb[1].mxu1  ;;  %v11338_v48 = vadd.f32 %v11246_v26, %v485_v33  ;;  %v11350_v13 = vadd.f32 %v11246_v26, %v598_v34  ;;  %v5951_v33 = vsub.f32 1.0, %v5950_v47  ;;  %v11366_v34 = vrot.slane %v5429_v31, %v11216_v62 }
 0x135   : > { %v11353_v0 = vadd.f32 %v11246_v26, %v487_v39  ;;  %v11359_v46 = vadd.f32 %v11246_v26, %v600_v40  ;;  %v5953_v26 = vmul.f32 %v11200_v32, %v5950_v47  ;;  %v11394_v32 = vrot.slane %v5429_v31, %v11211_v55 }
 0x136   : > { %15366 = vst [vmem:[#allocation37_spill] sm:$0xff] %v11338_v48  ;;  %15370 = vst [vmem:[#allocation41_spill] sm:$0xff] %v11350_v13  ;;  %v5952_v21 = vmul.f32 %v11197_v28, %v5951_v33  ;;  %v11391_v28 = vrot.slane %v5429_v31, %v11218_v63 }
 0x137   : > { %v491_v54 = vpop.f32.mrb[2].mxu0  ;;  %v604_v56 = vpop.f32.mrb[2].mxu1  ;;  %15371 = vst [vmem:[#allocation42_spill] sm:$0xff] %v11353_v0  ;;  %15373 = vst [vmem:[#allocation44_spill] sm:$0xff] %v11359_v46 }
 0x138   : > { %v493_v1 = vpop.f32.mrb[3].mxu0  ;;  %v606_v2 = vpop.f32.mrb[3].mxu1  ;;  %v11361_v53 = vadd.f32 %v657_v16, %v491_v54  ;;  %v11363_v60 = vadd.f32 %v657_v16, %v604_v56  ;;  %15374 = vst [vmem:[#allocation45_spill] sm:$0xff] %v11366_v34  ;;  %15376 = vst [vmem:[#allocation47_spill] sm:$0xff] %v11391_v28 }
 0x139   : > { %v11368_v38 = vadd.f32 %v657_v16, %v493_v1  ;;  %v11370_v39 = vadd.f32 %v657_v16, %v606_v2  ;;  %15377 = vst [vmem:[#allocation48_spill] sm:$0xff] %v11394_v32 }
 0x13b   : > { %v497_v23 = vpop.f32.mrb[4].mxu0  ;;  %v610_v24 = vpop.f32.mrb[4].mxu1  ;;  %15375 = vst [vmem:[#allocation46_spill] sm:$0xff] %v11368_v38 }
 0x13c   : > { %v499_v36 = vpop.f32.mrb[5].mxu0  ;;  %v612_v37 = vpop.f32.mrb[5].mxu1  ;;  %v11375_v40 = vadd.f32 %v11272_v49, %v497_v23  ;;  %v11378_v54 = vadd.f32 %v11272_v49, %v610_v24 }
 0x13d   : > { %v11381_v56 = vadd.f32 %v11272_v49, %v499_v36  ;;  %v11384_v1 = vadd.f32 %v11272_v49, %v612_v37  ;;  %v11405_v49 = vrot.slane %v5429_v31, %v11213_v58  ;;  %v11407_v37 = vadd.f32 %v5953_v26, %v5952_v21 }
 0x13f   : > { %v503_v44 = vpop.f32.mrb[6].mxu0  ;;  %v616_v61 = vpop.f32.mrb[6].mxu1  ;;  %15379 = vst [vmem:[#allocation50_spill] sm:$0xff] %v11405_v49  ;;  %15380 = vst [vmem:[#allocation51_spill] sm:$0xff] %v11407_v37 }
 0x140   : > { %v505_v30 = vpop.f32.mrb[7].mxu0  ;;  %v618_v12 = vpop.f32.mrb[7].mxu1  ;;  %v11386_v2 = vadd.f32 %v667_v59, %v503_v44  ;;  %v11388_v16 = vadd.f32 %v667_v59, %v616_v61 }
 0x141   : > { %v11396_v23 = vadd.f32 %v667_v59, %v505_v30  ;;  %v11398_v24 = vadd.f32 %v667_v59, %v618_v12 }
 0x143   : > { %v11400_v47 = vpop.f32.mrb[8].mxu0  ;;  %v11402_v36 = vpop.f32.mrb[8].mxu1 }
 0x144   : > { %15378 = vst [vmem:[#allocation49_spill] sm:$0xff] %v11402_v36  ;;  %v11409_v44 = vpop.f32.mrb[9].mxu0  ;;  %v11411_v61 = vpop.f32.mrb[9].mxu1  ;;  %v720_v33 = vmul.f32 %v11223_v7, %v11400_v47  ;;  %v722_v30 = vmul.f32 %v11226_v10, %v11402_v36  ;;  %v1251_v59 = vmul.f32 %v11249_v27, %v11400_v47  ;;  %v1253_v12 = vmul.f32 %v11254_v35, %v11402_v36 }
 0x145   : > { %v721_v31 = vmul.f32 %v11231_v14, %v11409_v44  ;;  %v723_v21 = vmul.f32 %v11234_v15, %v11411_v61  ;;  %v1252_v26 = vmul.f32 %v11237_v18, %v11409_v44  ;;  %v1254_v58 = vmul.f32 %v11242_v22, %v11411_v61 }
 0x146   : > { %v736_v55 = vadd.f32 %v720_v33, %v11338_v48  ;;  %v738_v63 = vadd.f32 %v722_v30, %v11350_v13  ;;  %v11432_v37 = vadd.f32 %v1251_v59, %v11338_v48  ;;  %v11435_v62 = vadd.f32 %v1253_v12, %v11350_v13 }
 0x147   : > { %v11437_v49 = vpop.f32.mrb[10].mxu0  ;;  %v11439_v32 = vpop.f32.mrb[10].mxu1  ;;  %v737_v28 = vadd.f32 %v721_v31, %v11353_v0  ;;  %v739_v34 = vadd.f32 %v723_v21, %v11359_v46  ;;  %v11444_v29 = vadd.f32 %v1252_v26, %v11353_v0  ;;  %v11447_v33 = vadd.f32 %v1254_v58, %v11359_v46 }
 0x148   : > { %15381 = vst [vmem:[#allocation52_spill] sm:$0xff] %v11437_v49  ;;  %15382 = vst [vmem:[#allocation53_spill] sm:$0xff] %v11439_v32  ;;  %v11449_v30 = vpop.f32.mrb[11].mxu0  ;;  %v11451_v59 = vpop.f32.mrb[11].mxu1  ;;  %v724_v12 = vmul.f32 %v11223_v7, %v11437_v49  ;;  %v752_v25 = vmax.f32 %v736_v55, 0.0  ;;  %v726_v20 = vmul.f32 %v11226_v10, %v11439_v32  ;;  %v754_v31 = vmax.f32 %v738_v63, 0.0 }
 0x149   : > { %v725_v21 = vmul.f32 %v11231_v14, %v11449_v30  ;;  %v753_v26 = vmax.f32 %v737_v28, 0.0  ;;  %v727_v58 = vmul.f32 %v11234_v15, %v11451_v59  ;;  %v755_v19 = vmax.f32 %v739_v34, 0.0 }
 0x14a   : > { %v740_v17 = vadd.f32 %v724_v12, %v11361_v53  ;;  %v742_v11 = vadd.f32 %v726_v20, %v11363_v60  ;;  %v1256_v9 = vmul.f32 %v11237_v18, %v11449_v30  ;;  %v1284_v55 = vmax.f32 %v11444_v29, 0.0 }
 0x14b   : > { %v11466_v8 = vpop.f32.mrb[12].mxu0  ;;  %v11468_v63 = vpop.f32.mrb[12].mxu1  ;;  %v741_v6 = vadd.f32 %v725_v21, %v11368_v38  ;;  %v743_v28 = vadd.f32 %v727_v58, %v11370_v39  ;;  %v1258_v34 = vmul.f32 %v11242_v22, %v11451_v59  ;;  %v1286_v12 = vmax.f32 %v11447_v33, 0.0 }
 0x14c   : > { %v11475_v5 = vpop.f32.mrb[13].mxu0  ;;  %v11477_v20 = vpop.f32.mrb[13].mxu1  ;;  %v756_v4 = vmax.f32 %v740_v17, 0.0  ;;  %v758_v3 = vmax.f32 %v742_v11, 0.0  ;;  %v728_v29 = vmul.f32 %v11223_v7, %v11466_v8  ;;  %v730_v57 = vmul.f32 %v11226_v10, %v11468_v63 }
 0x14d   : > { %v757_v21 = vmax.f32 %v741_v6, 0.0  ;;  %v759_v52 = vmax.f32 %v743_v28, 0.0  ;;  %v729_v58 = vmul.f32 %v11231_v14, %v11475_v5  ;;  %v731_v33 = vmul.f32 %v11234_v15, %v11477_v20 }
 0x14e   : > { %v10144_v51 = vpack.c.bf16 %v756_v4, %v752_v25  ;;  %v10152_v50 = vpack.c.bf16 %v758_v3, %v754_v31  ;;  %v744_v13 = vadd.f32 %v728_v29, %v11375_v40  ;;  %v746_v11 = vadd.f32 %v730_v57, %v11378_v54 }
 0x14f   : > { %v11489_v17 = vpop.f32.mrb[14].mxu0  ;;  %v11491_v45 = vpop.f32.mrb[14].mxu1  ;;  %v10142_v36 = vpack.c.bf16 %v757_v21, %v753_v26  ;;  %v10150_v48 = vpack.c.bf16 %v759_v52, %v755_v19  ;;  %v745_v6 = vadd.f32 %v729_v58, %v11381_v56  ;;  %v747_v28 = vadd.f32 %v731_v33, %v11384_v1 }
 0x150   : > { %v11495_v46 = vpop.f32.mrb[15].mxu0  ;;  %v11497_v43 = vpop.f32.mrb[15].mxu1  ;;  %v732_v3 = vmul.f32 %v11223_v7, %v11489_v17  ;;  %v760_v4 = vmax.f32 %v744_v13, 0.0  ;;  %v734_v57 = vmul.f32 %v11226_v10, %v11491_v45  ;;  %v762_v25 = vmax.f32 %v746_v11, 0.0 }
 0x151   : > { %10143 = vmatprep.subr.bf16.mxu0 %v10142_v36  ;;  %10151 = vmatprep.subr.bf16.mxu1 %v10150_v48  ;;  %v733_v52 = vmul.f32 %v11231_v14, %v11495_v46  ;;  %v761_v19 = vmax.f32 %v745_v6, 0.0  ;;  %v735_v31 = vmul.f32 %v11234_v15, %v11497_v43  ;;  %v763_v26 = vmax.f32 %v747_v28, 0.0 }
 0x152   : > { %10145 = vmatpush1.bf16.msra.mxu0 %v10144_v51  ;;  %10153 = vmatpush1.bf16.msra.mxu1 %v10152_v50  ;;  %v748_v29 = vadd.f32 %v732_v3, %v11386_v2  ;;  %v750_v7 = vadd.f32 %v734_v57, %v11388_v16  ;;  %v1272_v13 = vadd.f32 %v1256_v9, %v11368_v38  ;;  %v1283_v10 = vmax.f32 %v11432_v37, 0.0 }
 0x153   : > { %v749_v48 = vadd.f32 %v733_v52, %v11396_v23  ;;  %v751_v36 = vadd.f32 %v735_v31, %v11398_v24  ;;  %v1274_v14 = vadd.f32 %v1258_v34, %v11370_v39  ;;  %v1255_v15 = vmul.f32 %v11249_v27, %v11437_v49 }
 0x154   : > { %v764_v21 = vmax.f32 %v748_v29, 0.0  ;;  %v766_v51 = vmax.f32 %v750_v7, 0.0  ;;  %v1288_v50 = vmax.f32 %v1272_v13, 0.0  ;;  %v1257_v58 = vmul.f32 %v11254_v35, %v11439_v32 }
 0x155   : > { %v765_v33 = vmax.f32 %v749_v48, 0.0  ;;  %v767_v11 = vmax.f32 %v751_v36, 0.0  ;;  %v1290_v9 = vmax.f32 %v1274_v14, 0.0  ;;  %v1271_v37 = vadd.f32 %v1255_v15, %v11361_v53 }
 0x156   : > { %v10148_v6 = vpack.c.bf16 %v764_v21, %v760_v4  ;;  %v10156_v28 = vpack.c.bf16 %v766_v51, %v762_v25  ;;  %v11519_v3 = vpack.c.bf16 %v1288_v50, %v1284_v55  ;;  %v1273_v34 = vadd.f32 %v1257_v58, %v11363_v60 }
 0x157   : > { %v10146_v57 = vpack.c.bf16 %v765_v33, %v761_v19  ;;  %v10154_v52 = vpack.c.bf16 %v767_v11, %v763_v26  ;;  %v11522_v31 = vpack.c.bf16 %v1290_v9, %v1286_v12  ;;  %v1287_v29 = vmax.f32 %v1271_v37, 0.0 }
 0x158   : > { %15383 = vst [vmem:[#allocation54_spill] sm:$0xff] %v11519_v3  ;;  %v1285_v7 = vmax.f32 %v11435_v62, 0.0  ;;  %v1289_v13 = vmax.f32 %v1273_v34, 0.0  ;;  %v1260_v48 = vmul.f32 %v11237_v18, %v11475_v5  ;;  %v1264_v36 = vmul.f32 %v11237_v18, %v11495_v46  ;;  %v685_v62 = vld [vmem:[%s15197_s4] sm:$0xff] }
 0x159   : > { %15384 = vst [vmem:[#allocation55_spill] sm:$0xff] %v11522_v31  ;;  %10147 = vmatprep.subr.bf16.mxu0 %v10146_v57  ;;  %10155 = vmatprep.subr.bf16.mxu1 %v10154_v52  ;;  %v11529_v55 = vpack.c.bf16 %v1287_v29, %v1283_v10  ;;  %v1262_v4 = vmul.f32 %v11242_v22, %v11477_v20  ;;  %v15387_v37 = vmov 0.0  }
 0x15a   : > { %v1266_v12 = vmul.f32 %v11242_v22, %v11497_v43  ;;  %10149 = vmatpush1.bf16.msra.mxu0 %v10148_v6  ;;  %10157 = vmatpush1.bf16.msra.mxu1 %v10156_v28  ;;  %v11538_v25 = vpack.c.bf16 %v1289_v13, %v1285_v7  ;;  %v1276_v18 = vadd.f32 %v1260_v48, %v11381_v56 }
 0x15b   : > { %15385 = vst [vmem:[#allocation56_spill] sm:$0xff] %v11529_v55  ;;  %v1280_v19 = vadd.f32 %v1264_v36, %v11396_v23  ;;  %v1278_v26 = vadd.f32 %v1262_v4, %v11384_v1  ;;  %v1259_v22 = vmul.f32 %v11249_v27, %v11466_v8  ;;  %v1263_v14 = vmul.f32 %v11249_v27, %v11489_v17 }
 0x15c   : > { %15386 = vst [vmem:[#allocation57_spill] sm:$0xff] %v11538_v25  ;;  %v1282_v10 = vadd.f32 %v1266_v12, %v11398_v24  ;;  %v1292_v15 = vmax.f32 %v1276_v18, 0.0  ;;  %v1261_v51 = vmul.f32 %v11254_v35, %v11468_v63  ;;  %v1265_v50 = vmul.f32 %v11254_v35, %v11491_v45 }
 0x15d   : > { %v1296_v21 = vmax.f32 %v1280_v19, 0.0  ;;  %9780 = vmatmul.mubr.msk.f32.vlgmr.msra.gmra.mrb[16].mxu0 %vm768_vm2, %v685_v62  ;;  %9783 = vmatmul.mubr.msk.f32.vlgmr.msra.gmra.mrb[16].mxu1 %vm768_vm2, %v685_v62  ;;  %v1294_v58 = vmax.f32 %v1278_v26, 0.0  ;;  %v1275_v11 = vadd.f32 %v1259_v22, %v11375_v40  ;;  %v1279_v9 = vadd.f32 %v1263_v14, %v11386_v2  ;;  %v15391_v62 = vld [vmem:[#allocation15_spill] sm:$0xff] }
 0x15e   : > { %v1298_v33 = vmax.f32 %v1282_v10, 0.0  ;;  %848 = vmatprep.mubr.f32.mxu0 %v15387_v37  ;;  %931 = vmatprep.mubr.f32.mxu1 %v15387_v37  ;;  %v1277_v6 = vadd.f32 %v1261_v51, %v11378_v54  ;;  %v1281_v35 = vadd.f32 %v1265_v50, %v11388_v16  ;;  %v1777_v52 = vmul.f32 %v11259_v41, %v11409_v44  ;;  %v15393_v10 = vld [vmem:[#allocation44_spill] sm:$0xff]  ;;  %v15394_v51 = vld [vmem:[#allocation37_spill] sm:$0xff] }
 0x15f   : > { %v11558_v27 = vpack.c.bf16 %v1296_v21, %v1292_v15  ;;  %v1291_v34 = vmax.f32 %v1275_v11, 0.0  ;;  %v1295_v57 = vmax.f32 %v1279_v9, 0.0  ;;  %v1781_v13 = vmul.f32 %v11259_v41, %v11449_v30 }
 0x160   : > { %v11562_v28 = vpack.c.bf16 %v1298_v33, %v1294_v58  ;;  %v1293_v29 = vmax.f32 %v1277_v6, 0.0  ;;  %v1297_v7 = vmax.f32 %v1281_v35, 0.0  ;;  %v1779_v48 = vmul.f32 %v11262_v42, %v11411_v61  ;;  %v15395_v58 = vld [vmem:[#allocation49_spill] sm:$0xff]  ;;  %v15396_v33 = vld [vmem:[#allocation16_spill] sm:$0xff] }
 0x161   : > { %15388 = vst [vmem:[#allocation58_spill] sm:$0xff] %v11558_v27  ;;  %v11570_v36 = vpack.c.bf16 %v1295_v57, %v1291_v34  ;;  %v1793_v4 = vadd.f32 %v1777_v52, %v11353_v0  ;;  %v1783_v12 = vmul.f32 %v11262_v42, %v11451_v59  ;;  %v1776_v18 = vmul.f32 %v15391_v62, %v11400_v47 }
 0x162   : > { %15389 = vst [vmem:[#allocation59_spill] sm:$0xff] %v11562_v28  ;;  %v11577_v19 = vpack.c.bf16 %v1297_v7, %v1293_v29  ;;  %v1797_v26 = vadd.f32 %v1781_v13, %v11368_v38  ;;  %v1795_v22 = vadd.f32 %v1779_v48, %v15393_v10  ;;  %v1780_v14 = vmul.f32 %v15391_v62, %v11437_v49  ;;  %v15397_v29 = vld [vmem:[#allocation41_spill] sm:$0xff] }
 0x163   : > { %15390 = vst [vmem:[#allocation60_spill] sm:$0xff] %v11570_v36  ;;  %v1809_v15 = vmax.f32 %v1793_v4, 0.0  ;;  %v1799_v21 = vadd.f32 %v1783_v12, %v11370_v39  ;;  %v1792_v50 = vadd.f32 %v1776_v18, %v15394_v51  ;;  %v1778_v11 = vmul.f32 %v15396_v33, %v15395_v58 }
 0x164   : > { %15392 = vst [vmem:[#allocation15_spill] sm:$0xff] %v11577_v19  ;;  %v1813_v9 = vmax.f32 %v1797_v26, 0.0  ;;  %v1811_v6 = vmax.f32 %v1795_v22, 0.0  ;;  %v1796_v35 = vadd.f32 %v1780_v14, %v11361_v53  ;;  %v1782_v34 = vmul.f32 %v15396_v33, %v11439_v32 }
 0x165   : > { %v1815_v57 = vmax.f32 %v1799_v21, 0.0  ;;  %v1808_v52 = vmax.f32 %v1792_v50, 0.0  ;;  %v1794_v7 = vadd.f32 %v1778_v11, %v15397_v29  ;;  %v1785_v13 = vmul.f32 %v11259_v41, %v11475_v5 }
 0x166   : > { %v11593_v48 = vpack.c.bf16 %v1813_v9, %v1809_v15  ;;  %v1812_v4 = vmax.f32 %v1796_v35, 0.0  ;;  %v1798_v12 = vadd.f32 %v1782_v34, %v11363_v60  ;;  %v1789_v18 = vmul.f32 %v11259_v41, %v11495_v46 }
 0x167   : > { %v11598_v26 = vpack.c.bf16 %v1815_v57, %v1811_v6  ;;  %v1810_v22 = vmax.f32 %v1794_v7, 0.0  ;;  %v1801_v14 = vadd.f32 %v1785_v13, %v11381_v56  ;;  %v1787_v21 = vmul.f32 %v11262_v42, %v11477_v20 }
 0x168   : > { %15398 = vst [vmem:[#allocation44_spill] sm:$0xff] %v11593_v48  ;;  %v11603_v50 = vpack.c.bf16 %v1812_v4, %v1808_v52  ;;  %v1814_v11 = vmax.f32 %v1798_v12, 0.0  ;;  %v1805_v15 = vadd.f32 %v1789_v18, %v11396_v23  ;;  %v1791_v9 = vmul.f32 %v11262_v42, %v11497_v43 }
 0x169   : > { %15399 = vst [vmem:[#allocation37_spill] sm:$0xff] %v11598_v26  ;;  %v1817_v35 = vmax.f32 %v1801_v14, 0.0  ;;  %v1803_v34 = vadd.f32 %v1787_v21, %v11384_v1  ;;  %v1784_v41 = vmul.f32 %v15391_v62, %v11466_v8  ;;  %v1788_v6 = vmul.f32 %v15391_v62, %v11489_v17 }
 0x16a   : > { %15400 = vst [vmem:[#allocation16_spill] sm:$0xff] %v11603_v50  ;;  %v11613_v57 = vpack.c.bf16 %v1814_v11, %v1810_v22  ;;  %v1821_v7 = vmax.f32 %v1805_v15, 0.0  ;;  %v1807_v52 = vadd.f32 %v1791_v9, %v11398_v24  ;;  %v1786_v13 = vmul.f32 %v15396_v33, %v11468_v63  ;;  %v15403_v22 = vld [vmem:[#allocation17_spill] sm:$0xff] }
 0x16b   : > { %v1819_v4 = vmax.f32 %v1803_v34, 0.0  ;;  %v1800_v42 = vadd.f32 %v1784_v41, %v11375_v40  ;;  %v1804_v12 = vadd.f32 %v1788_v6, %v11386_v2  ;;  %v1790_v18 = vmul.f32 %v15396_v33, %v11491_v45 }
 0x16c   : > { %15401 = vst [vmem:[#allocation41_spill] sm:$0xff] %v11613_v57  ;;  %v11622_v14 = vpack.c.bf16 %v1821_v7, %v1817_v35  ;;  %v1823_v21 = vmax.f32 %v1807_v52, 0.0  ;;  %v1802_v62 = vadd.f32 %v1786_v13, %v11378_v54  ;;  %v2302_v11 = vmul.f32 %v15403_v22, %v11409_v44  ;;  %v15405_v35 = vld [vmem:[#allocation18_spill] sm:$0xff] }
 0x16d   : > { %v1816_v15 = vmax.f32 %v1800_v42, 0.0  ;;  %v1820_v9 = vmax.f32 %v1804_v12, 0.0  ;;  %v1806_v57 = vadd.f32 %v1790_v18, %v11388_v16  ;;  %v2306_v34 = vmul.f32 %v15403_v22, %v11449_v30 }
 0x16e   : > { %15402 = vst [vmem:[#allocation61_spill] sm:$0xff] %v11622_v14  ;;  %v11630_v41 = vpack.c.bf16 %v1823_v21, %v1819_v4  ;;  %v1818_v6 = vmax.f32 %v1802_v62, 0.0  ;;  %v2318_v33 = vadd.f32 %v2302_v11, %v11353_v0  ;;  %v2304_v7 = vmul.f32 %v15405_v35, %v11411_v61  ;;  %v15407_v4 = vld [vmem:[#allocation19_spill] sm:$0xff] }
 0x16f   : > { %v11635_v52 = vpack.c.bf16 %v1820_v9, %v1816_v15  ;;  %v1822_v13 = vmax.f32 %v1806_v57, 0.0  ;;  %v2322_v14 = vadd.f32 %v2306_v34, %v11368_v38  ;;  %v2308_v42 = vmul.f32 %v15405_v35, %v11451_v59  ;;  %v15409_v57 = vld [vmem:[#allocation20_spill] sm:$0xff] }
 0x170   : > { %15404 = vst [vmem:[#allocation17_spill] sm:$0xff] %v11630_v41  ;;  %v2334_v12 = vmax.f32 %v2318_v33, 0.0  ;;  %v2320_v18 = vadd.f32 %v2304_v7, %v15393_v10  ;;  %v2301_v21 = vmul.f32 %v15407_v4, %v11400_v47  ;;  %v2305_v62 = vmul.f32 %v15407_v4, %v11437_v49 }
 0x171   : > { %15406 = vst [vmem:[#allocation18_spill] sm:$0xff] %v11635_v52  ;;  %v11645_v11 = vpack.c.bf16 %v1822_v13, %v1818_v6  ;;  %v2338_v41 = vmax.f32 %v2322_v14, 0.0  ;;  %v2324_v15 = vadd.f32 %v2308_v42, %v11370_v39  ;;  %v2303_v9 = vmul.f32 %v15409_v57, %v15395_v58 }
 0x172   : > { %v2336_v34 = vmax.f32 %v2320_v18, 0.0  ;;  %v2317_v52 = vadd.f32 %v2301_v21, %v15394_v51  ;;  %v2321_v33 = vadd.f32 %v2305_v62, %v11361_v53  ;;  %v2307_v7 = vmul.f32 %v15409_v57, %v11439_v32 }
 0x173   : > { %15408 = vst [vmem:[#allocation19_spill] sm:$0xff] %v11645_v11  ;;  %v11654_v50 = vpack.c.bf16 %v2338_v41, %v2334_v12  ;;  %v2340_v26 = vmax.f32 %v2324_v15, 0.0  ;;  %v2319_v6 = vadd.f32 %v2303_v9, %v15397_v29  ;;  %v2310_v14 = vmul.f32 %v15403_v22, %v11475_v5 }
 0x174   : > { %v2333_v13 = vmax.f32 %v2317_v52, 0.0  ;;  %v2337_v42 = vmax.f32 %v2321_v33, 0.0  ;;  %v2323_v11 = vadd.f32 %v2307_v7, %v11363_v60  ;;  %v2314_v18 = vmul.f32 %v15403_v22, %v11495_v46 }
 0x175   : > { %15410 = vst [vmem:[#allocation20_spill] sm:$0xff] %v11654_v50  ;;  %v11662_v21 = vpack.c.bf16 %v2340_v26, %v2336_v34  ;;  %v2335_v62 = vmax.f32 %v2319_v6, 0.0  ;;  %v2326_v48 = vadd.f32 %v2310_v14, %v11381_v56  ;;  %v2312_v41 = vmul.f32 %v15405_v35, %v11477_v20 }
 0x176   : > { %v11667_v12 = vpack.c.bf16 %v2337_v42, %v2333_v13  ;;  %v2339_v15 = vmax.f32 %v2323_v11, 0.0  ;;  %v2330_v9 = vadd.f32 %v2314_v18, %v11396_v23  ;;  %v2316_v52 = vmul.f32 %v15405_v35, %v11497_v43 }
 0x177   : > { %15411 = vst [vmem:[#allocation62_spill] sm:$0xff] %v11662_v21  ;;  %v2342_v33 = vmax.f32 %v2326_v48, 0.0  ;;  %v2328_v7 = vadd.f32 %v2312_v41, %v11384_v1  ;;  %v2309_v26 = vmul.f32 %v15407_v4, %v11466_v8  ;;  %v2313_v22 = vmul.f32 %v15407_v4, %v11489_v17 }
 0x178   : > { %15412 = vst [vmem:[#allocation63_spill] sm:$0xff] %v11667_v12  ;;  %v11677_v34 = vpack.c.bf16 %v2339_v15, %v2335_v62  ;;  %v2346_v6 = vmax.f32 %v2330_v9, 0.0  ;;  %v2332_v14 = vadd.f32 %v2316_v52, %v11398_v24  ;;  %v2311_v11 = vmul.f32 %v15409_v57, %v11468_v63  ;;  %v15415_v62 = vld [vmem:[#allocation21_spill] sm:$0xff] }
 0x179   : > { %v2344_v13 = vmax.f32 %v2328_v7, 0.0  ;;  %v2325_v35 = vadd.f32 %v2309_v26, %v11375_v40  ;;  %v2329_v48 = vadd.f32 %v2313_v22, %v11386_v2  ;;  %v2315_v42 = vmul.f32 %v15409_v57, %v11491_v45 }
 0x17a   : > { %15413 = vst [vmem:[#allocation64_spill] sm:$0xff] %v11677_v34  ;;  %v11686_v18 = vpack.c.bf16 %v2346_v6, %v2342_v33  ;;  %v2348_v41 = vmax.f32 %v2332_v14, 0.0  ;;  %v2327_v4 = vadd.f32 %v2311_v11, %v11378_v54  ;;  %v2827_v15 = vmul.f32 %v15415_v62, %v11409_v44  ;;  %v15417_v33 = vld [vmem:[#allocation22_spill] sm:$0xff] }
 0x17b   : > { %v2341_v9 = vmax.f32 %v2325_v35, 0.0  ;;  %v2345_v52 = vmax.f32 %v2329_v48, 0.0  ;;  %v2331_v34 = vadd.f32 %v2315_v42, %v11388_v16  ;;  %v2831_v7 = vmul.f32 %v15415_v62, %v11449_v30 }
 0x17c   : > { %15414 = vst [vmem:[#allocation65_spill] sm:$0xff] %v11686_v18  ;;  %v11694_v26 = vpack.c.bf16 %v2348_v41, %v2344_v13  ;;  %v2343_v22 = vmax.f32 %v2327_v4, 0.0  ;;  %v2843_v57 = vadd.f32 %v2827_v15, %v11353_v0  ;;  %v2829_v6 = vmul.f32 %v15417_v33, %v11411_v61  ;;  %v15419_v13 = vld [vmem:[#allocation23_spill] sm:$0xff] }
 0x17d   : > { %v11699_v14 = vpack.c.bf16 %v2345_v52, %v2341_v9  ;;  %v2347_v11 = vmax.f32 %v2331_v34, 0.0  ;;  %v2847_v18 = vadd.f32 %v2831_v7, %v11368_v38  ;;  %v2833_v35 = vmul.f32 %v15417_v33, %v11451_v59  ;;  %v15421_v34 = vld [vmem:[#allocation24_spill] sm:$0xff] }
 0x17e   : > { %15416 = vst [vmem:[#allocation21_spill] sm:$0xff] %v11694_v26  ;;  %v2859_v48 = vmax.f32 %v2843_v57, 0.0  ;;  %v2845_v42 = vadd.f32 %v2829_v6, %v15393_v10  ;;  %v2826_v41 = vmul.f32 %v15419_v13, %v11400_v47  ;;  %v2830_v4 = vmul.f32 %v15419_v13, %v11437_v49 }
 0x17f   : > { %15418 = vst [vmem:[#allocation22_spill] sm:$0xff] %v11699_v14  ;;  %v11709_v15 = vpack.c.bf16 %v2347_v11, %v2343_v22  ;;  %v2863_v26 = vmax.f32 %v2847_v18, 0.0  ;;  %v2849_v9 = vadd.f32 %v2833_v35, %v11370_v39  ;;  %v2828_v52 = vmul.f32 %v15421_v34, %v15395_v58 }
 0x180   : > { %v2861_v7 = vmax.f32 %v2845_v42, 0.0  ;;  %v2842_v14 = vadd.f32 %v2826_v41, %v15394_v51  ;;  %v2846_v57 = vadd.f32 %v2830_v4, %v11361_v53  ;;  %v2832_v6 = vmul.f32 %v15421_v34, %v11439_v32 }
 0x181   : > { %15420 = vst [vmem:[#allocation23_spill] sm:$0xff] %v11709_v15  ;;  %v11718_v12 = vpack.c.bf16 %v2863_v26, %v2859_v48  ;;  %v2865_v21 = vmax.f32 %v2849_v9, 0.0  ;;  %v2844_v22 = vadd.f32 %v2828_v52, %v15397_v29  ;;  %v2835_v18 = vmul.f32 %v15415_v62, %v11475_v5 }
 0x182   : > { %v2858_v11 = vmax.f32 %v2842_v14, 0.0  ;;  %v2862_v35 = vmax.f32 %v2846_v57, 0.0  ;;  %v2848_v15 = vadd.f32 %v2832_v6, %v11363_v60  ;;  %v2839_v42 = vmul.f32 %v15415_v62, %v11495_v46 }
 0x183   : > { %15422 = vst [vmem:[#allocation24_spill] sm:$0xff] %v11718_v12  ;;  %v11726_v41 = vpack.c.bf16 %v2865_v21, %v2861_v7  ;;  %v2860_v4 = vmax.f32 %v2844_v22, 0.0  ;;  %v2851_v50 = vadd.f32 %v2835_v18, %v11381_v56  ;;  %v2837_v26 = vmul.f32 %v15417_v33, %v11477_v20 }
 0x184   : > { %v11731_v48 = vpack.c.bf16 %v2862_v35, %v2858_v11  ;;  %v2864_v9 = vmax.f32 %v2848_v15, 0.0  ;;  %v2855_v52 = vadd.f32 %v2839_v42, %v11396_v23  ;;  %v2841_v14 = vmul.f32 %v15417_v33, %v11497_v43 }
 0x185   : > { %15423 = vst [vmem:[#allocation66_spill] sm:$0xff] %v11726_v41  ;;  %v2867_v57 = vmax.f32 %v2851_v50, 0.0  ;;  %v2853_v6 = vadd.f32 %v2837_v26, %v11384_v1  ;;  %v2834_v21 = vmul.f32 %v15419_v13, %v11466_v8  ;;  %v2838_v62 = vmul.f32 %v15419_v13, %v11489_v17 }
 0x186   : > { %15424 = vst [vmem:[#allocation67_spill] sm:$0xff] %v11731_v48  ;;  %v11741_v7 = vpack.c.bf16 %v2864_v9, %v2860_v4  ;;  %v2871_v22 = vmax.f32 %v2855_v52, 0.0  ;;  %v2857_v18 = vadd.f32 %v2841_v14, %v11398_v24  ;;  %v2836_v15 = vmul.f32 %v15421_v34, %v11468_v63  ;;  %v15427_v4 = vld [vmem:[#allocation25_spill] sm:$0xff] }
 0x187   : > { %v2869_v11 = vmax.f32 %v2853_v6, 0.0  ;;  %v2850_v33 = vadd.f32 %v2834_v21, %v11375_v40  ;;  %v2854_v50 = vadd.f32 %v2838_v62, %v11386_v2  ;;  %v2840_v35 = vmul.f32 %v15421_v34, %v11491_v45 }
 0x188   : > { %15425 = vst [vmem:[#allocation68_spill] sm:$0xff] %v11741_v7  ;;  %v11750_v42 = vpack.c.bf16 %v2871_v22, %v2867_v57  ;;  %v2873_v26 = vmax.f32 %v2857_v18, 0.0  ;;  %v2852_v13 = vadd.f32 %v2836_v15, %v11378_v54  ;;  %v3352_v9 = vmul.f32 %v15427_v4, %v11409_v44  ;;  %v15429_v57 = vld [vmem:[#allocation26_spill] sm:$0xff] }
 0x189   : > { %v2866_v52 = vmax.f32 %v2850_v33, 0.0  ;;  %v2870_v14 = vmax.f32 %v2854_v50, 0.0  ;;  %v2856_v7 = vadd.f32 %v2840_v35, %v11388_v16  ;;  %v3356_v6 = vmul.f32 %v15427_v4, %v11449_v30 }
 0x18a   : > { %15426 = vst [vmem:[#allocation69_spill] sm:$0xff] %v11750_v42  ;;  %v11758_v21 = vpack.c.bf16 %v2873_v26, %v2869_v11  ;;  %v2868_v62 = vmax.f32 %v2852_v13, 0.0  ;;  %v3368_v34 = vadd.f32 %v3352_v9, %v11353_v0  ;;  %v3354_v22 = vmul.f32 %v15429_v57, %v11411_v61  ;;  %v15431_v11 = vld [vmem:[#allocation27_spill] sm:$0xff] }
 0x18b   : > { %v11763_v18 = vpack.c.bf16 %v2870_v14, %v2866_v52  ;;  %v2872_v15 = vmax.f32 %v2856_v7, 0.0  ;;  %v3372_v42 = vadd.f32 %v3356_v6, %v11368_v38  ;;  %v3358_v33 = vmul.f32 %v15429_v57, %v11451_v59  ;;  %v15433_v7 = vld [vmem:[#allocation28_spill] sm:$0xff] }
 0x18c   : > { %15428 = vst [vmem:[#allocation25_spill] sm:$0xff] %v11758_v21  ;;  %v3384_v50 = vmax.f32 %v3368_v34, 0.0  ;;  %v3370_v35 = vadd.f32 %v3354_v22, %v15393_v10  ;;  %v3351_v26 = vmul.f32 %v15431_v11, %v11400_v47  ;;  %v3355_v13 = vmul.f32 %v15431_v11, %v11437_v49 }
 0x18d   : > { %15430 = vst [vmem:[#allocation26_spill] sm:$0xff] %v11763_v18  ;;  %v11773_v9 = vpack.c.bf16 %v2872_v15, %v2868_v62  ;;  %v3388_v21 = vmax.f32 %v3372_v42, 0.0  ;;  %v3374_v52 = vadd.f32 %v3358_v33, %v11370_v39  ;;  %v3353_v14 = vmul.f32 %v15433_v7, %v15395_v58 }
 0x18e   : > { %v3386_v6 = vmax.f32 %v3370_v35, 0.0  ;;  %v3367_v18 = vadd.f32 %v3351_v26, %v15394_v51  ;;  %v3371_v34 = vadd.f32 %v3355_v13, %v11361_v53  ;;  %v3357_v22 = vmul.f32 %v15433_v7, %v11439_v32 }
 0x18f   : > { %15432 = vst [vmem:[#allocation27_spill] sm:$0xff] %v11773_v9  ;;  %v11782_v48 = vpack.c.bf16 %v3388_v21, %v3384_v50  ;;  %v3390_v41 = vmax.f32 %v3374_v52, 0.0  ;;  %v3369_v62 = vadd.f32 %v3353_v14, %v15397_v29  ;;  %v3360_v42 = vmul.f32 %v15427_v4, %v11475_v5 }
 0x190   : > { %v3383_v15 = vmax.f32 %v3367_v18, 0.0  ;;  %v3387_v33 = vmax.f32 %v3371_v34, 0.0  ;;  %v3373_v9 = vadd.f32 %v3357_v22, %v11363_v60  ;;  %v3364_v35 = vmul.f32 %v15427_v4, %v11495_v46 }
 0x191   : > { %15434 = vst [vmem:[#allocation28_spill] sm:$0xff] %v11782_v48  ;;  %v11790_v26 = vpack.c.bf16 %v3390_v41, %v3386_v6  ;;  %v3385_v13 = vmax.f32 %v3369_v62, 0.0  ;;  %v3376_v12 = vadd.f32 %v3360_v42, %v11381_v56  ;;  %v3362_v21 = vmul.f32 %v15429_v57, %v11477_v20 }
 0x192   : > { %v11795_v50 = vpack.c.bf16 %v3387_v33, %v3383_v15  ;;  %v3389_v52 = vmax.f32 %v3373_v9, 0.0  ;;  %v3380_v14 = vadd.f32 %v3364_v35, %v11396_v23  ;;  %v3366_v18 = vmul.f32 %v15429_v57, %v11497_v43 }
 0x193   : > { %15435 = vst [vmem:[#allocation70_spill] sm:$0xff] %v11790_v26  ;;  %v3392_v34 = vmax.f32 %v3376_v12, 0.0  ;;  %v3378_v22 = vadd.f32 %v3362_v21, %v11384_v1  ;;  %v3359_v41 = vmul.f32 %v15431_v11, %v11466_v8  ;;  %v3363_v4 = vmul.f32 %v15431_v11, %v11489_v17 }
 0x194   : > { %15436 = vst [vmem:[#allocation71_spill] sm:$0xff] %v11795_v50  ;;  %v11805_v6 = vpack.c.bf16 %v3389_v52, %v3385_v13  ;;  %v3396_v62 = vmax.f32 %v3380_v14, 0.0  ;;  %v3382_v42 = vadd.f32 %v3366_v18, %v11398_v24  ;;  %v3361_v9 = vmul.f32 %v15433_v7, %v11468_v63  ;;  %v15439_v13 = vld [vmem:[#allocation29_spill] sm:$0xff] }
 0x195   : > { %v3394_v15 = vmax.f32 %v3378_v22, 0.0  ;;  %v3375_v57 = vadd.f32 %v3359_v41, %v11375_v40  ;;  %v3379_v12 = vadd.f32 %v3363_v4, %v11386_v2  ;;  %v3365_v33 = vmul.f32 %v15433_v7, %v11491_v45 }
 0x196   : > { %15437 = vst [vmem:[#allocation72_spill] sm:$0xff] %v11805_v6  ;;  %v11814_v35 = vpack.c.bf16 %v3396_v62, %v3392_v34  ;;  %v3398_v21 = vmax.f32 %v3382_v42, 0.0  ;;  %v3377_v11 = vadd.f32 %v3361_v9, %v11378_v54  ;;  %v3877_v52 = vmul.f32 %v15439_v13, %v11409_v44  ;;  %v15441_v34 = vld [vmem:[#allocation30_spill] sm:$0xff] }
 0x197   : > { %v3391_v14 = vmax.f32 %v3375_v57, 0.0  ;;  %v3395_v18 = vmax.f32 %v3379_v12, 0.0  ;;  %v3381_v6 = vadd.f32 %v3365_v33, %v11388_v16  ;;  %v3881_v22 = vmul.f32 %v15439_v13, %v11449_v30 }
 0x198   : > { %15438 = vst [vmem:[#allocation73_spill] sm:$0xff] %v11814_v35  ;;  %v11822_v41 = vpack.c.bf16 %v3398_v21, %v3394_v15  ;;  %v3393_v4 = vmax.f32 %v3377_v11, 0.0  ;;  %v3893_v7 = vadd.f32 %v3877_v52, %v11353_v0  ;;  %v3879_v62 = vmul.f32 %v15441_v34, %v11411_v61  ;;  %v15443_v15 = vld [vmem:[#allocation31_spill] sm:$0xff] }
 0x199   : > { %v11827_v42 = vpack.c.bf16 %v3395_v18, %v3391_v14  ;;  %v3397_v9 = vmax.f32 %v3381_v6, 0.0  ;;  %v3897_v35 = vadd.f32 %v3881_v22, %v11368_v38  ;;  %v3883_v57 = vmul.f32 %v15441_v34, %v11451_v59  ;;  %v15445_v6 = vld [vmem:[#allocation32_spill] sm:$0xff] }
 0x19a   : > { %15440 = vst [vmem:[#allocation29_spill] sm:$0xff] %v11822_v41  ;;  %v3909_v12 = vmax.f32 %v3893_v7, 0.0  ;;  %v3895_v33 = vadd.f32 %v3879_v62, %v15393_v10  ;;  %v3876_v21 = vmul.f32 %v15443_v15, %v11400_v47  ;;  %v3880_v11 = vmul.f32 %v15443_v15, %v11437_v49 }
 0x19b   : > { %15442 = vst [vmem:[#allocation30_spill] sm:$0xff] %v11827_v42  ;;  %v11837_v52 = vpack.c.bf16 %v3397_v9, %v3393_v4  ;;  %v3913_v41 = vmax.f32 %v3897_v35, 0.0  ;;  %v3899_v14 = vadd.f32 %v3883_v57, %v11370_v39  ;;  %v3878_v18 = vmul.f32 %v15445_v6, %v15395_v58 }
 0x19c   : > { %v3911_v22 = vmax.f32 %v3895_v33, 0.0  ;;  %v3892_v42 = vadd.f32 %v3876_v21, %v15394_v51  ;;  %v3896_v7 = vadd.f32 %v3880_v11, %v11361_v53  ;;  %v3882_v62 = vmul.f32 %v15445_v6, %v11439_v32 }
 0x19d   : > { %15444 = vst [vmem:[#allocation31_spill] sm:$0xff] %v11837_v52  ;;  %v11846_v50 = vpack.c.bf16 %v3913_v41, %v3909_v12  ;;  %v3915_v26 = vmax.f32 %v3899_v14, 0.0  ;;  %v3894_v4 = vadd.f32 %v3878_v18, %v15397_v29  ;;  %v3885_v35 = vmul.f32 %v15439_v13, %v11475_v5 }
 0x19e   : > { %v3908_v9 = vmax.f32 %v3892_v42, 0.0  ;;  %v3912_v57 = vmax.f32 %v3896_v7, 0.0  ;;  %v3898_v52 = vadd.f32 %v3882_v62, %v11363_v60  ;;  %v3889_v33 = vmul.f32 %v15439_v13, %v11495_v46 }
 0x19f   : > { %15446 = vst [vmem:[#allocation32_spill] sm:$0xff] %v11846_v50  ;;  %v11854_v21 = vpack.c.bf16 %v3915_v26, %v3911_v22  ;;  %v3910_v11 = vmax.f32 %v3894_v4, 0.0  ;;  %v3901_v48 = vadd.f32 %v3885_v35, %v11381_v56  ;;  %v3887_v41 = vmul.f32 %v15441_v34, %v11477_v20 }
 0x1a0   : > { %v11859_v12 = vpack.c.bf16 %v3912_v57, %v3908_v9  ;;  %v3914_v14 = vmax.f32 %v3898_v52, 0.0  ;;  %v3905_v18 = vadd.f32 %v3889_v33, %v11396_v23  ;;  %v3891_v42 = vmul.f32 %v15441_v34, %v11497_v43 }
 0x1a1   : > { %15447 = vst [vmem:[#allocation74_spill] sm:$0xff] %v11854_v21  ;;  %v3917_v7 = vmax.f32 %v3901_v48, 0.0  ;;  %v3903_v62 = vadd.f32 %v3887_v41, %v11384_v1  ;;  %v3884_v26 = vmul.f32 %v15443_v15, %v11466_v8  ;;  %v3888_v13 = vmul.f32 %v15443_v15, %v11489_v17 }
 0x1a2   : > { %15448 = vst [vmem:[#allocation75_spill] sm:$0xff] %v11859_v12  ;;  %v11869_v22 = vpack.c.bf16 %v3914_v14, %v3910_v11  ;;  %v3921_v4 = vmax.f32 %v3905_v18, 0.0  ;;  %v3907_v35 = vadd.f32 %v3891_v42, %v11398_v24  ;;  %v3886_v52 = vmul.f32 %v15445_v6, %v11468_v63  ;;  %v15451_v11 = vld [vmem:[#allocation33_spill] sm:$0xff] }
 0x1a3   : > { %v3919_v9 = vmax.f32 %v3903_v62, 0.0  ;;  %v3900_v34 = vadd.f32 %v3884_v26, %v11375_v40  ;;  %v3904_v48 = vadd.f32 %v3888_v13, %v11386_v2  ;;  %v3890_v57 = vmul.f32 %v15445_v6, %v11491_v45 }
 0x1a4   : > { %15449 = vst [vmem:[#allocation76_spill] sm:$0xff] %v11869_v22  ;;  %v11878_v33 = vpack.c.bf16 %v3921_v4, %v3917_v7  ;;  %v3923_v41 = vmax.f32 %v3907_v35, 0.0  ;;  %v3902_v15 = vadd.f32 %v3886_v52, %v11378_v54  ;;  %v4402_v14 = vmul.f32 %v15451_v11, %v11409_v44  ;;  %v15453_v7 = vld [vmem:[#allocation34_spill] sm:$0xff] }
 0x1a5   : > { %v3916_v18 = vmax.f32 %v3900_v34, 0.0  ;;  %v3920_v42 = vmax.f32 %v3904_v48, 0.0  ;;  %v3906_v22 = vadd.f32 %v3890_v57, %v11388_v16  ;;  %v4406_v62 = vmul.f32 %v15451_v11, %v11449_v30 }
 0x1a6   : > { %15450 = vst [vmem:[#allocation77_spill] sm:$0xff] %v11878_v33  ;;  %v11886_v26 = vpack.c.bf16 %v3923_v41, %v3919_v9  ;;  %v3918_v13 = vmax.f32 %v3902_v15, 0.0  ;;  %v4418_v6 = vadd.f32 %v4402_v14, %v11353_v0  ;;  %v4404_v4 = vmul.f32 %v15453_v7, %v11411_v61  ;;  %v15455_v9 = vld [vmem:[#allocation35_spill] sm:$0xff] }
 0x1a7   : > { %v11891_v35 = vpack.c.bf16 %v3920_v42, %v3916_v18  ;;  %v3922_v52 = vmax.f32 %v3906_v22, 0.0  ;;  %v4422_v33 = vadd.f32 %v4406_v62, %v11368_v38  ;;  %v4408_v34 = vmul.f32 %v15453_v7, %v11451_v59  ;;  %v15457_v22 = vld [vmem:[#allocation36_spill] sm:$0xff] }
 0x1a8   : > { %15452 = vst [vmem:[#allocation33_spill] sm:$0xff] %v11886_v26  ;;  %v4434_v48 = vmax.f32 %v4418_v6, 0.0  ;;  %v4420_v57 = vadd.f32 %v4404_v4, %v15393_v10  ;;  %v4401_v41 = vmul.f32 %v15455_v9, %v11400_v47  ;;  %v4405_v15 = vmul.f32 %v15455_v9, %v11437_v49 }
 0x1a9   : > { %15454 = vst [vmem:[#allocation34_spill] sm:$0xff] %v11891_v35  ;;  %v11901_v14 = vpack.c.bf16 %v3922_v52, %v3918_v13  ;;  %v4438_v26 = vmax.f32 %v4422_v33, 0.0  ;;  %v4424_v18 = vadd.f32 %v4408_v34, %v11370_v39  ;;  %v4403_v42 = vmul.f32 %v15457_v22, %v15395_v58 }
 0x1aa   : > { %v4436_v62 = vmax.f32 %v4420_v57, 0.0  ;;  %v4417_v35 = vadd.f32 %v4401_v41, %v15394_v51  ;;  %v4421_v6 = vadd.f32 %v4405_v15, %v11361_v53  ;;  %v4407_v4 = vmul.f32 %v15457_v22, %v11439_v32 }
 0x1ab   : > { %15456 = vst [vmem:[#allocation35_spill] sm:$0xff] %v11901_v14  ;;  %v11910_v12 = vpack.c.bf16 %v4438_v26, %v4434_v48  ;;  %v4440_v21 = vmax.f32 %v4424_v18, 0.0  ;;  %v4419_v13 = vadd.f32 %v4403_v42, %v15397_v29  ;;  %v4410_v33 = vmul.f32 %v15451_v11, %v11475_v5 }
 0x1ac   : > { %v4433_v52 = vmax.f32 %v4417_v35, 0.0  ;;  %v4437_v34 = vmax.f32 %v4421_v6, 0.0  ;;  %v4423_v14 = vadd.f32 %v4407_v4, %v11363_v60  ;;  %v4414_v57 = vmul.f32 %v15451_v11, %v11495_v46 }
 0x1ad   : > { %15458 = vst [vmem:[#allocation36_spill] sm:$0xff] %v11910_v12  ;;  %v11918_v41 = vpack.c.bf16 %v4440_v21, %v4436_v62  ;;  %v4435_v15 = vmax.f32 %v4419_v13, 0.0  ;;  %v4426_v50 = vadd.f32 %v4410_v33, %v11381_v56  ;;  %v4412_v26 = vmul.f32 %v15453_v7, %v11477_v20 }
 0x1ae   : > { %v11923_v48 = vpack.c.bf16 %v4437_v34, %v4433_v52  ;;  %v4439_v18 = vmax.f32 %v4423_v14, 0.0  ;;  %v4430_v42 = vadd.f32 %v4414_v57, %v11396_v23  ;;  %v4416_v35 = vmul.f32 %v15453_v7, %v11497_v43 }
 0x1af   : > { %15459 = vst [vmem:[#allocation78_spill] sm:$0xff] %v11918_v41  ;;  %v4442_v6 = vmax.f32 %v4426_v50, 0.0  ;;  %v4428_v4 = vadd.f32 %v4412_v26, %v11384_v1  ;;  %v4409_v21 = vmul.f32 %v15455_v9, %v11466_v8  ;;  %v4413_v11 = vmul.f32 %v15455_v9, %v11489_v17 }
 0x1b0   : > { %15460 = vst [vmem:[#allocation79_spill] sm:$0xff] %v11923_v48  ;;  %v11933_v62 = vpack.c.bf16 %v4439_v18, %v4435_v15  ;;  %v4446_v13 = vmax.f32 %v4430_v42, 0.0  ;;  %v4432_v33 = vadd.f32 %v4416_v35, %v11398_v24  ;;  %v4411_v14 = vmul.f32 %v15457_v22, %v11468_v63  ;;  %v15463_v15 = vld [vmem:[#allocation38_spill] sm:$0xff] }
 0x1b1   : > { %v4444_v52 = vmax.f32 %v4428_v4, 0.0  ;;  %v4425_v7 = vadd.f32 %v4409_v21, %v11375_v40  ;;  %v4429_v50 = vadd.f32 %v4413_v11, %v11386_v2  ;;  %v4415_v34 = vmul.f32 %v15457_v22, %v11491_v45 }
 0x1b2   : > { %15461 = vst [vmem:[#allocation80_spill] sm:$0xff] %v11933_v62  ;;  %v11942_v57 = vpack.c.bf16 %v4446_v13, %v4442_v6  ;;  %v4448_v26 = vmax.f32 %v4432_v33, 0.0  ;;  %v4427_v9 = vadd.f32 %v4411_v14, %v11378_v54  ;;  %v4927_v18 = vmul.f32 %v15463_v15, %v11409_v44  ;;  %v15465_v6 = vld [vmem:[#allocation39_spill] sm:$0xff] }
 0x1b3   : > { %v4441_v42 = vmax.f32 %v4425_v7, 0.0  ;;  %v4445_v35 = vmax.f32 %v4429_v50, 0.0  ;;  %v4431_v62 = vadd.f32 %v4415_v34, %v11388_v16  ;;  %v4931_v4 = vmul.f32 %v15463_v15, %v11449_v30 }
 0x1b4   : > { %15462 = vst [vmem:[#allocation81_spill] sm:$0xff] %v11942_v57  ;;  %v11950_v21 = vpack.c.bf16 %v4448_v26, %v4444_v52  ;;  %v4443_v11 = vmax.f32 %v4427_v9, 0.0  ;;  %v4943_v22 = vadd.f32 %v4927_v18, %v11353_v0  ;;  %v4929_v13 = vmul.f32 %v15465_v6, %v11411_v61  ;;  %v15467_v52 = vld [vmem:[#allocation40_spill] sm:$0xff] }
 0x1b5   : > { %v11955_v33 = vpack.c.bf16 %v4445_v35, %v4441_v42  ;;  %v4447_v14 = vmax.f32 %v4431_v62, 0.0  ;;  %v4947_v57 = vadd.f32 %v4931_v4, %v11368_v38  ;;  %v4933_v7 = vmul.f32 %v15465_v6, %v11451_v59  ;;  %v15469_v62 = vld [vmem:[#allocation43_spill] sm:$0xff] }
 0x1b6   : > { %15464 = vst [vmem:[#allocation38_spill] sm:$0xff] %v11950_v21  ;;  %v4959_v50 = vmax.f32 %v4943_v22, 0.0  ;;  %v4945_v34 = vadd.f32 %v4929_v13, %v15393_v10  ;;  %v4926_v26 = vmul.f32 %v15467_v52, %v11400_v47  ;;  %v4930_v9 = vmul.f32 %v15467_v52, %v11437_v49 }
 0x1b7   : > { %15466 = vst [vmem:[#allocation39_spill] sm:$0xff] %v11955_v33  ;;  %v11965_v18 = vpack.c.bf16 %v4447_v14, %v4443_v11  ;;  %v4963_v21 = vmax.f32 %v4947_v57, 0.0  ;;  %v4949_v42 = vadd.f32 %v4933_v7, %v11370_v39  ;;  %v4928_v35 = vmul.f32 %v15469_v62, %v15395_v58 }
 0x1b8   : > { %v4961_v4 = vmax.f32 %v4945_v34, 0.0  ;;  %v4942_v33 = vadd.f32 %v4926_v26, %v15394_v51  ;;  %v4946_v22 = vadd.f32 %v4930_v9, %v11361_v53  ;;  %v4932_v13 = vmul.f32 %v15469_v62, %v11439_v32 }
 0x1b9   : > { %15468 = vst [vmem:[#allocation40_spill] sm:$0xff] %v11965_v18  ;;  %v11974_v48 = vpack.c.bf16 %v4963_v21, %v4959_v50  ;;  %v4965_v41 = vmax.f32 %v4949_v42, 0.0  ;;  %v4944_v11 = vadd.f32 %v4928_v35, %v15397_v29  ;;  %v4935_v57 = vmul.f32 %v15463_v15, %v11475_v5 }
 0x1ba   : > { %v4958_v14 = vmax.f32 %v4942_v33, 0.0  ;;  %v4962_v7 = vmax.f32 %v4946_v22, 0.0  ;;  %v4948_v18 = vadd.f32 %v4932_v13, %v11363_v60  ;;  %v4939_v34 = vmul.f32 %v15463_v15, %v11495_v46 }
 0x1bb   : > { %15470 = vst [vmem:[#allocation43_spill] sm:$0xff] %v11974_v48  ;;  %v11982_v26 = vpack.c.bf16 %v4965_v41, %v4961_v4  ;;  %v4960_v9 = vmax.f32 %v4944_v11, 0.0  ;;  %v4951_v12 = vadd.f32 %v4935_v57, %v11381_v56  ;;  %v4937_v21 = vmul.f32 %v15465_v6, %v11477_v20 }
 0x1bc   : > { %v11987_v50 = vpack.c.bf16 %v4962_v7, %v4958_v14  ;;  %v4964_v42 = vmax.f32 %v4948_v18, 0.0  ;;  %v4955_v35 = vadd.f32 %v4939_v34, %v11396_v23  ;;  %v4941_v33 = vmul.f32 %v15465_v6, %v11497_v43 }
 0x1bd   : > { %15471 = vst [vmem:[#allocation82_spill] sm:$0xff] %v11982_v26  ;;  %v4967_v22 = vmax.f32 %v4951_v12, 0.0  ;;  %v4953_v13 = vadd.f32 %v4937_v21, %v11384_v1  ;;  %v4934_v41 = vmul.f32 %v15467_v52, %v11466_v8  ;;  %v4938_v15 = vmul.f32 %v15467_v52, %v11489_v17  ;;  %v15475_v21 = vld [vmem:[#allocation45_spill] sm:$0xff] }
 0x1be   : > { %15472 = vst [vmem:[#allocation83_spill] sm:$0xff] %v11987_v50  ;;  %v11997_v4 = vpack.c.bf16 %v4964_v42, %v4960_v9  ;;  %v4971_v11 = vmax.f32 %v4955_v35, 0.0  ;;  %v4957_v18 = vadd.f32 %v4941_v33, %v11398_v24  ;;  %v4936_v57 = vmul.f32 %v15469_v62, %v11468_v63 }
 0x1bf   : > { %v4969_v14 = vmax.f32 %v4953_v13, 0.0  ;;  %v4950_v12 = vadd.f32 %v4934_v41, %v11375_v40  ;;  %v4954_v6 = vadd.f32 %v4938_v15, %v11386_v2  ;;  %v4940_v7 = vmul.f32 %v15469_v62, %v11491_v45  ;;  %v10010_v41 = vld [vmem:[%s11100_s10 + $0x23] ss:$8 sm:$0xf] }
 0x1c0   : > { %15473 = vst [vmem:[#allocation84_spill] sm:$0xff] %v11997_v4  ;;  %v12006_v34 = vpack.c.bf16 %v4971_v11, %v4967_v22  ;;  %v4973_v52 = vmax.f32 %v4957_v18, 0.0  ;;  %v4952_v9 = vadd.f32 %v4936_v57, %v11378_v54  ;;  %v5452_v42 = vmul.f32 %v15475_v21, %v11409_v44  ;;  %v15477_v22 = vld [vmem:[#allocation47_spill] sm:$0xff] }
 0x1c1   : > { %v4966_v35 = vmax.f32 %v4950_v12, 0.0  ;;  %v4970_v33 = vmax.f32 %v4954_v6, 0.0  ;;  %v4956_v4 = vadd.f32 %v4940_v7, %v11388_v16  ;;  %v5456_v13 = vmul.f32 %v15475_v21, %v11449_v30 }
 0x1c2   : > { %15474 = vst [vmem:[#allocation85_spill] sm:$0xff] %v12006_v34  ;;  %v12015_v15 = vpack.c.bf16 %v4973_v52, %v4969_v14  ;;  %v4968_v50 = vmax.f32 %v4952_v9, 0.0  ;;  %v5468_v62 = vadd.f32 %v5452_v42, %v11353_v0  ;;  %v5454_v11 = vmul.f32 %v15477_v22, %v11411_v61  ;;  %v15479_v34 = vld [vmem:[#allocation48_spill] sm:$0xff] }
 0x1c3   : > { %v12020_v18 = vpack.c.bf16 %v4970_v33, %v4966_v35  ;;  %v4972_v57 = vmax.f32 %v4956_v4, 0.0  ;;  %v5472_v12 = vadd.f32 %v5456_v13, %v11368_v38  ;;  %v5458_v6 = vmul.f32 %v15477_v22, %v11451_v59  ;;  %v686_v42 = vld [vmem:[%s15197_s4 + $0x8] sm:$0xff] }
 0x1c4   : > { %15476 = vst [vmem:[#allocation45_spill] sm:$0xff] %v12015_v15  ;;  %v5470_v7 = vadd.f32 %v5454_v11, %v15393_v10  ;;  %v5451_v14 = vmul.f32 %v15479_v34, %v11400_v47  ;;  %v5455_v52 = vmul.f32 %v15479_v34, %v11437_v49  ;;  %v6474_v9 = vadd.f32 11.0, %v10010_v41  ;;  %9781 = vmatmul.mubr.msk.f32.gmra.mrb[18].mxu0 %vm768_vm2, %v686_v42  ;;  %v15481_v41 = vld [vmem:[#allocation50_spill] sm:$0xff] }
 0x1c5   : > { %15478 = vst [vmem:[#allocation47_spill] sm:$0xff] %v12020_v18  ;;  %v12033_v35 = vpack.c.bf16 %v4972_v57, %v4968_v50  ;;  %v5484_v4 = vmax.f32 %v5468_v62, 0.0  ;;  %v5488_v33 = vmax.f32 %v5472_v12, 0.0  ;;  %v5474_v13 = vadd.f32 %v5458_v6, %v11370_v39  ;;  %9784 = vmatmul.mubr.msk.f32.gmra.mrb[18].mxu1 %vm768_vm2, %v686_v42  ;;  %854 = vmatprep.mubr.f32.mxu0 %v15387_v37  ;;  %v12047_v50 = vld [vmem:[%s15197_s4 + $0x10] sm:$0x1f] }
 0x1c6   : > { %v5486_v11 = vmax.f32 %v5470_v7, 0.0  ;;  %v5467_v18 = vadd.f32 %v5451_v14, %v15394_v51  ;;  %v5471_v15 = vadd.f32 %v5455_v52, %v11361_v53  ;;  %v5453_v26 = vmul.f32 %v15481_v41, %v15395_v58  ;;  %937 = vmatprep.mubr.f32.mxu1 %v15387_v37  ;;  %15482 = vst [vmem:[#allocation50_spill] sm:$0xff] %v12047_v50 }
 0x1c7   : > { %15480 = vst [vmem:[#allocation48_spill] sm:$0xff] %v12033_v35  ;;  %v12049_v62 = vpack.c.bf16 %v5488_v33, %v5484_v4  ;;  %v5490_v57 = vmax.f32 %v5474_v13, 0.0  ;;  %v5457_v12 = vmul.f32 %v15481_v41, %v11439_v32  ;;  %v5460_v6 = vmul.f32 %v15475_v21, %v11475_v5 }
 0x1c8   : > { %v5483_v7 = vmax.f32 %v5467_v18, 0.0  ;;  %v5487_v14 = vmax.f32 %v5471_v15, 0.0  ;;  %v5469_v52 = vadd.f32 %v5453_v26, %v15397_v29  ;;  %v5464_v42 = vmul.f32 %v15475_v21, %v11495_v46  ;;  %9782 = vmatmul.mubr.msk.f32.gmra.mrb[20].mxu0 %vm768_vm2, %v12047_v50 }
 0x1c9   : > { %15483 = vst [vmem:[#allocation86_spill] sm:$0xff] %v12049_v62  ;;  %v12058_v35 = vpack.c.bf16 %v5490_v57, %v5486_v11  ;;  %v5473_v48 = vadd.f32 %v5457_v12, %v11363_v60  ;;  %v5476_v4 = vadd.f32 %v5460_v6, %v11381_v56  ;;  %v5462_v33 = vmul.f32 %v15477_v22, %v11477_v20  ;;  %v15489_v62 = vld [vmem:[#allocation51_spill] sm:$0xff] }
 0x1ca   : > { %9785 = vmatmul.mubr.msk.f32.gmra.mrb[20].mxu1 %vm768_vm2, %v12047_v50  ;;  %v12068_v15 = vpack.c.bf16 %v5487_v14, %v5483_v7  ;;  %v5485_v26 = vmax.f32 %v5469_v52, 0.0  ;;  %v5480_v21 = vadd.f32 %v5464_v42, %v11396_v23  ;;  %v5466_v18 = vmul.f32 %v15477_v22, %v11497_v43  ;;  %1064 = vmatprep.mubr.f32.mxu0 %v15387_v37 }
 0x1cb   : > { %15484 = vst [vmem:[#allocation87_spill] sm:$0xff] %v12058_v35  ;;  %1147 = vmatprep.mubr.f32.mxu1 %v15387_v37  ;;  %v5489_v13 = vmax.f32 %v5473_v48, 0.0  ;;  %v5492_v11 = vmax.f32 %v5476_v4, 0.0  ;;  %v5478_v57 = vadd.f32 %v5462_v33, %v11384_v1  ;;  %v5459_v12 = vmul.f32 %v15479_v34, %v11466_v8  ;;  %v15488_v35 = vld [vmem:[#allocation13_spill] sm:$0xff] }
 0x1cc   : > { %15485 = vst [vmem:[#allocation88_spill] sm:$0xff] %v12068_v15  ;;  %v5496_v6 = vmax.f32 %v5480_v21, 0.0  ;;  %v5482_v7 = vadd.f32 %v5466_v18, %v11398_v24  ;;  %v5463_v14 = vmul.f32 %v15479_v34, %v11489_v17  ;;  %v5461_v22 = vmul.f32 %v15481_v41, %v11468_v63 }
 0x1cd   : > { %v12083_v52 = vpack.c.bf16 %v5489_v13, %v5485_v26  ;;  %v5494_v42 = vmax.f32 %v5478_v57, 0.0  ;;  %v5475_v48 = vadd.f32 %v5459_v12, %v11375_v40  ;;  %v5465_v4 = vmul.f32 %v15481_v41, %v11491_v45  ;;  %v15490_v26 = vld [vmem:[#allocation14_spill] sm:$0xff] }
 0x1ce   : > { %v12088_v33 = vpack.c.bf16 %v5496_v6, %v5492_v11  ;;  %v5498_v15 = vmax.f32 %v5482_v7, 0.0  ;;  %v5479_v21 = vadd.f32 %v5463_v14, %v11386_v2  ;;  %v5477_v18 = vadd.f32 %v5461_v22, %v11378_v54  ;;  %v15492_v6 = vld [vmem:[#allocation11_spill] sm:$0xff] }
 0x1cf   : > { %15486 = vst [vmem:[#allocation89_spill] sm:$0xff] %v12083_v52  ;;  %v5481_v34 = vadd.f32 %v5465_v4, %v11388_v16  ;;  %v5963_v50 = vrot.slane %v15489_v62, %v15488_v35  ;;  %v5971_v13 = vrot.slane %v15489_v62, %v15490_v26  ;;  %v12097_v57 = vmul.f32 0.0625, %v6474_v9 }
 0x1d0   : > { %15487 = vst [vmem:[#allocation90_spill] sm:$0xff] %v12088_v33  ;;  %v12099_v12 = vpack.c.bf16 %v5498_v15, %v5494_v42  ;;  %v5491_v41 = vmax.f32 %v5475_v48, 0.0  ;;  %v5495_v11 = vmax.f32 %v5479_v21, 0.0  ;;  %v5959_v7 = vrot.slane %v15489_v62, %v15492_v6 }
 0x1d1   : > { %v5493_v14 = vmax.f32 %v5477_v18, 0.0  ;;  %v5497_v33 = vmax.f32 %v5481_v34, 0.0  ;;  %v5977_v22 = vmul.f32 %v5963_v50, %v11409_v44  ;;  %v5981_v4 = vmul.f32 %v5963_v50, %v11449_v30 }
 0x1d2   : > { %15491 = vst [vmem:[#allocation13_spill] sm:$0xff] %v12099_v12  ;;  %v12105_v52 = vpack.c.bf16 %v5495_v11, %v5491_v41  ;;  %v5979_v19 = vmul.f32 %v5971_v13, %v11411_v61  ;;  %v5983_v9 = vmul.f32 %v5971_v13, %v11451_v59  ;;  %v5976_v15 = vmul.f32 %v5959_v7, %v11400_v47  ;;  %v15495_v11 = vld [vmem:[#allocation12_spill] sm:$0xff] }
 0x1d3   : > { %v12110_v42 = vpack.c.bf16 %v5497_v33, %v5493_v14  ;;  %v5993_v48 = vadd.f32 %v5977_v22, %v11353_v0  ;;  %v5997_v21 = vadd.f32 %v5981_v4, %v11368_v38  ;;  %v5980_v18 = vmul.f32 %v5959_v7, %v11437_v49 }
 0x1d4   : > { %15493 = vst [vmem:[#allocation51_spill] sm:$0xff] %v12105_v52  ;;  %v5995_v34 = vadd.f32 %v5979_v19, %v15393_v10  ;;  %v5999_v12 = vadd.f32 %v5983_v9, %v11370_v39  ;;  %v5992_v41 = vadd.f32 %v5976_v15, %v15394_v51  ;;  %v5967_v52 = vrot.slane %v15489_v62, %v15495_v11 }
 0x1d5   : > { %15494 = vst [vmem:[#allocation14_spill] sm:$0xff] %v12110_v42  ;;  %v6009_v36 = vmax.f32 %v5993_v48, 0.0  ;;  %v6013_v37 = vmax.f32 %v5997_v21, 0.0  ;;  %v5996_v33 = vadd.f32 %v5980_v18, %v11361_v53  ;;  %v5985_v14 = vmul.f32 %v5963_v50, %v11475_v5 }
 0x1d6   : > { %v6011_v22 = vmax.f32 %v5995_v34, 0.0  ;;  %v6015_v42 = vmax.f32 %v5999_v12, 0.0  ;;  %v6008_v4 = vmax.f32 %v5992_v41, 0.0  ;;  %v5978_v28 = vmul.f32 %v5967_v52, %v15395_v58 }
 0x1d7   : > { %v12123_v27 = vpack.c.bf16 %v6013_v37, %v6009_v36  ;;  %v6012_v19 = vmax.f32 %v5996_v33, 0.0  ;;  %v5982_v9 = vmul.f32 %v5967_v52, %v11439_v32  ;;  %v5989_v15 = vmul.f32 %v5963_v50, %v11495_v46 }
 0x1d8   : > { %v12127_v25 = vpack.c.bf16 %v6015_v42, %v6011_v22  ;;  %v5994_v62 = vadd.f32 %v5978_v28, %v15397_v29  ;;  %v6001_v48 = vadd.f32 %v5985_v14, %v11381_v56  ;;  %v5987_v21 = vmul.f32 %v5971_v13, %v11477_v20 }
 0x1d9   : > { %15496 = vst [vmem:[#allocation11_spill] sm:$0xff] %v12123_v27  ;;  %v12132_v12 = vpack.c.bf16 %v6012_v19, %v6008_v4  ;;  %v5998_v18 = vadd.f32 %v5982_v9, %v11363_v60  ;;  %v6005_v37 = vadd.f32 %v5989_v15, %v11396_v23  ;;  %v5991_v36 = vmul.f32 %v5971_v13, %v11497_v43  ;;  %v10031_v4 = vld [vmem:[%s11100_s10 + $0x24] ss:$8 sm:$0xf] }
 0x1da   : > { %15497 = vst [vmem:[#allocation12_spill] sm:$0xff] %v12127_v25  ;;  %v6010_v34 = vmax.f32 %v5994_v62, 0.0  ;;  %v6017_v50 = vmax.f32 %v6001_v48, 0.0  ;;  %v6003_v42 = vadd.f32 %v5987_v21, %v11384_v1  ;;  %v5984_v28 = vmul.f32 %v5959_v7, %v11466_v8  ;;  %v10052_v62 = vld [vmem:[%s11100_s10 + $0x25] ss:$8 sm:$0xf] }
 0x1db   : > { %15498 = vst [vmem:[#allocation91_spill] sm:$0xff] %v12132_v12  ;;  %v6014_v41 = vmax.f32 %v5998_v18, 0.0  ;;  %v6021_v33 = vmax.f32 %v6005_v37, 0.0  ;;  %v6007_v14 = vadd.f32 %v5991_v36, %v11398_v24  ;;  %v5988_v22 = vmul.f32 %v5959_v7, %v11489_v17  ;;  %v10073_v7 = vld [vmem:[%s11100_s10 + $0x26] ss:$8 sm:$0xf] }
 0x1dc   : > { %v6019_v19 = vmax.f32 %v6003_v42, 0.0  ;;  %v6000_v9 = vadd.f32 %v5984_v28, %v11375_v40  ;;  %v5986_v13 = vmul.f32 %v5967_v52, %v11468_v63  ;;  %v5990_v15 = vmul.f32 %v5967_v52, %v11491_v45  ;;  %v10094_v25 = vld [vmem:[%s11100_s10 + $0x27] ss:$8 sm:$0xf] }
 0x1dd   : > { %v12146_v48 = vpack.c.bf16 %v6014_v41, %v6010_v34  ;;  %v12148_v21 = vpack.c.bf16 %v6021_v33, %v6017_v50  ;;  %v6023_v18 = vmax.f32 %v6007_v14, 0.0  ;;  %v6004_v37 = vadd.f32 %v5988_v22, %v11386_v2  ;;  %v12159_v34 = vld [vmem:[%s11092_s25 + $0x7] ss:$8 sm:$0xf] }
 0x1de   : > { %v6016_v36 = vmax.f32 %v6000_v9, 0.0  ;;  %v6002_v42 = vadd.f32 %v5986_v13, %v11378_v54  ;;  %v6006_v28 = vadd.f32 %v5990_v15, %v11388_v16  ;;  %v6476_v12 = vsub.f32 1.0, %v12097_v57  ;;  %15502 = vst [vmem:[#allocation95_spill] sm:$0xff] %v12159_v34  ;;  %v12164_v22 = vld [vmem:[%s11092_s25 + $0x6] ss:$8 sm:$0xf] }
 0x1df   : > { %15499 = vst [vmem:[#allocation92_spill] sm:$0xff] %v12146_v48  ;;  %15500 = vst [vmem:[#allocation93_spill] sm:$0xff] %v12148_v21  ;;  %v12156_v27 = vpack.c.bf16 %v6023_v18, %v6019_v19  ;;  %v6020_v52 = vmax.f32 %v6004_v37, 0.0  ;;  %v6478_v50 = vmul.f32 %v12159_v34, %v12097_v57  ;;  %v6999_v41 = vadd.f32 12.0, %v10031_v4 }
 0x1e0   : > { %v6018_v33 = vmax.f32 %v6002_v42, 0.0  ;;  %v6022_v14 = vmax.f32 %v6006_v28, 0.0  ;;  %15503 = vst [vmem:[#allocation96_spill] sm:$0xff] %v12164_v22  ;;  %v6477_v9 = vmul.f32 %v12164_v22, %v6476_v12  ;;  %v7524_v13 = vadd.f32 13.0, %v10052_v62 }
 0x1e1   : > { %15501 = vst [vmem:[#allocation94_spill] sm:$0xff] %v12156_v27  ;;  %v12167_v15 = vpack.c.bf16 %v6020_v52, %v6016_v36  ;;  %v7000_v21 = vmul.f32 0.0625, %v6999_v41  ;;  %v8049_v48 = vadd.f32 14.0, %v10073_v7  ;;  %v8574_v19 = vadd.f32 15.0, %v10094_v25 }
 0x1e2   : > { %v12169_v18 = vpack.c.bf16 %v6022_v14, %v6018_v33  ;;  %v6479_v37 = vadd.f32 %v6478_v50, %v6477_v9  ;;  %v12171_v27 = vmul.f32 0.0625, %v7524_v13 }
 0x1e3   : > { %15504 = vst [vmem:[#allocation97_spill] sm:$0xff] %v12167_v15  ;;  %v7001_v55 = vsub.f32 1.0, %v7000_v21  ;;  %v7003_v57 = vmul.f32 %v12159_v34, %v7000_v21  ;;  %v12174_v4 = vmul.f32 0.0625, %v8049_v48  ;;  %v12176_v42 = vmul.f32 0.0625, %v8574_v19 }
 0x1e4   : > { %15505 = vst [vmem:[#allocation98_spill] sm:$0xff] %v12169_v18  ;;  %v6488_v12 = vrot.slane %v6479_v37, %v15488_v35  ;;  %v6496_v62 = vrot.slane %v6479_v37, %v15490_v26  ;;  %v6484_v36 = vrot.slane %v6479_v37, %v15492_v6  ;;  %v6492_v25 = vrot.slane %v6479_v37, %v15495_v11 }
 0x1e5   : > { %15506 = vst [vmem:[#allocation99_spill] sm:$0xff] %v12174_v4  ;;  %15507 = vst [vmem:[#allocation100_spill] sm:$0xff] %v12176_v42  ;;  %v7002_v7 = vmul.f32 %v12164_v22, %v7001_v55  ;;  %v7526_v28 = vsub.f32 1.0, %v12171_v27  ;;  %v12186_v52 = vmul.f32 %v12159_v34, %v12171_v27 }
 0x1e6   : > { %v6502_v21 = vmul.f32 %v6488_v12, %v11409_v44  ;;  %v6506_v50 = vmul.f32 %v6488_v12, %v11449_v30  ;;  %v6504_v41 = vmul.f32 %v6496_v62, %v11411_v61  ;;  %v6508_v33 = vmul.f32 %v6496_v62, %v11451_v59 }
 0x1e7   : > { %v6501_v14 = vmul.f32 %v6484_v36, %v11400_v47  ;;  %v6505_v55 = vmul.f32 %v6484_v36, %v11437_v49  ;;  %v6503_v9 = vmul.f32 %v6492_v25, %v15395_v58  ;;  %v6507_v13 = vmul.f32 %v6492_v25, %v11439_v32 }
 0x1e8   : > { %v6518_v27 = vadd.f32 %v6502_v21, %v11353_v0  ;;  %v6522_v19 = vadd.f32 %v6506_v50, %v11368_v38  ;;  %v6520_v37 = vadd.f32 %v6504_v41, %v15393_v10  ;;  %v6524_v48 = vadd.f32 %v6508_v33, %v11370_v39 }
 0x1e9   : > { %v6517_v18 = vadd.f32 %v6501_v14, %v15394_v51  ;;  %v6521_v15 = vadd.f32 %v6505_v55, %v11361_v53  ;;  %v6519_v31 = vadd.f32 %v6503_v9, %v15397_v29  ;;  %v6523_v3 = vadd.f32 %v6507_v13, %v11363_v60 }
 0x1ea   : > { %v6534_v42 = vmax.f32 %v6518_v27, 0.0  ;;  %v6538_v34 = vmax.f32 %v6522_v19, 0.0  ;;  %v6536_v58 = vmax.f32 %v6520_v37, 0.0  ;;  %v6540_v32 = vmax.f32 %v6524_v48, 0.0 }
 0x1eb   : > { %v6533_v49 = vmax.f32 %v6517_v18, 0.0  ;;  %v6537_v21 = vmax.f32 %v6521_v15, 0.0  ;;  %v6535_v0 = vmax.f32 %v6519_v31, 0.0  ;;  %v6539_v50 = vmax.f32 %v6523_v3, 0.0 }
 0x1ec   : > { %v12205_v38 = vpack.c.bf16 %v6538_v34, %v6534_v42  ;;  %v12207_v41 = vpack.c.bf16 %v6540_v32, %v6536_v58  ;;  %v6510_v33 = vmul.f32 %v6488_v12, %v11475_v5  ;;  %v6514_v14 = vmul.f32 %v6488_v12, %v11495_v46 }
 0x1ed   : > { %v12211_v55 = vpack.c.bf16 %v6537_v21, %v6533_v49  ;;  %v12213_v9 = vpack.c.bf16 %v6539_v50, %v6535_v0  ;;  %v6512_v13 = vmul.f32 %v6496_v62, %v11477_v20  ;;  %v6516_v48 = vmul.f32 %v6496_v62, %v11497_v43 }
 0x1ee   : > { %15508 = vst [vmem:[#allocation101_spill] sm:$0xff] %v12205_v38  ;;  %15509 = vst [vmem:[#allocation102_spill] sm:$0xff] %v12207_v41  ;;  %v6526_v15 = vadd.f32 %v6510_v33, %v11381_v56  ;;  %v6530_v3 = vadd.f32 %v6514_v14, %v11396_v23  ;;  %v6509_v31 = vmul.f32 %v6484_v36, %v11466_v8 }
 0x1ef   : > { %15510 = vst [vmem:[#allocation103_spill] sm:$0xff] %v12211_v55  ;;  %15511 = vst [vmem:[#allocation104_spill] sm:$0xff] %v12213_v9  ;;  %v6513_v32 = vmul.f32 %v6484_v36, %v11489_v17  ;;  %v6528_v58 = vadd.f32 %v6512_v13, %v11384_v1  ;;  %v6532_v34 = vadd.f32 %v6516_v48, %v11398_v24 }
 0x1f0   : > { %v6511_v49 = vmul.f32 %v6492_v25, %v11468_v63  ;;  %v6515_v0 = vmul.f32 %v6492_v25, %v11491_v45  ;;  %v6542_v18 = vmax.f32 %v6526_v15, 0.0  ;;  %v6546_v42 = vmax.f32 %v6530_v3, 0.0 }
 0x1f1   : > { %v6525_v12 = vadd.f32 %v6509_v31, %v11375_v40  ;;  %v6529_v62 = vadd.f32 %v6513_v32, %v11386_v2  ;;  %v6544_v27 = vmax.f32 %v6528_v58, 0.0  ;;  %v6548_v19 = vmax.f32 %v6532_v34, 0.0 }
 0x1f2   : > { %v6527_v37 = vadd.f32 %v6511_v49, %v11378_v54  ;;  %v6531_v36 = vadd.f32 %v6515_v0, %v11388_v16  ;;  %v12229_v21 = vpack.c.bf16 %v6546_v42, %v6542_v18  ;;  %v7004_v14 = vadd.f32 %v7003_v57, %v7002_v7 }
 0x1f3   : > { %v6541_v50 = vmax.f32 %v6525_v12, 0.0  ;;  %v6545_v33 = vmax.f32 %v6529_v62, 0.0  ;;  %v12231_v13 = vpack.c.bf16 %v6548_v19, %v6544_v27  ;;  %v7527_v15 = vmul.f32 %v12164_v22, %v7526_v28  ;;  %v15518_v27 = vld [vmem:[#allocation52_spill] sm:$0xff] }
 0x1f4   : > { %15512 = vst [vmem:[#allocation105_spill] sm:$0xff] %v12229_v21  ;;  %v6543_v25 = vmax.f32 %v6527_v37, 0.0  ;;  %v6547_v48 = vmax.f32 %v6531_v36, 0.0  ;;  %v7013_v31 = vrot.slane %v7004_v14, %v15488_v35  ;;  %v7021_v32 = vrot.slane %v7004_v14, %v15490_v26  ;;  %v15519_v37 = vld [vmem:[#allocation49_spill] sm:$0xff] }
 0x1f5   : > { %15513 = vst [vmem:[#allocation106_spill] sm:$0xff] %v12231_v13  ;;  %v12234_v3 = vpack.c.bf16 %v6545_v33, %v6541_v50  ;;  %v7009_v58 = vrot.slane %v7004_v14, %v15492_v6  ;;  %v7017_v49 = vrot.slane %v7004_v14, %v15495_v11  ;;  %v12243_v57 = vadd.f32 %v12186_v52, %v7527_v15  ;;  %v15520_v36 = vld [vmem:[#allocation53_spill] sm:$0xff]  ;;  %v15521_v33 = vld [vmem:[#allocation42_spill] sm:$0xff] }
 0x1f6   : > { %v12239_v34 = vpack.c.bf16 %v6547_v48, %v6543_v25  ;;  %v15516_v7 = vsub.f32 1.0, %v12174_v4  ;;  %v7027_v28 = vmul.f32 %v7013_v31, %v11409_v44  ;;  %v7031_v18 = vmul.f32 %v7013_v31, %v11449_v30  ;;  %v15522_v25 = vld [vmem:[#allocation46_spill] sm:$0xff] }
 0x1f7   : > { %15514 = vst [vmem:[#allocation107_spill] sm:$0xff] %v12234_v3  ;;  %v7029_v42 = vmul.f32 %v7021_v32, %v11411_v61  ;;  %v7033_v12 = vmul.f32 %v7021_v32, %v11451_v59  ;;  %v7026_v62 = vmul.f32 %v7009_v58, %v11400_v47  ;;  %v7030_v19 = vmul.f32 %v7009_v58, %v15518_v27 }
 0x1f8   : > { %15515 = vst [vmem:[#allocation108_spill] sm:$0xff] %v12239_v34  ;;  %v12248_v0 = vmul.f32 %v12164_v22, %v15516_v7  ;;  %v7028_v52 = vmul.f32 %v7017_v49, %v15519_v37  ;;  %v7032_v50 = vmul.f32 %v7017_v49, %v15520_v36  ;;  %v7043_v14 = vadd.f32 %v7027_v28, %v15521_v33 }
 0x1f9   : > { %v7047_v48 = vadd.f32 %v7031_v18, %v15522_v25  ;;  %v7045_v15 = vadd.f32 %v7029_v42, %v15393_v10  ;;  %v7049_v7 = vadd.f32 %v7033_v12, %v11370_v39  ;;  %v7042_v34 = vadd.f32 %v7026_v62, %v15394_v51 }
 0x1fa   : > { %15517 = vst [vmem:[#allocation109_spill] sm:$0xff] %v12248_v0  ;;  %v7046_v3 = vadd.f32 %v7030_v19, %v11361_v53  ;;  %v7044_v13 = vadd.f32 %v7028_v52, %v15397_v29  ;;  %v7048_v21 = vadd.f32 %v7032_v50, %v11363_v60  ;;  %v7059_v9 = vmax.f32 %v7043_v14, 0.0 }
 0x1fb   : > { %v7063_v55 = vmax.f32 %v7047_v48, 0.0  ;;  %v7061_v41 = vmax.f32 %v7045_v15, 0.0  ;;  %v7065_v38 = vmax.f32 %v7049_v7, 0.0  ;;  %v7058_v22 = vmax.f32 %v7042_v34, 0.0 }
 0x1fc   : > { %v7062_v28 = vmax.f32 %v7046_v3, 0.0  ;;  %v7060_v0 = vmax.f32 %v7044_v13, 0.0  ;;  %v7064_v18 = vmax.f32 %v7048_v21, 0.0  ;;  %v7035_v12 = vmul.f32 %v7013_v31, %v11475_v5 }
 0x1fd   : > { %v12266_v4 = vpack.c.bf16 %v7063_v55, %v7059_v9  ;;  %v12268_v42 = vpack.c.bf16 %v7065_v38, %v7061_v41  ;;  %v7039_v62 = vmul.f32 %v7013_v31, %v11495_v46  ;;  %v7037_v50 = vmul.f32 %v7021_v32, %v11477_v20 }
 0x1fe   : > { %v12272_v19 = vpack.c.bf16 %v7062_v28, %v7058_v22  ;;  %v12274_v52 = vpack.c.bf16 %v7064_v18, %v7060_v0  ;;  %v7041_v14 = vmul.f32 %v7021_v32, %v11497_v43  ;;  %v7051_v3 = vadd.f32 %v7035_v12, %v11381_v56 }
 0x1ff   : > { %15523 = vst [vmem:[#allocation52_spill] sm:$0xff] %v12266_v4  ;;  %15524 = vst [vmem:[#allocation49_spill] sm:$0xff] %v12268_v42  ;;  %v7055_v21 = vadd.f32 %v7039_v62, %v11396_v23  ;;  %v7034_v55 = vmul.f32 %v7009_v58, %v11466_v8  ;;  %v7038_v38 = vmul.f32 %v7009_v58, %v11489_v17 }
 0x200   : > { %15525 = vst [vmem:[#allocation53_spill] sm:$0xff] %v12272_v19  ;;  %15526 = vst [vmem:[#allocation42_spill] sm:$0xff] %v12274_v52  ;;  %v7053_v41 = vadd.f32 %v7037_v50, %v11384_v1  ;;  %v7057_v9 = vadd.f32 %v7041_v14, %v11398_v24  ;;  %v7036_v22 = vmul.f32 %v7017_v49, %v11468_v63  ;;  %v7067_v31 = vmax.f32 %v7051_v3, 0.0 }
 0x201   : > { %v7040_v13 = vmul.f32 %v7017_v49, %v11491_v45  ;;  %v7071_v34 = vmax.f32 %v7055_v21, 0.0  ;;  %v7050_v32 = vadd.f32 %v7034_v55, %v11375_v40  ;;  %v7054_v0 = vadd.f32 %v7038_v38, %v11386_v2 }
 0x202   : > { %v7069_v48 = vmax.f32 %v7053_v41, 0.0  ;;  %v7073_v15 = vmax.f32 %v7057_v9, 0.0  ;;  %v7052_v7 = vadd.f32 %v7036_v22, %v11378_v54  ;;  %v7538_v62 = vrot.slane %v12243_v57, %v15488_v35 }
 0x203   : > { %v7056_v58 = vadd.f32 %v7040_v13, %v11388_v16  ;;  %v12290_v28 = vpack.c.bf16 %v7071_v34, %v7067_v31  ;;  %v7066_v18 = vmax.f32 %v7050_v32, 0.0  ;;  %v7070_v12 = vmax.f32 %v7054_v0, 0.0 }
 0x204   : > { %v12294_v49 = vpack.c.bf16 %v7073_v15, %v7069_v48  ;;  %v7068_v50 = vmax.f32 %v7052_v7, 0.0  ;;  %v7546_v3 = vrot.slane %v12243_v57, %v15490_v26  ;;  %v7552_v55 = vmul.f32 %v7538_v62, %v11409_v44 }
 0x205   : > { %15527 = vst [vmem:[#allocation110_spill] sm:$0xff] %v12290_v28  ;;  %v7072_v14 = vmax.f32 %v7056_v58, 0.0  ;;  %v12298_v21 = vpack.c.bf16 %v7070_v12, %v7066_v18  ;;  %v7556_v38 = vmul.f32 %v7538_v62, %v11449_v30  ;;  %v7534_v41 = vrot.slane %v12243_v57, %v15492_v6 }
 0x206   : > { %15528 = vst [vmem:[#allocation111_spill] sm:$0xff] %v12294_v49  ;;  %v7554_v22 = vmul.f32 %v7546_v3, %v11411_v61  ;;  %v7558_v13 = vmul.f32 %v7546_v3, %v11451_v59  ;;  %v7542_v31 = vrot.slane %v12243_v57, %v15495_v11  ;;  %v7568_v34 = vadd.f32 %v7552_v55, %v15521_v33 }
 0x207   : > { %15529 = vst [vmem:[#allocation112_spill] sm:$0xff] %v12298_v21  ;;  %v12304_v9 = vpack.c.bf16 %v7072_v14, %v7068_v50  ;;  %v7572_v32 = vadd.f32 %v7556_v38, %v15522_v25  ;;  %v7551_v0 = vmul.f32 %v7534_v41, %v11400_v47  ;;  %v7555_v48 = vmul.f32 %v7534_v41, %v15518_v27 }
 0x208   : > { %v7570_v15 = vadd.f32 %v7554_v22, %v15393_v10  ;;  %v7574_v7 = vadd.f32 %v7558_v13, %v11370_v39  ;;  %v7553_v58 = vmul.f32 %v7542_v31, %v15519_v37  ;;  %v7557_v18 = vmul.f32 %v7542_v31, %v15520_v36 }
 0x209   : > { %15530 = vst [vmem:[#allocation113_spill] sm:$0xff] %v12304_v9  ;;  %v7584_v12 = vmax.f32 %v7568_v34, 0.0  ;;  %v7588_v50 = vmax.f32 %v7572_v32, 0.0  ;;  %v7567_v57 = vadd.f32 %v7551_v0, %v15394_v51  ;;  %v7571_v14 = vadd.f32 %v7555_v48, %v11361_v53 }
 0x20a   : > { %v7586_v55 = vmax.f32 %v7570_v15, 0.0  ;;  %v7590_v38 = vmax.f32 %v7574_v7, 0.0  ;;  %v7569_v9 = vadd.f32 %v7553_v58, %v15397_v29  ;;  %v7573_v21 = vadd.f32 %v7557_v18, %v11363_v60 }
 0x20b   : > { %v12322_v49 = vpack.c.bf16 %v7588_v50, %v7584_v12  ;;  %v7583_v22 = vmax.f32 %v7567_v57, 0.0  ;;  %v7587_v13 = vmax.f32 %v7571_v14, 0.0  ;;  %v7560_v28 = vmul.f32 %v7538_v62, %v11475_v5 }
 0x20c   : > { %v12325_v52 = vpack.c.bf16 %v7590_v38, %v7586_v55  ;;  %v7585_v34 = vmax.f32 %v7569_v9, 0.0  ;;  %v7589_v32 = vmax.f32 %v7573_v21, 0.0  ;;  %v7564_v0 = vmul.f32 %v7538_v62, %v11495_v46 }
 0x20d   : > { %15531 = vst [vmem:[#allocation114_spill] sm:$0xff] %v12322_v49  ;;  %v12328_v19 = vpack.c.bf16 %v7587_v13, %v7583_v22  ;;  %v7576_v48 = vadd.f32 %v7560_v28, %v11381_v56  ;;  %v7562_v15 = vmul.f32 %v7546_v3, %v11477_v20  ;;  %v7566_v7 = vmul.f32 %v7546_v3, %v11497_v43 }
 0x20e   : > { %15532 = vst [vmem:[#allocation115_spill] sm:$0xff] %v12325_v52  ;;  %v12333_v58 = vpack.c.bf16 %v7589_v32, %v7585_v34  ;;  %v7580_v18 = vadd.f32 %v7564_v0, %v11396_v23  ;;  %v7559_v12 = vmul.f32 %v7534_v41, %v11466_v8  ;;  %v7563_v50 = vmul.f32 %v7534_v41, %v11489_v17  ;;  %v15535_v34 = vld [vmem:[#allocation99_spill] sm:$0xff] }
 0x20f   : > { %15533 = vst [vmem:[#allocation116_spill] sm:$0xff] %v12328_v19  ;;  %v7592_v9 = vmax.f32 %v7576_v48, 0.0  ;;  %v7578_v21 = vadd.f32 %v7562_v15, %v11384_v1  ;;  %v7582_v62 = vadd.f32 %v7566_v7, %v11398_v24  ;;  %v7561_v57 = vmul.f32 %v7542_v31, %v11468_v63  ;;  %v15536_v41 = vld [vmem:[#allocation95_spill] sm:$0xff] }
 0x210   : > { %15534 = vst [vmem:[#allocation117_spill] sm:$0xff] %v12333_v58  ;;  %v7596_v28 = vmax.f32 %v7580_v18, 0.0  ;;  %v7575_v14 = vadd.f32 %v7559_v12, %v11375_v40  ;;  %v7579_v3 = vadd.f32 %v7563_v50, %v11386_v2  ;;  %v7565_v55 = vmul.f32 %v7542_v31, %v11491_v45  ;;  %v15539_v12 = vld [vmem:[#allocation109_spill] sm:$0xff]  ;;  %v15540_v50 = vld [vmem:[#allocation100_spill] sm:$0xff] }
 0x211   : > { %v7594_v38 = vmax.f32 %v7578_v21, 0.0  ;;  %v7598_v22 = vmax.f32 %v7582_v62, 0.0  ;;  %v7577_v13 = vadd.f32 %v7561_v57, %v11378_v54  ;;  %v8053_v32 = vmul.f32 %v15536_v41, %v15535_v34 }
 0x212   : > { %v12347_v0 = vpack.c.bf16 %v7596_v28, %v7592_v9  ;;  %v7591_v48 = vmax.f32 %v7575_v14, 0.0  ;;  %v7595_v15 = vmax.f32 %v7579_v3, 0.0  ;;  %v7581_v7 = vadd.f32 %v7565_v55, %v11388_v16  ;;  %v15543_v3 = vld [vmem:[#allocation96_spill] sm:$0xff] }
 0x213   : > { %v12350_v18 = vpack.c.bf16 %v7598_v22, %v7594_v38  ;;  %v8054_v58 = vadd.f32 %v8053_v32, %v15539_v12  ;;  %v8576_v19 = vsub.f32 1.0, %v15540_v50  ;;  %v7593_v21 = vmax.f32 %v7577_v13, 0.0 }
 0x214   : > { %15537 = vst [vmem:[#allocation99_spill] sm:$0xff] %v12347_v0  ;;  %v12354_v31 = vpack.c.bf16 %v7595_v15, %v7591_v48  ;;  %v7597_v62 = vmax.f32 %v7581_v7, 0.0  ;;  %v8578_v38 = vmul.f32 %v15536_v41, %v15540_v50 }
 0x215   : > { %15538 = vst [vmem:[#allocation95_spill] sm:$0xff] %v12350_v18  ;;  %v8063_v57 = vrot.slane %v8054_v58, %v15488_v35  ;;  %v8071_v34 = vrot.slane %v8054_v58, %v15490_v26  ;;  %v8059_v9 = vrot.slane %v8054_v58, %v15492_v6  ;;  %v8067_v28 = vrot.slane %v8054_v58, %v15495_v11 }
 0x216   : > { %15541 = vst [vmem:[#allocation109_spill] sm:$0xff] %v12354_v31  ;;  %v12360_v14 = vpack.c.bf16 %v7597_v62, %v7593_v21  ;;  %v8577_v55 = vmul.f32 %v15543_v3, %v8576_v19 }
 0x217   : > { %v8077_v22 = vmul.f32 %v8063_v57, %v11409_v44  ;;  %v8081_v13 = vmul.f32 %v8063_v57, %v11449_v30  ;;  %v8079_v32 = vmul.f32 %v8071_v34, %v11411_v61  ;;  %v8083_v48 = vmul.f32 %v8071_v34, %v11451_v59 }
 0x218   : > { %15542 = vst [vmem:[#allocation100_spill] sm:$0xff] %v12360_v14  ;;  %v8076_v15 = vmul.f32 %v8059_v9, %v11400_v47  ;;  %v8080_v7 = vmul.f32 %v8059_v9, %v15518_v27  ;;  %v8078_v58 = vmul.f32 %v8067_v28, %v15519_v37  ;;  %v8082_v12 = vmul.f32 %v8067_v28, %v15520_v36 }
 0x219   : > { %v8093_v19 = vadd.f32 %v8077_v22, %v15521_v33  ;;  %v8097_v41 = vadd.f32 %v8081_v13, %v15522_v25  ;;  %v8095_v50 = vadd.f32 %v8079_v32, %v15393_v10  ;;  %v8099_v21 = vadd.f32 %v8083_v48, %v11370_v39 }
 0x21a   : > { %v8092_v62 = vadd.f32 %v8076_v15, %v15394_v51  ;;  %v8096_v3 = vadd.f32 %v8080_v7, %v11361_v53  ;;  %v8094_v14 = vadd.f32 %v8078_v58, %v15397_v29  ;;  %v8098_v31 = vadd.f32 %v8082_v12, %v11363_v60 }
 0x21b   : > { %v8109_v18 = vmax.f32 %v8093_v19, 0.0  ;;  %v8113_v0 = vmax.f32 %v8097_v41, 0.0  ;;  %v8111_v52 = vmax.f32 %v8095_v50, 0.0  ;;  %v8115_v49 = vmax.f32 %v8099_v21, 0.0 }
 0x21c   : > { %v8108_v42 = vmax.f32 %v8092_v62, 0.0  ;;  %v8112_v22 = vmax.f32 %v8096_v3, 0.0  ;;  %v8110_v4 = vmax.f32 %v8094_v14, 0.0  ;;  %v8114_v13 = vmax.f32 %v8098_v31, 0.0 }
 0x21d   : > { %v12381_v25 = vpack.c.bf16 %v8113_v0, %v8109_v18  ;;  %v12383_v32 = vpack.c.bf16 %v8115_v49, %v8111_v52  ;;  %v8085_v48 = vmul.f32 %v8063_v57, %v11475_v5  ;;  %v8089_v15 = vmul.f32 %v8063_v57, %v11495_v46 }
 0x21e   : > { %v12387_v7 = vpack.c.bf16 %v8112_v22, %v8108_v42  ;;  %v12389_v58 = vpack.c.bf16 %v8114_v13, %v8110_v4  ;;  %v8087_v12 = vmul.f32 %v8071_v34, %v11477_v20  ;;  %v8091_v19 = vmul.f32 %v8071_v34, %v11497_v43 }
 0x21f   : > { %v8101_v41 = vadd.f32 %v8085_v48, %v11381_v56  ;;  %v8105_v31 = vadd.f32 %v8089_v15, %v11396_v23  ;;  %v8084_v0 = vmul.f32 %v8059_v9, %v11466_v8  ;;  %v8088_v52 = vmul.f32 %v8059_v9, %v11489_v17 }
 0x220   : > { %v8103_v49 = vadd.f32 %v8087_v12, %v11384_v1  ;;  %v8107_v18 = vadd.f32 %v8091_v19, %v11398_v24  ;;  %v8086_v42 = vmul.f32 %v8067_v28, %v11468_v63  ;;  %v8090_v4 = vmul.f32 %v8067_v28, %v11491_v45 }
 0x221   : > { %v8117_v57 = vmax.f32 %v8101_v41, 0.0  ;;  %v8121_v14 = vmax.f32 %v8105_v31, 0.0  ;;  %v8100_v34 = vadd.f32 %v8084_v0, %v11375_v40  ;;  %v8104_v50 = vadd.f32 %v8088_v52, %v11386_v2 }
 0x222   : > { %v8119_v21 = vmax.f32 %v8103_v49, 0.0  ;;  %v8123_v62 = vmax.f32 %v8107_v18, 0.0  ;;  %v8102_v3 = vadd.f32 %v8086_v42, %v11378_v54  ;;  %v8106_v9 = vadd.f32 %v8090_v4, %v11388_v16 }
 0x223   : > { %v12405_v22 = vpack.c.bf16 %v8121_v14, %v8117_v57  ;;  %v8116_v13 = vmax.f32 %v8100_v34, 0.0  ;;  %v8120_v48 = vmax.f32 %v8104_v50, 0.0  ;;  %v8579_v15 = vadd.f32 %v8578_v38, %v8577_v55  ;;  %v15545_v34 = vld [vmem:[#allocation46_spill] sm:$0xff] }
 0x224   : > { %v12407_v12 = vpack.c.bf16 %v8123_v62, %v8119_v21  ;;  %v8118_v28 = vmax.f32 %v8102_v3, 0.0  ;;  %v8122_v19 = vmax.f32 %v8106_v9, 0.0 }
 0x225   : > { %v12409_v41 = vpack.c.bf16 %v8120_v48, %v8116_v13  ;;  %v8588_v31 = vrot.slane %v8579_v15, %v15488_v35  ;;  %v8596_v0 = vrot.slane %v8579_v15, %v15490_v26  ;;  %v8584_v52 = vrot.slane %v8579_v15, %v15492_v6 }
 0x226   : > { %v12414_v49 = vpack.c.bf16 %v8122_v19, %v8118_v28  ;;  %v8592_v18 = vrot.slane %v8579_v15, %v15495_v11 }
 0x227   : > { %v8602_v42 = vmul.f32 %v8588_v31, %v11409_v44  ;;  %v8606_v55 = vmul.f32 %v8588_v31, %v11449_v30  ;;  %v8604_v38 = vmul.f32 %v8596_v0, %v11411_v61  ;;  %v8608_v4 = vmul.f32 %v8596_v0, %v11451_v59 }
 0x228   : > { %15544 = vst [vmem:[#allocation96_spill] sm:$0xff] %v12414_v49  ;;  %v8601_v57 = vmul.f32 %v8584_v52, %v11400_v47  ;;  %v8605_v35 = vmul.f32 %v8584_v52, %v15518_v27  ;;  %v8603_v26 = vmul.f32 %v8592_v18, %v15519_v37  ;;  %v8607_v6 = vmul.f32 %v8592_v18, %v15520_v36 }
 0x229   : > { %v8618_v14 = vadd.f32 %v8602_v42, %v15521_v33  ;;  %v8622_v11 = vadd.f32 %v8606_v55, %v15545_v34  ;;  %v8620_v44 = vadd.f32 %v8604_v38, %v15393_v10  ;;  %v8624_v30 = vadd.f32 %v8608_v4, %v11370_v39  ;;  %v12449_v55 = vpop.permute.xlu0 %946 }
 0x22a   : > { %v8617_v61 = vadd.f32 %v8601_v57, %v15394_v51  ;;  %v8621_v59 = vadd.f32 %v8605_v35, %v11361_v53  ;;  %v8619_v47 = vadd.f32 %v8603_v26, %v15397_v29  ;;  %v8623_v27 = vadd.f32 %v8607_v6, %v11363_v60 }
 0x22b   : > { %v8634_v50 = vmax.f32 %v8618_v14, 0.0  ;;  %v8638_v37 = vmax.f32 %v8622_v11, 0.0  ;;  %v8636_v21 = vmax.f32 %v8620_v44, 0.0  ;;  %v8640_v36 = vmax.f32 %v8624_v30, 0.0 }
 0x22c   : > { %v8633_v62 = vmax.f32 %v8617_v61, 0.0  ;;  %v8637_v33 = vmax.f32 %v8621_v59, 0.0  ;;  %v8635_v3 = vmax.f32 %v8619_v47, 0.0  ;;  %v8639_v9 = vmax.f32 %v8623_v27, 0.0 }
 0x22d   : > { %v12433_v13 = vpack.c.bf16 %v8638_v37, %v8634_v50  ;;  %v12435_v10 = vpack.c.bf16 %v8640_v36, %v8636_v21  ;;  %v8610_v39 = vmul.f32 %v8588_v31, %v11475_v5  ;;  %v8614_v53 = vmul.f32 %v8588_v31, %v11495_v46 }
 0x22e   : > { %v12439_v51 = vpack.c.bf16 %v8637_v33, %v8633_v62  ;;  %v12441_v29 = vpack.c.bf16 %v8639_v9, %v8635_v3  ;;  %v8612_v60 = vmul.f32 %v8596_v0, %v11477_v20  ;;  %v8616_v48 = vmul.f32 %v8596_v0, %v11497_v43  ;;  %v12490_v9 = vld [vmem:[%s15200_s7] sm:$0xff] }
 0x22f   : > { %15546 = vst [vmem:[#allocation46_spill] sm:$0xff] %v12433_v13  ;;  %15547 = vst [vmem:[#allocation118_spill] sm:$0xff] %v12435_v10  ;;  %v8626_v15 = vadd.f32 %v8610_v39, %v11381_v56  ;;  %v8630_v28 = vadd.f32 %v8614_v53, %v11396_v23  ;;  %v8609_v19 = vmul.f32 %v8584_v52, %v11466_v8 }
 0x230   : > { %15548 = vst [vmem:[#allocation119_spill] sm:$0xff] %v12439_v51  ;;  %15549 = vst [vmem:[#allocation120_spill] sm:$0xff] %v12441_v29  ;;  %v8613_v42 = vmul.f32 %v8584_v52, %v11489_v17  ;;  %v8628_v5 = vadd.f32 %v8612_v60, %v11384_v1  ;;  %v8632_v46 = vadd.f32 %v8616_v48, %v11398_v24  ;;  %v12455_v38 = vpop.f32.mrb[16].mxu0  ;;  %v12457_v43 = vpop.f32.mrb[16].mxu1  ;;  %v15554_v60 = vld [vmem:[#allocation54_spill] sm:$0xff]  ;;  %v15555_v48 = vld [vmem:[#allocation55_spill] sm:$0xff] }
 0x231   : > { %v8611_v31 = vmul.f32 %v8592_v18, %v11468_v63  ;;  %v8615_v20 = vmul.f32 %v8592_v18, %v11491_v45  ;;  %v8642_v56 = vmax.f32 %v8626_v15, 0.0  ;;  %v8646_v23 = vmax.f32 %v8630_v28, 0.0  ;;  %v12465_v24 = vpop.f32.mrb[17].mxu0  ;;  %v12467_v63 = vpop.f32.mrb[17].mxu1  ;;  %v15556_v15 = vld [vmem:[#allocation56_spill] sm:$0xff] }
 0x232   : > { %v8625_v8 = vadd.f32 %v8609_v19, %v11375_v40  ;;  %v8629_v17 = vadd.f32 %v8613_v42, %v11386_v2  ;;  %v949_v0 = vadd.f32 %v12449_v55, %v12455_v38  ;;  %v951_v1 = vadd.f32 %v12449_v55, %v12457_v43  ;;  %v12514_v28 = vld [vmem:[%s15200_s7 + $0x8] sm:$0xff]  ;;  %v15557_v19 = vld [vmem:[#allocation57_spill] sm:$0xff]  ;;  %v15558_v42 = vld [vmem:[#allocation58_spill] sm:$0xff] }
 0x233   : > { %v8644_v45 = vmax.f32 %v8628_v5, 0.0  ;;  %v8648_v52 = vmax.f32 %v8632_v46, 0.0  ;;  %v950_v18 = vadd.f32 %v12449_v55, %v12465_v24  ;;  %v952_v40 = vadd.f32 %v12449_v55, %v12467_v63  ;;  %v15559_v5 = vld [vmem:[#allocation59_spill] sm:$0xff] }
 0x234   : > { %v12473_v4 = vpack.c.bf16 %v8646_v23, %v8642_v56  ;;  %v8641_v2 = vmax.f32 %v8625_v8, 0.0  ;;  %v9786_v57 = vmul.f32 -1.442695, %v949_v0  ;;  %v9788_v35 = vmul.f32 -1.442695, %v951_v1  ;;  %v15562_v56 = vld [vmem:[#allocation15_spill] sm:$0xff] }
 0x235   : > { %v12475_v26 = vpack.c.bf16 %v8648_v52, %v8644_v45  ;;  %v8645_v6 = vmax.f32 %v8629_v17, 0.0  ;;  %v9787_v14 = vmul.f32 -1.442695, %v950_v18  ;;  %v9789_v34 = vmul.f32 -1.442695, %v952_v40  ;;  %v12543_v23 = vld [vmem:[%s15197_s4] sm:$0xff] }
 0x236   : > { %15550 = vst [vmem:[#allocation121_spill] sm:$0xff] %v12473_v4  ;;  %v8627_v11 = vadd.f32 %v8611_v31, %v11378_v54  ;;  %v8631_v44 = vadd.f32 %v8615_v20, %v11388_v16  ;;  %10460 = vpow2.f32 %v9786_v57  ;;  %v15560_v46 = vmov 0.0   ;;  %v15561_v31 = vld [vmem:[#allocation60_spill] sm:$0xff]  ;;  %v12529_v20 = vld [vmem:[%s15200_s7 + $0x10] sm:$0x3]  ;;  %v15563_v17 = vld [vmem:[#allocation50_spill] sm:$0xff] }
 0x237   : > { %15551 = vst [vmem:[#allocation122_spill] sm:$0xff] %v12475_v26  ;;  %v12479_v30 = vpack.c.bf16 %v8645_v6, %v8641_v2  ;;  %10462 = vpow2.f32 %v9788_v35  ;;  %v12554_v8 = vld [vmem:[%s15197_s4 + $0x8] sm:$0xff] }
 0x238   : > { %v8643_v61 = vmax.f32 %v8627_v11, 0.0  ;;  %v8647_v59 = vmax.f32 %v8631_v44, 0.0  ;;  %10464 = vpow2.f32 %v9787_v14 }
 0x239   : > { %15552 = vst [vmem:[#allocation123_spill] sm:$0xff] %v12479_v30  ;;  %10466 = vpow2.f32 %v9789_v34 }
 0x23a   : > { %v12481_v47 = vpack.c.bf16 %v8647_v59, %v8643_v61 }
 0x23c   : > { %15553 = vst [vmem:[#allocation124_spill] sm:$0xff] %v12481_v47 }
 0x240   : > { %v10461_v27 = vpop.eup %10460 }
 0x241   : > { %v10463_v50 = vpop.eup %10462  ;;  %v965_v37 = vadd.f32 1.0, %v10461_v27 }
 0x242   : > { %v10465_v21 = vpop.eup %10464  ;;  %v967_v62 = vadd.f32 1.0, %v10463_v50 }
 0x243   : > { %v10467_v36 = vpop.eup %10466  ;;  %v966_v33 = vadd.f32 1.0, %v10465_v21  ;;  %10468 = vrcp.f32 %v965_v37 }
 0x244   : > { %v968_v54 = vadd.f32 1.0, %v10467_v36 }
 0x245   : > { %10470 = vrcp.f32 %v966_v33 }
 0x246   : > { %10472 = vrcp.f32 %v968_v54 }
 0x247   : > { %10474 = vrcp.f32 %v967_v62 }
 0x24d   : > { %v12483_v16 = vpop.eup %10468 }
 0x24f   : > { %v12485_v3 = vpop.eup %10470 }
 0x250   : > { %v12492_v39 = vpop.eup %10472  ;;  %9790 = vmatprep.subr.msk.mxu0 %vm987_vm3, %v12485_v3 }
 0x251   : > { %v12496_v53 = vpop.eup %10474  ;;  %9795 = vmatprep.subr.msk.mxu1 %vm987_vm3, %v12492_v39  ;;  %9791 = vmatpush1.msk.msra.mxu0 %vm987_vm3, %v12483_v16 }
 0x252   : > { %9796 = vmatpush1.msk.msra.mxu1 %vm987_vm3, %v12496_v53  ;;  %9792 = vmatmul.mubr.msk.f32.vlgmr.msra.gmra.mrb[22].mxu0 %vm977_vm4, %v12490_v9 }
 0x253   : > { %9797 = vmatmul.mubr.msk.f32.vlgmr.msra.gmra.mrb[22].mxu1 %vm977_vm4, %v12490_v9  ;;  %10159 = vmatprep.subr.bf16.mxu0 %v15554_v60 }
 0x254   : > { %10167 = vmatprep.subr.bf16.mxu1 %v15555_v48  ;;  %10161 = vmatpush1.bf16.msra.mxu0 %v15556_v15 }
 0x255   : > { %10169 = vmatpush1.bf16.msra.mxu1 %v15557_v19  ;;  %10163 = vmatprep.subr.bf16.mxu0 %v15558_v42 }
 0x256   : > { %10171 = vmatprep.subr.bf16.mxu1 %v15559_v5  ;;  %1070 = vmatprep.mubr.f32.mxu0 %v15560_v46 }
 0x257   : > { %1153 = vmatprep.mubr.f32.mxu1 %v15560_v46  ;;  %9793 = vmatmul.mubr.msk.f32.gmra.mrb[24].mxu0 %vm977_vm4, %v12514_v28 }
 0x258   : > { %9798 = vmatmul.mubr.msk.f32.gmra.mrb[24].mxu1 %vm977_vm4, %v12514_v28  ;;  %10165 = vmatpush1.bf16.msra.mxu0 %v15561_v31 }
 0x259   : > { %10173 = vmatpush1.bf16.msra.mxu1 %v15562_v56  ;;  %1076 = vmatprep.mubr.f32.mxu0 %v15560_v46 }
 0x25a   : > { %1159 = vmatprep.mubr.f32.mxu1 %v15560_v46 }
 0x25b   : > { %9794 = vmatmul.mubr.msk.f32.gmra.mrb[26].mxu0 %vm977_vm4, %v12529_v20 }
 0x25c   : > { %9799 = vmatmul.mubr.msk.f32.gmra.mrb[26].mxu1 %vm977_vm4, %v12529_v20  ;;  %1363 = vmatprep.mubr.f32.mxu0 %v15560_v46 }
 0x25d   : > { %1446 = vmatprep.mubr.f32.mxu1 %v15560_v46 }
 0x25f   : > { %9801 = vmatmul.mubr.msk.f32.vlgmr.msra.gmra.mrb[28].mxu0 %vm768_vm2, %v12543_v23 }
 0x260   : > { %9804 = vmatmul.mubr.msk.f32.vlgmr.msra.gmra.mrb[28].mxu1 %vm768_vm2, %v12543_v23  ;;  %1369 = vmatprep.mubr.f32.mxu0 %v15560_v46 }
 0x261   : > { %1452 = vmatprep.mubr.f32.mxu1 %v15560_v46 }
 0x263   : > { %9802 = vmatmul.mubr.msk.f32.gmra.mrb[30].mxu0 %vm768_vm2, %v12554_v8 }
 0x264   : > { %9805 = vmatmul.mubr.msk.f32.gmra.mrb[30].mxu1 %vm768_vm2, %v12554_v8  ;;  %1375 = vmatprep.mubr.f32.mxu0 %v15560_v46 }
 0x265   : > { %1458 = vmatprep.mubr.f32.mxu1 %v15560_v46 }
 0x267   : > { %9803 = vmatmul.mubr.msk.f32.gmra.mrb[32].mxu0 %vm768_vm2, %v15563_v17 }
 0x268   : > { %9806 = vmatmul.mubr.msk.f32.gmra.mrb[32].mxu1 %vm768_vm2, %v15563_v17  ;;  %1569 = vmatprep.mubr.f32.mxu0 %v15560_v46 }
 0x269   : > { %1652 = vmatprep.mubr.f32.mxu1 %v15560_v46 }
 0x297   : > { %v850_v0 = vpop.f32.mrb[18].mxu0 }
 0x298   : > { %v933_v1 = vpop.f32.mrb[18].mxu1  ;;  %v852_v45 = vpop.f32.mrb[19].mxu0 }
 0x299   : > { %v935_v52 = vpop.f32.mrb[19].mxu1 }
 0x29b   : > { %v856_v18 = vpop.f32.mrb[20].mxu0 }
 0x29c   : > { %v858_v2 = vpop.f32.mrb[21].mxu0 }
 0x29d   : > { %v939_v40 = vpop.f32.mrb[20].mxu1 }
 0x29e   : > { %v941_v57 = vpop.f32.mrb[21].mxu1 }
 0x325   : > { %v1066_v35 = vpop.f32.mrb[22].mxu0 }
 0x326   : > { %v1178_v6 = vrot.slane %v1066_v35, 5  ;;  %v1149_v14 = vpop.f32.mrb[22].mxu1  ;;  %v1068_v34 = vpop.f32.mrb[23].mxu0 }
 0x327   : > { %v1180_v11 = vrot.slane %v1149_v14, 5  ;;  %v1179_v44 = vrot.slane %v1068_v34, 5  ;;  %v1151_v61 = vpop.f32.mrb[23].mxu1 }
 0x328   : > { %v12569_v59 = vmul.f32 %v1178_v6, %v12455_v38  ;;  %v1181_v27 = vrot.slane %v1151_v61, 5 }
 0x329   : > { %v12572_v50 = vmul.f32 %v1180_v11, %v12457_v43  ;;  %v12575_v37 = vmul.f32 %v1179_v44, %v12465_v24 }
 0x32a   : > { %v12578_v21 = vmul.f32 %v1181_v27, %v12467_v63  ;;  %v1072_v36 = vpop.f32.mrb[24].mxu0 }
 0x32b   : > { %v1182_v62 = vrot.slane %v1072_v36, 5  ;;  %v1155_v33 = vpop.f32.mrb[24].mxu1  ;;  %v1074_v54 = vpop.f32.mrb[25].mxu0 }
 0x32c   : > { %v1186_v60 = vrot.slane %v1155_v33, 5  ;;  %v1184_v48 = vrot.slane %v1074_v54, 5  ;;  %v1157_v15 = vpop.f32.mrb[25].mxu1 }
 0x32d   : > { %v1183_v38 = vsel %vm987_vm3, %v1178_v6, %v1182_v62  ;;  %v1188_v19 = vrot.slane %v1157_v15, 5 }
 0x32e   : > { %v12581_v42 = vmul.f32 %v1183_v38, %v850_v0  ;;  %v1187_v43 = vsel %vm987_vm3, %v1180_v11, %v1186_v60  ;;  %v1185_v24 = vsel %vm987_vm3, %v1179_v44, %v1184_v48  ;;  %v1078_v5 = vpop.f32.mrb[26].mxu0 }
 0x32f   : > { %v12585_v31 = vmul.f32 %v1187_v43, %v933_v1  ;;  %v12587_v63 = vmul.f32 %v1185_v24, %v852_v45  ;;  %v1189_v56 = vsel %vm987_vm3, %v1181_v27, %v1188_v19  ;;  %v1190_v17 = vrot.slane %v1078_v5, 5  ;;  %v1161_v35 = vpop.f32.mrb[26].mxu1  ;;  %v1080_v14 = vpop.f32.mrb[27].mxu0 }
 0x330   : > { %v12590_v34 = vmul.f32 %v1189_v56, %v935_v52  ;;  %v1194_v6 = vrot.slane %v1161_v35, 5  ;;  %v1192_v61 = vrot.slane %v1080_v14, 5  ;;  %v1163_v0 = vpop.f32.mrb[27].mxu1 }
 0x331   : > { %v1191_v36 = vsel %vm987_vm3, %v1182_v62, %v1190_v17  ;;  %v1196_v11 = vrot.slane %v1163_v0, 5 }
 0x332   : > { %v12593_v33 = vmul.f32 %v1191_v36, %v856_v18  ;;  %v1195_v1 = vsel %vm987_vm3, %v1186_v60, %v1194_v6  ;;  %v1193_v45 = vsel %vm987_vm3, %v1184_v48, %v1192_v61  ;;  %v12597_v44 = vpop.f32.mrb[28].mxu0 }
 0x333   : > { %v12599_v27 = vmul.f32 %v1195_v1, %v939_v40  ;;  %v12601_v54 = vmul.f32 %v1193_v45, %v858_v2  ;;  %v1197_v52 = vsel %vm987_vm3, %v1188_v19, %v1196_v11  ;;  %v1465_v15 = vadd.f32 %v12597_v44, %v12449_v55  ;;  %v12606_v38 = vpop.f32.mrb[28].mxu1  ;;  %v12608_v62 = vpop.f32.mrb[29].mxu0 }
 0x334   : > { %v12610_v18 = vmul.f32 %v1197_v52, %v941_v57  ;;  %v1467_v60 = vadd.f32 %v12606_v38, %v12449_v55  ;;  %v1466_v40 = vadd.f32 %v12608_v62, %v12449_v55  ;;  %v12616_v48 = vpop.f32.mrb[29].mxu1 }
 0x335   : > { %v9807_v2 = vmul.f32 -1.442695, %v1465_v15  ;;  %v1468_v19 = vadd.f32 %v12616_v48, %v12449_v55 }
 0x336   : > { %v9809_v43 = vmul.f32 -1.442695, %v1467_v60  ;;  %v9808_v24 = vmul.f32 -1.442695, %v1466_v40  ;;  %v12620_v5 = vpop.f32.mrb[30].mxu0 }
 0x337   : > { %10476 = vpow2.f32 %v9807_v2  ;;  %v9810_v56 = vmul.f32 -1.442695, %v1468_v19  ;;  %v12622_v57 = vpop.f32.mrb[30].mxu1  ;;  %v12624_v17 = vpop.f32.mrb[31].mxu0 }
 0x338   : > { %10478 = vpow2.f32 %v9809_v43  ;;  %v12626_v35 = vpop.f32.mrb[31].mxu1 }
 0x339   : > { %10480 = vpow2.f32 %v9808_v24 }
 0x33a   : > { %10482 = vpow2.f32 %v9810_v56  ;;  %v12628_v14 = vpop.f32.mrb[32].mxu0  ;;  %v15564_v56 = vld [vmem:[#allocation44_spill] sm:$0xff] }
 0x33b   : > { %v12630_v6 = vpop.f32.mrb[32].mxu1  ;;  %v12632_v61 = vpop.f32.mrb[33].mxu0 }
 0x33c   : > { %v12634_v0 = vpop.f32.mrb[33].mxu1 }
 0x341   : > { %v10477_v36 = vpop.eup %10476 }
 0x342   : > { %v10479_v11 = vpop.eup %10478  ;;  %v1481_v1 = vadd.f32 1.0, %v10477_v36  ;;  %v15565_v36 = vld [vmem:[#allocation37_spill] sm:$0xff] }
 0x343   : > { %v10481_v45 = vpop.eup %10480  ;;  %v1483_v15 = vadd.f32 1.0, %v10479_v11  ;;  %v15566_v11 = vld [vmem:[#allocation16_spill] sm:$0xff] }
 0x344   : > { %v10483_v52 = vpop.eup %10482  ;;  %v1482_v60 = vadd.f32 1.0, %v10481_v45  ;;  %10484 = vrcp.f32 %v1481_v1  ;;  %v15567_v1 = vld [vmem:[#allocation41_spill] sm:$0xff] }
 0x345   : > { %v1484_v40 = vadd.f32 1.0, %v10483_v52  ;;  %v15568_v45 = vld [vmem:[#allocation61_spill] sm:$0xff] }
 0x346   : > { %10486 = vrcp.f32 %v1482_v60  ;;  %v15569_v52 = vld [vmem:[#allocation17_spill] sm:$0xff]  ;;  %v15571_v60 = vld [vmem:[#allocation19_spill] sm:$0xff] }
 0x347   : > { %10488 = vrcp.f32 %v1484_v40  ;;  %v12693_v40 = vld [vmem:[%s15197_s4 + $0x10] sm:$0x1f] }
 0x348   : > { %10490 = vrcp.f32 %v1483_v15  ;;  %v15570_v15 = vld [vmem:[#allocation18_spill] sm:$0xff] }
 0x34e   : > { %v12636_v2 = vpop.eup %10484 }
 0x350   : > { %v12638_v19 = vpop.eup %10486 }
 0x351   : > { %v12640_v43 = vpop.eup %10488  ;;  %9811 = vmatprep.subr.msk.mxu0 %vm987_vm3, %v12638_v19 }
 0x352   : > { %v12644_v24 = vpop.eup %10490  ;;  %9816 = vmatprep.subr.msk.mxu1 %vm987_vm3, %v12640_v43  ;;  %9812 = vmatpush1.msk.msra.mxu0 %vm987_vm3, %v12636_v2 }
 0x353   : > { %9817 = vmatpush1.msk.msra.mxu1 %vm987_vm3, %v12644_v24  ;;  %9813 = vmatmul.mubr.msk.f32.vlgmr.msra.gmra.mrb[34].mxu0 %vm977_vm4, %v12490_v9 }
 0x354   : > { %9818 = vmatmul.mubr.msk.f32.vlgmr.msra.gmra.mrb[34].mxu1 %vm977_vm4, %v12490_v9  ;;  %10175 = vmatprep.subr.bf16.mxu0 %v15564_v56 }
 0x355   : > { %10183 = vmatprep.subr.bf16.mxu1 %v15565_v36  ;;  %10177 = vmatpush1.bf16.msra.mxu0 %v15566_v11 }
 0x356   : > { %10185 = vmatpush1.bf16.msra.mxu1 %v15567_v1  ;;  %10179 = vmatprep.subr.bf16.mxu0 %v15568_v45 }
 0x357   : > { %10187 = vmatprep.subr.bf16.mxu1 %v15569_v52  ;;  %1575 = vmatprep.mubr.f32.mxu0 %v15560_v46 }
 0x358   : > { %1658 = vmatprep.mubr.f32.mxu1 %v15560_v46  ;;  %9814 = vmatmul.mubr.msk.f32.gmra.mrb[36].mxu0 %vm977_vm4, %v12514_v28 }
 0x359   : > { %9819 = vmatmul.mubr.msk.f32.gmra.mrb[36].mxu1 %vm977_vm4, %v12514_v28  ;;  %10181 = vmatpush1.bf16.msra.mxu0 %v15570_v15 }
 0x35a   : > { %10189 = vmatpush1.bf16.msra.mxu1 %v15571_v60  ;;  %1581 = vmatprep.mubr.f32.mxu0 %v15560_v46 }
 0x35b   : > { %1664 = vmatprep.mubr.f32.mxu1 %v15560_v46 }
 0x35c   : > { %9815 = vmatmul.mubr.msk.f32.gmra.mrb[38].mxu0 %vm977_vm4, %v12529_v20 }
 0x35d   : > { %9820 = vmatmul.mubr.msk.f32.gmra.mrb[38].mxu1 %vm977_vm4, %v12529_v20  ;;  %1888 = vmatprep.mubr.f32.mxu0 %v15560_v46 }
 0x35e   : > { %1971 = vmatprep.mubr.f32.mxu1 %v15560_v46 }
 0x360   : > { %9822 = vmatmul.mubr.msk.f32.vlgmr.msra.gmra.mrb[40].mxu0 %vm768_vm2, %v12543_v23 }
 0x361   : > { %9825 = vmatmul.mubr.msk.f32.vlgmr.msra.gmra.mrb[40].mxu1 %vm768_vm2, %v12543_v23  ;;  %1894 = vmatprep.mubr.f32.mxu0 %v15560_v46 }
 0x362   : > { %1977 = vmatprep.mubr.f32.mxu1 %v15560_v46 }
 0x364   : > { %9823 = vmatmul.mubr.msk.f32.gmra.mrb[42].mxu0 %vm768_vm2, %v12554_v8 }
 0x365   : > { %9826 = vmatmul.mubr.msk.f32.gmra.mrb[42].mxu1 %vm768_vm2, %v12554_v8  ;;  %1900 = vmatprep.mubr.f32.mxu0 %v15560_v46 }
 0x366   : > { %1983 = vmatprep.mubr.f32.mxu1 %v15560_v46 }
 0x368   : > { %9824 = vmatmul.mubr.msk.f32.gmra.mrb[44].mxu0 %vm768_vm2, %v12693_v40 }
 0x369   : > { %9827 = vmatmul.mubr.msk.f32.gmra.mrb[44].mxu1 %vm768_vm2, %v12693_v40  ;;  %2094 = vmatprep.mubr.f32.mxu0 %v15560_v46 }
 0x36a   : > { %2177 = vmatprep.mubr.f32.mxu1 %v15560_v46 }
 0x426   : > { %v1571_v56 = vpop.f32.mrb[34].mxu0 }
 0x427   : > { %v1683_v36 = vrot.slane %v1571_v56, 5  ;;  %v1654_v11 = vpop.f32.mrb[34].mxu1  ;;  %v1573_v1 = vpop.f32.mrb[35].mxu0 }
 0x428   : > { %v1685_v45 = vrot.slane %v1654_v11, 5  ;;  %v1684_v52 = vrot.slane %v1573_v1, 5  ;;  %v1656_v15 = vpop.f32.mrb[35].mxu1 }
 0x429   : > { %v1715_v60 = vmul.f32 %v1683_v36, %v12597_v44  ;;  %v1686_v47 = vrot.slane %v1656_v15, 5 }
 0x42a   : > { %v1717_v30 = vmul.f32 %v1685_v45, %v12606_v38  ;;  %v1716_v26 = vmul.f32 %v1684_v52, %v12608_v62 }
 0x42b   : > { %v12705_v4 = vadd.f32 %v1715_v60, %v12569_v59  ;;  %v1718_v29 = vmul.f32 %v1686_v47, %v12616_v48  ;;  %v1577_v51 = vpop.f32.mrb[36].mxu0 }
 0x42c   : > { %v12709_v56 = vadd.f32 %v1717_v30, %v12572_v50  ;;  %v12712_v11 = vadd.f32 %v1716_v26, %v12575_v37  ;;  %v1687_v1 = vrot.slane %v1577_v51, 5  ;;  %v1660_v10 = vpop.f32.mrb[36].mxu1  ;;  %v1579_v44 = vpop.f32.mrb[37].mxu0 }
 0x42d   : > { %v12715_v15 = vadd.f32 %v1718_v29, %v12578_v21  ;;  %v1691_v38 = vrot.slane %v1660_v10, 5  ;;  %v1689_v62 = vrot.slane %v1579_v44, 5  ;;  %v1662_v13 = vpop.f32.mrb[37].mxu1 }
 0x42e   : > { %v1688_v59 = vsel %vm987_vm3, %v1683_v36, %v1687_v1  ;;  %v1693_v60 = vrot.slane %v1662_v13, 5 }
 0x42f   : > { %v1719_v48 = vmul.f32 %v1688_v59, %v12620_v5  ;;  %v1692_v30 = vsel %vm987_vm3, %v1685_v45, %v1691_v38  ;;  %v1690_v50 = vsel %vm987_vm3, %v1684_v52, %v1689_v62  ;;  %v1583_v26 = vpop.f32.mrb[38].mxu0 }
 0x430   : > { %v1721_v51 = vmul.f32 %v1692_v30, %v12622_v57  ;;  %v1720_v37 = vmul.f32 %v1690_v50, %v12624_v17  ;;  %v1694_v29 = vsel %vm987_vm3, %v1686_v47, %v1693_v60  ;;  %v1695_v21 = vrot.slane %v1583_v26, 5  ;;  %v1666_v10 = vpop.f32.mrb[38].mxu1  ;;  %v1585_v44 = vpop.f32.mrb[39].mxu0 }
 0x431   : > { %v12725_v49 = vadd.f32 %v1719_v48, %v12581_v42  ;;  %v1722_v13 = vmul.f32 %v1694_v29, %v12626_v35  ;;  %v1699_v5 = vrot.slane %v1666_v10, 5  ;;  %v1697_v36 = vrot.slane %v1585_v44, 5  ;;  %v1668_v45 = vpop.f32.mrb[39].mxu1 }
 0x432   : > { %v12729_v52 = vadd.f32 %v1721_v51, %v12585_v31  ;;  %v12732_v57 = vadd.f32 %v1720_v37, %v12587_v63  ;;  %v1696_v17 = vsel %vm987_vm3, %v1687_v1, %v1695_v21  ;;  %v1701_v47 = vrot.slane %v1668_v45, 5 }
 0x433   : > { %v12736_v59 = vadd.f32 %v1722_v13, %v12590_v34  ;;  %v1723_v42 = vmul.f32 %v1696_v17, %v12628_v14  ;;  %v1700_v48 = vsel %vm987_vm3, %v1691_v38, %v1699_v5  ;;  %v1698_v35 = vsel %vm987_vm3, %v1689_v62, %v1697_v36  ;;  %v12741_v30 = vpop.f32.mrb[40].mxu0 }
 0x434   : > { %v1725_v31 = vmul.f32 %v1700_v48, %v12630_v6  ;;  %v1724_v50 = vmul.f32 %v1698_v35, %v12632_v61  ;;  %v1702_v63 = vsel %vm987_vm3, %v1693_v60, %v1701_v47  ;;  %v1990_v1 = vadd.f32 %v12741_v30, %v12449_v55  ;;  %v12748_v26 = vpop.f32.mrb[40].mxu1  ;;  %v12750_v34 = vpop.f32.mrb[41].mxu0 }
 0x435   : > { %v12753_v14 = vadd.f32 %v1723_v42, %v12593_v33  ;;  %v1726_v38 = vmul.f32 %v1702_v63, %v12634_v0  ;;  %v1992_v62 = vadd.f32 %v12748_v26, %v12449_v55  ;;  %v1991_v6 = vadd.f32 %v12750_v34, %v12449_v55  ;;  %v12760_v61 = vpop.f32.mrb[41].mxu1 }
 0x436   : > { %v12763_v60 = vadd.f32 %v1725_v31, %v12599_v27  ;;  %v12766_v51 = vadd.f32 %v1724_v50, %v12601_v54  ;;  %v9828_v37 = vmul.f32 -1.442695, %v1990_v1  ;;  %v1993_v33 = vadd.f32 %v12760_v61, %v12449_v55 }
 0x437   : > { %v12771_v0 = vadd.f32 %v1726_v38, %v12610_v18  ;;  %v9830_v29 = vmul.f32 -1.442695, %v1992_v62  ;;  %v9829_v21 = vmul.f32 -1.442695, %v1991_v6  ;;  %v12773_v10 = vpop.f32.mrb[42].mxu0  ;;  %v1727_v1 = vmax.f32 %v12483_v16, %v12636_v2 }
 0x438   : > { %10492 = vpow2.f32 %v9828_v37  ;;  %v9831_v44 = vmul.f32 -1.442695, %v1993_v33  ;;  %v12775_v13 = vpop.f32.mrb[42].mxu1  ;;  %v12777_v27 = vpop.f32.mrb[43].mxu0  ;;  %v1731_v38 = vadd.f32 %v12636_v2, %v12483_v16  ;;  %v1729_v6 = vmax.f32 %v12496_v53, %v12644_v24 }
 0x439   : > { %10494 = vpow2.f32 %v9830_v29  ;;  %v12779_v54 = vpop.f32.mrb[43].mxu1  ;;  %v1733_v37 = vadd.f32 %v12644_v24, %v12496_v53  ;;  %v1728_v29 = vmax.f32 %v12485_v3, %v12638_v19  ;;  %v1730_v16 = vmax.f32 %v12492_v39, %v12640_v43 }
 0x43a   : > { %10496 = vpow2.f32 %v9829_v21  ;;  %v1732_v21 = vadd.f32 %v12638_v19, %v12485_v3  ;;  %v1734_v2 = vadd.f32 %v12640_v43, %v12492_v39  ;;  %v15572_v39 = vld [vmem:[#allocation20_spill] sm:$0xff]  ;;  %v15573_v43 = vld [vmem:[#allocation62_spill] sm:$0xff] }
 0x43b   : > { %10498 = vpow2.f32 %v9831_v44  ;;  %v12781_v5 = vpop.f32.mrb[44].mxu0 }
 0x43c   : > { %v12783_v36 = vpop.f32.mrb[44].mxu1  ;;  %v12785_v18 = vpop.f32.mrb[45].mxu0 }
 0x43d   : > { %v12787_v45 = vpop.f32.mrb[45].mxu1 }
 0x442   : > { %v10493_v17 = vpop.eup %10492 }
 0x443   : > { %v10495_v47 = vpop.eup %10494  ;;  %v2006_v42 = vadd.f32 1.0, %v10493_v17 }
 0x444   : > { %v10497_v48 = vpop.eup %10496  ;;  %v2008_v35 = vadd.f32 1.0, %v10495_v47 }
 0x445   : > { %v10499_v31 = vpop.eup %10498  ;;  %10500 = vrcp.f32 %v2006_v42  ;;  %v2007_v50 = vadd.f32 1.0, %v10497_v48 }
 0x446   : > { %10502 = vrcp.f32 %v2008_v35  ;;  %v2009_v63 = vadd.f32 1.0, %v10499_v31  ;;  %v15574_v31 = vld [vmem:[#allocation63_spill] sm:$0xff] }
 0x447   : > { %10504 = vrcp.f32 %v2007_v50  ;;  %v15575_v50 = vld [vmem:[#allocation64_spill] sm:$0xff] }
 0x448   : > { %10506 = vrcp.f32 %v2009_v63  ;;  %v15576_v63 = vld [vmem:[#allocation65_spill] sm:$0xff] }
 0x44f   : > { %v10501_v62 = vpop.eup %10500 }
 0x450   : > { %v10503_v33 = vpop.eup %10502  ;;  %v12801_v44 = vmax.f32 %v1727_v1, %v10501_v62  ;;  %v12803_v17 = vadd.f32 %v10501_v62, %v1731_v38  ;;  %v15577_v1 = vld [vmem:[#allocation21_spill] sm:$0xff]  ;;  %v15578_v38 = vld [vmem:[#allocation22_spill] sm:$0xff] }
 0x451   : > { %v10505_v47 = vpop.eup %10504  ;;  %v12809_v42 = vmax.f32 %v1729_v6, %v10503_v33  ;;  %v12811_v53 = vadd.f32 %v10503_v33, %v1733_v37 }
 0x452   : > { %v10507_v24 = vpop.eup %10506  ;;  %v12813_v48 = vmax.f32 %v1728_v29, %v10505_v47  ;;  %v12815_v35 = vadd.f32 %v10505_v47, %v1732_v21  ;;  %9832 = vmatprep.subr.msk.mxu0 %vm987_vm3, %v10505_v47 }
 0x453   : > { %v12818_v3 = vmax.f32 %v1730_v16, %v10507_v24  ;;  %v12820_v19 = vadd.f32 %v10507_v24, %v1734_v2  ;;  %9837 = vmatprep.subr.msk.mxu1 %vm987_vm3, %v10507_v24  ;;  %9833 = vmatpush1.msk.msra.mxu0 %vm987_vm3, %v10501_v62  ;;  %v15579_v62 = vld [vmem:[#allocation23_spill] sm:$0xff] }
 0x454   : > { %9838 = vmatpush1.msk.msra.mxu1 %vm987_vm3, %v10503_v33  ;;  %9834 = vmatmul.mubr.msk.f32.vlgmr.msra.gmra.mrb[46].mxu0 %vm977_vm4, %v12490_v9 }
 0x455   : > { %9839 = vmatmul.mubr.msk.f32.vlgmr.msra.gmra.mrb[46].mxu1 %vm977_vm4, %v12490_v9  ;;  %10191 = vmatprep.subr.bf16.mxu0 %v15572_v39 }
 0x456   : > { %10199 = vmatprep.subr.bf16.mxu1 %v15573_v43  ;;  %10193 = vmatpush1.bf16.msra.mxu0 %v15574_v31 }
 0x457   : > { %10201 = vmatpush1.bf16.msra.mxu1 %v15575_v50  ;;  %10195 = vmatprep.subr.bf16.mxu0 %v15576_v63 }
 0x458   : > { %10203 = vmatprep.subr.bf16.mxu1 %v15577_v1  ;;  %2100 = vmatprep.mubr.f32.mxu0 %v15560_v46 }
 0x459   : > { %2183 = vmatprep.mubr.f32.mxu1 %v15560_v46  ;;  %9835 = vmatmul.mubr.msk.f32.gmra.mrb[48].mxu0 %vm977_vm4, %v12514_v28 }
 0x45a   : > { %9840 = vmatmul.mubr.msk.f32.gmra.mrb[48].mxu1 %vm977_vm4, %v12514_v28  ;;  %10197 = vmatpush1.bf16.msra.mxu0 %v15578_v38 }
 0x45b   : > { %10205 = vmatpush1.bf16.msra.mxu1 %v15579_v62  ;;  %2106 = vmatprep.mubr.f32.mxu0 %v15560_v46 }
 0x45c   : > { %2189 = vmatprep.mubr.f32.mxu1 %v15560_v46 }
 0x45d   : > { %9836 = vmatmul.mubr.msk.f32.gmra.mrb[50].mxu0 %vm977_vm4, %v12529_v20 }
 0x45e   : > { %9841 = vmatmul.mubr.msk.f32.gmra.mrb[50].mxu1 %vm977_vm4, %v12529_v20  ;;  %2413 = vmatprep.mubr.f32.mxu0 %v15560_v46 }
 0x45f   : > { %2496 = vmatprep.mubr.f32.mxu1 %v15560_v46 }
 0x461   : > { %9843 = vmatmul.mubr.msk.f32.vlgmr.msra.gmra.mrb[52].mxu0 %vm768_vm2, %v12543_v23 }
 0x462   : > { %9846 = vmatmul.mubr.msk.f32.vlgmr.msra.gmra.mrb[52].mxu1 %vm768_vm2, %v12543_v23  ;;  %2419 = vmatprep.mubr.f32.mxu0 %v15560_v46 }
 0x463   : > { %2502 = vmatprep.mubr.f32.mxu1 %v15560_v46 }
 0x465   : > { %9844 = vmatmul.mubr.msk.f32.gmra.mrb[54].mxu0 %vm768_vm2, %v12554_v8 }
 0x466   : > { %9847 = vmatmul.mubr.msk.f32.gmra.mrb[54].mxu1 %vm768_vm2, %v12554_v8  ;;  %2425 = vmatprep.mubr.f32.mxu0 %v15560_v46 }
 0x467   : > { %2508 = vmatprep.mubr.f32.mxu1 %v15560_v46 }
 0x469   : > { %9845 = vmatmul.mubr.msk.f32.gmra.mrb[56].mxu0 %vm768_vm2, %v12693_v40 }
 0x46a   : > { %9848 = vmatmul.mubr.msk.f32.gmra.mrb[56].mxu1 %vm768_vm2, %v12693_v40  ;;  %2619 = vmatprep.mubr.f32.mxu0 %v15560_v46 }
 0x46b   : > { %2702 = vmatprep.mubr.f32.mxu1 %v15560_v46 }
 0x527   : > { %v2096_v6 = vpop.f32.mrb[46].mxu0 }
 0x528   : > { %v2208_v37 = vrot.slane %v2096_v6, 5  ;;  %v2179_v33 = vpop.f32.mrb[46].mxu1  ;;  %v2098_v29 = vpop.f32.mrb[47].mxu0 }
 0x529   : > { %v2210_v21 = vrot.slane %v2179_v33, 5  ;;  %v2209_v47 = vrot.slane %v2098_v29, 5  ;;  %v2181_v16 = vpop.f32.mrb[47].mxu1 }
 0x52a   : > { %v2240_v2 = vmul.f32 %v2208_v37, %v12741_v30  ;;  %v2211_v24 = vrot.slane %v2181_v16, 5 }
 0x52b   : > { %v2242_v39 = vmul.f32 %v2210_v21, %v12748_v26  ;;  %v2241_v43 = vmul.f32 %v2209_v47, %v12750_v34 }
 0x52c   : > { %v12873_v31 = vadd.f32 %v2240_v2, %v12705_v4  ;;  %v2243_v50 = vmul.f32 %v2211_v24, %v12760_v61  ;;  %v2102_v63 = vpop.f32.mrb[48].mxu0 }
 0x52d   : > { %v12877_v1 = vadd.f32 %v2242_v39, %v12709_v56  ;;  %v12880_v38 = vadd.f32 %v2241_v43, %v12712_v11  ;;  %v2212_v62 = vrot.slane %v2102_v63, 5  ;;  %v2185_v6 = vpop.f32.mrb[48].mxu1  ;;  %v2104_v30 = vpop.f32.mrb[49].mxu0 }
 0x52e   : > { %v12883_v33 = vadd.f32 %v2243_v50, %v12715_v15  ;;  %v2216_v26 = vrot.slane %v2185_v6, 5  ;;  %v2214_v34 = vrot.slane %v2104_v30, 5  ;;  %v2187_v29 = vpop.f32.mrb[49].mxu1 }
 0x52f   : > { %v2213_v4 = vsel %vm987_vm3, %v2208_v37, %v2212_v62  ;;  %v2218_v16 = vrot.slane %v2187_v29, 5 }
 0x530   : > { %v2244_v61 = vmul.f32 %v2213_v4, %v12773_v10  ;;  %v2217_v56 = vsel %vm987_vm3, %v2210_v21, %v2216_v26  ;;  %v2215_v2 = vsel %vm987_vm3, %v2209_v47, %v2214_v34  ;;  %v2108_v11 = vpop.f32.mrb[50].mxu0 }
 0x531   : > { %v2246_v39 = vmul.f32 %v2217_v56, %v12775_v13  ;;  %v2245_v43 = vmul.f32 %v2215_v2, %v12777_v27  ;;  %v2219_v15 = vsel %vm987_vm3, %v2211_v24, %v2218_v16  ;;  %v2220_v50 = vrot.slane %v2108_v11, 5  ;;  %v2191_v63 = vpop.f32.mrb[50].mxu1  ;;  %v2110_v6 = vpop.f32.mrb[51].mxu0 }
 0x532   : > { %v12893_v30 = vadd.f32 %v2244_v61, %v12725_v49  ;;  %v2247_v37 = vmul.f32 %v2219_v15, %v12779_v54  ;;  %v2224_v10 = vrot.slane %v2191_v63, 5  ;;  %v2222_v29 = vrot.slane %v2110_v6, 5  ;;  %v2193_v21 = vpop.f32.mrb[51].mxu1 }
 0x533   : > { %v12897_v47 = vadd.f32 %v2246_v39, %v12729_v52  ;;  %v12900_v13 = vadd.f32 %v2245_v43, %v12732_v57  ;;  %v2221_v27 = vsel %vm987_vm3, %v2212_v62, %v2220_v50  ;;  %v2226_v24 = vrot.slane %v2193_v21, 5 }
 0x534   : > { %v12904_v4 = vadd.f32 %v2247_v37, %v12736_v59  ;;  %v2248_v49 = vmul.f32 %v2221_v27, %v12781_v5  ;;  %v2225_v61 = vsel %vm987_vm3, %v2216_v26, %v2224_v10  ;;  %v2223_v54 = vsel %vm987_vm3, %v2214_v34, %v2222_v29  ;;  %v12909_v56 = vpop.f32.mrb[52].mxu0 }
 0x535   : > { %v2250_v52 = vmul.f32 %v2225_v61, %v12783_v36  ;;  %v2249_v2 = vmul.f32 %v2223_v54, %v12785_v18  ;;  %v2227_v57 = vsel %vm987_vm3, %v2218_v16, %v2226_v24  ;;  %v2515_v62 = vadd.f32 %v12909_v56, %v12449_v55  ;;  %v12916_v11 = vpop.f32.mrb[52].mxu1  ;;  %v12918_v59 = vpop.f32.mrb[53].mxu0 }
 0x536   : > { %v12921_v5 = vadd.f32 %v2248_v49, %v12753_v14  ;;  %v2251_v26 = vmul.f32 %v2227_v57, %v12787_v45  ;;  %v2517_v34 = vadd.f32 %v12916_v11, %v12449_v55  ;;  %v2516_v36 = vadd.f32 %v12918_v59, %v12449_v55  ;;  %v12928_v18 = vpop.f32.mrb[53].mxu1 }
 0x537   : > { %v12931_v16 = vadd.f32 %v2250_v52, %v12763_v60  ;;  %v12934_v39 = vadd.f32 %v2249_v2, %v12766_v51  ;;  %v9849_v43 = vmul.f32 -1.442695, %v2515_v62  ;;  %v2518_v14 = vadd.f32 %v12928_v18, %v12449_v55 }
 0x538   : > { %v12939_v45 = vadd.f32 %v2251_v26, %v12771_v0  ;;  %v9851_v15 = vmul.f32 -1.442695, %v2517_v34  ;;  %v9850_v50 = vmul.f32 -1.442695, %v2516_v36  ;;  %v12941_v63 = vpop.f32.mrb[54].mxu0 }
 0x539   : > { %10508 = vpow2.f32 %v9849_v43  ;;  %v9852_v6 = vmul.f32 -1.442695, %v2518_v14  ;;  %v12943_v37 = vpop.f32.mrb[54].mxu1  ;;  %v12945_v60 = vpop.f32.mrb[55].mxu0 }
 0x53a   : > { %10510 = vpow2.f32 %v9851_v15  ;;  %v12947_v51 = vpop.f32.mrb[55].mxu1 }
 0x53b   : > { %10512 = vpow2.f32 %v9850_v50 }
 0x53c   : > { %10514 = vpow2.f32 %v9852_v6  ;;  %v12949_v10 = vpop.f32.mrb[56].mxu0 }
 0x53d   : > { %v12951_v29 = vpop.f32.mrb[56].mxu1  ;;  %v12953_v0 = vpop.f32.mrb[57].mxu0 }
 0x53e   : > { %v12955_v21 = vpop.f32.mrb[57].mxu1 }
 0x543   : > { %v10509_v27 = vpop.eup %10508 }
 0x544   : > { %v10511_v24 = vpop.eup %10510  ;;  %v2531_v49 = vadd.f32 1.0, %v10509_v27 }
 0x545   : > { %v10513_v61 = vpop.eup %10512  ;;  %v2533_v54 = vadd.f32 1.0, %v10511_v24 }
 0x546   : > { %v10515_v52 = vpop.eup %10514  ;;  %10516 = vrcp.f32 %v2531_v49  ;;  %v2532_v2 = vadd.f32 1.0, %v10513_v61  ;;  %v15586_v49 = vld [vmem:[#allocation68_spill] sm:$0xff]  ;;  %v15587_v61 = vld [vmem:[#allocation69_spill] sm:$0xff] }
 0x547   : > { %10518 = vrcp.f32 %v2533_v54  ;;  %v2534_v57 = vadd.f32 1.0, %v10515_v52  ;;  %v15588_v54 = vld [vmem:[#allocation25_spill] sm:$0xff]  ;;  %v15590_v52 = vld [vmem:[#allocation27_spill] sm:$0xff] }
 0x548   : > { %10520 = vrcp.f32 %v2532_v2 }
 0x549   : > { %10522 = vrcp.f32 %v2534_v57 }
 0x550   : > { %v12957_v62 = vpop.eup %10516 }
 0x551   : > { %v12959_v26 = vpop.eup %10518  ;;  %v2777_v34 = vmax.f32 %v12801_v44, %v12957_v62  ;;  %v12965_v36 = vadd.f32 %v12957_v62, %v12803_v17  ;;  %v13158_v44 = vld [vmem:[%s15200_s7] sm:$0xff] }
 0x552   : > { %v12967_v43 = vpop.eup %10520  ;;  %v12973_v15 = vadd.f32 %v12959_v26, %v12811_v53  ;;  %v15583_v53 = vld [vmem:[#allocation24_spill] sm:$0xff] }
 0x553   : > { %v12975_v50 = vpop.eup %10522  ;;  %v12981_v27 = vadd.f32 %v12967_v43, %v12815_v35  ;;  %9853 = vmatprep.subr.msk.mxu0 %vm987_vm3, %v12967_v43  ;;  %v15584_v35 = vld [vmem:[#allocation66_spill] sm:$0xff] }
 0x554   : > { %15580 = vst [vmem:[#allocation54_spill] sm:$0xff] %v12975_v50  ;;  %v12989_v24 = vadd.f32 %v12975_v50, %v12820_v19  ;;  %9858 = vmatprep.subr.msk.mxu1 %vm987_vm3, %v12975_v50  ;;  %9854 = vmatpush1.msk.msra.mxu0 %vm987_vm3, %v12957_v62  ;;  %v15585_v19 = vld [vmem:[#allocation67_spill] sm:$0xff]  ;;  %v15595_v62 = vld [vmem:[#allocation70_spill] sm:$0xff] }
 0x555   : > { %15581 = vst [vmem:[#allocation55_spill] sm:$0xff] %v12981_v27  ;;  %9859 = vmatpush1.msk.msra.mxu1 %vm987_vm3, %v12959_v26  ;;  %9855 = vmatmul.mubr.msk.f32.vlgmr.msra.gmra.mrb[58].mxu0 %vm977_vm4, %v12490_v9 }
 0x556   : > { %15582 = vst [vmem:[#allocation56_spill] sm:$0xff] %v12989_v24  ;;  %9860 = vmatmul.mubr.msk.f32.vlgmr.msra.gmra.mrb[58].mxu1 %vm977_vm4, %v12490_v9  ;;  %10207 = vmatprep.subr.bf16.mxu0 %v15583_v53  ;;  %v15589_v9 = vld [vmem:[#allocation26_spill] sm:$0xff] }
 0x557   : > { %10215 = vmatprep.subr.bf16.mxu1 %v15584_v35  ;;  %10209 = vmatpush1.bf16.msra.mxu0 %v15585_v19 }
 0x558   : > { %10217 = vmatpush1.bf16.msra.mxu1 %v15586_v49  ;;  %10211 = vmatprep.subr.bf16.mxu0 %v15587_v61 }
 0x559   : > { %10219 = vmatprep.subr.bf16.mxu1 %v15588_v54  ;;  %2625 = vmatprep.mubr.f32.mxu0 %v15560_v46 }
 0x55a   : > { %2708 = vmatprep.mubr.f32.mxu1 %v15560_v46  ;;  %9856 = vmatmul.mubr.msk.f32.gmra.mrb[60].mxu0 %vm977_vm4, %v12514_v28 }
 0x55b   : > { %9861 = vmatmul.mubr.msk.f32.gmra.mrb[60].mxu1 %vm977_vm4, %v12514_v28  ;;  %10213 = vmatpush1.bf16.msra.mxu0 %v15589_v9 }
 0x55c   : > { %10221 = vmatpush1.bf16.msra.mxu1 %v15590_v52  ;;  %2631 = vmatprep.mubr.f32.mxu0 %v15560_v46 }
 0x55d   : > { %2714 = vmatprep.mubr.f32.mxu1 %v15560_v46 }
 0x55e   : > { %9857 = vmatmul.mubr.msk.f32.gmra.mrb[62].mxu0 %vm977_vm4, %v12529_v20 }
 0x55f   : > { %9862 = vmatmul.mubr.msk.f32.gmra.mrb[62].mxu1 %vm977_vm4, %v12529_v20  ;;  %2938 = vmatprep.mubr.f32.mxu0 %v15560_v46 }
 0x560   : > { %3021 = vmatprep.mubr.f32.mxu1 %v15560_v46 }
 0x562   : > { %9864 = vmatmul.mubr.msk.f32.vlgmr.msra.gmra.mrb[64].mxu0 %vm768_vm2, %v12543_v23 }
 0x563   : > { %9867 = vmatmul.mubr.msk.f32.vlgmr.msra.gmra.mrb[64].mxu1 %vm768_vm2, %v12543_v23  ;;  %2944 = vmatprep.mubr.f32.mxu0 %v15560_v46 }
 0x564   : > { %3027 = vmatprep.mubr.f32.mxu1 %v15560_v46 }
 0x566   : > { %9865 = vmatmul.mubr.msk.f32.gmra.mrb[66].mxu0 %vm768_vm2, %v12554_v8 }
 0x567   : > { %9868 = vmatmul.mubr.msk.f32.gmra.mrb[66].mxu1 %vm768_vm2, %v12554_v8  ;;  %2950 = vmatprep.mubr.f32.mxu0 %v15560_v46 }
 0x568   : > { %3033 = vmatprep.mubr.f32.mxu1 %v15560_v46 }
 0x56a   : > { %9866 = vmatmul.mubr.msk.f32.gmra.mrb[68].mxu0 %vm768_vm2, %v12693_v40 }
 0x56b   : > { %9869 = vmatmul.mubr.msk.f32.gmra.mrb[68].mxu1 %vm768_vm2, %v12693_v40  ;;  %3144 = vmatprep.mubr.f32.mxu0 %v15560_v46 }
 0x56c   : > { %3227 = vmatprep.mubr.f32.mxu1 %v15560_v46 }
 0x628   : > { %v2621_v28 = vpop.f32.mrb[58].mxu0 }
 0x629   : > { %v2733_v20 = vrot.slane %v2621_v28, 5  ;;  %v2704_v23 = vpop.f32.mrb[58].mxu1  ;;  %v2623_v2 = vpop.f32.mrb[59].mxu0 }
 0x62a   : > { %v2735_v57 = vrot.slane %v2704_v23, 5  ;;  %v2734_v8 = vrot.slane %v2623_v2, 5  ;;  %v2706_v53 = vpop.f32.mrb[59].mxu1 }
 0x62b   : > { %v2765_v35 = vmul.f32 %v2733_v20, %v12909_v56  ;;  %v2736_v19 = vrot.slane %v2706_v53, 5 }
 0x62c   : > { %v2767_v49 = vmul.f32 %v2735_v57, %v12916_v11  ;;  %v2766_v61 = vmul.f32 %v2734_v8, %v12918_v59 }
 0x62d   : > { %v13045_v54 = vadd.f32 %v2765_v35, %v12873_v31  ;;  %v2768_v9 = vmul.f32 %v2736_v19, %v12928_v18  ;;  %v2627_v52 = vpop.f32.mrb[60].mxu0 }
 0x62e   : > { %v13049_v28 = vadd.f32 %v2767_v49, %v12877_v1  ;;  %v13052_v23 = vadd.f32 %v2766_v61, %v12880_v38  ;;  %v2737_v2 = vrot.slane %v2627_v52, 5  ;;  %v2710_v17 = vpop.f32.mrb[60].mxu1  ;;  %v2629_v56 = vpop.f32.mrb[61].mxu0 }
 0x62f   : > { %v13055_v53 = vadd.f32 %v2768_v9, %v12883_v33  ;;  %v2741_v11 = vrot.slane %v2710_v17, 5  ;;  %v2739_v59 = vrot.slane %v2629_v56, 5  ;;  %v2712_v6 = vpop.f32.mrb[61].mxu1 }
 0x630   : > { %v2738_v31 = vsel %vm987_vm3, %v2733_v20, %v2737_v2  ;;  %v2743_v35 = vrot.slane %v2712_v6, 5 }
 0x631   : > { %v2769_v18 = vmul.f32 %v2738_v31, %v12941_v63  ;;  %v2742_v1 = vsel %vm987_vm3, %v2735_v57, %v2741_v11  ;;  %v2740_v49 = vsel %vm987_vm3, %v2734_v8, %v2739_v59  ;;  %v2633_v38 = vpop.f32.mrb[62].mxu0 }
 0x632   : > { %v2771_v61 = vmul.f32 %v2742_v1, %v12943_v37  ;;  %v2770_v52 = vmul.f32 %v2740_v49, %v12945_v60  ;;  %v2744_v33 = vsel %vm987_vm3, %v2736_v19, %v2743_v35  ;;  %v2745_v9 = vrot.slane %v2633_v38, 5  ;;  %v2716_v17 = vpop.f32.mrb[62].mxu1  ;;  %v2635_v56 = vpop.f32.mrb[63].mxu0 }
 0x633   : > { %v13065_v14 = vadd.f32 %v2769_v18, %v12893_v30  ;;  %v2772_v6 = vmul.f32 %v2744_v33, %v12947_v51  ;;  %v2749_v63 = vrot.slane %v2716_v17, 5  ;;  %v2747_v20 = vrot.slane %v2635_v56, 5  ;;  %v2718_v57 = vpop.f32.mrb[63].mxu1 }
 0x634   : > { %v13069_v8 = vadd.f32 %v2771_v61, %v12897_v47  ;;  %v13072_v37 = vadd.f32 %v2770_v52, %v12900_v13  ;;  %v2746_v60 = vsel %vm987_vm3, %v2737_v2, %v2745_v9  ;;  %v2751_v19 = vrot.slane %v2718_v57, 5 }
 0x635   : > { %v13076_v31 = vadd.f32 %v2772_v6, %v12904_v4  ;;  %v2773_v30 = vmul.f32 %v2746_v60, %v12949_v10  ;;  %v2750_v18 = vsel %vm987_vm3, %v2741_v11, %v2749_v63  ;;  %v2748_v51 = vsel %vm987_vm3, %v2739_v59, %v2747_v20  ;;  %v13081_v1 = vpop.f32.mrb[64].mxu0 }
 0x636   : > { %v2775_v47 = vmul.f32 %v2750_v18, %v12951_v29  ;;  %v2774_v49 = vmul.f32 %v2748_v51, %v12953_v0  ;;  %v2752_v13 = vsel %vm987_vm3, %v2743_v35, %v2751_v19  ;;  %v3040_v2 = vadd.f32 %v13081_v1, %v12449_v55  ;;  %v13088_v38 = vpop.f32.mrb[64].mxu1  ;;  %v13090_v4 = vpop.f32.mrb[65].mxu0 }
 0x637   : > { %v13093_v10 = vadd.f32 %v2773_v30, %v12921_v5  ;;  %v2776_v11 = vmul.f32 %v2752_v13, %v12955_v21  ;;  %v3042_v59 = vadd.f32 %v13088_v38, %v12449_v55  ;;  %v3041_v29 = vadd.f32 %v13090_v4, %v12449_v55  ;;  %v13100_v0 = vpop.f32.mrb[65].mxu1 }
 0x638   : > { %v13103_v35 = vadd.f32 %v2775_v47, %v12931_v16  ;;  %v13106_v61 = vadd.f32 %v2774_v49, %v12934_v39  ;;  %v9870_v52 = vmul.f32 -1.442695, %v3040_v2  ;;  %v3043_v5 = vadd.f32 %v13100_v0, %v12449_v55 }
 0x639   : > { %v13111_v21 = vadd.f32 %v2776_v11, %v12939_v45  ;;  %v9872_v33 = vmul.f32 -1.442695, %v3042_v59  ;;  %v9871_v9 = vmul.f32 -1.442695, %v3041_v29  ;;  %v13113_v17 = vpop.f32.mrb[66].mxu0 }
 0x63a   : > { %10524 = vpow2.f32 %v9870_v52  ;;  %v9873_v56 = vmul.f32 -1.442695, %v3043_v5  ;;  %v13115_v6 = vpop.f32.mrb[66].mxu1  ;;  %v13117_v16 = vpop.f32.mrb[67].mxu0  ;;  %v15592_v5 = vmax.f32 %v12809_v42, %v12959_v26  ;;  %v15594_v42 = vld [vmem:[#allocation28_spill] sm:$0xff]  ;;  %v15596_v26 = vld [vmem:[#allocation71_spill] sm:$0xff] }
 0x63b   : > { %10526 = vpow2.f32 %v9872_v33  ;;  %v13119_v39 = vpop.f32.mrb[67].mxu1 }
 0x63c   : > { %10528 = vpow2.f32 %v9871_v9 }
 0x63d   : > { %10530 = vpow2.f32 %v9873_v56  ;;  %v13121_v63 = vpop.f32.mrb[68].mxu0 }
 0x63e   : > { %v13123_v20 = vpop.f32.mrb[68].mxu1  ;;  %v13125_v45 = vpop.f32.mrb[69].mxu0 }
 0x63f   : > { %v13127_v57 = vpop.f32.mrb[69].mxu1 }
 0x644   : > { %v10525_v60 = vpop.eup %10524 }
 0x645   : > { %v10527_v19 = vpop.eup %10526  ;;  %v3056_v30 = vadd.f32 1.0, %v10525_v60  ;;  %v13175_v60 = vld [vmem:[%s15200_s7 + $0x8] sm:$0xff] }
 0x646   : > { %v10529_v18 = vpop.eup %10528  ;;  %v3058_v51 = vadd.f32 1.0, %v10527_v19  ;;  %v15600_v19 = vld [vmem:[#allocation30_spill] sm:$0xff] }
 0x647   : > { %v10531_v47 = vpop.eup %10530  ;;  %10532 = vrcp.f32 %v3056_v30  ;;  %v3057_v49 = vadd.f32 1.0, %v10529_v18  ;;  %v15601_v30 = vld [vmem:[#allocation31_spill] sm:$0xff]  ;;  %v13188_v18 = vld [vmem:[%s15200_s7 + $0x10] sm:$0x3] }
 0x648   : > { %10534 = vrcp.f32 %v3058_v51  ;;  %v3059_v13 = vadd.f32 1.0, %v10531_v47  ;;  %v13199_v51 = vld [vmem:[%s15197_s4] sm:$0xff]  ;;  %v13210_v47 = vld [vmem:[%s15197_s4 + $0x8] sm:$0xff] }
 0x649   : > { %10536 = vrcp.f32 %v3057_v49 }
 0x64a   : > { %10538 = vrcp.f32 %v3059_v13 }
 0x651   : > { %v10533_v2 = vpop.eup %10532 }
 0x652   : > { %v10535_v11 = vpop.eup %10534  ;;  %v13132_v59 = vmax.f32 %v2777_v34, %v10533_v2  ;;  %v13135_v29 = vadd.f32 %v10533_v2, %v12965_v36  ;;  %v15597_v34 = vld [vmem:[#allocation72_spill] sm:$0xff]  ;;  %v15598_v36 = vld [vmem:[#allocation73_spill] sm:$0xff] }
 0x653   : > { %v13137_v52 = vpop.eup %10536  ;;  %v13142_v33 = vmax.f32 %v15592_v5, %v10535_v11  ;;  %v13145_v9 = vadd.f32 %v10535_v11, %v12973_v15  ;;  %v15599_v15 = vld [vmem:[#allocation29_spill] sm:$0xff] }
 0x654   : > { %15591 = vst [vmem:[#allocation57_spill] sm:$0xff] %v13132_v59  ;;  %v13147_v56 = vpop.eup %10538  ;;  %9874 = vmatprep.subr.msk.mxu0 %vm987_vm3, %v13137_v52 }
 0x655   : > { %15593 = vst [vmem:[#allocation58_spill] sm:$0xff] %v13142_v33  ;;  %9879 = vmatprep.subr.msk.mxu1 %vm987_vm3, %v13147_v56  ;;  %9875 = vmatpush1.msk.msra.mxu0 %vm987_vm3, %v10533_v2 }
 0x656   : > { %9880 = vmatpush1.msk.msra.mxu1 %vm987_vm3, %v10535_v11  ;;  %9876 = vmatmul.mubr.msk.f32.vlgmr.msra.gmra.mrb[70].mxu0 %vm977_vm4, %v13158_v44 }
 0x657   : > { %9881 = vmatmul.mubr.msk.f32.vlgmr.msra.gmra.mrb[70].mxu1 %vm977_vm4, %v13158_v44  ;;  %10223 = vmatprep.subr.bf16.mxu0 %v15594_v42 }
 0x658   : > { %10231 = vmatprep.subr.bf16.mxu1 %v15595_v62  ;;  %10225 = vmatpush1.bf16.msra.mxu0 %v15596_v26 }
 0x659   : > { %10233 = vmatpush1.bf16.msra.mxu1 %v15597_v34  ;;  %10227 = vmatprep.subr.bf16.mxu0 %v15598_v36 }
 0x65a   : > { %10235 = vmatprep.subr.bf16.mxu1 %v15599_v15  ;;  %3150 = vmatprep.mubr.f32.mxu0 %v15560_v46 }
 0x65b   : > { %3233 = vmatprep.mubr.f32.mxu1 %v15560_v46  ;;  %9877 = vmatmul.mubr.msk.f32.gmra.mrb[72].mxu0 %vm977_vm4, %v13175_v60 }
 0x65c   : > { %9882 = vmatmul.mubr.msk.f32.gmra.mrb[72].mxu1 %vm977_vm4, %v13175_v60  ;;  %10229 = vmatpush1.bf16.msra.mxu0 %v15600_v19 }
 0x65d   : > { %10237 = vmatpush1.bf16.msra.mxu1 %v15601_v30  ;;  %3156 = vmatprep.mubr.f32.mxu0 %v15560_v46 }
 0x65e   : > { %3239 = vmatprep.mubr.f32.mxu1 %v15560_v46 }
 0x65f   : > { %9878 = vmatmul.mubr.msk.f32.gmra.mrb[74].mxu0 %vm977_vm4, %v13188_v18 }
 0x660   : > { %9883 = vmatmul.mubr.msk.f32.gmra.mrb[74].mxu1 %vm977_vm4, %v13188_v18  ;;  %3463 = vmatprep.mubr.f32.mxu0 %v15560_v46 }
 0x661   : > { %3546 = vmatprep.mubr.f32.mxu1 %v15560_v46 }
 0x663   : > { %9885 = vmatmul.mubr.msk.f32.vlgmr.msra.gmra.mrb[76].mxu0 %vm768_vm2, %v13199_v51 }
 0x664   : > { %9888 = vmatmul.mubr.msk.f32.vlgmr.msra.gmra.mrb[76].mxu1 %vm768_vm2, %v13199_v51  ;;  %3469 = vmatprep.mubr.f32.mxu0 %v15560_v46 }
 0x665   : > { %3552 = vmatprep.mubr.f32.mxu1 %v15560_v46 }
 0x667   : > { %9886 = vmatmul.mubr.msk.f32.gmra.mrb[78].mxu0 %vm768_vm2, %v13210_v47 }
 0x668   : > { %9889 = vmatmul.mubr.msk.f32.gmra.mrb[78].mxu1 %vm768_vm2, %v13210_v47  ;;  %3475 = vmatprep.mubr.f32.mxu0 %v15560_v46 }
 0x669   : > { %3558 = vmatprep.mubr.f32.mxu1 %v15560_v46 }
 0x66b   : > { %9887 = vmatmul.mubr.msk.f32.gmra.mrb[80].mxu0 %vm768_vm2, %v12693_v40 }
 0x66c   : > { %9890 = vmatmul.mubr.msk.f32.gmra.mrb[80].mxu1 %vm768_vm2, %v12693_v40  ;;  %3669 = vmatprep.mubr.f32.mxu0 %v15560_v46 }
 0x66d   : > { %3752 = vmatprep.mubr.f32.mxu1 %v15560_v46 }
 0x729   : > { %v3146_v49 = vpop.f32.mrb[70].mxu0 }
 0x72a   : > { %v3258_v13 = vrot.slane %v3146_v49, 5  ;;  %v3229_v2 = vpop.f32.mrb[70].mxu1  ;;  %v3148_v11 = vpop.f32.mrb[71].mxu0 }
 0x72b   : > { %v3260_v5 = vrot.slane %v3229_v2, 5  ;;  %v3259_v42 = vrot.slane %v3148_v11, 5  ;;  %v3231_v62 = vpop.f32.mrb[71].mxu1 }
 0x72c   : > { %v3290_v26 = vmul.f32 %v3258_v13, %v13081_v1  ;;  %v3261_v34 = vrot.slane %v3231_v62, 5 }
 0x72d   : > { %v3292_v36 = vmul.f32 %v3260_v5, %v13088_v38  ;;  %v3291_v15 = vmul.f32 %v3259_v42, %v13090_v4 }
 0x72e   : > { %v13228_v40 = vadd.f32 %v3290_v26, %v13045_v54  ;;  %v3293_v19 = vmul.f32 %v3261_v34, %v13100_v0  ;;  %v3152_v30 = vpop.f32.mrb[72].mxu0 }
 0x72f   : > { %v13232_v49 = vadd.f32 %v3292_v36, %v13049_v28  ;;  %v13235_v2 = vadd.f32 %v3291_v15, %v13052_v23  ;;  %v3262_v11 = vrot.slane %v3152_v30, 5  ;;  %v3235_v24 = vpop.f32.mrb[72].mxu1  ;;  %v3154_v1 = vpop.f32.mrb[73].mxu0 }
 0x730   : > { %v13238_v62 = vadd.f32 %v3293_v19, %v13055_v53  ;;  %v3266_v38 = vrot.slane %v3235_v24, 5  ;;  %v3264_v4 = vrot.slane %v3154_v1, 5  ;;  %v3237_v27 = vpop.f32.mrb[73].mxu1 }
 0x731   : > { %v3263_v54 = vsel %vm987_vm3, %v3258_v13, %v3262_v11  ;;  %v3268_v26 = vrot.slane %v3237_v27, 5 }
 0x732   : > { %v3294_v0 = vmul.f32 %v3263_v54, %v13113_v17  ;;  %v3267_v28 = vsel %vm987_vm3, %v3260_v5, %v3266_v38  ;;  %v3265_v36 = vsel %vm987_vm3, %v3259_v42, %v3264_v4  ;;  %v3158_v23 = vpop.f32.mrb[74].mxu0 }
 0x733   : > { %v3296_v15 = vmul.f32 %v3267_v28, %v13115_v6  ;;  %v3295_v30 = vmul.f32 %v3265_v36, %v13117_v16  ;;  %v3269_v53 = vsel %vm987_vm3, %v3261_v34, %v3268_v26  ;;  %v3270_v19 = vrot.slane %v3158_v23, 5  ;;  %v3241_v24 = vpop.f32.mrb[74].mxu1  ;;  %v3160_v1 = vpop.f32.mrb[75].mxu0 }
 0x734   : > { %v13248_v50 = vadd.f32 %v3294_v0, %v13065_v14  ;;  %v3297_v27 = vmul.f32 %v3269_v53, %v13119_v39  ;;  %v3274_v17 = vrot.slane %v3241_v24, 5  ;;  %v3272_v13 = vrot.slane %v3160_v1, 5  ;;  %v3243_v5 = vpop.f32.mrb[75].mxu1 }
 0x735   : > { %v13252_v42 = vadd.f32 %v3296_v15, %v13069_v8  ;;  %v13255_v6 = vadd.f32 %v3295_v30, %v13072_v37  ;;  %v3271_v16 = vsel %vm987_vm3, %v3262_v11, %v3270_v19  ;;  %v3276_v34 = vrot.slane %v3243_v5, 5 }
 0x736   : > { %v13259_v54 = vadd.f32 %v3297_v27, %v13076_v31  ;;  %v3298_v14 = vmul.f32 %v3271_v16, %v13121_v63  ;;  %v3275_v0 = vsel %vm987_vm3, %v3266_v38, %v3274_v17  ;;  %v3273_v39 = vsel %vm987_vm3, %v3264_v4, %v3272_v13  ;;  %v13264_v28 = vpop.f32.mrb[76].mxu0 }
 0x737   : > { %v3300_v8 = vmul.f32 %v3275_v0, %v13123_v20  ;;  %v3299_v36 = vmul.f32 %v3273_v39, %v13125_v45  ;;  %v3277_v37 = vsel %vm987_vm3, %v3268_v26, %v3276_v34  ;;  %v3565_v11 = vadd.f32 %v13264_v28, %v12449_v55  ;;  %v13271_v23 = vpop.f32.mrb[76].mxu1  ;;  %v13273_v31 = vpop.f32.mrb[77].mxu0 }
 0x738   : > { %v13276_v63 = vadd.f32 %v3298_v14, %v13093_v10  ;;  %v3301_v38 = vmul.f32 %v3277_v37, %v13127_v57  ;;  %v3567_v4 = vadd.f32 %v13271_v23, %v12449_v55  ;;  %v3566_v20 = vadd.f32 %v13273_v31, %v12449_v55  ;;  %v13283_v45 = vpop.f32.mrb[77].mxu1 }
 0x739   : > { %v13286_v26 = vadd.f32 %v3300_v8, %v13103_v35  ;;  %v13289_v15 = vadd.f32 %v3299_v36, %v13106_v61  ;;  %v9891_v30 = vmul.f32 -1.442695, %v3565_v11  ;;  %v3568_v10 = vadd.f32 %v13283_v45, %v12449_v55 }
 0x73a   : > { %v13294_v57 = vadd.f32 %v3301_v38, %v13111_v21  ;;  %v9893_v53 = vmul.f32 -1.442695, %v3567_v4  ;;  %v9892_v19 = vmul.f32 -1.442695, %v3566_v20  ;;  %v13296_v24 = vpop.f32.mrb[78].mxu0 }
 0x73b   : > { %10540 = vpow2.f32 %v9891_v30  ;;  %v9894_v1 = vmul.f32 -1.442695, %v3568_v10  ;;  %v13298_v27 = vpop.f32.mrb[78].mxu1  ;;  %v13300_v35 = vpop.f32.mrb[79].mxu0 }
 0x73c   : > { %10542 = vpow2.f32 %v9893_v53  ;;  %v13302_v61 = vpop.f32.mrb[79].mxu1 }
 0x73d   : > { %10544 = vpow2.f32 %v9892_v19 }
 0x73e   : > { %10546 = vpow2.f32 %v9894_v1  ;;  %v13304_v17 = vpop.f32.mrb[80].mxu0  ;;  %v15608_v1 = vld [vmem:[#allocation75_spill] sm:$0xff] }
 0x73f   : > { %v13306_v13 = vpop.f32.mrb[80].mxu1  ;;  %v13308_v21 = vpop.f32.mrb[81].mxu0 }
 0x740   : > { %v13310_v5 = vpop.f32.mrb[81].mxu1 }
 0x745   : > { %v10541_v16 = vpop.eup %10540 }
 0x746   : > { %v10543_v34 = vpop.eup %10542  ;;  %v3581_v14 = vadd.f32 1.0, %v10541_v16  ;;  %v15609_v16 = vld [vmem:[#allocation76_spill] sm:$0xff] }
 0x747   : > { %v10545_v0 = vpop.eup %10544  ;;  %v3583_v39 = vadd.f32 1.0, %v10543_v34  ;;  %v15610_v34 = vld [vmem:[#allocation77_spill] sm:$0xff] }
 0x748   : > { %v10547_v8 = vpop.eup %10546  ;;  %10548 = vrcp.f32 %v3581_v14  ;;  %v3582_v36 = vadd.f32 1.0, %v10545_v0  ;;  %v15611_v14 = vld [vmem:[#allocation33_spill] sm:$0xff]  ;;  %v15612_v0 = vld [vmem:[#allocation34_spill] sm:$0xff] }
 0x749   : > { %10550 = vrcp.f32 %v3583_v39  ;;  %v3584_v37 = vadd.f32 1.0, %v10547_v8  ;;  %v15613_v39 = vld [vmem:[#allocation35_spill] sm:$0xff]  ;;  %v13381_v8 = vld [vmem:[%s15197_s4 + $0x10] sm:$0x1f] }
 0x74a   : > { %10552 = vrcp.f32 %v3582_v36 }
 0x74b   : > { %10554 = vrcp.f32 %v3584_v37 }
 0x752   : > { %v13312_v11 = vpop.eup %10548 }
 0x753   : > { %15602 = vst [vmem:[#allocation59_spill] sm:$0xff] %v13312_v11  ;;  %v13314_v38 = vpop.eup %10550  ;;  %v13320_v20 = vadd.f32 %v13312_v11, %v13135_v29  ;;  %v15606_v29 = vld [vmem:[#allocation32_spill] sm:$0xff] }
 0x754   : > { %15603 = vst [vmem:[#allocation60_spill] sm:$0xff] %v13314_v38  ;;  %v13322_v30 = vpop.eup %10552  ;;  %v13328_v53 = vadd.f32 %v13314_v38, %v13145_v9  ;;  %v15607_v9 = vld [vmem:[#allocation74_spill] sm:$0xff] }
 0x755   : > { %15604 = vst [vmem:[#allocation15_spill] sm:$0xff] %v13320_v20  ;;  %v13330_v19 = vpop.eup %10554  ;;  %9895 = vmatprep.subr.msk.mxu0 %vm987_vm3, %v13322_v30 }
 0x756   : > { %15605 = vst [vmem:[#allocation50_spill] sm:$0xff] %v13328_v53  ;;  %9900 = vmatprep.subr.msk.mxu1 %vm987_vm3, %v13330_v19  ;;  %9896 = vmatpush1.msk.msra.mxu0 %vm987_vm3, %v13312_v11 }
 0x757   : > { %9901 = vmatpush1.msk.msra.mxu1 %vm987_vm3, %v13314_v38  ;;  %9897 = vmatmul.mubr.msk.f32.vlgmr.msra.gmra.mrb[82].mxu0 %vm977_vm4, %v13158_v44 }
 0x758   : > { %9902 = vmatmul.mubr.msk.f32.vlgmr.msra.gmra.mrb[82].mxu1 %vm977_vm4, %v13158_v44  ;;  %10239 = vmatprep.subr.bf16.mxu0 %v15606_v29 }
 0x759   : > { %10247 = vmatprep.subr.bf16.mxu1 %v15607_v9  ;;  %10241 = vmatpush1.bf16.msra.mxu0 %v15608_v1 }
 0x75a   : > { %10249 = vmatpush1.bf16.msra.mxu1 %v15609_v16  ;;  %10243 = vmatprep.subr.bf16.mxu0 %v15610_v34 }
 0x75b   : > { %10251 = vmatprep.subr.bf16.mxu1 %v15611_v14  ;;  %3675 = vmatprep.mubr.f32.mxu0 %v15560_v46 }
 0x75c   : > { %3758 = vmatprep.mubr.f32.mxu1 %v15560_v46  ;;  %9898 = vmatmul.mubr.msk.f32.gmra.mrb[84].mxu0 %vm977_vm4, %v13175_v60 }
 0x75d   : > { %9903 = vmatmul.mubr.msk.f32.gmra.mrb[84].mxu1 %vm977_vm4, %v13175_v60  ;;  %10245 = vmatpush1.bf16.msra.mxu0 %v15612_v0 }
 0x75e   : > { %10253 = vmatpush1.bf16.msra.mxu1 %v15613_v39  ;;  %3681 = vmatprep.mubr.f32.mxu0 %v15560_v46 }
 0x75f   : > { %3764 = vmatprep.mubr.f32.mxu1 %v15560_v46 }
 0x760   : > { %9899 = vmatmul.mubr.msk.f32.gmra.mrb[86].mxu0 %vm977_vm4, %v13188_v18 }
 0x761   : > { %9904 = vmatmul.mubr.msk.f32.gmra.mrb[86].mxu1 %vm977_vm4, %v13188_v18  ;;  %3988 = vmatprep.mubr.f32.mxu0 %v15560_v46 }
 0x762   : > { %4071 = vmatprep.mubr.f32.mxu1 %v15560_v46 }
 0x764   : > { %9906 = vmatmul.mubr.msk.f32.vlgmr.msra.gmra.mrb[88].mxu0 %vm768_vm2, %v13199_v51 }
 0x765   : > { %9909 = vmatmul.mubr.msk.f32.vlgmr.msra.gmra.mrb[88].mxu1 %vm768_vm2, %v13199_v51  ;;  %3994 = vmatprep.mubr.f32.mxu0 %v15560_v46 }
 0x766   : > { %4077 = vmatprep.mubr.f32.mxu1 %v15560_v46 }
 0x768   : > { %9907 = vmatmul.mubr.msk.f32.gmra.mrb[90].mxu0 %vm768_vm2, %v13210_v47 }
 0x769   : > { %9910 = vmatmul.mubr.msk.f32.gmra.mrb[90].mxu1 %vm768_vm2, %v13210_v47  ;;  %4000 = vmatprep.mubr.f32.mxu0 %v15560_v46 }
 0x76a   : > { %4083 = vmatprep.mubr.f32.mxu1 %v15560_v46 }
 0x76c   : > { %9908 = vmatmul.mubr.msk.f32.gmra.mrb[92].mxu0 %vm768_vm2, %v13381_v8 }
 0x76d   : > { %9911 = vmatmul.mubr.msk.f32.gmra.mrb[92].mxu1 %vm768_vm2, %v13381_v8  ;;  %4194 = vmatprep.mubr.f32.mxu0 %v15560_v46 }
 0x76e   : > { %4277 = vmatprep.mubr.f32.mxu1 %v15560_v46 }
 0x82a   : > { %v3671_v36 = vpop.f32.mrb[82].mxu0 }
 0x82b   : > { %v3783_v37 = vrot.slane %v3671_v36, 5  ;;  %v3754_v29 = vpop.f32.mrb[82].mxu1  ;;  %v3673_v9 = vpop.f32.mrb[83].mxu0 }
 0x82c   : > { %v3785_v1 = vrot.slane %v3754_v29, 5  ;;  %v3784_v16 = vrot.slane %v3673_v9, 5  ;;  %v3756_v34 = vpop.f32.mrb[83].mxu1 }
 0x82d   : > { %v3815_v14 = vmul.f32 %v3783_v37, %v13264_v28  ;;  %v3786_v0 = vrot.slane %v3756_v34, 5 }
 0x82e   : > { %v3817_v39 = vmul.f32 %v3785_v1, %v13271_v23  ;;  %v3816_v10 = vmul.f32 %v3784_v16, %v13273_v31 }
 0x82f   : > { %v13393_v4 = vadd.f32 %v3815_v14, %v13228_v40  ;;  %v3818_v53 = vmul.f32 %v3786_v0, %v13283_v45  ;;  %v3677_v20 = vpop.f32.mrb[84].mxu0 }
 0x830   : > { %v13397_v36 = vadd.f32 %v3817_v39, %v13232_v49  ;;  %v13400_v29 = vadd.f32 %v3816_v10, %v13235_v2  ;;  %v3787_v9 = vrot.slane %v3677_v20, 5  ;;  %v3760_v38 = vpop.f32.mrb[84].mxu1  ;;  %v3679_v28 = vpop.f32.mrb[85].mxu0 }
 0x831   : > { %v13403_v34 = vadd.f32 %v3818_v53, %v13238_v62  ;;  %v3791_v23 = vrot.slane %v3760_v38, 5  ;;  %v3789_v31 = vrot.slane %v3679_v28, 5  ;;  %v3762_v33 = vpop.f32.mrb[85].mxu1 }
 0x832   : > { %v3788_v40 = vsel %vm987_vm3, %v3783_v37, %v3787_v9  ;;  %v3793_v14 = vrot.slane %v3762_v33, 5 }
 0x833   : > { %v3819_v45 = vmul.f32 %v3788_v40, %v13296_v24  ;;  %v3792_v49 = vsel %vm987_vm3, %v3785_v1, %v3791_v23  ;;  %v3790_v39 = vsel %vm987_vm3, %v3784_v16, %v3789_v31  ;;  %v3683_v2 = vpop.f32.mrb[86].mxu0 }
 0x834   : > { %v3821_v20 = vmul.f32 %v3792_v49, %v13298_v27  ;;  %v3820_v10 = vmul.f32 %v3790_v39, %v13300_v35  ;;  %v3794_v62 = vsel %vm987_vm3, %v3786_v0, %v3793_v14  ;;  %v3795_v53 = vrot.slane %v3683_v2, 5  ;;  %v3766_v38 = vpop.f32.mrb[86].mxu1  ;;  %v3685_v28 = vpop.f32.mrb[87].mxu0 }
 0x835   : > { %v13413_v11 = vadd.f32 %v3819_v45, %v13248_v50  ;;  %v3822_v33 = vmul.f32 %v3794_v62, %v13302_v61  ;;  %v3799_v24 = vrot.slane %v3766_v38, 5  ;;  %v3797_v37 = vrot.slane %v3685_v28, 5  ;;  %v3768_v1 = vpop.f32.mrb[87].mxu1 }
 0x836   : > { %v13417_v16 = vadd.f32 %v3821_v20, %v13252_v42  ;;  %v13420_v27 = vadd.f32 %v3820_v10, %v13255_v6  ;;  %v3796_v35 = vsel %vm987_vm3, %v3787_v9, %v3795_v53  ;;  %v3801_v0 = vrot.slane %v3768_v1, 5 }
 0x837   : > { %v13424_v40 = vadd.f32 %v3822_v33, %v13259_v54  ;;  %v3823_v50 = vmul.f32 %v3796_v35, %v13304_v17  ;;  %v3800_v45 = vsel %vm987_vm3, %v3791_v23, %v3799_v24  ;;  %v3798_v61 = vsel %vm987_vm3, %v3789_v31, %v3797_v37  ;;  %v13429_v49 = vpop.f32.mrb[88].mxu0 }
 0x838   : > { %v3825_v42 = vmul.f32 %v3800_v45, %v13306_v13  ;;  %v3824_v39 = vmul.f32 %v3798_v61, %v13308_v21  ;;  %v3802_v6 = vsel %vm987_vm3, %v3793_v14, %v3801_v0  ;;  %v4090_v9 = vadd.f32 %v13429_v49, %v12449_v55  ;;  %v13436_v2 = vpop.f32.mrb[88].mxu1  ;;  %v13438_v54 = vpop.f32.mrb[89].mxu0 }
 0x839   : > { %v13441_v17 = vadd.f32 %v3823_v50, %v13276_v63  ;;  %v3826_v23 = vmul.f32 %v3802_v6, %v13310_v5  ;;  %v4092_v31 = vadd.f32 %v13436_v2, %v12449_v55  ;;  %v4091_v13 = vadd.f32 %v13438_v54, %v12449_v55  ;;  %v13448_v21 = vpop.f32.mrb[89].mxu1 }
 0x83a   : > { %v13451_v14 = vadd.f32 %v3825_v42, %v13286_v26  ;;  %v13454_v20 = vadd.f32 %v3824_v39, %v13289_v15  ;;  %v9912_v10 = vmul.f32 -1.442695, %v4090_v9  ;;  %v4093_v63 = vadd.f32 %v13448_v21, %v12449_v55 }
 0x83b   : > { %v13459_v5 = vadd.f32 %v3826_v23, %v13294_v57  ;;  %v9914_v62 = vmul.f32 -1.442695, %v4092_v31  ;;  %v9913_v53 = vmul.f32 -1.442695, %v4091_v13  ;;  %v13461_v38 = vpop.f32.mrb[90].mxu0 }
 0x83c   : > { %10556 = vpow2.f32 %v9912_v10  ;;  %v9915_v28 = vmul.f32 -1.442695, %v4093_v63  ;;  %v13463_v33 = vpop.f32.mrb[90].mxu1  ;;  %v13465_v26 = vpop.f32.mrb[91].mxu0  ;;  %v15617_v10 = vld [vmem:[#allocation36_spill] sm:$0xff]  ;;  %v15618_v63 = vld [vmem:[#allocation78_spill] sm:$0xff] }
 0x83d   : > { %10558 = vpow2.f32 %v9914_v62  ;;  %v13467_v15 = vpop.f32.mrb[91].mxu1  ;;  %v15619_v62 = vld [vmem:[#allocation79_spill] sm:$0xff] }
 0x83e   : > { %10560 = vpow2.f32 %v9913_v53  ;;  %v15620_v53 = vld [vmem:[#allocation80_spill] sm:$0xff] }
 0x83f   : > { %10562 = vpow2.f32 %v9915_v28  ;;  %v13469_v24 = vpop.f32.mrb[92].mxu0  ;;  %v15621_v28 = vld [vmem:[#allocation81_spill] sm:$0xff] }
 0x840   : > { %v13471_v37 = vpop.f32.mrb[92].mxu1  ;;  %v13473_v57 = vpop.f32.mrb[93].mxu0 }
 0x841   : > { %v13475_v1 = vpop.f32.mrb[93].mxu1 }
 0x846   : > { %v10557_v35 = vpop.eup %10556 }
 0x847   : > { %v10559_v0 = vpop.eup %10558  ;;  %v4106_v50 = vadd.f32 1.0, %v10557_v35  ;;  %v15622_v35 = vld [vmem:[#allocation38_spill] sm:$0xff] }
 0x848   : > { %v10561_v45 = vpop.eup %10560  ;;  %v4108_v42 = vadd.f32 1.0, %v10559_v0  ;;  %v15623_v0 = vld [vmem:[#allocation39_spill] sm:$0xff] }
 0x849   : > { %v10563_v61 = vpop.eup %10562  ;;  %v4107_v39 = vadd.f32 1.0, %v10561_v45  ;;  %10564 = vrcp.f32 %v4106_v50  ;;  %v15624_v50 = vld [vmem:[#allocation40_spill] sm:$0xff] }
 0x84a   : > { %v4109_v6 = vadd.f32 1.0, %v10563_v61 }
 0x84b   : > { %10566 = vrcp.f32 %v4107_v39 }
 0x84c   : > { %10568 = vrcp.f32 %v4109_v6 }
 0x84d   : > { %10570 = vrcp.f32 %v4108_v42 }
 0x853   : > { %v13477_v9 = vpop.eup %10564 }
 0x855   : > { %v13479_v23 = vpop.eup %10566 }
 0x856   : > { %15614 = vst [vmem:[#allocation44_spill] sm:$0xff] %v13479_v23  ;;  %v13481_v31 = vpop.eup %10568  ;;  %9916 = vmatprep.subr.msk.mxu0 %vm987_vm3, %v13479_v23 }
 0x857   : > { %15615 = vst [vmem:[#allocation37_spill] sm:$0xff] %v13481_v31  ;;  %v13485_v13 = vpop.eup %10570  ;;  %9921 = vmatprep.subr.msk.mxu1 %vm987_vm3, %v13481_v31  ;;  %9917 = vmatpush1.msk.msra.mxu0 %vm987_vm3, %v13477_v9 }
 0x858   : > { %15616 = vst [vmem:[#allocation16_spill] sm:$0xff] %v13485_v13  ;;  %9922 = vmatpush1.msk.msra.mxu1 %vm987_vm3, %v13485_v13  ;;  %9918 = vmatmul.mubr.msk.f32.vlgmr.msra.gmra.mrb[94].mxu0 %vm977_vm4, %v13158_v44 }
 0x859   : > { %9923 = vmatmul.mubr.msk.f32.vlgmr.msra.gmra.mrb[94].mxu1 %vm977_vm4, %v13158_v44  ;;  %10255 = vmatprep.subr.bf16.mxu0 %v15617_v10 }
 0x85a   : > { %10263 = vmatprep.subr.bf16.mxu1 %v15618_v63  ;;  %10257 = vmatpush1.bf16.msra.mxu0 %v15619_v62 }
 0x85b   : > { %10265 = vmatpush1.bf16.msra.mxu1 %v15620_v53  ;;  %10259 = vmatprep.subr.bf16.mxu0 %v15621_v28 }
 0x85c   : > { %10267 = vmatprep.subr.bf16.mxu1 %v15622_v35  ;;  %4200 = vmatprep.mubr.f32.mxu0 %v15560_v46 }
 0x85d   : > { %4283 = vmatprep.mubr.f32.mxu1 %v15560_v46  ;;  %9919 = vmatmul.mubr.msk.f32.gmra.mrb[96].mxu0 %vm977_vm4, %v13175_v60 }
 0x85e   : > { %9924 = vmatmul.mubr.msk.f32.gmra.mrb[96].mxu1 %vm977_vm4, %v13175_v60  ;;  %10261 = vmatpush1.bf16.msra.mxu0 %v15623_v0 }
 0x85f   : > { %10269 = vmatpush1.bf16.msra.mxu1 %v15624_v50  ;;  %4206 = vmatprep.mubr.f32.mxu0 %v15560_v46 }
 0x860   : > { %4289 = vmatprep.mubr.f32.mxu1 %v15560_v46 }
 0x861   : > { %9920 = vmatmul.mubr.msk.f32.gmra.mrb[98].mxu0 %vm977_vm4, %v13188_v18 }
 0x862   : > { %9925 = vmatmul.mubr.msk.f32.gmra.mrb[98].mxu1 %vm977_vm4, %v13188_v18  ;;  %4513 = vmatprep.mubr.f32.mxu0 %v15560_v46 }
 0x863   : > { %4596 = vmatprep.mubr.f32.mxu1 %v15560_v46 }
 0x865   : > { %9927 = vmatmul.mubr.msk.f32.vlgmr.msra.gmra.mrb[100].mxu0 %vm768_vm2, %v13199_v51 }
 0x866   : > { %9930 = vmatmul.mubr.msk.f32.vlgmr.msra.gmra.mrb[100].mxu1 %vm768_vm2, %v13199_v51  ;;  %4519 = vmatprep.mubr.f32.mxu0 %v15560_v46 }
 0x867   : > { %4602 = vmatprep.mubr.f32.mxu1 %v15560_v46 }
 0x869   : > { %9928 = vmatmul.mubr.msk.f32.gmra.mrb[102].mxu0 %vm768_vm2, %v13210_v47 }
 0x86a   : > { %9931 = vmatmul.mubr.msk.f32.gmra.mrb[102].mxu1 %vm768_vm2, %v13210_v47  ;;  %4525 = vmatprep.mubr.f32.mxu0 %v15560_v46 }
 0x86b   : > { %4608 = vmatprep.mubr.f32.mxu1 %v15560_v46 }
 0x86d   : > { %9929 = vmatmul.mubr.msk.f32.gmra.mrb[104].mxu0 %vm768_vm2, %v13381_v8 }
 0x86e   : > { %9932 = vmatmul.mubr.msk.f32.gmra.mrb[104].mxu1 %vm768_vm2, %v13381_v8  ;;  %4719 = vmatprep.mubr.f32.mxu0 %v15560_v46 }
 0x86f   : > { %4802 = vmatprep.mubr.f32.mxu1 %v15560_v46 }
 0x92b   : > { %v4196_v45 = vpop.f32.mrb[94].mxu0 }
 0x92c   : > { %v4308_v61 = vrot.slane %v4196_v45, 5  ;;  %v4279_v42 = vpop.f32.mrb[94].mxu1  ;;  %v4198_v39 = vpop.f32.mrb[95].mxu0 }
 0x92d   : > { %v4310_v6 = vrot.slane %v4279_v42, 5  ;;  %v4309_v10 = vrot.slane %v4198_v39, 5  ;;  %v4281_v63 = vpop.f32.mrb[95].mxu1 }
 0x92e   : > { %v4340_v62 = vmul.f32 %v4308_v61, %v13429_v49  ;;  %v4311_v53 = vrot.slane %v4281_v63, 5 }
 0x92f   : > { %v4342_v28 = vmul.f32 %v4310_v6, %v13436_v2  ;;  %v4341_v35 = vmul.f32 %v4309_v10, %v13438_v54 }
 0x930   : > { %v13541_v0 = vadd.f32 %v4340_v62, %v13393_v4  ;;  %v4343_v50 = vmul.f32 %v4311_v53, %v13448_v21  ;;  %v4202_v31 = vpop.f32.mrb[96].mxu0 }
 0x931   : > { %v13545_v45 = vadd.f32 %v4342_v28, %v13397_v36  ;;  %v13548_v42 = vadd.f32 %v4341_v35, %v13400_v29  ;;  %v4312_v39 = vrot.slane %v4202_v31, 5  ;;  %v4285_v23 = vpop.f32.mrb[96].mxu1  ;;  %v4204_v49 = vpop.f32.mrb[97].mxu0 }
 0x932   : > { %v13551_v63 = vadd.f32 %v4343_v50, %v13403_v34  ;;  %v4316_v2 = vrot.slane %v4285_v23, 5  ;;  %v4314_v54 = vrot.slane %v4204_v49, 5  ;;  %v4287_v13 = vpop.f32.mrb[97].mxu1 }
 0x933   : > { %v4313_v4 = vsel %vm987_vm3, %v4308_v61, %v4312_v39  ;;  %v4318_v62 = vrot.slane %v4287_v13, 5 }
 0x934   : > { %v4344_v21 = vmul.f32 %v4313_v4, %v13461_v38  ;;  %v4317_v36 = vsel %vm987_vm3, %v4310_v6, %v4316_v2  ;;  %v4315_v28 = vsel %vm987_vm3, %v4309_v10, %v4314_v54  ;;  %v4208_v29 = vpop.f32.mrb[98].mxu0 }
 0x935   : > { %v4346_v31 = vmul.f32 %v4317_v36, %v13463_v33  ;;  %v4345_v35 = vmul.f32 %v4315_v28, %v13465_v26  ;;  %v4319_v34 = vsel %vm987_vm3, %v4311_v53, %v4318_v62  ;;  %v4320_v50 = vrot.slane %v4208_v29, 5  ;;  %v4291_v23 = vpop.f32.mrb[98].mxu1  ;;  %v4210_v49 = vpop.f32.mrb[99].mxu0 }
 0x936   : > { %v13561_v59 = vadd.f32 %v4344_v21, %v13413_v11  ;;  %v4347_v13 = vmul.f32 %v4319_v34, %v13467_v15  ;;  %v4324_v38 = vrot.slane %v4291_v23, 5  ;;  %v4322_v61 = vrot.slane %v4210_v49, 5  ;;  %v4293_v6 = vpop.f32.mrb[99].mxu1 }
 0x937   : > { %v13565_v10 = vadd.f32 %v4346_v31, %v13417_v16  ;;  %v13568_v33 = vadd.f32 %v4345_v35, %v13420_v27  ;;  %v4321_v26 = vsel %vm987_vm3, %v4312_v39, %v4320_v50  ;;  %v4326_v53 = vrot.slane %v4293_v6, 5 }
 0x938   : > { %v13572_v4 = vadd.f32 %v4347_v13, %v13424_v40  ;;  %v4348_v11 = vmul.f32 %v4321_v26, %v13469_v24  ;;  %v4325_v21 = vsel %vm987_vm3, %v4316_v2, %v4324_v38  ;;  %v4323_v15 = vsel %vm987_vm3, %v4314_v54, %v4322_v61  ;;  %v13577_v36 = vpop.f32.mrb[100].mxu0 }
 0x939   : > { %v4350_v16 = vmul.f32 %v4325_v21, %v13471_v37  ;;  %v4349_v28 = vmul.f32 %v4323_v15, %v13473_v57  ;;  %v4327_v27 = vsel %vm987_vm3, %v4318_v62, %v4326_v53  ;;  %v4615_v39 = vadd.f32 %v13577_v36, %v12449_v55  ;;  %v13584_v29 = vpop.f32.mrb[100].mxu1  ;;  %v13586_v40 = vpop.f32.mrb[101].mxu0 }
 0x93a   : > { %v13589_v24 = vadd.f32 %v4348_v11, %v13441_v17  ;;  %v4351_v2 = vmul.f32 %v4327_v27, %v13475_v1  ;;  %v4617_v54 = vadd.f32 %v13584_v29, %v12449_v55  ;;  %v4616_v37 = vadd.f32 %v13586_v40, %v12449_v55  ;;  %v13596_v57 = vpop.f32.mrb[101].mxu1 }
 0x93b   : > { %v13599_v62 = vadd.f32 %v4350_v16, %v13451_v14  ;;  %v13602_v31 = vadd.f32 %v4349_v28, %v13454_v20  ;;  %v9933_v35 = vmul.f32 -1.442695, %v4615_v39  ;;  %v4618_v17 = vadd.f32 %v13596_v57, %v12449_v55 }
 0x93c   : > { %v13607_v1 = vadd.f32 %v4351_v2, %v13459_v5  ;;  %v9935_v34 = vmul.f32 -1.442695, %v4617_v54  ;;  %v9934_v50 = vmul.f32 -1.442695, %v4616_v37  ;;  %v13609_v23 = vpop.f32.mrb[102].mxu0 }
 0x93d   : > { %10572 = vpow2.f32 %v9933_v35  ;;  %v9936_v49 = vmul.f32 -1.442695, %v4618_v17  ;;  %v13611_v13 = vpop.f32.mrb[102].mxu1  ;;  %v13613_v14 = vpop.f32.mrb[103].mxu0  ;;  %v15629_v35 = vld [vmem:[#allocation43_spill] sm:$0xff]  ;;  %v15630_v17 = vld [vmem:[#allocation82_spill] sm:$0xff] }
 0x93e   : > { %10574 = vpow2.f32 %v9935_v34  ;;  %v13615_v20 = vpop.f32.mrb[103].mxu1  ;;  %v15631_v34 = vld [vmem:[#allocation83_spill] sm:$0xff] }
 0x93f   : > { %10576 = vpow2.f32 %v9934_v50  ;;  %v15632_v50 = vld [vmem:[#allocation84_spill] sm:$0xff] }
 0x940   : > { %10578 = vpow2.f32 %v9936_v49  ;;  %v13617_v38 = vpop.f32.mrb[104].mxu0  ;;  %v15633_v49 = vld [vmem:[#allocation85_spill] sm:$0xff] }
 0x941   : > { %v13619_v61 = vpop.f32.mrb[104].mxu1  ;;  %v13621_v5 = vpop.f32.mrb[105].mxu0 }
 0x942   : > { %v13623_v6 = vpop.f32.mrb[105].mxu1 }
 0x947   : > { %v10573_v26 = vpop.eup %10572 }
 0x948   : > { %v10575_v53 = vpop.eup %10574  ;;  %v4631_v11 = vadd.f32 1.0, %v10573_v26  ;;  %v15634_v26 = vld [vmem:[#allocation45_spill] sm:$0xff] }
 0x949   : > { %v10577_v21 = vpop.eup %10576  ;;  %v4633_v16 = vadd.f32 1.0, %v10575_v53  ;;  %v15636_v53 = vld [vmem:[#allocation48_spill] sm:$0xff] }
 0x94a   : > { %v10579_v15 = vpop.eup %10578  ;;  %v4632_v28 = vadd.f32 1.0, %v10577_v21  ;;  %10580 = vrcp.f32 %v4631_v11 }
 0x94b   : > { %v4634_v27 = vadd.f32 1.0, %v10579_v15 }
 0x94c   : > { %10582 = vrcp.f32 %v4632_v28 }
 0x94d   : > { %10584 = vrcp.f32 %v4634_v27 }
 0x94e   : > { %10586 = vrcp.f32 %v4633_v16 }
 0x954   : > { %v13625_v39 = vpop.eup %10580 }
 0x955   : > { %15625 = vst [vmem:[#allocation41_spill] sm:$0xff] %v13625_v39 }
 0x956   : > { %v13627_v2 = vpop.eup %10582 }
 0x957   : > { %15626 = vst [vmem:[#allocation61_spill] sm:$0xff] %v13627_v2  ;;  %v13629_v54 = vpop.eup %10584  ;;  %9937 = vmatprep.subr.msk.mxu0 %vm987_vm3, %v13627_v2 }
 0x958   : > { %15627 = vst [vmem:[#allocation17_spill] sm:$0xff] %v13629_v54  ;;  %v13633_v37 = vpop.eup %10586  ;;  %9942 = vmatprep.subr.msk.mxu1 %vm987_vm3, %v13629_v54  ;;  %9938 = vmatpush1.msk.msra.mxu0 %vm987_vm3, %v13625_v39 }
 0x959   : > { %15628 = vst [vmem:[#allocation18_spill] sm:$0xff] %v13633_v37  ;;  %9943 = vmatpush1.msk.msra.mxu1 %vm987_vm3, %v13633_v37  ;;  %9939 = vmatmul.mubr.msk.f32.vlgmr.msra.gmra.mrb[106].mxu0 %vm977_vm4, %v13158_v44 }
 0x95a   : > { %9944 = vmatmul.mubr.msk.f32.vlgmr.msra.gmra.mrb[106].mxu1 %vm977_vm4, %v13158_v44  ;;  %10271 = vmatprep.subr.bf16.mxu0 %v15629_v35  ;;  %v15635_v44 = vld [vmem:[#allocation47_spill] sm:$0xff] }
 0x95b   : > { %10279 = vmatprep.subr.bf16.mxu1 %v15630_v17  ;;  %10273 = vmatpush1.bf16.msra.mxu0 %v15631_v34 }
 0x95c   : > { %10281 = vmatpush1.bf16.msra.mxu1 %v15632_v50  ;;  %10275 = vmatprep.subr.bf16.mxu0 %v15633_v49 }
 0x95d   : > { %10283 = vmatprep.subr.bf16.mxu1 %v15634_v26  ;;  %4725 = vmatprep.mubr.f32.mxu0 %v15560_v46 }
 0x95e   : > { %4808 = vmatprep.mubr.f32.mxu1 %v15560_v46  ;;  %9940 = vmatmul.mubr.msk.f32.gmra.mrb[108].mxu0 %vm977_vm4, %v13175_v60 }
 0x95f   : > { %9945 = vmatmul.mubr.msk.f32.gmra.mrb[108].mxu1 %vm977_vm4, %v13175_v60  ;;  %10277 = vmatpush1.bf16.msra.mxu0 %v15635_v44 }
 0x960   : > { %10285 = vmatpush1.bf16.msra.mxu1 %v15636_v53  ;;  %4731 = vmatprep.mubr.f32.mxu0 %v15560_v46 }
 0x961   : > { %4814 = vmatprep.mubr.f32.mxu1 %v15560_v46 }
 0x962   : > { %9941 = vmatmul.mubr.msk.f32.gmra.mrb[110].mxu0 %vm977_vm4, %v13188_v18 }
 0x963   : > { %9946 = vmatmul.mubr.msk.f32.gmra.mrb[110].mxu1 %vm977_vm4, %v13188_v18  ;;  %5038 = vmatprep.mubr.f32.mxu0 %v15560_v46 }
 0x964   : > { %5121 = vmatprep.mubr.f32.mxu1 %v15560_v46 }
 0x966   : > { %9948 = vmatmul.mubr.msk.f32.vlgmr.msra.gmra.mrb[112].mxu0 %vm768_vm2, %v13199_v51 }
 0x967   : > { %9951 = vmatmul.mubr.msk.f32.vlgmr.msra.gmra.mrb[112].mxu1 %vm768_vm2, %v13199_v51  ;;  %5044 = vmatprep.mubr.f32.mxu0 %v15560_v46 }
 0x968   : > { %5127 = vmatprep.mubr.f32.mxu1 %v15560_v46 }
 0x96a   : > { %9949 = vmatmul.mubr.msk.f32.gmra.mrb[114].mxu0 %vm768_vm2, %v13210_v47 }
 0x96b   : > { %9952 = vmatmul.mubr.msk.f32.gmra.mrb[114].mxu1 %vm768_vm2, %v13210_v47  ;;  %5050 = vmatprep.mubr.f32.mxu0 %v15560_v46 }
 0x96c   : > { %5133 = vmatprep.mubr.f32.mxu1 %v15560_v46 }
 0x96e   : > { %9950 = vmatmul.mubr.msk.f32.gmra.mrb[116].mxu0 %vm768_vm2, %v13381_v8 }
 0x96f   : > { %9953 = vmatmul.mubr.msk.f32.gmra.mrb[116].mxu1 %vm768_vm2, %v13381_v8  ;;  %5244 = vmatprep.mubr.f32.mxu0 %v15560_v46 }
 0x970   : > { %5327 = vmatprep.mubr.f32.mxu1 %v15560_v46 }
 0xa2c   : > { %v4721_v60 = vpop.f32.mrb[106].mxu0 }
 0xa2d   : > { %v4833_v18 = vrot.slane %v4721_v60, 5  ;;  %v4804_v51 = vpop.f32.mrb[106].mxu1  ;;  %v4723_v11 = vpop.f32.mrb[107].mxu0 }
 0xa2e   : > { %v4835_v21 = vrot.slane %v4804_v51, 5  ;;  %v4834_v47 = vrot.slane %v4723_v11, 5  ;;  %v4806_v15 = vpop.f32.mrb[107].mxu1 }
 0xa2f   : > { %v4865_v16 = vmul.f32 %v4833_v18, %v13577_v36  ;;  %v4836_v28 = vrot.slane %v4806_v15, 5 }
 0xa30   : > { %v4867_v27 = vmul.f32 %v4835_v21, %v13584_v29  ;;  %v4866_v35 = vmul.f32 %v4834_v47, %v13586_v40 }
 0xa31   : > { %v13689_v17 = vadd.f32 %v4865_v16, %v13541_v0  ;;  %v4868_v34 = vmul.f32 %v4836_v28, %v13596_v57  ;;  %v4727_v50 = vpop.f32.mrb[108].mxu0 }
 0xa32   : > { %v13693_v49 = vadd.f32 %v4867_v27, %v13545_v45  ;;  %v13696_v26 = vadd.f32 %v4866_v35, %v13548_v42  ;;  %v4837_v44 = vrot.slane %v4727_v50, 5  ;;  %v4810_v53 = vpop.f32.mrb[108].mxu1  ;;  %v4729_v36 = vpop.f32.mrb[109].mxu0 }
 0xa33   : > { %v13699_v60 = vadd.f32 %v4868_v34, %v13551_v63  ;;  %v4841_v29 = vrot.slane %v4810_v53, 5  ;;  %v4839_v40 = vrot.slane %v4729_v36, 5  ;;  %v4812_v51 = vpop.f32.mrb[109].mxu1 }
 0xa34   : > { %v4838_v0 = vsel %vm987_vm3, %v4833_v18, %v4837_v44  ;;  %v4843_v11 = vrot.slane %v4812_v51, 5 }
 0xa35   : > { %v4869_v57 = vmul.f32 %v4838_v0, %v13609_v23  ;;  %v4842_v45 = vsel %vm987_vm3, %v4835_v21, %v4841_v29  ;;  %v4840_v15 = vsel %vm987_vm3, %v4834_v47, %v4839_v40  ;;  %v4733_v42 = vpop.f32.mrb[110].mxu0 }
 0xa36   : > { %v4871_v16 = vmul.f32 %v4842_v45, %v13611_v13  ;;  %v4870_v27 = vmul.f32 %v4840_v15, %v13613_v14  ;;  %v4844_v63 = vsel %vm987_vm3, %v4836_v28, %v4843_v11  ;;  %v4845_v35 = vrot.slane %v4733_v42, 5  ;;  %v4816_v34 = vpop.f32.mrb[110].mxu1  ;;  %v4735_v50 = vpop.f32.mrb[111].mxu0 }
 0xa37   : > { %v13709_v53 = vadd.f32 %v4869_v57, %v13561_v59  ;;  %v4872_v18 = vmul.f32 %v4844_v63, %v13615_v20  ;;  %v4849_v23 = vrot.slane %v4816_v34, 5  ;;  %v4847_v36 = vrot.slane %v4735_v50, 5  ;;  %v4818_v21 = vpop.f32.mrb[111].mxu1 }
 0xa38   : > { %v13713_v47 = vadd.f32 %v4871_v16, %v13565_v10  ;;  %v13716_v13 = vadd.f32 %v4870_v27, %v13568_v33  ;;  %v4846_v14 = vsel %vm987_vm3, %v4837_v44, %v4845_v35  ;;  %v4851_v28 = vrot.slane %v4818_v21, 5 }
 0xa39   : > { %v13720_v51 = vadd.f32 %v4872_v18, %v13572_v4  ;;  %v4873_v59 = vmul.f32 %v4846_v14, %v13617_v38  ;;  %v4850_v0 = vsel %vm987_vm3, %v4841_v29, %v4849_v23  ;;  %v4848_v20 = vsel %vm987_vm3, %v4839_v40, %v4847_v36  ;;  %v13725_v57 = vpop.f32.mrb[112].mxu0 }
 0xa3a   : > { %v4875_v10 = vmul.f32 %v4850_v0, %v13619_v61  ;;  %v4874_v45 = vmul.f32 %v4848_v20, %v13621_v5  ;;  %v4852_v33 = vsel %vm987_vm3, %v4843_v11, %v4851_v28  ;;  %v5140_v44 = vadd.f32 %v13725_v57, %v12449_v55  ;;  %v13732_v15 = vpop.f32.mrb[112].mxu1  ;;  %v13734_v4 = vpop.f32.mrb[113].mxu0 }
 0xa3b   : > { %v13737_v38 = vadd.f32 %v4873_v59, %v13589_v24  ;;  %v4876_v29 = vmul.f32 %v4852_v33, %v13623_v6  ;;  %v5142_v40 = vadd.f32 %v13732_v15, %v12449_v55  ;;  %v5141_v61 = vadd.f32 %v13734_v4, %v12449_v55  ;;  %v13744_v5 = vpop.f32.mrb[113].mxu1 }
 0xa3c   : > { %v13747_v11 = vadd.f32 %v4875_v10, %v13599_v62  ;;  %v13750_v42 = vadd.f32 %v4874_v45, %v13602_v31  ;;  %v9954_v16 = vmul.f32 -1.442695, %v5140_v44  ;;  %v5143_v24 = vadd.f32 %v13744_v5, %v12449_v55 }
 0xa3d   : > { %v13755_v6 = vadd.f32 %v4876_v29, %v13607_v1  ;;  %v9956_v27 = vmul.f32 -1.442695, %v5142_v40  ;;  %v9955_v63 = vmul.f32 -1.442695, %v5141_v61  ;;  %v13757_v35 = vpop.f32.mrb[114].mxu0  ;;  %v13792_v61 = vld [vmem:[%s15200_s7] sm:$0xff] }
 0xa3e   : > { %10588 = vpow2.f32 %v9954_v16  ;;  %v9957_v34 = vmul.f32 -1.442695, %v5143_v24  ;;  %v13759_v50 = vpop.f32.mrb[114].mxu1  ;;  %v13761_v62 = vpop.f32.mrb[115].mxu0  ;;  %v15641_v16 = vld [vmem:[#allocation86_spill] sm:$0xff]  ;;  %v15642_v24 = vld [vmem:[#allocation87_spill] sm:$0xff] }
 0xa3f   : > { %10590 = vpow2.f32 %v9956_v27  ;;  %v13763_v31 = vpop.f32.mrb[115].mxu1  ;;  %v15643_v27 = vld [vmem:[#allocation88_spill] sm:$0xff] }
 0xa40   : > { %10592 = vpow2.f32 %v9955_v63  ;;  %v15644_v63 = vld [vmem:[#allocation89_spill] sm:$0xff] }
 0xa41   : > { %10594 = vpow2.f32 %v9957_v34  ;;  %v13765_v18 = vpop.f32.mrb[116].mxu0  ;;  %v15645_v34 = vld [vmem:[#allocation90_spill] sm:$0xff] }
 0xa42   : > { %v13767_v23 = vpop.f32.mrb[116].mxu1  ;;  %v13769_v1 = vpop.f32.mrb[117].mxu0 }
 0xa43   : > { %v13771_v36 = vpop.f32.mrb[117].mxu1 }
 0xa48   : > { %v10589_v21 = vpop.eup %10588 }
 0xa49   : > { %v10591_v14 = vpop.eup %10590  ;;  %v5156_v28 = vadd.f32 1.0, %v10589_v21  ;;  %v15646_v21 = vld [vmem:[#allocation13_spill] sm:$0xff] }
 0xa4a   : > { %v10593_v59 = vpop.eup %10592  ;;  %v5158_v20 = vadd.f32 1.0, %v10591_v14  ;;  %v13809_v14 = vld [vmem:[%s15200_s7 + $0x8] sm:$0xff] }
 0xa4b   : > { %v10595_v0 = vpop.eup %10594  ;;  %v5157_v10 = vadd.f32 1.0, %v10593_v59  ;;  %10596 = vrcp.f32 %v5156_v28  ;;  %v15647_v28 = vld [vmem:[#allocation51_spill] sm:$0xff]  ;;  %v15648_v59 = vld [vmem:[#allocation14_spill] sm:$0xff] }
 0xa4c   : > { %v5159_v45 = vadd.f32 1.0, %v10595_v0  ;;  %v13822_v0 = vld [vmem:[%s15200_s7 + $0x10] sm:$0x3] }
 0xa4d   : > { %10598 = vrcp.f32 %v5157_v10  ;;  %v13844_v10 = vld [vmem:[%s15197_s4 + $0x8] sm:$0xff] }
 0xa4e   : > { %10600 = vrcp.f32 %v5159_v45 }
 0xa4f   : > { %10602 = vrcp.f32 %v5158_v20  ;;  %v13833_v20 = vld [vmem:[%s15197_s4] sm:$0xff] }
 0xa55   : > { %v13773_v33 = vpop.eup %10596 }
 0xa56   : > { %15637 = vst [vmem:[#allocation19_spill] sm:$0xff] %v13773_v33 }
 0xa57   : > { %v13775_v44 = vpop.eup %10598 }
 0xa58   : > { %15638 = vst [vmem:[#allocation20_spill] sm:$0xff] %v13775_v44  ;;  %v13777_v29 = vpop.eup %10600  ;;  %9958 = vmatprep.subr.msk.mxu0 %vm987_vm3, %v13775_v44 }
 0xa59   : > { %15639 = vst [vmem:[#allocation62_spill] sm:$0xff] %v13777_v29  ;;  %v13781_v40 = vpop.eup %10602  ;;  %9963 = vmatprep.subr.msk.mxu1 %vm987_vm3, %v13777_v29  ;;  %9959 = vmatpush1.msk.msra.mxu0 %vm987_vm3, %v13773_v33 }
 0xa5a   : > { %15640 = vst [vmem:[#allocation63_spill] sm:$0xff] %v13781_v40  ;;  %9964 = vmatpush1.msk.msra.mxu1 %vm987_vm3, %v13781_v40  ;;  %9960 = vmatmul.mubr.msk.f32.vlgmr.msra.gmra.mrb[118].mxu0 %vm977_vm4, %v13792_v61 }
 0xa5b   : > { %9965 = vmatmul.mubr.msk.f32.vlgmr.msra.gmra.mrb[118].mxu1 %vm977_vm4, %v13792_v61  ;;  %10287 = vmatprep.subr.bf16.mxu0 %v15641_v16 }
 0xa5c   : > { %10295 = vmatprep.subr.bf16.mxu1 %v15642_v24  ;;  %10289 = vmatpush1.bf16.msra.mxu0 %v15643_v27 }
 0xa5d   : > { %10297 = vmatpush1.bf16.msra.mxu1 %v15644_v63  ;;  %10291 = vmatprep.subr.bf16.mxu0 %v15645_v34 }
 0xa5e   : > { %10299 = vmatprep.subr.bf16.mxu1 %v15646_v21  ;;  %5250 = vmatprep.mubr.f32.mxu0 %v15560_v46 }
 0xa5f   : > { %5333 = vmatprep.mubr.f32.mxu1 %v15560_v46  ;;  %9961 = vmatmul.mubr.msk.f32.gmra.mrb[120].mxu0 %vm977_vm4, %v13809_v14 }
 0xa60   : > { %9966 = vmatmul.mubr.msk.f32.gmra.mrb[120].mxu1 %vm977_vm4, %v13809_v14  ;;  %10293 = vmatpush1.bf16.msra.mxu0 %v15647_v28 }
 0xa61   : > { %10301 = vmatpush1.bf16.msra.mxu1 %v15648_v59  ;;  %5256 = vmatprep.mubr.f32.mxu0 %v15560_v46 }
 0xa62   : > { %5339 = vmatprep.mubr.f32.mxu1 %v15560_v46 }
 0xa63   : > { %9962 = vmatmul.mubr.msk.f32.gmra.mrb[122].mxu0 %vm977_vm4, %v13822_v0 }
 0xa64   : > { %9967 = vmatmul.mubr.msk.f32.gmra.mrb[122].mxu1 %vm977_vm4, %v13822_v0  ;;  %5563 = vmatprep.mubr.f32.mxu0 %v15560_v46 }
 0xa65   : > { %5646 = vmatprep.mubr.f32.mxu1 %v15560_v46 }
 0xa67   : > { %9969 = vmatmul.mubr.msk.f32.vlgmr.msra.gmra.mrb[124].mxu0 %vm768_vm2, %v13833_v20 }
 0xa68   : > { %9972 = vmatmul.mubr.msk.f32.vlgmr.msra.gmra.mrb[124].mxu1 %vm768_vm2, %v13833_v20  ;;  %5569 = vmatprep.mubr.f32.mxu0 %v15560_v46 }
 0xa69   : > { %5652 = vmatprep.mubr.f32.mxu1 %v15560_v46 }
 0xa6b   : > { %9970 = vmatmul.mubr.msk.f32.gmra.mrb[126].mxu0 %vm768_vm2, %v13844_v10 }
 0xa6c   : > { %9973 = vmatmul.mubr.msk.f32.gmra.mrb[126].mxu1 %vm768_vm2, %v13844_v10  ;;  %5575 = vmatprep.mubr.f32.mxu0 %v15560_v46 }
 0xa6d   : > { %5658 = vmatprep.mubr.f32.mxu1 %v15560_v46 }
 0xa6f   : > { %9971 = vmatmul.mubr.msk.f32.gmra.mrb[128].mxu0 %vm768_vm2, %v13381_v8 }
 0xa70   : > { %9974 = vmatmul.mubr.msk.f32.gmra.mrb[128].mxu1 %vm768_vm2, %v13381_v8  ;;  %5769 = vmatprep.mubr.f32.mxu0 %v15560_v46 }
 0xa71   : > { %5852 = vmatprep.mubr.f32.mxu1 %v15560_v46 }
 0xb2d   : > { %v5246_v45 = vpop.f32.mrb[118].mxu0 }
 0xb2e   : > { %v5358_v16 = vrot.slane %v5246_v45, 5  ;;  %v5329_v24 = vpop.f32.mrb[118].mxu1  ;;  %v5248_v27 = vpop.f32.mrb[119].mxu0 }
 0xb2f   : > { %v5360_v63 = vrot.slane %v5329_v24, 5  ;;  %v5359_v34 = vrot.slane %v5248_v27, 5  ;;  %v5331_v21 = vpop.f32.mrb[119].mxu1 }
 0xb30   : > { %v5390_v28 = vmul.f32 %v5358_v16, %v13725_v57  ;;  %v5361_v59 = vrot.slane %v5331_v21, 5 }
 0xb31   : > { %v5392_v29 = vmul.f32 %v5360_v63, %v13732_v15  ;;  %v5391_v44 = vmul.f32 %v5359_v34, %v13734_v4 }
 0xb32   : > { %v13862_v8 = vadd.f32 %v5390_v28, %v13689_v17  ;;  %v5393_v40 = vmul.f32 %v5361_v59, %v13744_v5  ;;  %v5252_v33 = vpop.f32.mrb[120].mxu0 }
 0xb33   : > { %v13866_v45 = vadd.f32 %v5392_v29, %v13693_v49  ;;  %v13869_v24 = vadd.f32 %v5391_v44, %v13696_v26  ;;  %v5362_v27 = vrot.slane %v5252_v33, 5  ;;  %v5335_v54 = vpop.f32.mrb[120].mxu1  ;;  %v5254_v57 = vpop.f32.mrb[121].mxu0 }
 0xb34   : > { %v13872_v21 = vadd.f32 %v5393_v40, %v13699_v60  ;;  %v5366_v15 = vrot.slane %v5335_v54, 5  ;;  %v5364_v4 = vrot.slane %v5254_v57, 5  ;;  %v5337_v2 = vpop.f32.mrb[121].mxu1 }
 0xb35   : > { %v5363_v17 = vsel %vm987_vm3, %v5358_v16, %v5362_v27  ;;  %v5368_v28 = vrot.slane %v5337_v2, 5 }
 0xb36   : > { %v5394_v5 = vmul.f32 %v5363_v17, %v13757_v35  ;;  %v5367_v49 = vsel %vm987_vm3, %v5360_v63, %v5366_v15  ;;  %v5365_v29 = vsel %vm987_vm3, %v5359_v34, %v5364_v4  ;;  %v5258_v26 = vpop.f32.mrb[122].mxu0 }
 0xb37   : > { %v5396_v33 = vmul.f32 %v5367_v49, %v13759_v50  ;;  %v5395_v44 = vmul.f32 %v5365_v29, %v13761_v62  ;;  %v5369_v60 = vsel %vm987_vm3, %v5361_v59, %v5368_v28  ;;  %v5370_v40 = vrot.slane %v5258_v26, 5  ;;  %v5341_v54 = vpop.f32.mrb[122].mxu1  ;;  %v5260_v57 = vpop.f32.mrb[123].mxu0 }
 0xb38   : > { %v13882_v37 = vadd.f32 %v5394_v5, %v13709_v53  ;;  %v5397_v2 = vmul.f32 %v5369_v60, %v13763_v31  ;;  %v5374_v35 = vrot.slane %v5341_v54, 5  ;;  %v5372_v16 = vrot.slane %v5260_v57, 5  ;;  %v5343_v63 = vpop.f32.mrb[123].mxu1 }
 0xb39   : > { %v13886_v34 = vadd.f32 %v5396_v33, %v13713_v47  ;;  %v13889_v50 = vadd.f32 %v5395_v44, %v13716_v13  ;;  %v5371_v62 = vsel %vm987_vm3, %v5362_v27, %v5370_v40  ;;  %v5376_v59 = vrot.slane %v5343_v63, 5 }
 0xb3a   : > { %v13893_v17 = vadd.f32 %v5397_v2, %v13720_v51  ;;  %v5398_v53 = vmul.f32 %v5371_v62, %v13765_v18  ;;  %v5375_v5 = vsel %vm987_vm3, %v5366_v15, %v5374_v35  ;;  %v5373_v31 = vsel %vm987_vm3, %v5364_v4, %v5372_v16  ;;  %v13898_v49 = vpop.f32.mrb[124].mxu0 }
 0xb3b   : > { %v5400_v47 = vmul.f32 %v5375_v5, %v13767_v23  ;;  %v5399_v29 = vmul.f32 %v5373_v31, %v13769_v1  ;;  %v5377_v13 = vsel %vm987_vm3, %v5368_v28, %v5376_v59  ;;  %v5665_v27 = vadd.f32 %v13898_v49, %v12449_v55  ;;  %v13905_v26 = vpop.f32.mrb[124].mxu1  ;;  %v13907_v51 = vpop.f32.mrb[125].mxu0 }
 0xb3c   : > { %v13910_v18 = vadd.f32 %v5398_v53, %v13737_v38  ;;  %v5401_v15 = vmul.f32 %v5377_v13, %v13771_v36  ;;  %v5667_v4 = vadd.f32 %v13905_v26, %v12449_v55  ;;  %v5666_v23 = vadd.f32 %v13907_v51, %v12449_v55  ;;  %v13917_v1 = vpop.f32.mrb[125].mxu1 }
 0xb3d   : > { %v13920_v28 = vadd.f32 %v5400_v47, %v13747_v11  ;;  %v13923_v33 = vadd.f32 %v5399_v29, %v13750_v42  ;;  %v9975_v44 = vmul.f32 -1.442695, %v5665_v27  ;;  %v5668_v38 = vadd.f32 %v13917_v1, %v12449_v55 }
 0xb3e   : > { %v13928_v36 = vadd.f32 %v5401_v15, %v13755_v6  ;;  %v9977_v60 = vmul.f32 -1.442695, %v5667_v4  ;;  %v9976_v40 = vmul.f32 -1.442695, %v5666_v23  ;;  %v13930_v54 = vpop.f32.mrb[126].mxu0 }
 0xb3f   : > { %10604 = vpow2.f32 %v9975_v44  ;;  %v9978_v57 = vmul.f32 -1.442695, %v5668_v38  ;;  %v13932_v2 = vpop.f32.mrb[126].mxu1  ;;  %v13934_v11 = vpop.f32.mrb[127].mxu0  ;;  %v15653_v44 = vld [vmem:[#allocation11_spill] sm:$0xff]  ;;  %v15654_v38 = vld [vmem:[#allocation12_spill] sm:$0xff] }
 0xb40   : > { %10606 = vpow2.f32 %v9977_v60  ;;  %v13936_v42 = vpop.f32.mrb[127].mxu1  ;;  %v15655_v60 = vld [vmem:[#allocation91_spill] sm:$0xff] }
 0xb41   : > { %10608 = vpow2.f32 %v9976_v40  ;;  %v15656_v40 = vld [vmem:[#allocation92_spill] sm:$0xff] }
 0xb42   : > { %10610 = vpow2.f32 %v9978_v57  ;;  %v13938_v35 = vpop.f32.mrb[128].mxu0  ;;  %v15657_v57 = vld [vmem:[#allocation93_spill] sm:$0xff] }
 0xb43   : > { %v13940_v16 = vpop.f32.mrb[128].mxu1  ;;  %v13942_v6 = vpop.f32.mrb[129].mxu0 }
 0xb44   : > { %v13944_v63 = vpop.f32.mrb[129].mxu1 }
 0xb49   : > { %v10605_v62 = vpop.eup %10604 }
 0xb4a   : > { %v10607_v59 = vpop.eup %10606  ;;  %v5681_v53 = vadd.f32 1.0, %v10605_v62  ;;  %v15658_v62 = vld [vmem:[#allocation94_spill] sm:$0xff] }
 0xb4b   : > { %v10609_v5 = vpop.eup %10608  ;;  %v5683_v47 = vadd.f32 1.0, %v10607_v59  ;;  %v15659_v59 = vld [vmem:[#allocation97_spill] sm:$0xff] }
 0xb4c   : > { %v10611_v31 = vpop.eup %10610  ;;  %v5682_v29 = vadd.f32 1.0, %v10609_v5  ;;  %10612 = vrcp.f32 %v5681_v53  ;;  %v15660_v53 = vld [vmem:[#allocation98_spill] sm:$0xff]  ;;  %v14003_v5 = vld [vmem:[%s15197_s4 + $0x10] sm:$0x1f] }
 0xb4d   : > { %v5684_v13 = vadd.f32 1.0, %v10611_v31 }
 0xb4e   : > { %10614 = vrcp.f32 %v5682_v29 }
 0xb4f   : > { %10616 = vrcp.f32 %v5684_v13 }
 0xb50   : > { %10618 = vrcp.f32 %v5683_v47 }
 0xb56   : > { %v13946_v27 = vpop.eup %10612 }
 0xb57   : > { %15649 = vst [vmem:[#allocation64_spill] sm:$0xff] %v13946_v27 }
 0xb58   : > { %v13948_v15 = vpop.eup %10614 }
 0xb59   : > { %15650 = vst [vmem:[#allocation65_spill] sm:$0xff] %v13948_v15  ;;  %v13950_v4 = vpop.eup %10616  ;;  %9979 = vmatprep.subr.msk.mxu0 %vm987_vm3, %v13948_v15 }
 0xb5a   : > { %15651 = vst [vmem:[#allocation21_spill] sm:$0xff] %v13950_v4  ;;  %v13954_v23 = vpop.eup %10618  ;;  %9984 = vmatprep.subr.msk.mxu1 %vm987_vm3, %v13950_v4  ;;  %9980 = vmatpush1.msk.msra.mxu0 %vm987_vm3, %v13946_v27 }
 0xb5b   : > { %15652 = vst [vmem:[#allocation22_spill] sm:$0xff] %v13954_v23  ;;  %9985 = vmatpush1.msk.msra.mxu1 %vm987_vm3, %v13954_v23  ;;  %9981 = vmatmul.mubr.msk.f32.vlgmr.msra.gmra.mrb[130].mxu0 %vm977_vm4, %v13792_v61 }
 0xb5c   : > { %9986 = vmatmul.mubr.msk.f32.vlgmr.msra.gmra.mrb[130].mxu1 %vm977_vm4, %v13792_v61  ;;  %10303 = vmatprep.subr.bf16.mxu0 %v15653_v44 }
 0xb5d   : > { %10311 = vmatprep.subr.bf16.mxu1 %v15654_v38  ;;  %10305 = vmatpush1.bf16.msra.mxu0 %v15655_v60 }
 0xb5e   : > { %10313 = vmatpush1.bf16.msra.mxu1 %v15656_v40  ;;  %10307 = vmatprep.subr.bf16.mxu0 %v15657_v57 }
 0xb5f   : > { %10315 = vmatprep.subr.bf16.mxu1 %v15658_v62  ;;  %5775 = vmatprep.mubr.f32.mxu0 %v15560_v46 }
 0xb60   : > { %5858 = vmatprep.mubr.f32.mxu1 %v15560_v46  ;;  %9982 = vmatmul.mubr.msk.f32.gmra.mrb[132].mxu0 %vm977_vm4, %v13809_v14 }
 0xb61   : > { %9987 = vmatmul.mubr.msk.f32.gmra.mrb[132].mxu1 %vm977_vm4, %v13809_v14  ;;  %10309 = vmatpush1.bf16.msra.mxu0 %v15659_v59 }
 0xb62   : > { %10317 = vmatpush1.bf16.msra.mxu1 %v15660_v53  ;;  %5781 = vmatprep.mubr.f32.mxu0 %v15560_v46 }
 0xb63   : > { %5864 = vmatprep.mubr.f32.mxu1 %v15560_v46 }
 0xb64   : > { %9983 = vmatmul.mubr.msk.f32.gmra.mrb[134].mxu0 %vm977_vm4, %v13822_v0 }
 0xb65   : > { %9988 = vmatmul.mubr.msk.f32.gmra.mrb[134].mxu1 %vm977_vm4, %v13822_v0  ;;  %6088 = vmatprep.mubr.f32.mxu0 %v15560_v46 }
 0xb66   : > { %6171 = vmatprep.mubr.f32.mxu1 %v15560_v46 }
 0xb68   : > { %9990 = vmatmul.mubr.msk.f32.vlgmr.msra.gmra.mrb[136].mxu0 %vm768_vm2, %v13833_v20 }
 0xb69   : > { %9993 = vmatmul.mubr.msk.f32.vlgmr.msra.gmra.mrb[136].mxu1 %vm768_vm2, %v13833_v20  ;;  %6094 = vmatprep.mubr.f32.mxu0 %v15560_v46 }
 0xb6a   : > { %6177 = vmatprep.mubr.f32.mxu1 %v15560_v46 }
 0xb6c   : > { %9991 = vmatmul.mubr.msk.f32.gmra.mrb[138].mxu0 %vm768_vm2, %v13844_v10 }
 0xb6d   : > { %9994 = vmatmul.mubr.msk.f32.gmra.mrb[138].mxu1 %vm768_vm2, %v13844_v10  ;;  %6100 = vmatprep.mubr.f32.mxu0 %v15560_v46 }
 0xb6e   : > { %6183 = vmatprep.mubr.f32.mxu1 %v15560_v46 }
 0xb70   : > { %9992 = vmatmul.mubr.msk.f32.gmra.mrb[140].mxu0 %vm768_vm2, %v14003_v5 }
 0xb71   : > { %9995 = vmatmul.mubr.msk.f32.gmra.mrb[140].mxu1 %vm768_vm2, %v14003_v5  ;;  %6294 = vmatprep.mubr.f32.mxu0 %v15560_v46 }
 0xb72   : > { %6377 = vmatprep.mubr.f32.mxu1 %v15560_v46 }
 0xc2e   : > { %v5771_v31 = vpop.f32.mrb[130].mxu0 }
 0xc2f   : > { %v5883_v47 = vrot.slane %v5771_v31, 5  ;;  %v5854_v29 = vpop.f32.mrb[130].mxu1  ;;  %v5773_v13 = vpop.f32.mrb[131].mxu0 }
 0xc30   : > { %v5885_v44 = vrot.slane %v5854_v29, 5  ;;  %v5884_v38 = vrot.slane %v5773_v13, 5  ;;  %v5856_v60 = vpop.f32.mrb[131].mxu1 }
 0xc31   : > { %v5915_v40 = vmul.f32 %v5883_v47, %v13898_v49  ;;  %v5886_v57 = vrot.slane %v5856_v60, 5 }
 0xc32   : > { %v5917_v62 = vmul.f32 %v5885_v44, %v13905_v26  ;;  %v5916_v59 = vmul.f32 %v5884_v38, %v13907_v51 }
 0xc33   : > { %v14015_v53 = vadd.f32 %v5915_v40, %v13862_v8  ;;  %v5918_v4 = vmul.f32 %v5886_v57, %v13917_v1  ;;  %v5777_v15 = vpop.f32.mrb[132].mxu0 }
 0xc34   : > { %v14019_v31 = vadd.f32 %v5917_v62, %v13866_v45  ;;  %v14022_v29 = vadd.f32 %v5916_v59, %v13869_v24  ;;  %v5887_v13 = vrot.slane %v5777_v15, 5  ;;  %v5860_v23 = vpop.f32.mrb[132].mxu1  ;;  %v5779_v49 = vpop.f32.mrb[133].mxu0 }
 0xc35   : > { %v14025_v60 = vadd.f32 %v5918_v4, %v13872_v21  ;;  %v5891_v26 = vrot.slane %v5860_v23, 5  ;;  %v5889_v51 = vrot.slane %v5779_v49, 5  ;;  %v5862_v27 = vpop.f32.mrb[133].mxu1 }
 0xc36   : > { %v5888_v8 = vsel %vm987_vm3, %v5883_v47, %v5887_v13  ;;  %v5893_v40 = vrot.slane %v5862_v27, 5 }
 0xc37   : > { %v5919_v1 = vmul.f32 %v5888_v8, %v13930_v54  ;;  %v5892_v45 = vsel %vm987_vm3, %v5885_v44, %v5891_v26  ;;  %v5890_v62 = vsel %vm987_vm3, %v5884_v38, %v5889_v51  ;;  %v5783_v24 = vpop.f32.mrb[134].mxu0 }
 0xc38   : > { %v5921_v15 = vmul.f32 %v5892_v45, %v13932_v2  ;;  %v5920_v59 = vmul.f32 %v5890_v62, %v13934_v11  ;;  %v5894_v21 = vsel %vm987_vm3, %v5886_v57, %v5893_v40  ;;  %v5895_v4 = vrot.slane %v5783_v24, 5  ;;  %v5866_v23 = vpop.f32.mrb[134].mxu1  ;;  %v5785_v49 = vpop.f32.mrb[135].mxu0 }
 0xc39   : > { %v14035_v39 = vadd.f32 %v5919_v1, %v13882_v37  ;;  %v5922_v27 = vmul.f32 %v5894_v21, %v13936_v42  ;;  %v5899_v54 = vrot.slane %v5866_v23, 5  ;;  %v5897_v47 = vrot.slane %v5785_v49, 5  ;;  %v5868_v44 = vpop.f32.mrb[135].mxu1 }
 0xc3a   : > { %v14039_v38 = vadd.f32 %v5921_v15, %v13886_v34  ;;  %v14042_v2 = vadd.f32 %v5920_v59, %v13889_v50  ;;  %v5896_v11 = vsel %vm987_vm3, %v5887_v13, %v5895_v4  ;;  %v5901_v57 = vrot.slane %v5868_v44, 5 }
 0xc3b   : > { %v14046_v8 = vadd.f32 %v5922_v27, %v13893_v17  ;;  %v5923_v37 = vmul.f32 %v5896_v11, %v13938_v35  ;;  %v5900_v1 = vsel %vm987_vm3, %v5891_v26, %v5899_v54  ;;  %v5898_v42 = vsel %vm987_vm3, %v5889_v51, %v5897_v47  ;;  %v14051_v45 = vpop.f32.mrb[136].mxu0 }
 0xc3c   : > { %v5925_v34 = vmul.f32 %v5900_v1, %v13940_v16  ;;  %v5924_v62 = vmul.f32 %v5898_v42, %v13942_v6  ;;  %v5902_v50 = vsel %vm987_vm3, %v5893_v40, %v5901_v57  ;;  %v6190_v13 = vadd.f32 %v14051_v45, %v12449_v55  ;;  %v14058_v24 = vpop.f32.mrb[136].mxu1  ;;  %v14060_v17 = vpop.f32.mrb[137].mxu0 }
 0xc3d   : > { %v14063_v35 = vadd.f32 %v5923_v37, %v13910_v18  ;;  %v5926_v26 = vmul.f32 %v5902_v50, %v13944_v63  ;;  %v6192_v51 = vadd.f32 %v14058_v24, %v12449_v55  ;;  %v6191_v16 = vadd.f32 %v14060_v17, %v12449_v55  ;;  %v14070_v6 = vpop.f32.mrb[137].mxu1 }
 0xc3e   : > { %v14073_v40 = vadd.f32 %v5925_v34, %v13920_v28  ;;  %v14076_v15 = vadd.f32 %v5924_v62, %v13923_v33  ;;  %v9996_v59 = vmul.f32 -1.442695, %v6190_v13  ;;  %v6193_v18 = vadd.f32 %v14070_v6, %v12449_v55 }
 0xc3f   : > { %v14081_v63 = vadd.f32 %v5926_v26, %v13928_v36  ;;  %v9998_v21 = vmul.f32 -1.442695, %v6192_v51  ;;  %v9997_v4 = vmul.f32 -1.442695, %v6191_v16  ;;  %v14083_v23 = vpop.f32.mrb[138].mxu0 }
 0xc40   : > { %10620 = vpow2.f32 %v9996_v59  ;;  %v9999_v49 = vmul.f32 -1.442695, %v6193_v18  ;;  %v14085_v27 = vpop.f32.mrb[138].mxu1  ;;  %v14087_v28 = vpop.f32.mrb[139].mxu0  ;;  %v15665_v59 = vld [vmem:[#allocation101_spill] sm:$0xff]  ;;  %v15666_v18 = vld [vmem:[#allocation102_spill] sm:$0xff] }
 0xc41   : > { %10622 = vpow2.f32 %v9998_v21  ;;  %v14089_v33 = vpop.f32.mrb[139].mxu1  ;;  %v15667_v21 = vld [vmem:[#allocation103_spill] sm:$0xff] }
 0xc42   : > { %10624 = vpow2.f32 %v9997_v4  ;;  %v15668_v4 = vld [vmem:[#allocation104_spill] sm:$0xff] }
 0xc43   : > { %10626 = vpow2.f32 %v9999_v49  ;;  %v14091_v54 = vpop.f32.mrb[140].mxu0  ;;  %v15669_v49 = vld [vmem:[#allocation105_spill] sm:$0xff] }
 0xc44   : > { %v14093_v47 = vpop.f32.mrb[140].mxu1  ;;  %v14095_v36 = vpop.f32.mrb[141].mxu0 }
 0xc45   : > { %v14097_v44 = vpop.f32.mrb[141].mxu1 }
 0xc4a   : > { %v10621_v11 = vpop.eup %10620 }
 0xc4b   : > { %v10623_v57 = vpop.eup %10622  ;;  %v6206_v37 = vadd.f32 1.0, %v10621_v11  ;;  %v15670_v11 = vld [vmem:[#allocation106_spill] sm:$0xff] }
 0xc4c   : > { %v10625_v1 = vpop.eup %10624  ;;  %v6208_v34 = vadd.f32 1.0, %v10623_v57  ;;  %v15671_v57 = vld [vmem:[#allocation107_spill] sm:$0xff] }
 0xc4d   : > { %v10627_v42 = vpop.eup %10626  ;;  %v6207_v62 = vadd.f32 1.0, %v10625_v1  ;;  %10628 = vrcp.f32 %v6206_v37  ;;  %v15672_v37 = vld [vmem:[#allocation108_spill] sm:$0xff] }
 0xc4e   : > { %v6209_v50 = vadd.f32 1.0, %v10627_v42 }
 0xc4f   : > { %10630 = vrcp.f32 %v6207_v62 }
 0xc50   : > { %10632 = vrcp.f32 %v6209_v50 }
 0xc51   : > { %10634 = vrcp.f32 %v6208_v34 }
 0xc57   : > { %v14099_v13 = vpop.eup %10628 }
 0xc58   : > { %15661 = vst [vmem:[#allocation23_spill] sm:$0xff] %v14099_v13 }
 0xc59   : > { %v14101_v26 = vpop.eup %10630 }
 0xc5a   : > { %15662 = vst [vmem:[#allocation24_spill] sm:$0xff] %v14101_v26  ;;  %v14103_v51 = vpop.eup %10632  ;;  %10000 = vmatprep.subr.msk.mxu0 %vm987_vm3, %v14101_v26 }
 0xc5b   : > { %15663 = vst [vmem:[#allocation66_spill] sm:$0xff] %v14103_v51  ;;  %v14107_v16 = vpop.eup %10634  ;;  %10005 = vmatprep.subr.msk.mxu1 %vm987_vm3, %v14103_v51  ;;  %10001 = vmatpush1.msk.msra.mxu0 %vm987_vm3, %v14099_v13 }
 0xc5c   : > { %15664 = vst [vmem:[#allocation67_spill] sm:$0xff] %v14107_v16  ;;  %10006 = vmatpush1.msk.msra.mxu1 %vm987_vm3, %v14107_v16  ;;  %10002 = vmatmul.mubr.msk.f32.vlgmr.msra.gmra.mrb[142].mxu0 %vm977_vm4, %v13792_v61 }
 0xc5d   : > { %10007 = vmatmul.mubr.msk.f32.vlgmr.msra.gmra.mrb[142].mxu1 %vm977_vm4, %v13792_v61  ;;  %10319 = vmatprep.subr.bf16.mxu0 %v15665_v59 }
 0xc5e   : > { %10327 = vmatprep.subr.bf16.mxu1 %v15666_v18  ;;  %10321 = vmatpush1.bf16.msra.mxu0 %v15667_v21 }
 0xc5f   : > { %10329 = vmatpush1.bf16.msra.mxu1 %v15668_v4  ;;  %10323 = vmatprep.subr.bf16.mxu0 %v15669_v49 }
 0xc60   : > { %10331 = vmatprep.subr.bf16.mxu1 %v15670_v11  ;;  %6300 = vmatprep.mubr.f32.mxu0 %v15560_v46 }
 0xc61   : > { %6383 = vmatprep.mubr.f32.mxu1 %v15560_v46  ;;  %10003 = vmatmul.mubr.msk.f32.gmra.mrb[144].mxu0 %vm977_vm4, %v13809_v14 }
 0xc62   : > { %10008 = vmatmul.mubr.msk.f32.gmra.mrb[144].mxu1 %vm977_vm4, %v13809_v14  ;;  %10325 = vmatpush1.bf16.msra.mxu0 %v15671_v57 }
 0xc63   : > { %10333 = vmatpush1.bf16.msra.mxu1 %v15672_v37  ;;  %6306 = vmatprep.mubr.f32.mxu0 %v15560_v46 }
 0xc64   : > { %6389 = vmatprep.mubr.f32.mxu1 %v15560_v46 }
 0xc65   : > { %10004 = vmatmul.mubr.msk.f32.gmra.mrb[146].mxu0 %vm977_vm4, %v13822_v0 }
 0xc66   : > { %10009 = vmatmul.mubr.msk.f32.gmra.mrb[146].mxu1 %vm977_vm4, %v13822_v0  ;;  %6613 = vmatprep.mubr.f32.mxu0 %v15560_v46 }
 0xc67   : > { %6696 = vmatprep.mubr.f32.mxu1 %v15560_v46 }
 0xc69   : > { %10011 = vmatmul.mubr.msk.f32.vlgmr.msra.gmra.mrb[148].mxu0 %vm768_vm2, %v13833_v20 }
 0xc6a   : > { %10014 = vmatmul.mubr.msk.f32.vlgmr.msra.gmra.mrb[148].mxu1 %vm768_vm2, %v13833_v20  ;;  %6619 = vmatprep.mubr.f32.mxu0 %v15560_v46 }
 0xc6b   : > { %6702 = vmatprep.mubr.f32.mxu1 %v15560_v46 }
 0xc6d   : > { %10012 = vmatmul.mubr.msk.f32.gmra.mrb[150].mxu0 %vm768_vm2, %v13844_v10 }
 0xc6e   : > { %10015 = vmatmul.mubr.msk.f32.gmra.mrb[150].mxu1 %vm768_vm2, %v13844_v10  ;;  %6625 = vmatprep.mubr.f32.mxu0 %v15560_v46 }
 0xc6f   : > { %6708 = vmatprep.mubr.f32.mxu1 %v15560_v46 }
 0xc71   : > { %10013 = vmatmul.mubr.msk.f32.gmra.mrb[152].mxu0 %vm768_vm2, %v14003_v5 }
 0xc72   : > { %10016 = vmatmul.mubr.msk.f32.gmra.mrb[152].mxu1 %vm768_vm2, %v14003_v5  ;;  %6819 = vmatprep.mubr.f32.mxu0 %v15560_v46 }
 0xc73   : > { %6902 = vmatprep.mubr.f32.mxu1 %v15560_v46 }
 0xd2f   : > { %v6296_v1 = vpop.f32.mrb[142].mxu0 }
 0xd30   : > { %v6408_v42 = vrot.slane %v6296_v1, 5  ;;  %v6379_v34 = vpop.f32.mrb[142].mxu1  ;;  %v6298_v62 = vpop.f32.mrb[143].mxu0 }
 0xd31   : > { %v6410_v50 = vrot.slane %v6379_v34, 5  ;;  %v6409_v59 = vrot.slane %v6298_v62, 5  ;;  %v6381_v18 = vpop.f32.mrb[143].mxu1 }
 0xd32   : > { %v6440_v21 = vmul.f32 %v6408_v42, %v14051_v45  ;;  %v6411_v4 = vrot.slane %v6381_v18, 5 }
 0xd33   : > { %v6442_v49 = vmul.f32 %v6410_v50, %v14058_v24  ;;  %v6441_v11 = vmul.f32 %v6409_v59, %v14060_v17 }
 0xd34   : > { %v14163_v57 = vadd.f32 %v6440_v21, %v14015_v53  ;;  %v6443_v37 = vmul.f32 %v6411_v4, %v14070_v6  ;;  %v6302_v51 = vpop.f32.mrb[144].mxu0 }
 0xd35   : > { %v14167_v1 = vadd.f32 %v6442_v49, %v14019_v31  ;;  %v14170_v34 = vadd.f32 %v6441_v11, %v14022_v29  ;;  %v6412_v62 = vrot.slane %v6302_v51, 5  ;;  %v6385_v26 = vpop.f32.mrb[144].mxu1  ;;  %v6304_v45 = vpop.f32.mrb[145].mxu0 }
 0xd36   : > { %v14173_v18 = vadd.f32 %v6443_v37, %v14025_v60  ;;  %v6416_v24 = vrot.slane %v6385_v26, 5  ;;  %v6414_v17 = vrot.slane %v6304_v45, 5  ;;  %v6387_v16 = vpop.f32.mrb[145].mxu1 }
 0xd37   : > { %v6413_v53 = vsel %vm987_vm3, %v6408_v42, %v6412_v62  ;;  %v6418_v21 = vrot.slane %v6387_v16, 5 }
 0xd38   : > { %v6444_v6 = vmul.f32 %v6413_v53, %v14083_v23  ;;  %v6417_v31 = vsel %vm987_vm3, %v6410_v50, %v6416_v24  ;;  %v6415_v49 = vsel %vm987_vm3, %v6409_v59, %v6414_v17  ;;  %v6308_v29 = vpop.f32.mrb[146].mxu0 }
 0xd39   : > { %v6446_v51 = vmul.f32 %v6417_v31, %v14085_v27  ;;  %v6445_v11 = vmul.f32 %v6415_v49, %v14087_v28  ;;  %v6419_v60 = vsel %vm987_vm3, %v6411_v4, %v6418_v21  ;;  %v6420_v37 = vrot.slane %v6308_v29, 5  ;;  %v6391_v26 = vpop.f32.mrb[146].mxu1  ;;  %v6310_v45 = vpop.f32.mrb[147].mxu0 }
 0xd3a   : > { %v14183_v13 = vadd.f32 %v6444_v6, %v14035_v39  ;;  %v6447_v16 = vmul.f32 %v6419_v60, %v14089_v33  ;;  %v6424_v23 = vrot.slane %v6391_v26, 5  ;;  %v6422_v42 = vrot.slane %v6310_v45, 5  ;;  %v6393_v50 = vpop.f32.mrb[147].mxu1 }
 0xd3b   : > { %v14187_v59 = vadd.f32 %v6446_v51, %v14039_v38  ;;  %v14190_v27 = vadd.f32 %v6445_v11, %v14042_v2  ;;  %v6421_v28 = vsel %vm987_vm3, %v6412_v62, %v6420_v37  ;;  %v6426_v4 = vrot.slane %v6393_v50, 5 }
 0xd3c   : > { %v14194_v53 = vadd.f32 %v6447_v16, %v14046_v8  ;;  %v6448_v39 = vmul.f32 %v6421_v28, %v14091_v54  ;;  %v6425_v6 = vsel %vm987_vm3, %v6416_v24, %v6424_v23  ;;  %v6423_v33 = vsel %vm987_vm3, %v6414_v17, %v6422_v42  ;;  %v14199_v31 = vpop.f32.mrb[148].mxu0 }
 0xd3d   : > { %v6450_v38 = vmul.f32 %v6425_v6, %v14093_v47  ;;  %v6449_v49 = vmul.f32 %v6423_v33, %v14095_v36  ;;  %v6427_v2 = vsel %vm987_vm3, %v6418_v21, %v6426_v4  ;;  %v6715_v62 = vadd.f32 %v14199_v31, %v12449_v55  ;;  %v14206_v29 = vpop.f32.mrb[148].mxu1  ;;  %v14208_v8 = vpop.f32.mrb[149].mxu0 }
 0xd3e   : > { %v14211_v54 = vadd.f32 %v6448_v39, %v14063_v35  ;;  %v6451_v24 = vmul.f32 %v6427_v2, %v14097_v44  ;;  %v6717_v17 = vadd.f32 %v14206_v29, %v12449_v55  ;;  %v6716_v47 = vadd.f32 %v14208_v8, %v12449_v55  ;;  %v14218_v36 = vpop.f32.mrb[149].mxu1 }
 0xd3f   : > { %v14221_v21 = vadd.f32 %v6450_v38, %v14073_v40  ;;  %v14224_v51 = vadd.f32 %v6449_v49, %v14076_v15  ;;  %v10017_v11 = vmul.f32 -1.442695, %v6715_v62  ;;  %v6718_v35 = vadd.f32 %v14218_v36, %v12449_v55 }
 0xd40   : > { %v14229_v44 = vadd.f32 %v6451_v24, %v14081_v63  ;;  %v10019_v60 = vmul.f32 -1.442695, %v6717_v17  ;;  %v10018_v37 = vmul.f32 -1.442695, %v6716_v47  ;;  %v14231_v26 = vpop.f32.mrb[150].mxu0 }
 0xd41   : > { %10636 = vpow2.f32 %v10017_v11  ;;  %v10020_v45 = vmul.f32 -1.442695, %v6718_v35  ;;  %v14233_v16 = vpop.f32.mrb[150].mxu1  ;;  %v14235_v40 = vpop.f32.mrb[151].mxu0  ;;  %v15676_v11 = vld [vmem:[#allocation52_spill] sm:$0xff]  ;;  %v15677_v35 = vld [vmem:[#allocation49_spill] sm:$0xff] }
 0xd42   : > { %10638 = vpow2.f32 %v10019_v60  ;;  %v14237_v15 = vpop.f32.mrb[151].mxu1  ;;  %v15678_v60 = vld [vmem:[#allocation53_spill] sm:$0xff] }
 0xd43   : > { %10640 = vpow2.f32 %v10018_v37  ;;  %v15679_v37 = vld [vmem:[#allocation42_spill] sm:$0xff] }
 0xd44   : > { %10642 = vpow2.f32 %v10020_v45  ;;  %v14239_v23 = vpop.f32.mrb[152].mxu0  ;;  %v15680_v45 = vld [vmem:[#allocation110_spill] sm:$0xff] }
 0xd45   : > { %v14241_v42 = vpop.f32.mrb[152].mxu1  ;;  %v14243_v63 = vpop.f32.mrb[153].mxu0 }
 0xd46   : > { %v14245_v50 = vpop.f32.mrb[153].mxu1 }
 0xd4b   : > { %v10637_v28 = vpop.eup %10636 }
 0xd4c   : > { %v10639_v4 = vpop.eup %10638  ;;  %v6731_v39 = vadd.f32 1.0, %v10637_v28  ;;  %v15681_v28 = vld [vmem:[#allocation111_spill] sm:$0xff] }
 0xd4d   : > { %v10641_v6 = vpop.eup %10640  ;;  %v6733_v38 = vadd.f32 1.0, %v10639_v4  ;;  %v15683_v4 = vld [vmem:[#allocation113_spill] sm:$0xff] }
 0xd4e   : > { %v10643_v33 = vpop.eup %10642  ;;  %v6732_v49 = vadd.f32 1.0, %v10641_v6  ;;  %10644 = vrcp.f32 %v6731_v39 }
 0xd4f   : > { %v6734_v2 = vadd.f32 1.0, %v10643_v33 }
 0xd50   : > { %10646 = vrcp.f32 %v6732_v49 }
 0xd51   : > { %10648 = vrcp.f32 %v6734_v2 }
 0xd52   : > { %10650 = vrcp.f32 %v6733_v38 }
 0xd58   : > { %v14247_v62 = vpop.eup %10644 }
 0xd5a   : > { %v14249_v24 = vpop.eup %10646 }
 0xd5b   : > { %15673 = vst [vmem:[#allocation68_spill] sm:$0xff] %v14249_v24  ;;  %v14251_v17 = vpop.eup %10648  ;;  %10021 = vmatprep.subr.msk.mxu0 %vm987_vm3, %v14249_v24 }
 0xd5c   : > { %15674 = vst [vmem:[#allocation69_spill] sm:$0xff] %v14251_v17  ;;  %v14255_v47 = vpop.eup %10650  ;;  %10026 = vmatprep.subr.msk.mxu1 %vm987_vm3, %v14251_v17  ;;  %10022 = vmatpush1.msk.msra.mxu0 %vm987_vm3, %v14247_v62 }
 0xd5d   : > { %15675 = vst [vmem:[#allocation25_spill] sm:$0xff] %v14255_v47  ;;  %10027 = vmatpush1.msk.msra.mxu1 %vm987_vm3, %v14255_v47  ;;  %10023 = vmatmul.mubr.msk.f32.vlgmr.msra.gmra.mrb[154].mxu0 %vm977_vm4, %v13792_v61 }
 0xd5e   : > { %10028 = vmatmul.mubr.msk.f32.vlgmr.msra.gmra.mrb[154].mxu1 %vm977_vm4, %v13792_v61  ;;  %10335 = vmatprep.subr.bf16.mxu0 %v15676_v11  ;;  %v15682_v61 = vld [vmem:[#allocation112_spill] sm:$0xff] }
 0xd5f   : > { %10343 = vmatprep.subr.bf16.mxu1 %v15677_v35  ;;  %10337 = vmatpush1.bf16.msra.mxu0 %v15678_v60 }
 0xd60   : > { %10345 = vmatpush1.bf16.msra.mxu1 %v15679_v37  ;;  %10339 = vmatprep.subr.bf16.mxu0 %v15680_v45 }
 0xd61   : > { %10347 = vmatprep.subr.bf16.mxu1 %v15681_v28  ;;  %6825 = vmatprep.mubr.f32.mxu0 %v15560_v46 }
 0xd62   : > { %6908 = vmatprep.mubr.f32.mxu1 %v15560_v46  ;;  %10024 = vmatmul.mubr.msk.f32.gmra.mrb[156].mxu0 %vm977_vm4, %v13809_v14 }
 0xd63   : > { %10029 = vmatmul.mubr.msk.f32.gmra.mrb[156].mxu1 %vm977_vm4, %v13809_v14  ;;  %10341 = vmatpush1.bf16.msra.mxu0 %v15682_v61 }
 0xd64   : > { %10349 = vmatpush1.bf16.msra.mxu1 %v15683_v4  ;;  %6831 = vmatprep.mubr.f32.mxu0 %v15560_v46 }
 0xd65   : > { %6914 = vmatprep.mubr.f32.mxu1 %v15560_v46 }
 0xd66   : > { %10025 = vmatmul.mubr.msk.f32.gmra.mrb[158].mxu0 %vm977_vm4, %v13822_v0 }
 0xd67   : > { %10030 = vmatmul.mubr.msk.f32.gmra.mrb[158].mxu1 %vm977_vm4, %v13822_v0  ;;  %7138 = vmatprep.mubr.f32.mxu0 %v15560_v46 }
 0xd68   : > { %7221 = vmatprep.mubr.f32.mxu1 %v15560_v46 }
 0xd6a   : > { %10032 = vmatmul.mubr.msk.f32.vlgmr.msra.gmra.mrb[160].mxu0 %vm768_vm2, %v13833_v20 }
 0xd6b   : > { %10035 = vmatmul.mubr.msk.f32.vlgmr.msra.gmra.mrb[160].mxu1 %vm768_vm2, %v13833_v20  ;;  %7144 = vmatprep.mubr.f32.mxu0 %v15560_v46 }
 0xd6c   : > { %7227 = vmatprep.mubr.f32.mxu1 %v15560_v46 }
 0xd6e   : > { %10033 = vmatmul.mubr.msk.f32.gmra.mrb[162].mxu0 %vm768_vm2, %v13844_v10 }
 0xd6f   : > { %10036 = vmatmul.mubr.msk.f32.gmra.mrb[162].mxu1 %vm768_vm2, %v13844_v10  ;;  %7150 = vmatprep.mubr.f32.mxu0 %v15560_v46 }
 0xd70   : > { %7233 = vmatprep.mubr.f32.mxu1 %v15560_v46 }
 0xd72   : > { %10034 = vmatmul.mubr.msk.f32.gmra.mrb[164].mxu0 %vm768_vm2, %v14003_v5 }
 0xd73   : > { %10037 = vmatmul.mubr.msk.f32.gmra.mrb[164].mxu1 %vm768_vm2, %v14003_v5  ;;  %7344 = vmatprep.mubr.f32.mxu0 %v15560_v46 }
 0xd74   : > { %7427 = vmatprep.mubr.f32.mxu1 %v15560_v46 }
 0xe30   : > { %v6821_v14 = vpop.f32.mrb[154].mxu0 }
 0xe31   : > { %v6933_v0 = vrot.slane %v6821_v14, 5  ;;  %v6904_v20 = vpop.f32.mrb[154].mxu1  ;;  %v6823_v39 = vpop.f32.mrb[155].mxu0 }
 0xe32   : > { %v6935_v6 = vrot.slane %v6904_v20, 5  ;;  %v6934_v10 = vrot.slane %v6823_v39, 5  ;;  %v6906_v33 = vpop.f32.mrb[155].mxu1 }
 0xe33   : > { %v6965_v38 = vmul.f32 %v6933_v0, %v14199_v31  ;;  %v6936_v49 = vrot.slane %v6906_v33, 5 }
 0xe34   : > { %v6967_v2 = vmul.f32 %v6935_v6, %v14206_v29  ;;  %v6966_v11 = vmul.f32 %v6934_v10, %v14208_v8 }
 0xe35   : > { %v14311_v35 = vadd.f32 %v6965_v38, %v14163_v57  ;;  %v6968_v60 = vmul.f32 %v6936_v49, %v14218_v36  ;;  %v6827_v37 = vpop.f32.mrb[156].mxu0 }
 0xe36   : > { %v14315_v45 = vadd.f32 %v6967_v2, %v14167_v1  ;;  %v14318_v28 = vadd.f32 %v6966_v11, %v14170_v34  ;;  %v6937_v61 = vrot.slane %v6827_v37, 5  ;;  %v6910_v4 = vpop.f32.mrb[156].mxu1  ;;  %v6829_v31 = vpop.f32.mrb[157].mxu0 }
 0xe37   : > { %v14321_v14 = vadd.f32 %v6968_v60, %v14173_v18  ;;  %v6941_v29 = vrot.slane %v6910_v4, 5  ;;  %v6939_v8 = vrot.slane %v6829_v31, 5  ;;  %v6912_v20 = vpop.f32.mrb[157].mxu1 }
 0xe38   : > { %v6938_v57 = vsel %vm987_vm3, %v6933_v0, %v6937_v61  ;;  %v6943_v39 = vrot.slane %v6912_v20, 5 }
 0xe39   : > { %v6969_v36 = vmul.f32 %v6938_v57, %v14231_v26  ;;  %v6942_v1 = vsel %vm987_vm3, %v6935_v6, %v6941_v29  ;;  %v6940_v33 = vsel %vm987_vm3, %v6934_v10, %v6939_v8  ;;  %v6833_v34 = vpop.f32.mrb[158].mxu0 }
 0xe3a   : > { %v6971_v38 = vmul.f32 %v6942_v1, %v14233_v16  ;;  %v6970_v2 = vmul.f32 %v6940_v33, %v14235_v40  ;;  %v6944_v18 = vsel %vm987_vm3, %v6936_v49, %v6943_v39  ;;  %v6945_v11 = vrot.slane %v6833_v34, 5  ;;  %v6916_v60 = vpop.f32.mrb[158].mxu1  ;;  %v6835_v37 = vpop.f32.mrb[159].mxu0 }
 0xe3b   : > { %v14331_v4 = vadd.f32 %v6969_v36, %v14183_v13  ;;  %v6972_v0 = vmul.f32 %v6944_v18, %v14237_v15  ;;  %v6949_v26 = vrot.slane %v6916_v60, 5  ;;  %v6947_v31 = vrot.slane %v6835_v37, 5  ;;  %v6918_v6 = vpop.f32.mrb[159].mxu1 }
 0xe3c   : > { %v14335_v10 = vadd.f32 %v6971_v38, %v14187_v59  ;;  %v14338_v16 = vadd.f32 %v6970_v2, %v14190_v27  ;;  %v6946_v40 = vsel %vm987_vm3, %v6937_v61, %v6945_v11  ;;  %v6951_v49 = vrot.slane %v6918_v6, 5 }
 0xe3d   : > { %v14342_v20 = vadd.f32 %v6972_v0, %v14194_v53  ;;  %v6973_v13 = vmul.f32 %v6946_v40, %v14239_v23  ;;  %v6950_v57 = vsel %vm987_vm3, %v6941_v29, %v6949_v26  ;;  %v6948_v15 = vsel %vm987_vm3, %v6939_v8, %v6947_v31  ;;  %v14347_v36 = vpop.f32.mrb[160].mxu0 }
 0xe3e   : > { %v6975_v59 = vmul.f32 %v6950_v57, %v14241_v42  ;;  %v6974_v1 = vmul.f32 %v6948_v15, %v14243_v63  ;;  %v6952_v27 = vsel %vm987_vm3, %v6943_v39, %v6951_v49  ;;  %v7240_v61 = vadd.f32 %v14347_v36, %v12449_v55  ;;  %v14354_v33 = vpop.f32.mrb[160].mxu1  ;;  %v14356_v53 = vpop.f32.mrb[161].mxu0 }
 0xe3f   : > { %v14359_v23 = vadd.f32 %v6973_v13, %v14211_v54  ;;  %v6976_v29 = vmul.f32 %v6952_v27, %v14245_v50  ;;  %v7242_v8 = vadd.f32 %v14354_v33, %v12449_v55  ;;  %v7241_v42 = vadd.f32 %v14356_v53, %v12449_v55  ;;  %v14366_v63 = vpop.f32.mrb[161].mxu1 }
 0xe40   : > { %v14369_v39 = vadd.f32 %v6975_v59, %v14221_v21  ;;  %v14372_v34 = vadd.f32 %v6974_v1, %v14224_v51  ;;  %v10038_v38 = vmul.f32 -1.442695, %v7240_v61  ;;  %v7243_v54 = vadd.f32 %v14366_v63, %v12449_v55 }
 0xe41   : > { %v14377_v50 = vadd.f32 %v6976_v29, %v14229_v44  ;;  %v10040_v2 = vmul.f32 -1.442695, %v7242_v8  ;;  %v10039_v18 = vmul.f32 -1.442695, %v7241_v42  ;;  %v14379_v11 = vpop.f32.mrb[162].mxu0  ;;  %v14414_v42 = vld [vmem:[%s15200_s7] sm:$0xff] }
 0xe42   : > { %10652 = vpow2.f32 %v10038_v38  ;;  %v10041_v60 = vmul.f32 -1.442695, %v7243_v54  ;;  %v14381_v37 = vpop.f32.mrb[162].mxu1  ;;  %v14383_v21 = vpop.f32.mrb[163].mxu0  ;;  %v15688_v38 = vld [vmem:[#allocation114_spill] sm:$0xff]  ;;  %v15689_v54 = vld [vmem:[#allocation115_spill] sm:$0xff] }
 0xe43   : > { %10654 = vpow2.f32 %v10040_v2  ;;  %v14385_v51 = vpop.f32.mrb[163].mxu1  ;;  %v15690_v2 = vld [vmem:[#allocation116_spill] sm:$0xff] }
 0xe44   : > { %10656 = vpow2.f32 %v10039_v18  ;;  %v15691_v18 = vld [vmem:[#allocation117_spill] sm:$0xff] }
 0xe45   : > { %10658 = vpow2.f32 %v10041_v60  ;;  %v14387_v0 = vpop.f32.mrb[164].mxu0  ;;  %v15692_v60 = vld [vmem:[#allocation99_spill] sm:$0xff] }
 0xe46   : > { %v14389_v26 = vpop.f32.mrb[164].mxu1  ;;  %v14391_v44 = vpop.f32.mrb[165].mxu0 }
 0xe47   : > { %v14393_v31 = vpop.f32.mrb[165].mxu1 }
 0xe4c   : > { %v10653_v6 = vpop.eup %10652 }
 0xe4d   : > { %v10655_v40 = vpop.eup %10654  ;;  %v7256_v49 = vadd.f32 1.0, %v10653_v6  ;;  %v15693_v6 = vld [vmem:[#allocation95_spill] sm:$0xff] }
 0xe4e   : > { %v10657_v13 = vpop.eup %10656  ;;  %v7258_v15 = vadd.f32 1.0, %v10655_v40  ;;  %v14431_v40 = vld [vmem:[%s15200_s7 + $0x8] sm:$0xff] }
 0xe4f   : > { %v10659_v57 = vpop.eup %10658  ;;  %v7257_v59 = vadd.f32 1.0, %v10657_v13  ;;  %10660 = vrcp.f32 %v7256_v49  ;;  %v15694_v49 = vld [vmem:[#allocation109_spill] sm:$0xff]  ;;  %v15695_v13 = vld [vmem:[#allocation100_spill] sm:$0xff] }
 0xe50   : > { %v7259_v1 = vadd.f32 1.0, %v10659_v57  ;;  %v14444_v57 = vld [vmem:[%s15200_s7 + $0x10] sm:$0x3] }
 0xe51   : > { %10662 = vrcp.f32 %v7257_v59  ;;  %v14466_v59 = vld [vmem:[%s15197_s4 + $0x8] sm:$0xff] }
 0xe52   : > { %10664 = vrcp.f32 %v7259_v1 }
 0xe53   : > { %10666 = vrcp.f32 %v7258_v15  ;;  %v14455_v15 = vld [vmem:[%s15197_s4] sm:$0xff] }
 0xe59   : > { %v14395_v27 = vpop.eup %10660 }
 0xe5a   : > { %15684 = vst [vmem:[#allocation26_spill] sm:$0xff] %v14395_v27 }
 0xe5b   : > { %v14397_v61 = vpop.eup %10662 }
 0xe5c   : > { %15685 = vst [vmem:[#allocation27_spill] sm:$0xff] %v14397_v61  ;;  %v14399_v29 = vpop.eup %10664  ;;  %10042 = vmatprep.subr.msk.mxu0 %vm987_vm3, %v14397_v61 }
 0xe5d   : > { %15686 = vst [vmem:[#allocation28_spill] sm:$0xff] %v14399_v29  ;;  %v14403_v8 = vpop.eup %10666  ;;  %10047 = vmatprep.subr.msk.mxu1 %vm987_vm3, %v14399_v29  ;;  %10043 = vmatpush1.msk.msra.mxu0 %vm987_vm3, %v14395_v27 }
 0xe5e   : > { %15687 = vst [vmem:[#allocation70_spill] sm:$0xff] %v14403_v8  ;;  %10048 = vmatpush1.msk.msra.mxu1 %vm987_vm3, %v14403_v8  ;;  %10044 = vmatmul.mubr.msk.f32.vlgmr.msra.gmra.mrb[166].mxu0 %vm977_vm4, %v14414_v42 }
 0xe5f   : > { %10049 = vmatmul.mubr.msk.f32.vlgmr.msra.gmra.mrb[166].mxu1 %vm977_vm4, %v14414_v42  ;;  %10351 = vmatprep.subr.bf16.mxu0 %v15688_v38 }
 0xe60   : > { %10359 = vmatprep.subr.bf16.mxu1 %v15689_v54  ;;  %10353 = vmatpush1.bf16.msra.mxu0 %v15690_v2 }
 0xe61   : > { %10361 = vmatpush1.bf16.msra.mxu1 %v15691_v18  ;;  %10355 = vmatprep.subr.bf16.mxu0 %v15692_v60 }
 0xe62   : > { %10363 = vmatprep.subr.bf16.mxu1 %v15693_v6  ;;  %7350 = vmatprep.mubr.f32.mxu0 %v15560_v46 }
 0xe63   : > { %7433 = vmatprep.mubr.f32.mxu1 %v15560_v46  ;;  %10045 = vmatmul.mubr.msk.f32.gmra.mrb[168].mxu0 %vm977_vm4, %v14431_v40 }
 0xe64   : > { %10050 = vmatmul.mubr.msk.f32.gmra.mrb[168].mxu1 %vm977_vm4, %v14431_v40  ;;  %10357 = vmatpush1.bf16.msra.mxu0 %v15694_v49 }
 0xe65   : > { %10365 = vmatpush1.bf16.msra.mxu1 %v15695_v13  ;;  %7356 = vmatprep.mubr.f32.mxu0 %v15560_v46 }
 0xe66   : > { %7439 = vmatprep.mubr.f32.mxu1 %v15560_v46 }
 0xe67   : > { %10046 = vmatmul.mubr.msk.f32.gmra.mrb[170].mxu0 %vm977_vm4, %v14444_v57 }
 0xe68   : > { %10051 = vmatmul.mubr.msk.f32.gmra.mrb[170].mxu1 %vm977_vm4, %v14444_v57  ;;  %7663 = vmatprep.mubr.f32.mxu0 %v15560_v46 }
 0xe69   : > { %7746 = vmatprep.mubr.f32.mxu1 %v15560_v46 }
 0xe6b   : > { %10053 = vmatmul.mubr.msk.f32.vlgmr.msra.gmra.mrb[172].mxu0 %vm768_vm2, %v14455_v15 }
 0xe6c   : > { %10056 = vmatmul.mubr.msk.f32.vlgmr.msra.gmra.mrb[172].mxu1 %vm768_vm2, %v14455_v15  ;;  %7669 = vmatprep.mubr.f32.mxu0 %v15560_v46 }
 0xe6d   : > { %7752 = vmatprep.mubr.f32.mxu1 %v15560_v46 }
 0xe6f   : > { %10054 = vmatmul.mubr.msk.f32.gmra.mrb[174].mxu0 %vm768_vm2, %v14466_v59 }
 0xe70   : > { %10057 = vmatmul.mubr.msk.f32.gmra.mrb[174].mxu1 %vm768_vm2, %v14466_v59  ;;  %7675 = vmatprep.mubr.f32.mxu0 %v15560_v46 }
 0xe71   : > { %7758 = vmatprep.mubr.f32.mxu1 %v15560_v46 }
 0xe73   : > { %10055 = vmatmul.mubr.msk.f32.gmra.mrb[176].mxu0 %vm768_vm2, %v14003_v5 }
 0xe74   : > { %10058 = vmatmul.mubr.msk.f32.gmra.mrb[176].mxu1 %vm768_vm2, %v14003_v5  ;;  %7869 = vmatprep.mubr.f32.mxu0 %v15560_v46 }
 0xe75   : > { %7952 = vmatprep.mubr.f32.mxu1 %v15560_v46 }
 0xf31   : > { %v7346_v1 = vpop.f32.mrb[166].mxu0 }
 0xf32   : > { %v7458_v38 = vrot.slane %v7346_v1, 5  ;;  %v7429_v54 = vpop.f32.mrb[166].mxu1  ;;  %v7348_v2 = vpop.f32.mrb[167].mxu0 }
 0xf33   : > { %v7460_v18 = vrot.slane %v7429_v54, 5  ;;  %v7459_v60 = vrot.slane %v7348_v2, 5  ;;  %v7431_v6 = vpop.f32.mrb[167].mxu1 }
 0xf34   : > { %v7490_v49 = vmul.f32 %v7458_v38, %v14347_v36  ;;  %v7461_v13 = vrot.slane %v7431_v6, 5 }
 0xf35   : > { %v7492_v29 = vmul.f32 %v7460_v18, %v14354_v33  ;;  %v7491_v61 = vmul.f32 %v7459_v60, %v14356_v53 }
 0xf36   : > { %v14484_v5 = vadd.f32 %v7490_v49, %v14311_v35  ;;  %v7493_v8 = vmul.f32 %v7461_v13, %v14366_v63  ;;  %v7352_v17 = vpop.f32.mrb[168].mxu0 }
 0xf37   : > { %v14488_v1 = vadd.f32 %v7492_v29, %v14315_v45  ;;  %v14491_v54 = vadd.f32 %v7491_v61, %v14318_v28  ;;  %v7462_v2 = vrot.slane %v7352_v17, 5  ;;  %v7435_v27 = vpop.f32.mrb[168].mxu1  ;;  %v7354_v36 = vpop.f32.mrb[169].mxu0 }
 0xf38   : > { %v14494_v6 = vadd.f32 %v7493_v8, %v14321_v14  ;;  %v7466_v33 = vrot.slane %v7435_v27, 5  ;;  %v7464_v53 = vrot.slane %v7354_v36, 5  ;;  %v7437_v24 = vpop.f32.mrb[169].mxu1 }
 0xf39   : > { %v7463_v35 = vsel %vm987_vm3, %v7458_v38, %v7462_v2  ;;  %v7468_v49 = vrot.slane %v7437_v24, 5 }
 0xf3a   : > { %v7494_v63 = vmul.f32 %v7463_v35, %v14379_v11  ;;  %v7467_v45 = vsel %vm987_vm3, %v7460_v18, %v7466_v33  ;;  %v7465_v29 = vsel %vm987_vm3, %v7459_v60, %v7464_v53  ;;  %v7358_v28 = vpop.f32.mrb[170].mxu0 }
 0xf3b   : > { %v7496_v17 = vmul.f32 %v7467_v45, %v14381_v37  ;;  %v7495_v61 = vmul.f32 %v7465_v29, %v14383_v21  ;;  %v7469_v14 = vsel %vm987_vm3, %v7461_v13, %v7468_v49  ;;  %v7470_v8 = vrot.slane %v7358_v28, 5  ;;  %v7441_v27 = vpop.f32.mrb[170].mxu1  ;;  %v7360_v36 = vpop.f32.mrb[171].mxu0 }
 0xf3c   : > { %v14504_v47 = vadd.f32 %v7494_v63, %v14331_v4  ;;  %v7497_v24 = vmul.f32 %v7469_v14, %v14385_v51  ;;  %v7474_v11 = vrot.slane %v7441_v27, 5  ;;  %v7472_v38 = vrot.slane %v7360_v36, 5  ;;  %v7443_v18 = vpop.f32.mrb[171].mxu1 }
 0xf3d   : > { %v14508_v60 = vadd.f32 %v7496_v17, %v14335_v10  ;;  %v14511_v37 = vadd.f32 %v7495_v61, %v14338_v16  ;;  %v7471_v21 = vsel %vm987_vm3, %v7462_v2, %v7470_v8  ;;  %v7476_v13 = vrot.slane %v7443_v18, 5 }
 0xf3e   : > { %v14515_v35 = vadd.f32 %v7497_v24, %v14342_v20  ;;  %v7498_v4 = vmul.f32 %v7471_v21, %v14387_v0  ;;  %v7475_v63 = vsel %vm987_vm3, %v7466_v33, %v7474_v11  ;;  %v7473_v51 = vsel %vm987_vm3, %v7464_v53, %v7472_v38  ;;  %v14520_v45 = vpop.f32.mrb[172].mxu0 }
 0xf3f   : > { %v7500_v10 = vmul.f32 %v7475_v63, %v14389_v26  ;;  %v7499_v29 = vmul.f32 %v7473_v51, %v14391_v44  ;;  %v7477_v16 = vsel %vm987_vm3, %v7468_v49, %v7476_v13  ;;  %v7765_v2 = vadd.f32 %v14520_v45, %v12449_v55  ;;  %v14527_v28 = vpop.f32.mrb[172].mxu1  ;;  %v14529_v20 = vpop.f32.mrb[173].mxu0 }
 0xf40   : > { %v14532_v0 = vadd.f32 %v7498_v4, %v14359_v23  ;;  %v7501_v33 = vmul.f32 %v7477_v16, %v14393_v31  ;;  %v7767_v53 = vadd.f32 %v14527_v28, %v12449_v55  ;;  %v7766_v26 = vadd.f32 %v14529_v20, %v12449_v55  ;;  %v14539_v44 = vpop.f32.mrb[173].mxu1 }
 0xf41   : > { %v14542_v49 = vadd.f32 %v7500_v10, %v14369_v39  ;;  %v14545_v17 = vadd.f32 %v7499_v29, %v14372_v34  ;;  %v10059_v61 = vmul.f32 -1.442695, %v7765_v2  ;;  %v7768_v23 = vadd.f32 %v14539_v44, %v12449_v55 }
 0xf42   : > { %v14550_v31 = vadd.f32 %v7501_v33, %v14377_v50  ;;  %v10061_v14 = vmul.f32 -1.442695, %v7767_v53  ;;  %v10060_v8 = vmul.f32 -1.442695, %v7766_v26  ;;  %v14552_v27 = vpop.f32.mrb[174].mxu0 }
 0xf43   : > { %10668 = vpow2.f32 %v10059_v61  ;;  %v10062_v36 = vmul.f32 -1.442695, %v7768_v23  ;;  %v14554_v24 = vpop.f32.mrb[174].mxu1  ;;  %v14556_v39 = vpop.f32.mrb[175].mxu0 }
 0xf44   : > { %10670 = vpow2.f32 %v10061_v14  ;;  %v14558_v34 = vpop.f32.mrb[175].mxu1 }
 0xf45   : > { %10672 = vpow2.f32 %v10060_v8 }
 0xf46   : > { %10674 = vpow2.f32 %v10062_v36  ;;  %v14560_v11 = vpop.f32.mrb[176].mxu0 }
 0xf47   : > { %v14562_v38 = vpop.f32.mrb[176].mxu1  ;;  %v14564_v50 = vpop.f32.mrb[177].mxu0 }
 0xf48   : > { %v14566_v18 = vpop.f32.mrb[177].mxu1 }
 0xf4d   : > { %v10669_v21 = vpop.eup %10668 }
 0xf4e   : > { %v10671_v13 = vpop.eup %10670  ;;  %v7781_v4 = vadd.f32 1.0, %v10669_v21 }
 0xf4f   : > { %v10673_v63 = vpop.eup %10672  ;;  %v7783_v10 = vadd.f32 1.0, %v10671_v13 }
 0xf50   : > { %v10675_v51 = vpop.eup %10674  ;;  %v7782_v29 = vadd.f32 1.0, %v10673_v63  ;;  %10676 = vrcp.f32 %v7781_v4 }
 0xf51   : > { %v7784_v16 = vadd.f32 1.0, %v10675_v51 }
 0xf52   : > { %10678 = vrcp.f32 %v7782_v29 }
 0xf53   : > { %10680 = vrcp.f32 %v7784_v16 }
 0xf54   : > { %10682 = vrcp.f32 %v7783_v10 }
 0xf5a   : > { %v14568_v2 = vpop.eup %10676 }
 0xf5c   : > { %v14570_v33 = vpop.eup %10678 }
 0xf5d   : > { %v14572_v53 = vpop.eup %10680  ;;  %10063 = vmatprep.subr.msk.mxu0 %vm987_vm3, %v14570_v33 }
 0xf5e   : > { %v14576_v26 = vpop.eup %10682  ;;  %10068 = vmatprep.subr.msk.mxu1 %vm987_vm3, %v14572_v53  ;;  %10064 = vmatpush1.msk.msra.mxu0 %vm987_vm3, %v14568_v2 }
 0xf5f   : > { %10069 = vmatpush1.msk.msra.mxu1 %vm987_vm3, %v14576_v26  ;;  %10065 = vmatmul.mubr.msk.f32.vlgmr.msra.gmra.mrb[178].mxu0 %vm977_vm4, %v14414_v42 }
 0xf60   : > { %10070 = vmatmul.mubr.msk.f32.vlgmr.msra.gmra.mrb[178].mxu1 %vm977_vm4, %v14414_v42  ;;  %10367 = vmatprep.subr.bf16.mxu0 %v12381_v25  ;;  %v15696_v25 = vld [vmem:[#allocation96_spill] sm:$0xff] }
 0xf61   : > { %10375 = vmatprep.subr.bf16.mxu1 %v12383_v32  ;;  %10369 = vmatpush1.bf16.msra.mxu0 %v12387_v7  ;;  %v14625_v32 = vld [vmem:[%s15197_s4 + $0x10] sm:$0x1f] }
 0xf62   : > { %10377 = vmatpush1.bf16.msra.mxu1 %v12389_v58  ;;  %10371 = vmatprep.subr.bf16.mxu0 %v12405_v22 }
 0xf63   : > { %10379 = vmatprep.subr.bf16.mxu1 %v12407_v12  ;;  %7875 = vmatprep.mubr.f32.mxu0 %v15560_v46 }
 0xf64   : > { %7958 = vmatprep.mubr.f32.mxu1 %v15560_v46  ;;  %10066 = vmatmul.mubr.msk.f32.gmra.mrb[180].mxu0 %vm977_vm4, %v14431_v40 }
 0xf65   : > { %10071 = vmatmul.mubr.msk.f32.gmra.mrb[180].mxu1 %vm977_vm4, %v14431_v40  ;;  %10373 = vmatpush1.bf16.msra.mxu0 %v12409_v41 }
 0xf66   : > { %10381 = vmatpush1.bf16.msra.mxu1 %v15696_v25  ;;  %7881 = vmatprep.mubr.f32.mxu0 %v15560_v46 }
 0xf67   : > { %7964 = vmatprep.mubr.f32.mxu1 %v15560_v46 }
 0xf68   : > { %10067 = vmatmul.mubr.msk.f32.gmra.mrb[182].mxu0 %vm977_vm4, %v14444_v57 }
 0xf69   : > { %10072 = vmatmul.mubr.msk.f32.gmra.mrb[182].mxu1 %vm977_vm4, %v14444_v57  ;;  %8188 = vmatprep.mubr.f32.mxu0 %v15560_v46 }
 0xf6a   : > { %8271 = vmatprep.mubr.f32.mxu1 %v15560_v46 }
 0xf6c   : > { %10074 = vmatmul.mubr.msk.f32.vlgmr.msra.gmra.mrb[184].mxu0 %vm768_vm2, %v14455_v15 }
 0xf6d   : > { %10077 = vmatmul.mubr.msk.f32.vlgmr.msra.gmra.mrb[184].mxu1 %vm768_vm2, %v14455_v15  ;;  %8194 = vmatprep.mubr.f32.mxu0 %v15560_v46 }
 0xf6e   : > { %8277 = vmatprep.mubr.f32.mxu1 %v15560_v46 }
 0xf70   : > { %10075 = vmatmul.mubr.msk.f32.gmra.mrb[186].mxu0 %vm768_vm2, %v14466_v59 }
 0xf71   : > { %10078 = vmatmul.mubr.msk.f32.gmra.mrb[186].mxu1 %vm768_vm2, %v14466_v59  ;;  %8200 = vmatprep.mubr.f32.mxu0 %v15560_v46 }
 0xf72   : > { %8283 = vmatprep.mubr.f32.mxu1 %v15560_v46 }
 0xf74   : > { %10076 = vmatmul.mubr.msk.f32.gmra.mrb[188].mxu0 %vm768_vm2, %v14625_v32 }
 0xf75   : > { %10079 = vmatmul.mubr.msk.f32.gmra.mrb[188].mxu1 %vm768_vm2, %v14625_v32  ;;  %8394 = vmatprep.mubr.f32.mxu0 %v15560_v46 }
 0xf76   : > { %8477 = vmatprep.mubr.f32.mxu1 %v15560_v46 }
0x1032   : > { %v7871_v7 = vpop.f32.mrb[178].mxu0 }
0x1033   : > { %v7983_v58 = vrot.slane %v7871_v7, 5  ;;  %v7954_v22 = vpop.f32.mrb[178].mxu1  ;;  %v7873_v12 = vpop.f32.mrb[179].mxu0 }
0x1034   : > { %v7985_v41 = vrot.slane %v7954_v22, 5  ;;  %v7984_v61 = vrot.slane %v7873_v12, 5  ;;  %v7956_v23 = vpop.f32.mrb[179].mxu1 }
0x1035   : > { %v8015_v14 = vmul.f32 %v7983_v58, %v14520_v45  ;;  %v7986_v8 = vrot.slane %v7956_v23, 5 }
0x1036   : > { %v8017_v36 = vmul.f32 %v7985_v41, %v14527_v28  ;;  %v8016_v21 = vmul.f32 %v7984_v61, %v14529_v20 }
0x1037   : > { %v14637_v13 = vadd.f32 %v8015_v14, %v14484_v5  ;;  %v8018_v4 = vmul.f32 %v7986_v8, %v14539_v44  ;;  %v7877_v63 = vpop.f32.mrb[180].mxu0 }
0x1038   : > { %v14641_v51 = vadd.f32 %v8017_v36, %v14488_v1  ;;  %v14644_v10 = vadd.f32 %v8016_v21, %v14491_v54  ;;  %v7987_v29 = vrot.slane %v7877_v63, 5  ;;  %v7960_v16 = vpop.f32.mrb[180].mxu1  ;;  %v7879_v45 = vpop.f32.mrb[181].mxu0 }
0x1039   : > { %v14647_v25 = vadd.f32 %v8018_v4, %v14494_v6  ;;  %v7991_v28 = vrot.slane %v7960_v16, 5  ;;  %v7989_v20 = vrot.slane %v7879_v45, 5  ;;  %v7962_v7 = vpop.f32.mrb[181].mxu1 }
0x103a   : > { %v7988_v5 = vsel %vm987_vm3, %v7983_v58, %v7987_v29  ;;  %v7993_v22 = vrot.slane %v7962_v7, 5 }
0x103b   : > { %v8019_v44 = vmul.f32 %v7988_v5, %v14552_v27  ;;  %v7992_v1 = vsel %vm987_vm3, %v7985_v41, %v7991_v28  ;;  %v7990_v12 = vsel %vm987_vm3, %v7984_v61, %v7989_v20  ;;  %v7883_v54 = vpop.f32.mrb[182].mxu0 }
0x103c   : > { %v8021_v23 = vmul.f32 %v7992_v1, %v14554_v24  ;;  %v8020_v14 = vmul.f32 %v7990_v12, %v14556_v39  ;;  %v7994_v6 = vsel %vm987_vm3, %v7986_v8, %v7993_v22  ;;  %v7995_v36 = vrot.slane %v7883_v54, 5  ;;  %v7966_v21 = vpop.f32.mrb[182].mxu1  ;;  %v7885_v4 = vpop.f32.mrb[183].mxu0 }
0x103d   : > { %v14657_v63 = vadd.f32 %v8019_v44, %v14504_v47  ;;  %v8022_v58 = vmul.f32 %v7994_v6, %v14558_v34  ;;  %v7999_v27 = vrot.slane %v7966_v21, 5  ;;  %v7997_v16 = vrot.slane %v7885_v4, 5  ;;  %v7968_v41 = vpop.f32.mrb[183].mxu1 }
0x103e   : > { %v14661_v61 = vadd.f32 %v8021_v23, %v14508_v60  ;;  %v14664_v24 = vadd.f32 %v8020_v14, %v14511_v37  ;;  %v7996_v39 = vsel %vm987_vm3, %v7987_v29, %v7995_v36  ;;  %v8001_v8 = vrot.slane %v7968_v41, 5 }
0x103f   : > { %v14668_v45 = vadd.f32 %v8022_v58, %v14515_v35  ;;  %v8023_v47 = vmul.f32 %v7996_v39, %v14560_v11  ;;  %v8000_v7 = vsel %vm987_vm3, %v7991_v28, %v7999_v27  ;;  %v7998_v34 = vsel %vm987_vm3, %v7989_v20, %v7997_v16  ;;  %v14673_v5 = vpop.f32.mrb[184].mxu0 }
0x1040   : > { %v8025_v60 = vmul.f32 %v8000_v7, %v14562_v38  ;;  %v8024_v44 = vmul.f32 %v7998_v34, %v14564_v50  ;;  %v8002_v37 = vsel %vm987_vm3, %v7993_v22, %v8001_v8  ;;  %v8290_v29 = vadd.f32 %v14673_v5, %v12449_v55  ;;  %v14680_v1 = vpop.f32.mrb[184].mxu1  ;;  %v14682_v35 = vpop.f32.mrb[185].mxu0 }
0x1041   : > { %v14685_v11 = vadd.f32 %v8023_v47, %v14532_v0  ;;  %v8026_v28 = vmul.f32 %v8002_v37, %v14566_v18  ;;  %v8292_v20 = vadd.f32 %v14680_v1, %v12449_v55  ;;  %v8291_v38 = vadd.f32 %v14682_v35, %v12449_v55  ;;  %v14692_v50 = vpop.f32.mrb[185].mxu1 }
0x1042   : > { %v14695_v22 = vadd.f32 %v8025_v60, %v14542_v49  ;;  %v14698_v12 = vadd.f32 %v8024_v44, %v14545_v17  ;;  %v10080_v54 = vmul.f32 -1.442695, %v8290_v29  ;;  %v8293_v0 = vadd.f32 %v14692_v50, %v12449_v55 }
0x1043   : > { %v14703_v18 = vadd.f32 %v8026_v28, %v14550_v31  ;;  %v10082_v23 = vmul.f32 -1.442695, %v8292_v20  ;;  %v10081_v14 = vmul.f32 -1.442695, %v8291_v38  ;;  %v14705_v6 = vpop.f32.mrb[186].mxu0  ;;  %v15697_v20 = vld [vmem:[#allocation46_spill] sm:$0xff] }
0x1044   : > { %10684 = vpow2.f32 %v10080_v54  ;;  %v10083_v36 = vmul.f32 -1.442695, %v8293_v0  ;;  %v14707_v21 = vpop.f32.mrb[186].mxu1  ;;  %v14709_v49 = vpop.f32.mrb[187].mxu0  ;;  %v15698_v38 = vld [vmem:[#allocation118_spill] sm:$0xff]  ;;  %v15699_v54 = vld [vmem:[#allocation119_spill] sm:$0xff] }
0x1045   : > { %10686 = vpow2.f32 %v10082_v23  ;;  %v14711_v17 = vpop.f32.mrb[187].mxu1  ;;  %v15700_v0 = vld [vmem:[#allocation120_spill] sm:$0xff]  ;;  %v15701_v23 = vld [vmem:[#allocation121_spill] sm:$0xff] }
0x1046   : > { %10688 = vpow2.f32 %v10081_v14  ;;  %v15702_v14 = vld [vmem:[#allocation122_spill] sm:$0xff] }
0x1047   : > { %10690 = vpow2.f32 %v10083_v36  ;;  %v14713_v4 = vpop.f32.mrb[188].mxu0  ;;  %v15703_v36 = vld [vmem:[#allocation123_spill] sm:$0xff] }
0x1048   : > { %v14715_v58 = vpop.f32.mrb[188].mxu1  ;;  %v14717_v31 = vpop.f32.mrb[189].mxu0 }
0x1049   : > { %v14719_v27 = vpop.f32.mrb[189].mxu1 }
0x104e   : > { %v10685_v16 = vpop.eup %10684 }
0x104f   : > { %v10687_v41 = vpop.eup %10686  ;;  %v8306_v39 = vadd.f32 1.0, %v10685_v16  ;;  %v15704_v16 = vld [vmem:[#allocation124_spill] sm:$0xff] }
0x1050   : > { %v10689_v8 = vpop.eup %10688  ;;  %v8308_v7 = vadd.f32 1.0, %v10687_v41 }
0x1051   : > { %v10691_v47 = vpop.eup %10690  ;;  %v8307_v34 = vadd.f32 1.0, %v10689_v8  ;;  %10692 = vrcp.f32 %v8306_v39 }
0x1052   : > { %v8309_v60 = vadd.f32 1.0, %v10691_v47 }
0x1053   : > { %10694 = vrcp.f32 %v8307_v34 }
0x1054   : > { %10696 = vrcp.f32 %v8309_v60 }
0x1055   : > { %10698 = vrcp.f32 %v8308_v7 }
0x105b   : > { %v14721_v44 = vpop.eup %10692 }
0x105d   : > { %v14723_v37 = vpop.eup %10694 }
0x105e   : > { %v14725_v29 = vpop.eup %10696  ;;  %10084 = vmatprep.subr.msk.mxu0 %vm987_vm3, %v14723_v37 }
0x105f   : > { %v14729_v28 = vpop.eup %10698  ;;  %10089 = vmatprep.subr.msk.mxu1 %vm987_vm3, %v14725_v29  ;;  %10085 = vmatpush1.msk.msra.mxu0 %vm987_vm3, %v14721_v44 }
0x1060   : > { %10090 = vmatpush1.msk.msra.mxu1 %vm987_vm3, %v14729_v28  ;;  %10086 = vmatmul.mubr.msk.f32.vlgmr.msra.gmra.mrb[190].mxu0 %vm977_vm4, %v14414_v42 }
0x1061   : > { %10091 = vmatmul.mubr.msk.f32.vlgmr.msra.gmra.mrb[190].mxu1 %vm977_vm4, %v14414_v42  ;;  %10383 = vmatprep.subr.bf16.mxu0 %v15697_v20 }
0x1062   : > { %10391 = vmatprep.subr.bf16.mxu1 %v15698_v38  ;;  %10385 = vmatpush1.bf16.msra.mxu0 %v15699_v54 }
0x1063   : > { %10393 = vmatpush1.bf16.msra.mxu1 %v15700_v0  ;;  %10387 = vmatprep.subr.bf16.mxu0 %v15701_v23 }
0x1064   : > { %10395 = vmatprep.subr.bf16.mxu1 %v15702_v14  ;;  %8400 = vmatprep.mubr.f32.mxu0 %v15560_v46 }
0x1065   : > { %8483 = vmatprep.mubr.f32.mxu1 %v15560_v46  ;;  %10087 = vmatmul.mubr.msk.f32.gmra.mrb[192].mxu0 %vm977_vm4, %v14431_v40 }
0x1066   : > { %10092 = vmatmul.mubr.msk.f32.gmra.mrb[192].mxu1 %vm977_vm4, %v14431_v40  ;;  %10389 = vmatpush1.bf16.msra.mxu0 %v15703_v36 }
0x1067   : > { %10397 = vmatpush1.bf16.msra.mxu1 %v15704_v16  ;;  %8406 = vmatprep.mubr.f32.mxu0 %v15560_v46 }
0x1068   : > { %8489 = vmatprep.mubr.f32.mxu1 %v15560_v46 }
0x1069   : > { %10088 = vmatmul.mubr.msk.f32.gmra.mrb[194].mxu0 %vm977_vm4, %v14444_v57 }
0x106a   : > { %10093 = vmatmul.mubr.msk.f32.gmra.mrb[194].mxu1 %vm977_vm4, %v14444_v57  ;;  %8713 = vmatprep.mubr.f32.mxu0 %v15560_v46 }
0x106b   : > { %8796 = vmatprep.mubr.f32.mxu1 %v15560_v46 }
0x106d   : > { %10095 = vmatmul.mubr.msk.f32.vlgmr.msra.gmra.mrb[196].mxu0 %vm768_vm2, %v14455_v15 }
0x106e   : > { %10098 = vmatmul.mubr.msk.f32.vlgmr.msra.gmra.mrb[196].mxu1 %vm768_vm2, %v14455_v15  ;;  %8719 = vmatprep.mubr.f32.mxu0 %v15560_v46 }
0x106f   : > { %8802 = vmatprep.mubr.f32.mxu1 %v15560_v46 }
0x1071   : > { %10096 = vmatmul.mubr.msk.f32.gmra.mrb[198].mxu0 %vm768_vm2, %v14466_v59 }
0x1072   : > { %10099 = vmatmul.mubr.msk.f32.gmra.mrb[198].mxu1 %vm768_vm2, %v14466_v59  ;;  %8725 = vmatprep.mubr.f32.mxu0 %v15560_v46 }
0x1073   : > { %8808 = vmatprep.mubr.f32.mxu1 %v15560_v46 }
0x1075   : > { %10097 = vmatmul.mubr.msk.f32.gmra.mrb[200].mxu0 %vm768_vm2, %v14625_v32 }
0x1076   : > { %10100 = vmatmul.mubr.msk.f32.gmra.mrb[200].mxu1 %vm768_vm2, %v14625_v32  ;;  %8919 = vmatprep.mubr.f32.mxu0 %v15560_v46 }
0x1077   : > { %9002 = vmatprep.mubr.f32.mxu1 %v15560_v46 }
0x1133   : > { %v8396_v15 = vpop.f32.mrb[190].mxu0 }
0x1134   : > { %v8508_v41 = vrot.slane %v8396_v15, 5  ;;  %v8479_v39 = vpop.f32.mrb[190].mxu1  ;;  %v8398_v8 = vpop.f32.mrb[191].mxu0 }
0x1135   : > { %v8510_v47 = vrot.slane %v8479_v39, 5  ;;  %v8509_v59 = vrot.slane %v8398_v8, 5  ;;  %v8481_v7 = vpop.f32.mrb[191].mxu1 }
0x1136   : > { %v8540_v34 = vmul.f32 %v8508_v41, %v14673_v5  ;;  %v8511_v60 = vrot.slane %v8481_v7, 5 }
0x1137   : > { %v8542_v20 = vmul.f32 %v8510_v47, %v14680_v1  ;;  %v8541_v38 = vmul.f32 %v8509_v59, %v14682_v35 }
0x1138   : > { %v14785_v32 = vadd.f32 %v8540_v34, %v14637_v13  ;;  %v8543_v54 = vmul.f32 %v8511_v60, %v14692_v50  ;;  %v8402_v0 = vpop.f32.mrb[192].mxu0 }
0x1139   : > { %v14789_v23 = vadd.f32 %v8542_v20, %v14641_v51  ;;  %v14792_v14 = vadd.f32 %v8541_v38, %v14644_v10  ;;  %v8512_v36 = vrot.slane %v8402_v0, 5  ;;  %v8485_v16 = vpop.f32.mrb[192].mxu1  ;;  %v8404_v5 = vpop.f32.mrb[193].mxu0 }
0x113a   : > { %v14795_v15 = vadd.f32 %v8543_v54, %v14647_v25  ;;  %v8516_v1 = vrot.slane %v8485_v16, 5  ;;  %v8514_v35 = vrot.slane %v8404_v5, 5  ;;  %v8487_v39 = vpop.f32.mrb[193].mxu1 }
0x113b   : > { %v8513_v13 = vsel %vm987_vm3, %v8508_v41, %v8512_v36  ;;  %v8518_v8 = vrot.slane %v8487_v39, 5 }
0x113c   : > { %v8544_v50 = vmul.f32 %v8513_v13, %v14705_v6  ;;  %v8517_v51 = vsel %vm987_vm3, %v8510_v47, %v8516_v1  ;;  %v8515_v7 = vsel %vm987_vm3, %v8509_v59, %v8514_v35  ;;  %v8408_v10 = vpop.f32.mrb[194].mxu0 }
0x113d   : > { %v8546_v34 = vmul.f32 %v8517_v51, %v14707_v21  ;;  %v8545_v20 = vmul.f32 %v8515_v7, %v14709_v49  ;;  %v8519_v25 = vsel %vm987_vm3, %v8511_v60, %v8518_v8  ;;  %v8520_v38 = vrot.slane %v8408_v10, 5  ;;  %v8491_v54 = vpop.f32.mrb[194].mxu1  ;;  %v8410_v0 = vpop.f32.mrb[195].mxu0 }
0x113e   : > { %v14805_v16 = vadd.f32 %v8544_v50, %v14657_v63  ;;  %v8547_v41 = vmul.f32 %v8519_v25, %v14711_v17  ;;  %v8524_v6 = vrot.slane %v8491_v54, 5  ;;  %v8522_v5 = vrot.slane %v8410_v0, 5  ;;  %v8493_v47 = vpop.f32.mrb[195].mxu1 }
0x113f   : > { %v14809_v59 = vadd.f32 %v8546_v34, %v14661_v61  ;;  %v14812_v21 = vadd.f32 %v8545_v20, %v14664_v24  ;;  %v8521_v49 = vsel %vm987_vm3, %v8512_v36, %v8520_v38  ;;  %v8526_v60 = vrot.slane %v8493_v47, 5  ;;  %v15710_v47 = vld [vmem:[#allocation55_spill] sm:$0xff] }
0x1140   : > { %v14816_v39 = vadd.f32 %v8547_v41, %v14668_v45  ;;  %v8548_v63 = vmul.f32 %v8521_v49, %v14713_v4  ;;  %v8525_v13 = vsel %vm987_vm3, %v8516_v1, %v8524_v6  ;;  %v8523_v17 = vsel %vm987_vm3, %v8514_v35, %v8522_v5  ;;  %v14821_v50 = vpop.f32.mrb[196].mxu0 }
0x1141   : > { %v8550_v61 = vmul.f32 %v8525_v13, %v14715_v58  ;;  %v8549_v51 = vmul.f32 %v8523_v17, %v14717_v31  ;;  %v8527_v24 = vsel %vm987_vm3, %v8518_v8, %v8526_v60  ;;  %v8815_v36 = vadd.f32 %v14821_v50, %v12449_v55  ;;  %v14828_v7 = vpop.f32.mrb[196].mxu1  ;;  %v14830_v45 = vpop.f32.mrb[197].mxu0  ;;  %v15711_v60 = vld [vmem:[#allocation56_spill] sm:$0xff] }
0x1142   : > { %v14833_v4 = vadd.f32 %v8548_v63, %v14685_v11  ;;  %v8551_v1 = vmul.f32 %v8527_v24, %v14719_v27  ;;  %v8817_v35 = vadd.f32 %v14828_v7, %v12449_v55  ;;  %v8816_v58 = vadd.f32 %v14830_v45, %v12449_v55  ;;  %v14840_v31 = vpop.f32.mrb[197].mxu1  ;;  %v15713_v24 = vld [vmem:[#allocation59_spill] sm:$0xff] }
0x1143   : > { %v14843_v8 = vadd.f32 %v8550_v61, %v14695_v22  ;;  %v14846_v10 = vadd.f32 %v8549_v51, %v14698_v12  ;;  %v10101_v34 = vmul.f32 -1.442695, %v8815_v36  ;;  %v8818_v11 = vadd.f32 %v14840_v31, %v12449_v55  ;;  %v15708_v55 = vld [vmem:[#allocation54_spill] sm:$0xff] }
0x1144   : > { %v14851_v27 = vadd.f32 %v8551_v1, %v14703_v18  ;;  %v10103_v20 = vmul.f32 -1.442695, %v8817_v35  ;;  %v10102_v25 = vmul.f32 -1.442695, %v8816_v58  ;;  %v14853_v38 = vpop.f32.mrb[198].mxu0  ;;  %v15707_v12 = vmax.f32 %v12813_v48, %v12967_v43  ;;  %v15715_v1 = vld [vmem:[#allocation16_spill] sm:$0xff] }
0x1145   : > { %15705 = vst [vmem:[#allocation71_spill] sm:$0xff] %v14846_v10  ;;  %10700 = vpow2.f32 %v10101_v34  ;;  %v10104_v54 = vmul.f32 -1.442695, %v8818_v11  ;;  %v14855_v0 = vpop.f32.mrb[198].mxu1  ;;  %v14857_v22 = vpop.f32.mrb[199].mxu0  ;;  %v15709_v18 = vmax.f32 %v12818_v3, %v15708_v55  ;;  %v3307_v49 = vadd.f32 %v13137_v52, %v15710_v47  ;;  %v15716_v35 = vld [vmem:[#allocation58_spill] sm:$0xff] }
0x1146   : > { %15706 = vst [vmem:[#allocation72_spill] sm:$0xff] %v14851_v27  ;;  %v3303_v41 = vmax.f32 %v15707_v12, %v13137_v52  ;;  %10702 = vpow2.f32 %v10103_v20  ;;  %v14867_v5 = vpop.f32.mrb[199].mxu1  ;;  %v3309_v63 = vadd.f32 %v13147_v56, %v15711_v60  ;;  %v15712_v52 = vld [vmem:[#allocation57_spill] sm:$0xff]  ;;  %v15717_v58 = vld [vmem:[#allocation60_spill] sm:$0xff]  ;;  %v15721_v55 = vld [vmem:[#allocation15_spill] sm:$0xff] }
0x1147   : > { %v3305_v6 = vmax.f32 %v15709_v18, %v13147_v56  ;;  %10704 = vpow2.f32 %v10102_v25  ;;  %v3832_v3 = vadd.f32 %v13322_v30, %v3307_v49  ;;  %v15714_v36 = vmax.f32 %v15712_v52, %v15713_v24  ;;  %v15719_v20 = vld [vmem:[#allocation44_spill] sm:$0xff]  ;;  %v15723_v49 = vld [vmem:[#allocation41_spill] sm:$0xff] }
0x1148   : > { %v3828_v13 = vmax.f32 %v3303_v41, %v13322_v30  ;;  %10706 = vpow2.f32 %v10104_v54  ;;  %v14875_v43 = vpop.f32.mrb[200].mxu0  ;;  %v3834_v17 = vadd.f32 %v13330_v19, %v3309_v63  ;;  %v15718_v34 = vmax.f32 %v15716_v35, %v15717_v58  ;;  %v15720_v54 = vld [vmem:[#allocation37_spill] sm:$0xff]  ;;  %v15724_v63 = vld [vmem:[#allocation18_spill] sm:$0xff] }
0x1149   : > { %v3830_v48 = vmax.f32 %v3305_v6, %v13330_v19  ;;  %v14879_v61 = vpop.f32.mrb[200].mxu1  ;;  %v14881_v51 = vpop.f32.mrb[201].mxu0  ;;  %v4352_v56 = vmax.f32 %v15714_v36, %v13477_v9  ;;  %v4357_v19 = vadd.f32 %v15719_v20, %v3832_v3  ;;  %v4356_v18 = vadd.f32 %v13477_v9, %v15721_v55  ;;  %v15722_v6 = vld [vmem:[#allocation50_spill] sm:$0xff]  ;;  %v15725_v24 = vld [vmem:[#allocation61_spill] sm:$0xff]  ;;  %v15727_v9 = vld [vmem:[#allocation19_spill] sm:$0xff] }
0x114a   : > { %v4354_v11 = vmax.f32 %v15718_v34, %v15715_v1  ;;  %v4353_v25 = vmax.f32 %v3828_v13, %v15719_v20  ;;  %v14893_v12 = vpop.f32.mrb[201].mxu1  ;;  %v4359_v41 = vadd.f32 %v15720_v54, %v3834_v17  ;;  %v4358_v47 = vadd.f32 %v15715_v1, %v15722_v6  ;;  %v15726_v36 = vld [vmem:[#allocation17_spill] sm:$0xff]  ;;  %v15728_v20 = vld [vmem:[#allocation63_spill] sm:$0xff]  ;;  %v15730_v55 = vld [vmem:[#allocation62_spill] sm:$0xff] }
0x114b   : > { %v4355_v30 = vmax.f32 %v3830_v48, %v15720_v54  ;;  %v4877_v60 = vmax.f32 %v4352_v56, %v15723_v49  ;;  %v4882_v35 = vadd.f32 %v15725_v24, %v4357_v19  ;;  %v4881_v17 = vadd.f32 %v15723_v49, %v4356_v18  ;;  %v15729_v54 = vld [vmem:[#allocation20_spill] sm:$0xff]  ;;  %v15734_v27 = vld [vmem:[#allocation21_spill] sm:$0xff] }
0x114c   : > { %v4879_v52 = vmax.f32 %v4354_v11, %v15724_v63  ;;  %v4878_v13 = vmax.f32 %v4353_v25, %v15725_v24  ;;  %v4884_v3 = vadd.f32 %v15726_v36, %v4359_v41  ;;  %v4883_v58 = vadd.f32 %v15724_v63, %v4358_v47  ;;  %v15731_v49 = vld [vmem:[#allocation64_spill] sm:$0xff]  ;;  %v15732_v63 = vld [vmem:[#allocation22_spill] sm:$0xff]  ;;  %v15733_v24 = vld [vmem:[#allocation65_spill] sm:$0xff] }
0x114d   : > { %v4880_v48 = vmax.f32 %v4355_v30, %v15726_v36  ;;  %v5402_v34 = vmax.f32 %v4877_v60, %v15727_v9  ;;  %v5407_v25 = vadd.f32 %v15729_v54, %v4882_v35  ;;  %v5406_v19 = vadd.f32 %v15727_v9, %v4881_v17 }
0x114e   : > { %v5404_v1 = vmax.f32 %v4879_v52, %v15728_v20  ;;  %v5403_v56 = vmax.f32 %v4878_v13, %v15729_v54  ;;  %v5409_v30 = vadd.f32 %v15730_v55, %v4884_v3  ;;  %v5408_v41 = vadd.f32 %v15728_v20, %v4883_v58 }
0x114f   : > { %v5405_v11 = vmax.f32 %v4880_v48, %v15730_v55  ;;  %v10701_v6 = vpop.eup %10700  ;;  %v5927_v47 = vmax.f32 %v5402_v34, %v15731_v49  ;;  %v5931_v35 = vadd.f32 %v15731_v49, %v5406_v19  ;;  %v5932_v58 = vadd.f32 %v15733_v24, %v5407_v25  ;;  %v15735_v34 = vld [vmem:[#allocation23_spill] sm:$0xff] }
0x1150   : > { %v10703_v18 = vpop.eup %10702  ;;  %v5929_v60 = vmax.f32 %v5404_v1, %v15732_v63  ;;  %v5928_v52 = vmax.f32 %v5403_v56, %v15733_v24  ;;  %v8831_v36 = vadd.f32 1.0, %v10701_v6  ;;  %v5933_v3 = vadd.f32 %v15732_v63, %v5408_v41  ;;  %v15736_v55 = vld [vmem:[#allocation67_spill] sm:$0xff]  ;;  %v15737_v6 = vld [vmem:[#allocation24_spill] sm:$0xff] }
0x1151   : > { %v10705_v13 = vpop.eup %10704  ;;  %v5930_v48 = vmax.f32 %v5405_v11, %v15734_v27  ;;  %v8833_v10 = vadd.f32 1.0, %v10703_v18  ;;  %v5934_v9 = vadd.f32 %v15734_v27, %v5409_v30  ;;  %v6452_v20 = vmax.f32 %v5927_v47, %v15735_v34  ;;  %v15738_v30 = vld [vmem:[#allocation66_spill] sm:$0xff]  ;;  %v15740_v24 = vld [vmem:[#allocation68_spill] sm:$0xff] }
0x1152   : > { %v10707_v54 = vpop.eup %10706  ;;  %10708 = vrcp.f32 %v8831_v36  ;;  %v8832_v17 = vadd.f32 1.0, %v10705_v13  ;;  %v6456_v56 = vadd.f32 %v15735_v34, %v5931_v35  ;;  %v6454_v11 = vmax.f32 %v5929_v60, %v15736_v55  ;;  %v15741_v36 = vld [vmem:[#allocation26_spill] sm:$0xff] }
0x1153   : > { %10710 = vrcp.f32 %v8833_v10  ;;  %v8834_v1 = vadd.f32 1.0, %v10707_v54  ;;  %v6453_v18 = vmax.f32 %v5928_v52, %v15737_v6  ;;  %v6458_v19 = vadd.f32 %v15736_v55, %v5933_v3  ;;  %v15739_v10 = vld [vmem:[#allocation25_spill] sm:$0xff] }
0x1154   : > { %10712 = vrcp.f32 %v8832_v17  ;;  %v6977_v41 = vmax.f32 %v6452_v20, %v14247_v62  ;;  %v6457_v25 = vadd.f32 %v15737_v6, %v5932_v58  ;;  %v6981_v27 = vadd.f32 %v14247_v62, %v6456_v56  ;;  %v15742_v54 = vld [vmem:[#allocation69_spill] sm:$0xff]  ;;  %v15743_v58 = vld [vmem:[#allocation70_spill] sm:$0xff]  ;;  %v15744_v20 = vld [vmem:[#allocation27_spill] sm:$0xff] }
0x1155   : > { %10714 = vrcp.f32 %v8834_v1  ;;  %v6455_v49 = vmax.f32 %v5930_v48, %v15738_v30  ;;  %v6979_v47 = vmax.f32 %v6454_v11, %v15739_v10  ;;  %v6459_v63 = vadd.f32 %v15738_v30, %v5934_v9  ;;  %v15745_v11 = vld [vmem:[#allocation28_spill] sm:$0xff] }
0x1156   : > { %v6983_v60 = vadd.f32 %v15739_v10, %v6458_v19  ;;  %v6978_v52 = vmax.f32 %v6453_v18, %v15740_v24  ;;  %v7502_v13 = vmax.f32 %v6977_v41, %v15741_v36  ;;  %v6982_v35 = vadd.f32 %v15740_v24, %v6457_v25 }
0x1157   : > { %v7506_v3 = vadd.f32 %v15741_v36, %v6981_v27  ;;  %v6980_v17 = vmax.f32 %v6455_v49, %v15742_v54  ;;  %v7504_v62 = vmax.f32 %v6979_v47, %v15743_v58  ;;  %v6984_v48 = vadd.f32 %v15742_v54, %v6459_v63 }
0x1158   : > { %v7508_v34 = vadd.f32 %v15743_v58, %v6983_v60  ;;  %v7503_v9 = vmax.f32 %v6978_v52, %v15744_v20  ;;  %v8027_v1 = vmax.f32 %v7502_v13, %v14568_v2  ;;  %v7507_v56 = vadd.f32 %v15744_v20, %v6982_v35 }
0x1159   : > { %v8031_v55 = vadd.f32 %v14568_v2, %v7506_v3  ;;  %v7505_v6 = vmax.f32 %v6980_v17, %v15745_v11  ;;  %v8029_v18 = vmax.f32 %v7504_v62, %v14576_v26  ;;  %v7509_v19 = vadd.f32 %v15745_v11, %v6984_v48 }
0x115a   : > { %v8033_v41 = vadd.f32 %v14576_v26, %v7508_v34  ;;  %v8028_v25 = vmax.f32 %v7503_v9, %v14570_v33  ;;  %v14955_v27 = vmax.f32 %v8027_v1, %v14721_v44  ;;  %v8032_v30 = vadd.f32 %v14570_v33, %v7507_v56 }
0x115b   : > { %v8556_v49 = vadd.f32 %v14721_v44, %v8031_v55  ;;  %v8030_v2 = vmax.f32 %v7505_v6, %v14572_v53  ;;  %v14963_v47 = vmax.f32 %v8029_v18, %v14729_v28  ;;  %v8034_v63 = vadd.f32 %v14572_v53, %v7509_v19  ;;  %v10748_v19 = vld [vmem:[%s15200_s7 + $0x8] sm:$0xff] }
0x115c   : > { %v14959_v10 = vpop.eup %10708  ;;  %v8558_v26 = vadd.f32 %v14729_v28, %v8033_v41  ;;  %v14970_v24 = vmax.f32 %v8028_v25, %v14723_v37  ;;  %v8557_v44 = vadd.f32 %v14723_v37, %v8032_v30 }
0x115d   : > { %v14967_v60 = vpop.eup %10710  ;;  %v9077_v33 = vmax.f32 %v14955_v27, %v14959_v10  ;;  %v9081_v52 = vadd.f32 %v14959_v10, %v8556_v49  ;;  %v14979_v13 = vmax.f32 %v8030_v2, %v14725_v29  ;;  %v8559_v28 = vadd.f32 %v14725_v29, %v8034_v63  ;;  %v10749_v63 = vld [vmem:[%s15200_s7 + $0x10] sm:$0x3] }
0x115e   : > { %v14976_v36 = vpop.eup %10712  ;;  %v9079_v53 = vmax.f32 %v14963_v47, %v14967_v60  ;;  %v9083_v35 = vadd.f32 %v14967_v60, %v8558_v26 }
0x115f   : > { %v14985_v3 = vpop.eup %10714  ;;  %v9078_v54 = vmax.f32 %v14970_v24, %v14976_v36  ;;  %10105 = vmatprep.subr.msk.mxu0 %vm987_vm3, %v14976_v36  ;;  %v9082_v37 = vadd.f32 %v14976_v36, %v8557_v44  ;;  %v9097_v17 = vadd.f32 1e-05, %v9081_v52 }
0x1160   : > { %v9080_v58 = vmax.f32 %v14979_v13, %v14985_v3  ;;  %10110 = vmatprep.subr.msk.mxu1 %vm987_vm3, %v14985_v3  ;;  %10106 = vmatpush1.msk.msra.mxu0 %vm987_vm3, %v14959_v10  ;;  %v9084_v29 = vadd.f32 %v14985_v3, %v8559_v28  ;;  %v9099_v62 = vadd.f32 1e-05, %v9083_v35 }
0x1161   : > { %10111 = vmatpush1.msk.msra.mxu1 %vm987_vm3, %v14967_v60  ;;  %10107 = vmatmul.mubr.msk.f32.vlgmr.msra.gmra.mrb[202].mxu0 %vm977_vm4, %v14414_v42  ;;  %v9098_v48 = vadd.f32 1e-05, %v9082_v37  ;;  %10716 = vrcp.f32 %v9097_v17 }
0x1162   : > { %10112 = vmatmul.mubr.msk.f32.vlgmr.msra.gmra.mrb[202].mxu1 %vm977_vm4, %v14414_v42  ;;  %10115 = vmatprep.subr.msk.mxu0 %vm987_vm3, %v9082_v37  ;;  %v9100_v34 = vadd.f32 1e-05, %v9084_v29  ;;  %10718 = vrcp.f32 %v9099_v62 }
0x1163   : > { %10720 = vrcp.f32 %v9098_v48  ;;  %10120 = vmatprep.subr.msk.mxu1 %vm987_vm3, %v9084_v29  ;;  %10116 = vmatpush1.msk.msra.mxu0 %vm987_vm3, %v9081_v52 }
0x1164   : > { %10722 = vrcp.f32 %v9100_v34  ;;  %10121 = vmatpush1.msk.msra.mxu1 %vm987_vm3, %v9083_v35  ;;  %8925 = vmatprep.mubr.f32.mxu0 %v15560_v46 }
0x1165   : > { %9008 = vmatprep.mubr.f32.mxu1 %v15560_v46  ;;  %10108 = vmatmul.mubr.msk.f32.gmra.mrb[204].mxu0 %vm977_vm4, %v14431_v40 }
0x1166   : > { %10113 = vmatmul.mubr.msk.f32.gmra.mrb[204].mxu1 %vm977_vm4, %v14431_v40  ;;  %8931 = vmatprep.mubr.f32.mxu0 %v15560_v46  ;;  %v10747_v40 = vld [vmem:[%s15200_s7] sm:$0xff] }
0x1167   : > { %9014 = vmatprep.mubr.f32.mxu1 %v15560_v46 }
0x1169   : > { %10109 = vmatmul.mubr.msk.f32.gmra.mrb[206].mxu0 %vm977_vm4, %v14444_v57 }
0x116a   : > { %10114 = vmatmul.mubr.msk.f32.gmra.mrb[206].mxu1 %vm977_vm4, %v14444_v57  ;;  %9193 = vmatprep.mubr.f32.mxu0 %v15560_v46 }
0x116b   : > { %v10717_v42 = vpop.eup %10716  ;;  %9276 = vmatprep.mubr.f32.mxu1 %v15560_v46 }
0x116c   : > { %v10719_v20 = vpop.eup %10718  ;;  %v9105_v9 = vmul.f32 %v10717_v42, %v9097_v17 }
0x116d   : > { %v10721_v1 = vpop.eup %10720  ;;  %10117 = vmatmul.mubr.msk.f32.vlgmr.msra.gmra.mrb[208].mxu0 %vm977_vm4, %v10747_v40  ;;  %v9107_v56 = vmul.f32 %v10719_v20, %v9099_v62 }
0x116e   : > { %v10723_v55 = vpop.eup %10722  ;;  %10122 = vmatmul.mubr.msk.f32.vlgmr.msra.gmra.mrb[208].mxu1 %vm977_vm4, %v10747_v40  ;;  %9199 = vmatprep.mubr.f32.mxu0 %v15560_v46  ;;  %v9106_v57 = vmul.f32 %v10721_v1, %v9098_v48  ;;  %v9109_v18 = vsub.f32 2.0, %v9105_v9 }
0x116f   : > { %9282 = vmatprep.mubr.f32.mxu1 %v15560_v46  ;;  %v9108_v11 = vmul.f32 %v10723_v55, %v9100_v34  ;;  %v9111_v25 = vsub.f32 2.0, %v9107_v56 }
0x1170   : > { %v9110_v6 = vsub.f32 2.0, %v9106_v57  ;;  %v9113_v2 = vmul.f32 %v10717_v42, %v9109_v18 }
0x1171   : > { %10118 = vmatmul.mubr.msk.f32.gmra.mrb[210].mxu0 %vm977_vm4, %v10748_v19  ;;  %v9112_v41 = vsub.f32 2.0, %v9108_v11  ;;  %v9115_v26 = vmul.f32 %v10719_v20, %v9111_v25 }
0x1172   : > { %10123 = vmatmul.mubr.msk.f32.gmra.mrb[210].mxu1 %vm977_vm4, %v10748_v19  ;;  %9205 = vmatprep.mubr.f32.mxu0 %v15560_v46  ;;  %v9114_v30 = vmul.f32 %v10721_v1, %v9110_v6 }
0x1173   : > { %9288 = vmatprep.mubr.f32.mxu1 %v15560_v46  ;;  %v9116_v49 = vmul.f32 %v10723_v55, %v9112_v41  ;;  %v15063_v55 = vpop.permute.xlu1 %9483 }
0x1174   : > { %10125 = vmatprep.subr.msk.mxu0 %vm987_vm3, %v9114_v30 }
0x1175   : > { %10130 = vmatprep.subr.msk.mxu1 %vm987_vm3, %v9116_v49  ;;  %10119 = vmatmul.mubr.msk.f32.gmra.mrb[212].mxu0 %vm977_vm4, %v10749_v63 }
0x1176   : > { %10124 = vmatmul.mubr.msk.f32.gmra.mrb[212].mxu1 %vm977_vm4, %v10749_v63  ;;  %10126 = vmatpush1.msk.msra.mxu0 %vm987_vm3, %v9113_v2 }
0x1177   : > { %10131 = vmatpush1.msk.msra.mxu1 %vm987_vm3, %v9115_v26  ;;  %9371 = vmatprep.mubr.f32.mxu0 %v15560_v46 }
0x1178   : > { %9454 = vmatprep.mubr.f32.mxu1 %v15560_v46 }
0x1179   : > { %10127 = vmatmul.mubr.msk.f32.vlgmr.msra.gmra.mrb[214].mxu0 %vm977_vm4, %v10747_v40 }
0x117a   : > { %10132 = vmatmul.mubr.msk.f32.vlgmr.msra.gmra.mrb[214].mxu1 %vm977_vm4, %v10747_v40  ;;  %9377 = vmatprep.mubr.f32.mxu0 %v15560_v46 }
0x117b   : > { %9460 = vmatprep.mubr.f32.mxu1 %v15560_v46 }
0x117d   : > { %10128 = vmatmul.mubr.msk.f32.gmra.mrb[216].mxu0 %vm977_vm4, %v10748_v19 }
0x117e   : > { %10133 = vmatmul.mubr.msk.f32.gmra.mrb[216].mxu1 %vm977_vm4, %v10748_v19  ;;  %9383 = vmatprep.mubr.f32.mxu0 %v15560_v46 }
0x117f   : > { %9466 = vmatprep.mubr.f32.mxu1 %v15560_v46 }
0x1181   : > { %10129 = vmatmul.mubr.msk.f32.gmra.mrb[218].mxu0 %vm977_vm4, %v10749_v63 }
0x1182   : > { %10134 = vmatmul.mubr.msk.f32.gmra.mrb[218].mxu1 %vm977_vm4, %v10749_v63 }
0x1234   : > { %v8921_v44 = vpop.f32.mrb[202].mxu0 }
0x1235   : > { %v9033_v52 = vrot.slane %v8921_v44, 5  ;;  %v9004_v28 = vpop.f32.mrb[202].mxu1  ;;  %v8923_v35 = vpop.f32.mrb[203].mxu0 }
0x1236   : > { %v9035_v37 = vrot.slane %v9004_v28, 5  ;;  %v9034_v17 = vrot.slane %v8923_v35, 5  ;;  %v9006_v29 = vpop.f32.mrb[203].mxu1 }
0x1237   : > { %v9065_v62 = vmul.f32 %v9033_v52, %v14821_v50  ;;  %v9036_v48 = vrot.slane %v9006_v29, 5 }
0x1238   : > { %v9067_v34 = vmul.f32 %v9035_v37, %v14828_v7  ;;  %v9066_v42 = vmul.f32 %v9034_v17, %v14830_v45  ;;  %v8927_v20 = vpop.f32.mrb[204].mxu0 }
0x1239   : > { %v9085_v46 = vadd.f32 %v9065_v62, %v14785_v32  ;;  %v9068_v9 = vmul.f32 %v9036_v48, %v14840_v31  ;;  %v9037_v1 = vrot.slane %v8927_v20, 5  ;;  %v9010_v40 = vpop.f32.mrb[204].mxu1  ;;  %v8929_v56 = vpop.f32.mrb[205].mxu0 }
0x123a   : > { %v9087_v57 = vadd.f32 %v9067_v34, %v14789_v23  ;;  %v9086_v11 = vadd.f32 %v9066_v42, %v14792_v14  ;;  %v9041_v50 = vrot.slane %v9010_v40, 5  ;;  %v9039_v6 = vrot.slane %v8929_v56, 5  ;;  %v9012_v18 = vpop.f32.mrb[205].mxu1 }
0x123b   : > { %v9088_v7 = vadd.f32 %v9068_v9, %v14795_v15  ;;  %v9038_v45 = vsel %vm987_vm3, %v9033_v52, %v9037_v1  ;;  %v9043_v19 = vrot.slane %v9012_v18, 5 }
0x123c   : > { %v9069_v32 = vmul.f32 %v9038_v45, %v14853_v38  ;;  %v9042_v31 = vsel %vm987_vm3, %v9035_v37, %v9041_v50  ;;  %v9040_v41 = vsel %vm987_vm3, %v9034_v17, %v9039_v6  ;;  %v8933_v25 = vpop.f32.mrb[206].mxu0  ;;  %v15747_v45 = vld [vmem:[#allocation72_spill] sm:$0xff] }
0x123d   : > { %v9071_v30 = vmul.f32 %v9042_v31, %v14855_v0  ;;  %v9070_v23 = vmul.f32 %v9040_v41, %v14857_v22  ;;  %v9044_v14 = vsel %vm987_vm3, %v9036_v48, %v9043_v19  ;;  %v9045_v49 = vrot.slane %v8933_v25, 5  ;;  %v9016_v2 = vpop.f32.mrb[206].mxu1  ;;  %v8935_v63 = vpop.f32.mrb[207].mxu0 }
0x123e   : > { %v9089_v15 = vadd.f32 %v9069_v32, %v14805_v16  ;;  %v9072_v26 = vmul.f32 %v9044_v14, %v14867_v5  ;;  %v9049_v44 = vrot.slane %v9016_v2, 5  ;;  %v9047_v38 = vrot.slane %v8935_v63, 5  ;;  %v9018_v52 = vpop.f32.mrb[207].mxu1  ;;  %v9479_v22 = vpop.permute.xlu1 %9478 }
0x123f   : > { %v9091_v28 = vadd.f32 %v9071_v30, %v14809_v59  ;;  %v9090_v35 = vadd.f32 %v9070_v23, %v14812_v21  ;;  %v9046_v0 = vsel %vm987_vm3, %v9037_v1, %v9045_v49  ;;  %v9051_v37 = vrot.slane %v9018_v52, 5 }
0x1240   : > { %v9092_v17 = vadd.f32 %v9072_v26, %v14816_v39  ;;  %v9073_v29 = vmul.f32 %v9046_v0, %v14875_v43  ;;  %v9050_v62 = vsel %vm987_vm3, %v9041_v50, %v9049_v44  ;;  %v9048_v16 = vsel %vm987_vm3, %v9039_v6, %v9047_v38  ;;  %v9195_v5 = vpop.f32.mrb[208].mxu0  ;;  %v15746_v50 = vld [vmem:[#allocation71_spill] sm:$0xff]  ;;  %v9489_v38 = vpop.permute.xlu0 %9488 }
0x1241   : > { %v9075_v48 = vmul.f32 %v9050_v62, %v14879_v61  ;;  %v9074_v34 = vmul.f32 %v9048_v16, %v14881_v51  ;;  %v9052_v59 = vsel %vm987_vm3, %v9043_v19, %v9051_v37  ;;  %v9491_v21 = vmul.f32 %v9479_v22, %v9195_v5  ;;  %v9278_v42 = vpop.f32.mrb[208].mxu1  ;;  %v9197_v20 = vpop.f32.mrb[209].mxu0 }
0x1242   : > { %v9093_v9 = vadd.f32 %v9073_v29, %v14833_v4  ;;  %v9076_v39 = vmul.f32 %v9052_v59, %v14893_v12  ;;  %v9493_v1 = vmul.f32 %v9479_v22, %v9278_v42  ;;  %v9492_v43 = vmul.f32 %v9479_v22, %v9197_v20  ;;  %v9280_v40 = vpop.f32.mrb[209].mxu1 }
0x1243   : > { %v9095_v56 = vadd.f32 %v9075_v48, %v14843_v8  ;;  %v9094_v6 = vadd.f32 %v9074_v34, %v15746_v50  ;;  %v9515_v18 = vrot.slane %v9491_v21, 5  ;;  %v9494_v61 = vmul.f32 %v9479_v22, %v9280_v40 }
0x1244   : > { %v9096_v51 = vadd.f32 %v9076_v39, %v15747_v45  ;;  %v9517_v32 = vrot.slane %v9493_v1, 5  ;;  %v9516_v19 = vrot.slane %v9492_v43, 5  ;;  %v9201_v31 = vpop.f32.mrb[210].mxu0 }
0x1245   : > { %v9547_v41 = vadd.f32 %v9515_v18, %v9085_v46  ;;  %v9518_v25 = vrot.slane %v9494_v61, 5  ;;  %v9495_v4 = vmul.f32 %v15063_v55, %v9201_v31  ;;  %v9284_v30 = vpop.f32.mrb[210].mxu1  ;;  %v9203_v12 = vpop.f32.mrb[211].mxu0 }
0x1246   : > { %v9549_v23 = vadd.f32 %v9517_v32, %v9087_v57  ;;  %v9548_v14 = vadd.f32 %v9516_v19, %v9086_v11  ;;  %v9497_v49 = vmul.f32 %v15063_v55, %v9284_v30  ;;  %v9496_v8 = vmul.f32 %v15063_v55, %v9203_v12  ;;  %v9286_v2 = vpop.f32.mrb[211].mxu1 }
0x1247   : > { %v9550_v63 = vadd.f32 %v9518_v25, %v9088_v7  ;;  %v9519_v26 = vrot.slane %v9495_v4, 5  ;;  %v9498_v44 = vmul.f32 %v15063_v55, %v9286_v2 }
0x1248   : > { %v9523_v52 = vrot.slane %v9497_v49, 5  ;;  %v9521_v0 = vrot.slane %v9496_v8, 5  ;;  %v9207_v46 = vpop.f32.mrb[212].mxu0 }
0x1249   : > { %v9520_v37 = vsel %vm987_vm3, %v9515_v18, %v9519_v26  ;;  %v9525_v22 = vrot.slane %v9498_v44, 5  ;;  %v9499_v29 = vmul.f32 %v9489_v38, %v9207_v46  ;;  %v9290_v57 = vpop.f32.mrb[212].mxu1  ;;  %v9209_v11 = vpop.f32.mrb[213].mxu0 }
0x124a   : > { %v9551_v62 = vadd.f32 %v9520_v37, %v9089_v15  ;;  %v9524_v16 = vsel %vm987_vm3, %v9517_v32, %v9523_v52  ;;  %v9522_v5 = vsel %vm987_vm3, %v9516_v19, %v9521_v0  ;;  %v9501_v7 = vmul.f32 %v9489_v38, %v9290_v57  ;;  %v9292_v48 = vpop.f32.mrb[213].mxu1 }
0x124b   : > { %v9553_v34 = vadd.f32 %v9524_v16, %v9091_v28  ;;  %v9552_v55 = vadd.f32 %v9522_v5, %v9090_v35  ;;  %v9526_v59 = vsel %vm987_vm3, %v9518_v25, %v9525_v22  ;;  %v9527_v21 = vrot.slane %v9499_v29, 5 }
0x124c   : > { %v9554_v42 = vadd.f32 %v9526_v59, %v9092_v17  ;;  %v9531_v20 = vrot.slane %v9501_v7, 5  ;;  %v9500_v39 = vmul.f32 %v9489_v38, %v9209_v11  ;;  %v9502_v1 = vmul.f32 %v9489_v38, %v9292_v48  ;;  %v9373_v43 = vpop.f32.mrb[214].mxu0 }
0x124d   : > { %v9528_v40 = vsel %vm987_vm3, %v9519_v26, %v9527_v21  ;;  %v9571_v15 = vrot.slane %v9373_v43, 5  ;;  %v9456_v50 = vpop.f32.mrb[214].mxu1  ;;  %v9375_v18 = vpop.f32.mrb[215].mxu0 }
0x124e   : > { %v9555_v61 = vadd.f32 %v9528_v40, %v9093_v9  ;;  %v9532_v45 = vsel %vm987_vm3, %v9523_v52, %v9531_v20  ;;  %v9529_v32 = vrot.slane %v9500_v39, 5  ;;  %v9533_v28 = vrot.slane %v9502_v1, 5  ;;  %v9458_v35 = vpop.f32.mrb[215].mxu1 }
0x124f   : > { %v9557_v19 = vadd.f32 %v9532_v45, %v9095_v56  ;;  %v9603_v31 = vmul.f32 %v9571_v15, %v9547_v41  ;;  %v9573_v25 = vrot.slane %v9456_v50, 5  ;;  %v9572_v4 = vrot.slane %v9375_v18, 5 }
0x1250   : > { %v9530_v17 = vsel %vm987_vm3, %v9521_v0, %v9529_v32  ;;  %v9534_v30 = vsel %vm987_vm3, %v9525_v22, %v9533_v28  ;;  %v9574_v12 = vrot.slane %v9458_v35, 5  ;;  %v9379_v49 = vpop.f32.mrb[216].mxu0 }
0x1251   : > { %v9556_v8 = vadd.f32 %v9530_v17, %v9094_v6  ;;  %v9558_v2 = vadd.f32 %v9534_v30, %v9096_v51  ;;  %v9615_v9 = vsel %vm987_vm3, %v9077_v33, %v9603_v31  ;;  %v9605_v26 = vmul.f32 %v9573_v25, %v9549_v23  ;;  %v9462_v44 = vpop.f32.mrb[216].mxu1  ;;  %v9381_v38 = vpop.f32.mrb[217].mxu0 }
0x1252   : > { %9624 = vst [vmem:[%s15109_s12] sm:$0xff] %v9615_v9  ;;  %v9604_v56 = vmul.f32 %v9572_v4, %v9548_v14  ;;  %v9606_v41 = vmul.f32 %v9574_v12, %v9550_v63  ;;  %v9575_v52 = vrot.slane %v9379_v49, 5  ;;  %v9579_v6 = vrot.slane %v9462_v44, 5  ;;  %v9464_v51 = vpop.f32.mrb[217].mxu1 }
0x1253   : > { %v9617_v27 = vsel %vm987_vm3, %v9079_v53, %v9605_v26  ;;  %v9577_v10 = vrot.slane %v9381_v38, 5  ;;  %v9581_v33 = vrot.slane %v9464_v51, 5 }
0x1254   : > { %9626 = vst [vmem:[%s15109_s12 + $0x10] sm:$0xff] %v9617_v27  ;;  %v9616_v23 = vsel %vm987_vm3, %v9078_v54, %v9604_v56  ;;  %v9618_v14 = vsel %vm987_vm3, %v9080_v58, %v9606_v41  ;;  %v9576_v63 = vsel %vm987_vm3, %v9571_v15, %v9575_v52  ;;  %v9580_v47 = vsel %vm987_vm3, %v9573_v25, %v9579_v6  ;;  %v9385_v60 = vpop.f32.mrb[218].mxu0 }
0x1255   : > { %9625 = vst [vmem:[%s15109_s12 + $0x8] sm:$0xff] %v9616_v23  ;;  %9627 = vst [vmem:[%s15109_s12 + $0x18] sm:$0xff] %v9618_v14  ;;  %v9607_v53 = vmul.f32 %v9576_v63, %v9551_v62  ;;  %v9609_v24 = vmul.f32 %v9580_v47, %v9553_v34  ;;  %v9578_v36 = vsel %vm987_vm3, %v9572_v4, %v9577_v10  ;;  %v9468_v3 = vpop.f32.mrb[218].mxu1  ;;  %v9387_v54 = vpop.f32.mrb[219].mxu0  ;;  %v9583_v46 = vrot.slane %v9385_v60, 5 }
0x1256   : > { %v9582_v13 = vsel %vm987_vm3, %v9574_v12, %v9581_v33  ;;  %v9608_v58 = vmul.f32 %v9578_v36, %v9552_v55  ;;  %v9587_v37 = vrot.slane %v9468_v3, 5  ;;  %v9470_v22 = vpop.f32.mrb[219].mxu1  ;;  %v9585_v29 = vrot.slane %v9387_v54, 5 }
0x1257   : > { %v9610_v0 = vmul.f32 %v9582_v13, %v9554_v42  ;;  %9628 = vst [vmem:[%s15109_s12 + $0x20] sm:$0xff] %v9607_v53  ;;  %9630 = vst [vmem:[%s15109_s12 + $0x30] sm:$0xff] %v9609_v24  ;;  %v9589_v57 = vrot.slane %v9470_v22, 5  ;;  %v9584_v11 = vsel %vm987_vm3, %v9575_v52, %v9583_v46 }
0x1258   : > { %9629 = vst [vmem:[%s15109_s12 + $0x28] sm:$0xff] %v9608_v58  ;;  %v9588_v62 = vsel %vm987_vm3, %v9579_v6, %v9587_v37  ;;  %v9611_v16 = vmul.f32 %v9584_v11, %v9555_v61  ;;  %v9586_v7 = vsel %vm987_vm3, %v9577_v10, %v9585_v29 }
0x1259   : > { %9631 = vst [vmem:[%s15109_s12 + $0x38] sm:$0xff] %v9610_v0  ;;  %v9613_v5 = vmul.f32 %v9588_v62, %v9557_v19  ;;  %v9590_v48 = vsel %vm987_vm3, %v9581_v33, %v9589_v57  ;;  %v9612_v34 = vmul.f32 %v9586_v7, %v9556_v8 }
0x125a   : > { %v9614_v55 = vmul.f32 %v9590_v48, %v9558_v2  ;;  %v9620_v59 = vsel %vm9619_vm5, %v9611_v16, 0.0 }
0x125b   : > { %v9622_v21 = vsel %vm9619_vm5, %v9613_v5, 0.0  ;;  %9632 = vst [vmem:[%s15109_s12 + $0x40] sm:$0xff] %v9620_v59  ;;  %v9621_v42 = vsel %vm9619_vm5, %v9612_v34, 0.0 }
0x125c   : > { %9634 = vst [vmem:[%s15109_s12 + $0x50] sm:$0xff] %v9622_v21  ;;  %v9623_v20 = vsel %vm9619_vm5, %v9614_v55, 0.0  ;;  %9633 = vst [vmem:[%s15109_s12 + $0x48] sm:$0xff] %v9621_v42 }
0x125d   : > { %9635 = vst [vmem:[%s15109_s12 + $0x58] sm:$0xff] %v9623_v20 }
0x125e   : > { %10823 = shalt.err (!%p10820_p11)
}
0x125f   : > { %s10824_s25 = scalar_lea.hbm %s15144_s19, 1536  ;;  %s10828_s12 = scalar_lea.hbm %s15201_s8, 12288 }
0x1260   : > { %p10825_p7 = scmp.ne.s32.totalorder %s15144_s19, %s10824_s25  ;;  %p10829_p1 = scmp.lt.u32.totalorder %s15144_s19, %s15201_s8 }
0x1261   : > { %p10830_p3 = scmp.lt.u32.totalorder %s10828_s12, %s10824_s25  ;;  %p10832_p12 = scmp.lt.u32.totalorder %s10824_s25, %s15144_s19 }
0x1262   : > { %p10826_p8 = pnand %p10825_p7, %p15748_p0 }
0x1263   : > { %p10831_p6 = por %p10830_p3, %p10829_p1 }
0x1264   : > { %p10827_p13 = pneg %p10826_p8 }
0x1265   : > { %p10833_p2 = por %p10832_p12, %p10831_p6 }
0x1267   : > { %p10834_p9 = pnand %p10833_p2, %p10827_p13 }
0x1269   : > { %10837 = shalt.err (!%p10834_p9)
}
0x126a   : > { %s10890_s0 = smov 512   ;;  %s10891_s21 = smov 4096  }
0x126b   : > { %s10892_s20 = smov 32  }
0x126c   : > { %10403 = dma.vmem_to_hbm [thread:$0]  (%p15748_p0), %s15146_s22, 1536, %s15144_s19, %s9637_s16, %s10890_s0, %s10891_s21, %s10892_s20  }
0x126d PF: > { %p10417_p4 = scmp.ge.s32.totalorder %s10880_s30, 2  ;;  %s9665_s24 = sand.u32 1, %s10868_s27  }
0x126e   : > { %p15749_p5 = scmp.ne.s32.totalorder %s15333_s18, 0  ;;  %s9666_s26 = scalar_lea.sflag [#allocation4], %s9665_s24 }
0x1270   : > { %p10413_p10 = pnand %p10417_p4, %p15749_p5 }
0x1272   : > { %10863 = dma.done.wait (!%p10413_p10), %s9666_s26, 1536  }
0x1273   : > { %10865 = vsyncadd (!%p10413_p10), %s9666_s26, 4294965760  ;;  %p24_p11 = scmp.ge.s32.totalorder %s10963_s11, 10   ;;  %s15750_s27 = smov %s10872_s28 }
0x1274   : > { %s15751_s28 = smov %s10876_s29  ;;  %s15752_s29 = smov %s10975_s14 }
0x1275   : > { %s15753_s30 = smov %s10963_s11  ;;  %26 = sbr.rel (!%p24_p11) target bundleno = 9 (0x9), region = 127 }
0x127c   :  { %9671 = vsyncpa [#allocation3], 1 }
0x127d   :  { %9673 = vsyncpa [#allocation3 + $0x1], 1 }
0x127e   :  { %9674 = vsyncpa [#allocation6], 1 }
0x127f   :  { %9676 = vsyncpa [#allocation6 + $0x1], 1 }
0x1280   :  { %9677 = vsyncpa [#allocation4], 1 }
0x1281   :  { %9679 = vsyncpa [#allocation4 + $0x1], 1 }

</bundles_post_ra>
